<compile_context>
chip_gen: v7x
topology: tpu7x:2x2x1
jax: 0.10.0
libtpu: 0.0.40
codegen_flags: <defaults>
</compile_context>

<pallas_src>
import functools

import jax
import jax.numpy as jnp
import numpy as np
from jax.experimental import pallas as pl
from jax.experimental.pallas import tpu as pltpu

LANES = 128     # lane width for MXU-facing weights / activations
C1 = 6          # conv1 out channels
C1P = 8         # conv1 channels as stored between the stages (narrow output)
C2 = 16         # conv2 out channels
TB1 = 8         # images per stage-1 grid step  -> 8 * 196 = 1568 rows / block
TB2 = 16        # images per stage-2 grid step  -> 16 * 25 = 400 rows / block


# ----------------------------------------------------------------------------
# Pallas kernels
# ----------------------------------------------------------------------------
def _conv1_relu_pool_kernel(p_ref, w_ref, b_ref, o_ref):
    """conv1 (as matmul) + 2x2 max-pool + bias + ReLU for one batch tile.

    p_ref : (4, TB1*196, 75) bf16  im2col patches; leading axis = pool tap.
    w_ref : (75, 128)        bf16  conv1 weights (out-ch padded 6 -> 128).
    b_ref : (1, 128)         f32   conv1 bias (padded).
    o_ref : (TB1*196, 8)     f32   pooled activations, channels 0..5 valid.
    """
    w = w_ref[...]
    m = jnp.dot(p_ref[0], w, preferred_element_type=jnp.float32)
    m = jnp.maximum(m, jnp.dot(p_ref[1], w, preferred_element_type=jnp.float32))
    m = jnp.maximum(m, jnp.dot(p_ref[2], w, preferred_element_type=jnp.float32))
    m = jnp.maximum(m, jnp.dot(p_ref[3], w, preferred_element_type=jnp.float32))
    y = jnp.maximum(m + b_ref[...], 0.0)        # bias/ReLU after max: exact
    o_ref[...] = y[:, :C1P]


def _conv2_pool_fc_kernel(p_ref, w2_ref, b2_ref, wfc1_ref, bfc1_ref,
                          wfc2_ref, bfc2_ref, wfc3_ref, bfc3_ref,
                          o_ref, qq_ref, *, tb):
    """conv2 + pool + fc1 + ReLU + fc2 + ReLU + fc3 for one tile of `tb` images.

    p_ref   : (4, tb*25, 150) bf16  conv2 im2col patches grouped by pool tap;
                                    rows ordered (spatial r = oh*5+ow major,
                                    image minor).
    w2_ref  : (150, 128) bf16;  b2_ref : (1, 128) f32.
    wfc1_ref: (3200, 128) bf16  fc1 as one matrix, row index = r*128 + channel.
    wfc2/3  : (128, 128) bf16;  biases (1, 128) f32.
    o_ref   : (tb, 128)  f32    logits in lanes 0..9.
    qq_ref  : (tb, 3200) bf16   scratch: repacked pooled conv2 activations.
    """
    w2 = w2_ref[...]
    m = jnp.dot(p_ref[0], w2, preferred_element_type=jnp.float32)
    m = jnp.maximum(m, jnp.dot(p_ref[1], w2, preferred_element_type=jnp.float32))
    m = jnp.maximum(m, jnp.dot(p_ref[2], w2, preferred_element_type=jnp.float32))
    m = jnp.maximum(m, jnp.dot(p_ref[3], w2, preferred_element_type=jnp.float32))
    q = jnp.maximum(m + b2_ref[...], 0.0).astype(jnp.bfloat16)   # (tb*25, 128)

    # Repack rows (r major, image minor) -> (tb, 25*128): 25 aligned 128-lane
    # block copies, so fc1 is a single streaming K=3200 matmul (no MXU-drain
    # bubbles from 25 skinny matmuls).
    for r in range(25):
        qq_ref[:, r * LANES:(r + 1) * LANES] = q[r * tb:(r + 1) * tb, :]

    h = jnp.dot(qq_ref[...], wfc1_ref[...], preferred_element_type=jnp.float32)
    h = jnp.maximum(h + bfc1_ref[...], 0.0).astype(jnp.bfloat16)
    h = jnp.dot(h, wfc2_ref[...], preferred_element_type=jnp.float32)
    h = jnp.maximum(h + bfc2_ref[...], 0.0).astype(jnp.bfloat16)
    o_ref[...] = (jnp.dot(h, wfc3_ref[...], preferred_element_type=jnp.float32)
                  + bfc3_ref[...])


# ----------------------------------------------------------------------------
# XLA glue: pool-tap-grouped im2col (small bf16 arrays, no K padding)
# ----------------------------------------------------------------------------
def _conv1_patches(x_nhwc):
    """(BP,32,32,3) bf16 -> (4, BP*196, 75) bf16; rows (b, oh2, ow2) per tap."""
    bp = x_nhwc.shape[0]
    taps = [x_nhwc[:, di:di + 28, dj:dj + 28, :]
            for di in range(5) for dj in range(5)]
    p = jnp.concatenate(taps, axis=-1)              # (BP,28,28,75)  f=(di*5+dj)*3+c
    p = p.reshape(bp, 14, 2, 14, 2, 75)             # (b, oh2, i, ow2, j, f)
    p = p.transpose(2, 4, 0, 1, 3, 5)               # (i, j, b, oh2, ow2, f)
    return p.reshape(4, bp * 196, 75)


def _conv2_patches(h1, tb):
    """(BP,14,14,6) bf16 -> (4, BP*25, 150) bf16; rows (tile | r major, b minor)."""
    bp = h1.shape[0]
    taps = [h1[:, di:di + 10, dj:dj + 10, :]
            for di in range(5) for dj in range(5)]
    p = jnp.concatenate(taps, axis=-1)              # (BP,10,10,150) f=(di*5+dj)*6+c
    p = p.reshape(bp // tb, tb, 5, 2, 5, 2, 150)    # (t, b, oh2, i, ow2, j, f)
    p = p.transpose(3, 5, 0, 2, 4, 1, 6)            # (i, j, t, oh2, ow2, b, f)
    return p.reshape(4, bp * 25, 150)


# ----------------------------------------------------------------------------
# Forward pass
# ----------------------------------------------------------------------------
def net_forward(x, params):
    """x: (B, 3, 32, 32) float32 (NCHW, like the PyTorch module) -> (B, 10)."""
    B = x.shape[0]
    BP = -(-B // TB2) * TB2                          # batch padded to tile size
    x_nhwc = jnp.transpose(x, (0, 2, 3, 1)).astype(jnp.bfloat16)
    x_nhwc = jnp.pad(x_nhwc, ((0, BP - B), (0, 0), (0, 0), (0, 0)))

    # --- stage 1: conv1 + ReLU + 2x2 pool, gridded over batch tiles ----------
    p1 = _conv1_patches(x_nhwc)                      # (4, BP*196, 75) bf16
    r1 = TB1 * 196
    n1 = BP // TB1
    pooled1 = pl.pallas_call(
        _conv1_relu_pool_kernel,
        out_shape=jax.ShapeDtypeStruct((BP * 196, C1P), jnp.float32),
        grid_spec=pltpu.PrefetchScalarGridSpec(
            num_scalar_prefetch=0,
            grid=(n1,),
            in_specs=[pl.BlockSpec((4, r1, 75), lambda i: (0, i, 0)),
                      pl.BlockSpec((75, LANES), lambda i: (0, 0)),
                      pl.BlockSpec((1, LANES), lambda i: (0, 0))],
            out_specs=pl.BlockSpec((r1, C1P), lambda i: (i, 0))),
        compiler_params=pltpu.CompilerParams(
            dimension_semantics=("parallel",),
            vmem_limit_bytes=32 * 1024 * 1024),
        cost_estimate=pl.CostEstimate(
            flops=2 * 4 * BP * 196 * 75 * LANES,
            transcendentals=0,
            bytes_accessed=(4 * BP * 196 * 75 * 2 + 75 * LANES * 2
                            + BP * 196 * C1P * 4)),
    )(p1, params["w1"], params["b1"])

    # --- stage 2: conv2 + ReLU + pool + fc1/fc2/fc3, gridded over batch ------
    h1 = pooled1.reshape(BP, 14, 14, C1P)[:, :, :, :C1].astype(jnp.bfloat16)
    p2 = _conv2_patches(h1, TB2)                     # (4, BP*25, 150) bf16
    r2 = TB2 * 25
    n2 = BP // TB2
    w_bytes = (150 * LANES + 25 * LANES * LANES + 2 * LANES * LANES) * 2
    logits = pl.pallas_call(
        functools.partial(_conv2_pool_fc_kernel, tb=TB2),
        out_shape=jax.ShapeDtypeStruct((BP, LANES), jnp.float32),
        grid_spec=pltpu.PrefetchScalarGridSpec(
            num_scalar_prefetch=0,
            grid=(n2,),
            in_specs=[pl.BlockSpec((4, r2, 150), lambda i: (0, i, 0)),
                      pl.BlockSpec((150, LANES), lambda i: (0, 0)),
                      pl.BlockSpec((1, LANES), lambda i: (0, 0)),
                      pl.BlockSpec((25 * LANES, LANES), lambda i: (0, 0)),
                      pl.BlockSpec((1, LANES), lambda i: (0, 0)),
                      pl.BlockSpec((LANES, LANES), lambda i: (0, 0)),
                      pl.BlockSpec((1, LANES), lambda i: (0, 0)),
                      pl.BlockSpec((LANES, LANES), lambda i: (0, 0)),
                      pl.BlockSpec((1, LANES), lambda i: (0, 0))],
            out_specs=pl.BlockSpec((TB2, LANES), lambda i: (i, 0)),
            scratch_shapes=[pltpu.VMEM((TB2, 25 * LANES), jnp.bfloat16)]),
        compiler_params=pltpu.CompilerParams(
            dimension_semantics=("parallel",),
            vmem_limit_bytes=32 * 1024 * 1024),
        cost_estimate=pl.CostEstimate(
            flops=2 * BP * (4 * 25 * 150 * LANES + 25 * LANES * LANES
                            + 2 * LANES * LANES),
            transcendentals=0,
            bytes_accessed=4 * BP * 25 * 150 * 2 + w_bytes + BP * LANES * 4),
    )(p2, params["w2"], params["b2"], params["wfc1"], params["bfc1"],
      params["wfc2"], params["bfc2"], params["wfc3"], params["bfc3"])

    return logits[:B, :10]


# ----------------------------------------------------------------------------
# One-time parameter preparation (PyTorch layout -> bf16, matmul-friendly)
# ----------------------------------------------------------------------------
def _pad_to(a, shape):
    return jnp.pad(a, [(0, t - s) for s, t in zip(a.shape, shape)])


def prep_params(raw):
    bf = lambda a: a.astype(jnp.bfloat16)
    # conv weights -> (K, OC) matrices with feature order (di, dj, c).
    w1 = jnp.transpose(raw["conv1_w"], (2, 3, 1, 0)).reshape(75, C1)
    w2 = jnp.transpose(raw["conv2_w"], (2, 3, 1, 0)).reshape(150, C2)
    # fc1: row index r*128 + c  maps to PyTorch flat feature c*25 + r.
    fc1 = jnp.transpose(raw["fc1_w"].reshape(120, C2, 25), (2, 1, 0))  # (r, c, n)
    return {
        "w1": bf(_pad_to(w1, (75, LANES))),
        "b1": _pad_to(raw["conv1_b"][None, :], (1, LANES)),
        "w2": bf(_pad_to(w2, (150, LANES))),
        "b2": _pad_to(raw["conv2_b"][None, :], (1, LANES)),
        "wfc1": bf(_pad_to(fc1, (25, LANES, LANES)).reshape(25 * LANES, LANES)),
        "bfc1": _pad_to(raw["fc1_b"][None, :], (1, LANES)),
        "wfc2": bf(_pad_to(raw["fc2_w"].T, (LANES, LANES))),
        "bfc2": _pad_to(raw["fc2_b"][None, :], (1, LANES)),
        "wfc3": bf(_pad_to(raw["fc3_w"].T, (LANES, LANES))),
        "bfc3": _pad_to(raw["fc3_b"][None, :], (1, LANES)),
    }


def init_params(key):
    """Deterministic PyTorch-default-style uniform(-1/sqrt(fan_in)) init."""
    ks = jax.random.split(key, 10)

    def u(k, shape, fan_in):
        bound = 1.0 / np.sqrt(fan_in)
        return jax.random.uniform(k, shape, jnp.float32, -bound, bound)

    return {
        "conv1_w": u(ks[0], (6, 3, 5, 5), 3 * 5 * 5),
        "conv1_b": u(ks[1], (6,), 3 * 5 * 5),
        "conv2_w": u(ks[2], (16, 6, 5, 5), 6 * 5 * 5),
        "conv2_b": u(ks[3], (16,), 6 * 5 * 5),
        "fc1_w": u(ks[4], (120, 400), 400),
        "fc1_b": u(ks[5], (120,), 400),
        "fc2_w": u(ks[6], (84, 120), 120),
        "fc2_b": u(ks[7], (84,), 120),
        "fc3_w": u(ks[8], (10, 84), 84),
        "fc3_b": u(ks[9], (10,), 84),
    }


# ----------------------------------------------------------------------------
# Pure-XLA reference (validation only, PyTorch semantics, f32 HIGHEST)
# ----------------------------------------------------------------------------
def net_forward_reference(x, raw):
    hi = jax.lax.Precision.HIGHEST

    def conv(y, w, b):
        y = jax.lax.conv_general_dilated(
            y, w, (1, 1), "VALID",
            dimension_numbers=("NCHW", "OIHW", "NCHW"), precision=hi)
        return jax.nn.relu(y + b[None, :, None, None])

    def pool(y):
        return jnp.maximum(
            jnp.maximum(y[:, :, 0::2, 0::2], y[:, :, 0::2, 1::2]),
            jnp.maximum(y[:, :, 1::2, 0::2], y[:, :, 1::2, 1::2]))

    y = pool(conv(x, raw["conv1_w"], raw["conv1_b"]))
    y = pool(conv(y, raw["conv2_w"], raw["conv2_b"]))
    y = y.reshape(y.shape[0], -1)
    y = jax.nn.relu(jnp.dot(y, raw["fc1_w"].T, precision=hi) + raw["fc1_b"])
    y = jax.nn.relu(jnp.dot(y, raw["fc2_w"].T, precision=hi) + raw["fc2_b"])
    return jnp.dot(y, raw["fc3_w"].T, precision=hi) + raw["fc3_b"]


if __name__ == "__main__":
    key = jax.random.PRNGKey(0)
    k_params, k_x = jax.random.split(key)
    raw = init_params(k_params)
    params = prep_params(raw)          # weight layout prep done once, not per step

    # CIFAR10-shaped input: fc1 (16*5*5) forces 32x32 spatial.
    x = jax.random.normal(k_x, (2, 3, 32, 32), dtype=jnp.float32)

    fwd = jax.jit(net_forward)
    out = jax.block_until_ready(fwd(x, params))
    assert out.shape == (2, 10), out.shape
    assert out.dtype == jnp.float32

    # Validate against plain XLA (loose tol: bf16 MXU path vs HIGHEST f32 ref).
    ref = jax.block_until_ready(jax.jit(net_forward_reference)(x, raw))
    err = float(jnp.max(jnp.abs(out - ref)))
    assert err < 5e-2, f"mismatch vs reference: max abs err = {err}"

    print("KERNEL_OK")
</pallas_src>

<mosaic_0001>
module attributes {stable_mosaic.version = 11 : i64} {
  func.func @_conv1_relu_pool_kernel(%arg0: i32, %arg1: memref<4x1568x75xbf16, #tpu.memory_space<vmem>>, %arg2: memref<75x128xbf16, #tpu.memory_space<vmem>>, %arg3: memref<1x128xf32, #tpu.memory_space<vmem>>, %arg4: memref<1568x8xf32, #tpu.memory_space<vmem>>) attributes {dimension_semantics = [#tpu.dimension_semantics<parallel>], iteration_bounds = array<i64: 2>, scalar_prefetch = 0 : i64, scratch_operands = 0 : i64, tpu.core_type = #tpu.core_type<tc>, window_params = [{transform_indices = @transform_0, window_bounds = array<i64: 4, 1568, 75>}, {pipeline_mode = #tpu.pipeline_mode<synchronous>, transform_indices = @transform_1, window_bounds = array<i64: 75, 128>}, {pipeline_mode = #tpu.pipeline_mode<synchronous>, transform_indices = @transform_2, window_bounds = array<i64: 1, 128>}, {transform_indices = @transform_3, window_bounds = array<i64: 1568, 8>}]} {
    %c0 = arith.constant 0 : index
    %c0_0 = arith.constant 0 : index
    %0 = vector.load %arg2[%c0, %c0_0] : memref<75x128xbf16, #tpu.memory_space<vmem>>, vector<75x128xbf16>
    %c0_1 = arith.constant 0 : index
    %c0_2 = arith.constant 0 : index
    %c0_3 = arith.constant 0 : index
    %1 = vector.load %arg1[%c0_1, %c0_2, %c0_3] : memref<4x1568x75xbf16, #tpu.memory_space<vmem>>, vector<1x1568x75xbf16>
    %2 = vector.shape_cast %1 : vector<1x1568x75xbf16> to vector<1568x75xbf16>
    %cst = arith.constant dense<0.000000e+00> : vector<1568x128xf32>
    %3 = tpu.matmul %2, %0, %cst {dimension_numbers = #tpu.dot_dimension_numbers<[1], [0], [0], [1], [0, 0, 1, 1], [], []>} : vector<1568x75xbf16>, vector<75x128xbf16>, vector<1568x128xf32> -> vector<1568x128xf32>
    %c1 = arith.constant 1 : index
    %c0_4 = arith.constant 0 : index
    %c0_5 = arith.constant 0 : index
    %4 = vector.load %arg1[%c1, %c0_4, %c0_5] : memref<4x1568x75xbf16, #tpu.memory_space<vmem>>, vector<1x1568x75xbf16>
    %5 = vector.shape_cast %4 : vector<1x1568x75xbf16> to vector<1568x75xbf16>
    %cst_6 = arith.constant dense<0.000000e+00> : vector<1568x128xf32>
    %6 = tpu.matmul %5, %0, %cst_6 {dimension_numbers = #tpu.dot_dimension_numbers<[1], [0], [0], [1], [0, 0, 1, 1], [], []>} : vector<1568x75xbf16>, vector<75x128xbf16>, vector<1568x128xf32> -> vector<1568x128xf32>
    %7 = arith.maximumf %3, %6 : vector<1568x128xf32>
    %c2 = arith.constant 2 : index
    %c0_7 = arith.constant 0 : index
    %c0_8 = arith.constant 0 : index
    %8 = vector.load %arg1[%c2, %c0_7, %c0_8] : memref<4x1568x75xbf16, #tpu.memory_space<vmem>>, vector<1x1568x75xbf16>
    %9 = vector.shape_cast %8 : vector<1x1568x75xbf16> to vector<1568x75xbf16>
    %cst_9 = arith.constant dense<0.000000e+00> : vector<1568x128xf32>
    %10 = tpu.matmul %9, %0, %cst_9 {dimension_numbers = #tpu.dot_dimension_numbers<[1], [0], [0], [1], [0, 0, 1, 1], [], []>} : vector<1568x75xbf16>, vector<75x128xbf16>, vector<1568x128xf32> -> vector<1568x128xf32>
    %11 = arith.maximumf %7, %10 : vector<1568x128xf32>
    %c3 = arith.constant 3 : index
    %c0_10 = arith.constant 0 : index
    %c0_11 = arith.constant 0 : index
    %12 = vector.load %arg1[%c3, %c0_10, %c0_11] : memref<4x1568x75xbf16, #tpu.memory_space<vmem>>, vector<1x1568x75xbf16>
    %13 = vector.shape_cast %12 : vector<1x1568x75xbf16> to vector<1568x75xbf16>
    %cst_12 = arith.constant dense<0.000000e+00> : vector<1568x128xf32>
    %14 = tpu.matmul %13, %0, %cst_12 {dimension_numbers = #tpu.dot_dimension_numbers<[1], [0], [0], [1], [0, 0, 1, 1], [], []>} : vector<1568x75xbf16>, vector<75x128xbf16>, vector<1568x128xf32> -> vector<1568x128xf32>
    %15 = arith.maximumf %11, %14 : vector<1568x128xf32>
    %c0_13 = arith.constant 0 : index
    %c0_14 = arith.constant 0 : index
    %16 = vector.load %arg3[%c0_13, %c0_14] : memref<1x128xf32, #tpu.memory_space<vmem>>, vector<1x128xf32>
    %17 = vector.broadcast %16 : vector<1x128xf32> to vector<1568x128xf32>
    %18 = arith.addf %15, %17 : vector<1568x128xf32>
    %cst_15 = arith.constant 0.000000e+00 : f32
    %19 = vector.broadcast %cst_15 : f32 to vector<1568x128xf32>
    %20 = arith.maximumf %18, %19 : vector<1568x128xf32>
    %21 = vector.extract_strided_slice %20 {offsets = [0, 0], sizes = [1568, 8], strides = [1, 1]} : vector<1568x128xf32> to vector<1568x8xf32>
    %c0_16 = arith.constant 0 : index
    %c0_17 = arith.constant 0 : index
    %22 = vector.load %arg4[%c0_16, %c0_17] : memref<1568x8xf32, #tpu.memory_space<vmem>>, vector<1568x8xf32>
    tpu.vector_store %arg4[%c0_16, %c0_17], %21 {strides = array<i32>} : memref<1568x8xf32, #tpu.memory_space<vmem>>, vector<1568x8xf32>,
    return
  }
  func.func @transform_0(%arg0: i32) -> (i32, i32, i32) {
    %c0_i32 = arith.constant 0 : i32
    %c0_i32_0 = arith.constant 0 : i32
    %c0_i32_1 = arith.constant 0 : i32
    return %c0_i32, %arg0, %c0_i32_0 : i32, i32, i32
  }
  func.func @transform_1(%arg0: i32) -> (i32, i32) {
    %c0_i32 = arith.constant 0 : i32
    %c0_i32_0 = arith.constant 0 : i32
    %c0_i32_1 = arith.constant 0 : i32
    return %c0_i32, %c0_i32_0 : i32, i32
  }
  func.func @transform_2(%arg0: i32) -> (i32, i32) {
    %c0_i32 = arith.constant 0 : i32
    %c0_i32_0 = arith.constant 0 : i32
    %c0_i32_1 = arith.constant 0 : i32
    return %c0_i32, %c0_i32_0 : i32, i32
  }
  func.func @transform_3(%arg0: i32) -> (i32, i32) {
    %c0_i32 = arith.constant 0 : i32
    %c0_i32_0 = arith.constant 0 : i32
    return %arg0, %c0_i32 : i32, i32
  }
}

module attributes {stable_mosaic.version = 11 : i64} {
  func.func @_conv2_pool_fc_kernel(%arg0: i32, %arg1: memref<4x400x150xbf16, #tpu.memory_space<vmem>>, %arg2: memref<150x128xbf16, #tpu.memory_space<vmem>>, %arg3: memref<1x128xf32, #tpu.memory_space<vmem>>, %arg4: memref<3200x128xbf16, #tpu.memory_space<vmem>>, %arg5: memref<1x128xf32, #tpu.memory_space<vmem>>, %arg6: memref<128x128xbf16, #tpu.memory_space<vmem>>, %arg7: memref<1x128xf32, #tpu.memory_space<vmem>>, %arg8: memref<128x128xbf16, #tpu.memory_space<vmem>>, %arg9: memref<1x128xf32, #tpu.memory_space<vmem>>, %arg10: memref<16x128xf32, #tpu.memory_space<vmem>>, %arg11: memref<16x3200xbf16, #tpu.memory_space<vmem>>) attributes {dimension_semantics = [#tpu.dimension_semantics<parallel>], iteration_bounds = array<i64: 1>, scalar_prefetch = 0 : i64, scratch_operands = 1 : i64, tpu.core_type = #tpu.core_type<tc>, window_params = [{transform_indices = @transform_0, window_bounds = array<i64: 4, 400, 150>}, {pipeline_mode = #tpu.pipeline_mode<synchronous>, transform_indices = @transform_1, window_bounds = array<i64: 150, 128>}, {pipeline_mode = #tpu.pipeline_mode<synchronous>, transform_indices = @transform_2, window_bounds = array<i64: 1, 128>}, {pipeline_mode = #tpu.pipeline_mode<synchronous>, transform_indices = @transform_3, window_bounds = array<i64: 3200, 128>}, {pipeline_mode = #tpu.pipeline_mode<synchronous>, transform_indices = @transform_4, window_bounds = array<i64: 1, 128>}, {pipeline_mode = #tpu.pipeline_mode<synchronous>, transform_indices = @transform_5, window_bounds = array<i64: 128, 128>}, {pipeline_mode = #tpu.pipeline_mode<synchronous>, transform_indices = @transform_6, window_bounds = array<i64: 1, 128>}, {pipeline_mode = #tpu.pipeline_mode<synchronous>, transform_indices = @transform_7, window_bounds = array<i64: 128, 128>}, {pipeline_mode = #tpu.pipeline_mode<synchronous>, transform_indices = @transform_8, window_bounds = array<i64: 1, 128>}, {transform_indices = @transform_9, window_bounds = array<i64: 16, 128>}]} {
    %c0 = arith.constant 0 : index
    %c0_0 = arith.constant 0 : index
    %0 = vector.load %arg2[%c0, %c0_0] : memref<150x128xbf16, #tpu.memory_space<vmem>>, vector<150x128xbf16>
    %c0_1 = arith.constant 0 : index
    %c0_2 = arith.constant 0 : index
    %c0_3 = arith.constant 0 : index
    %1 = vector.load %arg1[%c0_1, %c0_2, %c0_3] : memref<4x400x150xbf16, #tpu.memory_space<vmem>>, vector<1x400x150xbf16>
    %2 = vector.shape_cast %1 : vector<1x400x150xbf16> to vector<400x150xbf16>
    %cst = arith.constant dense<0.000000e+00> : vector<400x128xf32>
    %3 = tpu.matmul %2, %0, %cst {dimension_numbers = #tpu.dot_dimension_numbers<[1], [0], [0], [1], [0, 0, 1, 1], [], []>} : vector<400x150xbf16>, vector<150x128xbf16>, vector<400x128xf32> -> vector<400x128xf32>
    %c1 = arith.constant 1 : index
    %c0_4 = arith.constant 0 : index
    %c0_5 = arith.constant 0 : index
    %4 = vector.load %arg1[%c1, %c0_4, %c0_5] : memref<4x400x150xbf16, #tpu.memory_space<vmem>>, vector<1x400x150xbf16>
    %5 = vector.shape_cast %4 : vector<1x400x150xbf16> to vector<400x150xbf16>
    %cst_6 = arith.constant dense<0.000000e+00> : vector<400x128xf32>
    %6 = tpu.matmul %5, %0, %cst_6 {dimension_numbers = #tpu.dot_dimension_numbers<[1], [0], [0], [1], [0, 0, 1, 1], [], []>} : vector<400x150xbf16>, vector<150x128xbf16>, vector<400x128xf32> -> vector<400x128xf32>
    %7 = arith.maximumf %3, %6 : vector<400x128xf32>
    %c2 = arith.constant 2 : index
    %c0_7 = arith.constant 0 : index
    %c0_8 = arith.constant 0 : index
    %8 = vector.load %arg1[%c2, %c0_7, %c0_8] : memref<4x400x150xbf16, #tpu.memory_space<vmem>>, vector<1x400x150xbf16>
    %9 = vector.shape_cast %8 : vector<1x400x150xbf16> to vector<400x150xbf16>
    %cst_9 = arith.constant dense<0.000000e+00> : vector<400x128xf32>
    %10 = tpu.matmul %9, %0, %cst_9 {dimension_numbers = #tpu.dot_dimension_numbers<[1], [0], [0], [1], [0, 0, 1, 1], [], []>} : vector<400x150xbf16>, vector<150x128xbf16>, vector<400x128xf32> -> vector<400x128xf32>
    %11 = arith.maximumf %7, %10 : vector<400x128xf32>
    %c3 = arith.constant 3 : index
    %c0_10 = arith.constant 0 : index
    %c0_11 = arith.constant 0 : index
    %12 = vector.load %arg1[%c3, %c0_10, %c0_11] : memref<4x400x150xbf16, #tpu.memory_space<vmem>>, vector<1x400x150xbf16>
    %13 = vector.shape_cast %12 : vector<1x400x150xbf16> to vector<400x150xbf16>
    %cst_12 = arith.constant dense<0.000000e+00> : vector<400x128xf32>
    %14 = tpu.matmul %13, %0, %cst_12 {dimension_numbers = #tpu.dot_dimension_numbers<[1], [0], [0], [1], [0, 0, 1, 1], [], []>} : vector<400x150xbf16>, vector<150x128xbf16>, vector<400x128xf32> -> vector<400x128xf32>
    %15 = arith.maximumf %11, %14 : vector<400x128xf32>
    %c0_13 = arith.constant 0 : index
    %c0_14 = arith.constant 0 : index
    %16 = vector.load %arg3[%c0_13, %c0_14] : memref<1x128xf32, #tpu.memory_space<vmem>>, vector<1x128xf32>
    %17 = vector.broadcast %16 : vector<1x128xf32> to vector<400x128xf32>
    %18 = arith.addf %15, %17 : vector<400x128xf32>
    %cst_15 = arith.constant 0.000000e+00 : f32
    %19 = vector.broadcast %cst_15 : f32 to vector<400x128xf32>
    %20 = arith.maximumf %18, %19 : vector<400x128xf32>
    %21 = arith.truncf %20 : vector<400x128xf32> to vector<400x128xbf16>
    %22 = vector.extract_strided_slice %21 {offsets = [0, 0], sizes = [16, 128], strides = [1, 1]} : vector<400x128xbf16> to vector<16x128xbf16>
    %c0_16 = arith.constant 0 : index
    %c0_17 = arith.constant 0 : index
    %23 = vector.load %arg11[%c0_16, %c0_17] : memref<16x3200xbf16, #tpu.memory_space<vmem>>, vector<16x128xbf16>
    tpu.vector_store %arg11[%c0_16, %c0_17], %22 {strides = array<i32>} : memref<16x3200xbf16, #tpu.memory_space<vmem>>, vector<16x128xbf16>,
    %24 = vector.extract_strided_slice %21 {offsets = [16, 0], sizes = [16, 128], strides = [1, 1]} : vector<400x128xbf16> to vector<16x128xbf16>
    %c0_18 = arith.constant 0 : index
    %c128 = arith.constant 128 : index
    %25 = vector.load %arg11[%c0_18, %c128] : memref<16x3200xbf16, #tpu.memory_space<vmem>>, vector<16x128xbf16>
    tpu.vector_store %arg11[%c0_18, %c128], %24 {strides = array<i32>} : memref<16x3200xbf16, #tpu.memory_space<vmem>>, vector<16x128xbf16>,
    %26 = vector.extract_strided_slice %21 {offsets = [32, 0], sizes = [16, 128], strides = [1, 1]} : vector<400x128xbf16> to vector<16x128xbf16>
    %c0_19 = arith.constant 0 : index
    %c256 = arith.constant 256 : index
    %27 = vector.load %arg11[%c0_19, %c256] : memref<16x3200xbf16, #tpu.memory_space<vmem>>, vector<16x128xbf16>
    tpu.vector_store %arg11[%c0_19, %c256], %26 {strides = array<i32>} : memref<16x3200xbf16, #tpu.memory_space<vmem>>, vector<16x128xbf16>,
    %28 = vector.extract_strided_slice %21 {offsets = [48, 0], sizes = [16, 128], strides = [1, 1]} : vector<400x128xbf16> to vector<16x128xbf16>
    %c0_20 = arith.constant 0 : index
    %c384 = arith.constant 384 : index
    %29 = vector.load %arg11[%c0_20, %c384] : memref<16x3200xbf16, #tpu.memory_space<vmem>>, vector<16x128xbf16>
    tpu.vector_store %arg11[%c0_20, %c384], %28 {strides = array<i32>} : memref<16x3200xbf16, #tpu.memory_space<vmem>>, vector<16x128xbf16>,
    %30 = vector.extract_strided_slice %21 {offsets = [64, 0], sizes = [16, 128], strides = [1, 1]} : vector<400x128xbf16> to vector<16x128xbf16>
    %c0_21 = arith.constant 0 : index
    %c512 = arith.constant 512 : index
    %31 = vector.load %arg11[%c0_21, %c512] : memref<16x3200xbf16, #tpu.memory_space<vmem>>, vector<16x128xbf16>
    tpu.vector_store %arg11[%c0_21, %c512], %30 {strides = array<i32>} : memref<16x3200xbf16, #tpu.memory_space<vmem>>, vector<16x128xbf16>,
    %32 = vector.extract_strided_slice %21 {offsets = [80, 0], sizes = [16, 128], strides = [1, 1]} : vector<400x128xbf16> to vector<16x128xbf16>
    %c0_22 = arith.constant 0 : index
    %c640 = arith.constant 640 : index
    %33 = vector.load %arg11[%c0_22, %c640] : memref<16x3200xbf16, #tpu.memory_space<vmem>>, vector<16x128xbf16>
    tpu.vector_store %arg11[%c0_22, %c640], %32 {strides = array<i32>} : memref<16x3200xbf16, #tpu.memory_space<vmem>>, vector<16x128xbf16>,
    %34 = vector.extract_strided_slice %21 {offsets = [96, 0], sizes = [16, 128], strides = [1, 1]} : vector<400x128xbf16> to vector<16x128xbf16>
    %c0_23 = arith.constant 0 : index
    %c768 = arith.constant 768 : index
    %35 = vector.load %arg11[%c0_23, %c768] : memref<16x3200xbf16, #tpu.memory_space<vmem>>, vector<16x128xbf16>
    tpu.vector_store %arg11[%c0_23, %c768], %34 {strides = array<i32>} : memref<16x3200xbf16, #tpu.memory_space<vmem>>, vector<16x128xbf16>,
    %36 = vector.extract_strided_slice %21 {offsets = [112, 0], sizes = [16, 128], strides = [1, 1]} : vector<400x128xbf16> to vector<16x128xbf16>
    %c0_24 = arith.constant 0 : index
    %c896 = arith.constant 896 : index
    %37 = vector.load %arg11[%c0_24, %c896] : memref<16x3200xbf16, #tpu.memory_space<vmem>>, vector<16x128xbf16>
    tpu.vector_store %arg11[%c0_24, %c896], %36 {strides = array<i32>} : memref<16x3200xbf16, #tpu.memory_space<vmem>>, vector<16x128xbf16>,
    %38 = vector.extract_strided_slice %21 {offsets = [128, 0], sizes = [16, 128], strides = [1, 1]} : vector<400x128xbf16> to vector<16x128xbf16>
    %c0_25 = arith.constant 0 : index
    %c1024 = arith.constant 1024 : index
    %39 = vector.load %arg11[%c0_25, %c1024] : memref<16x3200xbf16, #tpu.memory_space<vmem>>, vector<16x128xbf16>
    tpu.vector_store %arg11[%c0_25, %c1024], %38 {strides = array<i32>} : memref<16x3200xbf16, #tpu.memory_space<vmem>>, vector<16x128xbf16>,
    %40 = vector.extract_strided_slice %21 {offsets = [144, 0], sizes = [16, 128], strides = [1, 1]} : vector<400x128xbf16> to vector<16x128xbf16>
    %c0_26 = arith.constant 0 : index
    %c1152 = arith.constant 1152 : index
    %41 = vector.load %arg11[%c0_26, %c1152] : memref<16x3200xbf16, #tpu.memory_space<vmem>>, vector<16x128xbf16>
    tpu.vector_store %arg11[%c0_26, %c1152], %40 {strides = array<i32>} : memref<16x3200xbf16, #tpu.memory_space<vmem>>, vector<16x128xbf16>,
    %42 = vector.extract_strided_slice %21 {offsets = [160, 0], sizes = [16, 128], strides = [1, 1]} : vector<400x128xbf16> to vector<16x128xbf16>
    %c0_27 = arith.constant 0 : index
    %c1280 = arith.constant 1280 : index
    %43 = vector.load %arg11[%c0_27, %c1280] : memref<16x3200xbf16, #tpu.memory_space<vmem>>, vector<16x128xbf16>
    tpu.vector_store %arg11[%c0_27, %c1280], %42 {strides = array<i32>} : memref<16x3200xbf16, #tpu.memory_space<vmem>>, vector<16x128xbf16>,
    %44 = vector.extract_strided_slice %21 {offsets = [176, 0], sizes = [16, 128], strides = [1, 1]} : vector<400x128xbf16> to vector<16x128xbf16>
    %c0_28 = arith.constant 0 : index
    %c1408 = arith.constant 1408 : index
    %45 = vector.load %arg11[%c0_28, %c1408] : memref<16x3200xbf16, #tpu.memory_space<vmem>>, vector<16x128xbf16>
    tpu.vector_store %arg11[%c0_28, %c1408], %44 {strides = array<i32>} : memref<16x3200xbf16, #tpu.memory_space<vmem>>, vector<16x128xbf16>,
    %46 = vector.extract_strided_slice %21 {offsets = [192, 0], sizes = [16, 128], strides = [1, 1]} : vector<400x128xbf16> to vector<16x128xbf16>
    %c0_29 = arith.constant 0 : index
    %c1536 = arith.constant 1536 : index
    %47 = vector.load %arg11[%c0_29, %c1536] : memref<16x3200xbf16, #tpu.memory_space<vmem>>, vector<16x128xbf16>
    tpu.vector_store %arg11[%c0_29, %c1536], %46 {strides = array<i32>} : memref<16x3200xbf16, #tpu.memory_space<vmem>>, vector<16x128xbf16>,
    %48 = vector.extract_strided_slice %21 {offsets = [208, 0], sizes = [16, 128], strides = [1, 1]} : vector<400x128xbf16> to vector<16x128xbf16>
    %c0_30 = arith.constant 0 : index
    %c1664 = arith.constant 1664 : index
    %49 = vector.load %arg11[%c0_30, %c1664] : memref<16x3200xbf16, #tpu.memory_space<vmem>>, vector<16x128xbf16>
    tpu.vector_store %arg11[%c0_30, %c1664], %48 {strides = array<i32>} : memref<16x3200xbf16, #tpu.memory_space<vmem>>, vector<16x128xbf16>,
    %50 = vector.extract_strided_slice %21 {offsets = [224, 0], sizes = [16, 128], strides = [1, 1]} : vector<400x128xbf16> to vector<16x128xbf16>
    %c0_31 = arith.constant 0 : index
    %c1792 = arith.constant 1792 : index
    %51 = vector.load %arg11[%c0_31, %c1792] : memref<16x3200xbf16, #tpu.memory_space<vmem>>, vector<16x128xbf16>
    tpu.vector_store %arg11[%c0_31, %c1792], %50 {strides = array<i32>} : memref<16x3200xbf16, #tpu.memory_space<vmem>>, vector<16x128xbf16>,
    %52 = vector.extract_strided_slice %21 {offsets = [240, 0], sizes = [16, 128], strides = [1, 1]} : vector<400x128xbf16> to vector<16x128xbf16>
    %c0_32 = arith.constant 0 : index
    %c1920 = arith.constant 1920 : index
    %53 = vector.load %arg11[%c0_32, %c1920] : memref<16x3200xbf16, #tpu.memory_space<vmem>>, vector<16x128xbf16>
    tpu.vector_store %arg11[%c0_32, %c1920], %52 {strides = array<i32>} : memref<16x3200xbf16, #tpu.memory_space<vmem>>, vector<16x128xbf16>,
    %54 = vector.extract_strided_slice %21 {offsets = [256, 0], sizes = [16, 128], strides = [1, 1]} : vector<400x128xbf16> to vector<16x128xbf16>
    %c0_33 = arith.constant 0 : index
    %c2048 = arith.constant 2048 : index
    %55 = vector.load %arg11[%c0_33, %c2048] : memref<16x3200xbf16, #tpu.memory_space<vmem>>, vector<16x128xbf16>
    tpu.vector_store %arg11[%c0_33, %c2048], %54 {strides = array<i32>} : memref<16x3200xbf16, #tpu.memory_space<vmem>>, vector<16x128xbf16>,
    %56 = vector.extract_strided_slice %21 {offsets = [272, 0], sizes = [16, 128], strides = [1, 1]} : vector<400x128xbf16> to vector<16x128xbf16>
    %c0_34 = arith.constant 0 : index
    %c2176 = arith.constant 2176 : index
    %57 = vector.load %arg11[%c0_34, %c2176] : memref<16x3200xbf16, #tpu.memory_space<vmem>>, vector<16x128xbf16>
    tpu.vector_store %arg11[%c0_34, %c2176], %56 {strides = array<i32>} : memref<16x3200xbf16, #tpu.memory_space<vmem>>, vector<16x128xbf16>,
    %58 = vector.extract_strided_slice %21 {offsets = [288, 0], sizes = [16, 128], strides = [1, 1]} : vector<400x128xbf16> to vector<16x128xbf16>
    %c0_35 = arith.constant 0 : index
    %c2304 = arith.constant 2304 : index
    %59 = vector.load %arg11[%c0_35, %c2304] : memref<16x3200xbf16, #tpu.memory_space<vmem>>, vector<16x128xbf16>
    tpu.vector_store %arg11[%c0_35, %c2304], %58 {strides = array<i32>} : memref<16x3200xbf16, #tpu.memory_space<vmem>>, vector<16x128xbf16>,
    %60 = vector.extract_strided_slice %21 {offsets = [304, 0], sizes = [16, 128], strides = [1, 1]} : vector<400x128xbf16> to vector<16x128xbf16>
    %c0_36 = arith.constant 0 : index
    %c2432 = arith.constant 2432 : index
    %61 = vector.load %arg11[%c0_36, %c2432] : memref<16x3200xbf16, #tpu.memory_space<vmem>>, vector<16x128xbf16>
    tpu.vector_store %arg11[%c0_36, %c2432], %60 {strides = array<i32>} : memref<16x3200xbf16, #tpu.memory_space<vmem>>, vector<16x128xbf16>,
    %62 = vector.extract_strided_slice %21 {offsets = [320, 0], sizes = [16, 128], strides = [1, 1]} : vector<400x128xbf16> to vector<16x128xbf16>
    %c0_37 = arith.constant 0 : index
    %c2560 = arith.constant 2560 : index
    %63 = vector.load %arg11[%c0_37, %c2560] : memref<16x3200xbf16, #tpu.memory_space<vmem>>, vector<16x128xbf16>
    tpu.vector_store %arg11[%c0_37, %c2560], %62 {strides = array<i32>} : memref<16x3200xbf16, #tpu.memory_space<vmem>>, vector<16x128xbf16>,
    %64 = vector.extract_strided_slice %21 {offsets = [336, 0], sizes = [16, 128], strides = [1, 1]} : vector<400x128xbf16> to vector<16x128xbf16>
    %c0_38 = arith.constant 0 : index
    %c2688 = arith.constant 2688 : index
    %65 = vector.load %arg11[%c0_38, %c2688] : memref<16x3200xbf16, #tpu.memory_space<vmem>>, vector<16x128xbf16>
    tpu.vector_store %arg11[%c0_38, %c2688], %64 {strides = array<i32>} : memref<16x3200xbf16, #tpu.memory_space<vmem>>, vector<16x128xbf16>,
    %66 = vector.extract_strided_slice %21 {offsets = [352, 0], sizes = [16, 128], strides = [1, 1]} : vector<400x128xbf16> to vector<16x128xbf16>
    %c0_39 = arith.constant 0 : index
    %c2816 = arith.constant 2816 : index
    %67 = vector.load %arg11[%c0_39, %c2816] : memref<16x3200xbf16, #tpu.memory_space<vmem>>, vector<16x128xbf16>
    tpu.vector_store %arg11[%c0_39, %c2816], %66 {strides = array<i32>} : memref<16x3200xbf16, #tpu.memory_space<vmem>>, vector<16x128xbf16>,
    %68 = vector.extract_strided_slice %21 {offsets = [368, 0], sizes = [16, 128], strides = [1, 1]} : vector<400x128xbf16> to vector<16x128xbf16>
    %c0_40 = arith.constant 0 : index
    %c2944 = arith.constant 2944 : index
    %69 = vector.load %arg11[%c0_40, %c2944] : memref<16x3200xbf16, #tpu.memory_space<vmem>>, vector<16x128xbf16>
    tpu.vector_store %arg11[%c0_40, %c2944], %68 {strides = array<i32>} : memref<16x3200xbf16, #tpu.memory_space<vmem>>, vector<16x128xbf16>,
    %70 = vector.extract_strided_slice %21 {offsets = [384, 0], sizes = [16, 128], strides = [1, 1]} : vector<400x128xbf16> to vector<16x128xbf16>
    %c0_41 = arith.constant 0 : index
    %c3072 = arith.constant 3072 : index
    %71 = vector.load %arg11[%c0_41, %c3072] : memref<16x3200xbf16, #tpu.memory_space<vmem>>, vector<16x128xbf16>
    tpu.vector_store %arg11[%c0_41, %c3072], %70 {strides = array<i32>} : memref<16x3200xbf16, #tpu.memory_space<vmem>>, vector<16x128xbf16>,
    %c0_42 = arith.constant 0 : index
    %c0_43 = arith.constant 0 : index
    %72 = vector.load %arg11[%c0_42, %c0_43] : memref<16x3200xbf16, #tpu.memory_space<vmem>>, vector<16x3200xbf16>
    %c0_44 = arith.constant 0 : index
    %c0_45 = arith.constant 0 : index
    %73 = vector.load %arg4[%c0_44, %c0_45] : memref<3200x128xbf16, #tpu.memory_space<vmem>>, vector<3200x128xbf16>
    %cst_46 = arith.constant dense<0.000000e+00> : vector<16x128xf32>
    %74 = tpu.matmul %72, %73, %cst_46 {dimension_numbers = #tpu.dot_dimension_numbers<[1], [0], [0], [1], [0, 0, 1, 1], [], []>} : vector<16x3200xbf16>, vector<3200x128xbf16>, vector<16x128xf32> -> vector<16x128xf32>
    %c0_47 = arith.constant 0 : index
    %c0_48 = arith.constant 0 : index
    %75 = vector.load %arg5[%c0_47, %c0_48] : memref<1x128xf32, #tpu.memory_space<vmem>>, vector<1x128xf32>
    %76 = vector.broadcast %75 : vector<1x128xf32> to vector<16x128xf32>
    %77 = arith.addf %74, %76 : vector<16x128xf32>
    %cst_49 = arith.constant 0.000000e+00 : f32
    %78 = vector.broadcast %cst_49 : f32 to vector<16x128xf32>
    %79 = arith.maximumf %77, %78 : vector<16x128xf32>
    %80 = arith.truncf %79 : vector<16x128xf32> to vector<16x128xbf16>
    %c0_50 = arith.constant 0 : index
    %c0_51 = arith.constant 0 : index
    %81 = vector.load %arg6[%c0_50, %c0_51] : memref<128x128xbf16, #tpu.memory_space<vmem>>, vector<128x128xbf16>
    %cst_52 = arith.constant dense<0.000000e+00> : vector<16x128xf32>
    %82 = tpu.matmul %80, %81, %cst_52 {dimension_numbers = #tpu.dot_dimension_numbers<[1], [0], [0], [1], [0, 0, 1, 1], [], []>} : vector<16x128xbf16>, vector<128x128xbf16>, vector<16x128xf32> -> vector<16x128xf32>
    %c0_53 = arith.constant 0 : index
    %c0_54 = arith.constant 0 : index
    %83 = vector.load %arg7[%c0_53, %c0_54] : memref<1x128xf32, #tpu.memory_space<vmem>>, vector<1x128xf32>
    %84 = vector.broadcast %83 : vector<1x128xf32> to vector<16x128xf32>
    %85 = arith.addf %82, %84 : vector<16x128xf32>
    %cst_55 = arith.constant 0.000000e+00 : f32
    %86 = vector.broadcast %cst_55 : f32 to vector<16x128xf32>
    %87 = arith.maximumf %85, %86 : vector<16x128xf32>
    %88 = arith.truncf %87 : vector<16x128xf32> to vector<16x128xbf16>
    %c0_56 = arith.constant 0 : index
    %c0_57 = arith.constant 0 : index
    %89 = vector.load %arg8[%c0_56, %c0_57] : memref<128x128xbf16, #tpu.memory_space<vmem>>, vector<128x128xbf16>
    %cst_58 = arith.constant dense<0.000000e+00> : vector<16x128xf32>
    %90 = tpu.matmul %88, %89, %cst_58 {dimension_numbers = #tpu.dot_dimension_numbers<[1], [0], [0], [1], [0, 0, 1, 1], [], []>} : vector<16x128xbf16>, vector<128x128xbf16>, vector<16x128xf32> -> vector<16x128xf32>
    %c0_59 = arith.constant 0 : index
    %c0_60 = arith.constant 0 : index
    %91 = vector.load %arg9[%c0_59, %c0_60] : memref<1x128xf32, #tpu.memory_space<vmem>>, vector<1x128xf32>
    %92 = vector.broadcast %91 : vector<1x128xf32> to vector<16x128xf32>
    %93 = arith.addf %90, %92 : vector<16x128xf32>
    %c0_61 = arith.constant 0 : index
    %c0_62 = arith.constant 0 : index
    %94 = vector.load %arg10[%c0_61, %c0_62] : memref<16x128xf32, #tpu.memory_space<vmem>>, vector<16x128xf32>
    tpu.vector_store %arg10[%c0_61, %c0_62], %93 {strides = array<i32>} : memref<16x128xf32, #tpu.memory_space<vmem>>, vector<16x128xf32>,
    return
  }
  func.func @transform_0(%arg0: i32) -> (i32, i32, i32) {
    %c0_i32 = arith.constant 0 : i32
    %c0_i32_0 = arith.constant 0 : i32
    %c0_i32_1 = arith.constant 0 : i32
    return %c0_i32, %arg0, %c0_i32_0 : i32, i32, i32
  }
  func.func @transform_1(%arg0: i32) -> (i32, i32) {
    %c0_i32 = arith.constant 0 : i32
    %c0_i32_0 = arith.constant 0 : i32
    %c0_i32_1 = arith.constant 0 : i32
    return %c0_i32, %c0_i32_0 : i32, i32
  }
  func.func @transform_2(%arg0: i32) -> (i32, i32) {
    %c0_i32 = arith.constant 0 : i32
    %c0_i32_0 = arith.constant 0 : i32
    %c0_i32_1 = arith.constant 0 : i32
    return %c0_i32, %c0_i32_0 : i32, i32
  }
  func.func @transform_3(%arg0: i32) -> (i32, i32) {
    %c0_i32 = arith.constant 0 : i32
    %c0_i32_0 = arith.constant 0 : i32
    %c0_i32_1 = arith.constant 0 : i32
    return %c0_i32, %c0_i32_0 : i32, i32
  }
  func.func @transform_4(%arg0: i32) -> (i32, i32) {
    %c0_i32 = arith.constant 0 : i32
    %c0_i32_0 = arith.constant 0 : i32
    %c0_i32_1 = arith.constant 0 : i32
    return %c0_i32, %c0_i32_0 : i32, i32
  }
  func.func @transform_5(%arg0: i32) -> (i32, i32) {
    %c0_i32 = arith.constant 0 : i32
    %c0_i32_0 = arith.constant 0 : i32
    %c0_i32_1 = arith.constant 0 : i32
    return %c0_i32, %c0_i32_0 : i32, i32
  }
  func.func @transform_6(%arg0: i32) -> (i32, i32) {
    %c0_i32 = arith.constant 0 : i32
    %c0_i32_0 = arith.constant 0 : i32
    %c0_i32_1 = arith.constant 0 : i32
    return %c0_i32, %c0_i32_0 : i32, i32
  }
  func.func @transform_7(%arg0: i32) -> (i32, i32) {
    %c0_i32 = arith.constant 0 : i32
    %c0_i32_0 = arith.constant 0 : i32
    %c0_i32_1 = arith.constant 0 : i32
    return %c0_i32, %c0_i32_0 : i32, i32
  }
  func.func @transform_8(%arg0: i32) -> (i32, i32) {
    %c0_i32 = arith.constant 0 : i32
    %c0_i32_0 = arith.constant 0 : i32
    %c0_i32_1 = arith.constant 0 : i32
    return %c0_i32, %c0_i32_0 : i32, i32
  }
  func.func @transform_9(%arg0: i32) -> (i32, i32) {
    %c0_i32 = arith.constant 0 : i32
    %c0_i32_0 = arith.constant 0 : i32
    return %arg0, %c0_i32 : i32, i32
  }
}

</mosaic_0001>

<bundles_post_ra>
// kernel: net_forward.2
= control target key start
LH: loop header
LB: loop body
LE: loop exit
PB: predicated region body
PF: predicated region fallthrough
CT: control target
= control target key end

     0   :  { %s18101_s12 = smov 0   ;;  %s18103_s13 = smov 0   ;;  %s22111_s0 = inlined_call_operand.vmem [shape: bf16[4,3136,75], index: 0, kind: input, shape index: {}]   ;;  %s22112_s1 = inlined_call_operand.vmem [shape: bf16[75,128], index: 1, kind: input, shape index: {}]   ;;  %s22113_s2 = inlined_call_operand.vmem [shape: f32[1,128], index: 2, kind: input, shape index: {}]   ;;  %s22114_s3 = inlined_call_operand.vmem [shape: f32[3136,8], index: 3, kind: output, shape index: {}]  }
   0x1   :  { %s18105_s14 = smov 0  }
   0x2 LB: > { %s15006_s15 = sadd.s32 4294967295, %s18078_s14   ;;  %s18118_s16 = sadd.s32 1, %s18078_s14   ;;  %s18078_s14 = sphi %s18105_s14, %s23354_s14   ;;  %s18074_s13 = sphi %s18103_s13, %s23353_s13   ;;  %s18070_s12 = sphi %s18101_s12, %s23352_s12  }
   0x3   : > { %s17_s17 = ssub.s32 %s18078_s14, %s18118_s16  ;;  %s20_s18 = sadd.s32 1, %s18074_s13 }
   0x4   : > { %p18_p0 = scmp.eq.s32.totalorder %s17_s17, 0  ;;  %p27_p1 = scmp.ne.s32.totalorder %s18074_s13, %s18070_s12 }
   0x5   : > { %p28_p2 = scmp.eq.s32.totalorder %s18078_s14, 0  ;;  %p15009_p4 = scmp.ge.s32.totalorder %s18078_s14, 2 }
   0x6   : > { %s18127_s19 = scalar_select %p18_p0, %s18074_s13, %s20_s18  }
   0x7   : > { %p29_p3 = por %p28_p2, %p27_p1  ;;  %127 = sbr.rel (%p15009_p4) target bundleno = 215 (0xd7), region = 24 }
   0xe   : > { %130 = sbr.rel (!%p29_p3) target bundleno = 215 (0xd7), region = 28  ;;  %s132_s20 = sand.u32 (%p29_p3), 1, %s18074_s13  }
   0xf   : > { %s16393_s21 = smul.u32 (%p29_p3), 784, %s18078_s14 }
  0x10   : > { %s17630_s22 = smul.u32 (%p29_p3), 3136, %s132_s20 }
  0x11   : > { %s18135_s25 = scalar_lea.vmem (%p29_p3), %s22111_s0, %s16393_s21 }
  0x12   : > { %v153_v0 = vld [vmem:[%s18135_s25] sm:$0xff] (%p29_p3)   ;;  %v157_v1 = vld [vmem:[%s18135_s25 + $0x8] sm:$0xff] (%p29_p3)   ;;  %v161_v2 = vld [vmem:[%s18135_s25 + $0x10] sm:$0xff] (%p29_p3)   ;;  %s18140_s26 = scalar_lea.vmem (%p29_p3), [#allocation2], %s17630_s22 }
  0x13   : > { %154 = vst [vmem:[%s18140_s26] sm:$0xff] (%p29_p3), %v153_v0   ;;  %158 = vst [vmem:[%s18140_s26 + $0x8] sm:$0xff] (%p29_p3), %v157_v1   ;;  %v165_v3 = vld [vmem:[%s18135_s25 + $0x18] sm:$0xff] (%p29_p3)   ;;  %v169_v4 = vld [vmem:[%s18135_s25 + $0x20] sm:$0xff] (%p29_p3)  }
  0x14   : > { %162 = vst [vmem:[%s18140_s26 + $0x10] sm:$0xff] (%p29_p3), %v161_v2   ;;  %v173_v5 = vld [vmem:[%s18135_s25 + $0x28] sm:$0xff] (%p29_p3)   ;;  %166 = vst [vmem:[%s18140_s26 + $0x18] sm:$0xff] (%p29_p3), %v165_v3   ;;  %v177_v6 = vld [vmem:[%s18135_s25 + $0x30] sm:$0xff] (%p29_p3)  }
  0x15   : > { %170 = vst [vmem:[%s18140_s26 + $0x20] sm:$0xff] %v169_v4   ;;  %174 = vst [vmem:[%s18140_s26 + $0x28] sm:$0xff] %v173_v5   ;;  %v181_v7 = vld [vmem:[%s18135_s25 + $0x38] sm:$0xff]   ;;  %v185_v8 = vld [vmem:[%s18135_s25 + $0x40] sm:$0xff]  }
  0x16   : > { %178 = vst [vmem:[%s18140_s26 + $0x30] sm:$0xff] %v177_v6   ;;  %182 = vst [vmem:[%s18140_s26 + $0x38] sm:$0xff] %v181_v7   ;;  %v189_v9 = vld [vmem:[%s18135_s25 + $0x48] sm:$0xff]   ;;  %v193_v10 = vld [vmem:[%s18135_s25 + $0x50] sm:$0xff]  }
  0x17   : > { %186 = vst [vmem:[%s18140_s26 + $0x40] sm:$0xff] %v185_v8   ;;  %v197_v11 = vld [vmem:[%s18135_s25 + $0x58] sm:$0xff]   ;;  %190 = vst [vmem:[%s18140_s26 + $0x48] sm:$0xff] %v189_v9   ;;  %v201_v12 = vld [vmem:[%s18135_s25 + $0x60] sm:$0xff]  }
  0x18   : > { %194 = vst [vmem:[%s18140_s26 + $0x50] sm:$0xff] %v193_v10   ;;  %198 = vst [vmem:[%s18140_s26 + $0x58] sm:$0xff] %v197_v11   ;;  %v205_v13 = vld [vmem:[%s18135_s25 + $0x68] sm:$0xff]   ;;  %v209_v14 = vld [vmem:[%s18135_s25 + $0x70] sm:$0xff]  }
  0x19   : > { %202 = vst [vmem:[%s18140_s26 + $0x60] sm:$0xff] %v201_v12   ;;  %206 = vst [vmem:[%s18140_s26 + $0x68] sm:$0xff] %v205_v13   ;;  %v213_v15 = vld [vmem:[%s18135_s25 + $0x78] sm:$0xff]   ;;  %v217_v16 = vld [vmem:[%s18135_s25 + $0x80] sm:$0xff]  }
  0x1a   : > { %210 = vst [vmem:[%s18140_s26 + $0x70] sm:$0xff] %v209_v14   ;;  %v221_v17 = vld [vmem:[%s18135_s25 + $0x88] sm:$0xff]   ;;  %214 = vst [vmem:[%s18140_s26 + $0x78] sm:$0xff] %v213_v15   ;;  %v225_v18 = vld [vmem:[%s18135_s25 + $0x90] sm:$0xff]  }
  0x1b   : > { %218 = vst [vmem:[%s18140_s26 + $0x80] sm:$0xff] %v217_v16   ;;  %222 = vst [vmem:[%s18140_s26 + $0x88] sm:$0xff] %v221_v17   ;;  %v229_v19 = vld [vmem:[%s18135_s25 + $0x98] sm:$0xff]   ;;  %v233_v20 = vld [vmem:[%s18135_s25 + $0xa0] sm:$0xff]  }
  0x1c   : > { %226 = vst [vmem:[%s18140_s26 + $0x90] sm:$0xff] %v225_v18   ;;  %230 = vst [vmem:[%s18140_s26 + $0x98] sm:$0xff] %v229_v19   ;;  %v237_v21 = vld [vmem:[%s18135_s25 + $0xa8] sm:$0xff]   ;;  %v241_v22 = vld [vmem:[%s18135_s25 + $0xb0] sm:$0xff]  }
  0x1d   : > { %234 = vst [vmem:[%s18140_s26 + $0xa0] sm:$0xff] %v233_v20   ;;  %v245_v23 = vld [vmem:[%s18135_s25 + $0xb8] sm:$0xff]   ;;  %238 = vst [vmem:[%s18140_s26 + $0xa8] sm:$0xff] %v237_v21   ;;  %v249_v24 = vld [vmem:[%s18135_s25 + $0xc0] sm:$0xff]  }
  0x1e   : > { %242 = vst [vmem:[%s18140_s26 + $0xb0] sm:$0xff] %v241_v22   ;;  %246 = vst [vmem:[%s18140_s26 + $0xb8] sm:$0xff] %v245_v23   ;;  %v253_v25 = vld [vmem:[%s18135_s25 + $0xc8] sm:$0xff]   ;;  %v257_v26 = vld [vmem:[%s18135_s25 + $0xd0] sm:$0xff]  }
  0x1f   : > { %250 = vst [vmem:[%s18140_s26 + $0xc0] sm:$0xff] %v249_v24   ;;  %254 = vst [vmem:[%s18140_s26 + $0xc8] sm:$0xff] %v253_v25   ;;  %v261_v27 = vld [vmem:[%s18135_s25 + $0xd8] sm:$0xff]   ;;  %v265_v28 = vld [vmem:[%s18135_s25 + $0xe0] sm:$0xff]  }
  0x20   : > { %258 = vst [vmem:[%s18140_s26 + $0xd0] sm:$0xff] %v257_v26   ;;  %v269_v29 = vld [vmem:[%s18135_s25 + $0xe8] sm:$0xff]   ;;  %262 = vst [vmem:[%s18140_s26 + $0xd8] sm:$0xff] %v261_v27   ;;  %v273_v30 = vld [vmem:[%s18135_s25 + $0xf0] sm:$0xff]  }
  0x21   : > { %266 = vst [vmem:[%s18140_s26 + $0xe0] sm:$0xff] %v265_v28   ;;  %270 = vst [vmem:[%s18140_s26 + $0xe8] sm:$0xff] %v269_v29   ;;  %v277_v31 = vld [vmem:[%s18135_s25 + $0xf8] sm:$0xff]   ;;  %v281_v32 = vld [vmem:[%s18135_s25 + $0x100] sm:$0xff]  }
  0x22   : > { %274 = vst [vmem:[%s18140_s26 + $0xf0] sm:$0xff] %v273_v30   ;;  %278 = vst [vmem:[%s18140_s26 + $0xf8] sm:$0xff] %v277_v31   ;;  %v285_v33 = vld [vmem:[%s18135_s25 + $0x108] sm:$0xff]   ;;  %v289_v34 = vld [vmem:[%s18135_s25 + $0x110] sm:$0xff]  }
  0x23   : > { %282 = vst [vmem:[%s18140_s26 + $0x100] sm:$0xff] %v281_v32   ;;  %v293_v35 = vld [vmem:[%s18135_s25 + $0x118] sm:$0xff]   ;;  %286 = vst [vmem:[%s18140_s26 + $0x108] sm:$0xff] %v285_v33   ;;  %v297_v36 = vld [vmem:[%s18135_s25 + $0x120] sm:$0xff]  }
  0x24   : > { %290 = vst [vmem:[%s18140_s26 + $0x110] sm:$0xff] %v289_v34   ;;  %294 = vst [vmem:[%s18140_s26 + $0x118] sm:$0xff] %v293_v35   ;;  %v301_v37 = vld [vmem:[%s18135_s25 + $0x128] sm:$0xff]   ;;  %v305_v38 = vld [vmem:[%s18135_s25 + $0x130] sm:$0xff]  }
  0x25   : > { %298 = vst [vmem:[%s18140_s26 + $0x120] sm:$0xff] %v297_v36   ;;  %302 = vst [vmem:[%s18140_s26 + $0x128] sm:$0xff] %v301_v37   ;;  %v309_v39 = vld [vmem:[%s18135_s25 + $0x138] sm:$0xff]   ;;  %v313_v40 = vld [vmem:[%s18135_s25 + $0x140] sm:$0xff]  }
  0x26   : > { %306 = vst [vmem:[%s18140_s26 + $0x130] sm:$0xff] %v305_v38   ;;  %v317_v41 = vld [vmem:[%s18135_s25 + $0x148] sm:$0xff]   ;;  %310 = vst [vmem:[%s18140_s26 + $0x138] sm:$0xff] %v309_v39   ;;  %v321_v42 = vld [vmem:[%s18135_s25 + $0x150] sm:$0xff]  }
  0x27   : > { %314 = vst [vmem:[%s18140_s26 + $0x140] sm:$0xff] %v313_v40   ;;  %318 = vst [vmem:[%s18140_s26 + $0x148] sm:$0xff] %v317_v41   ;;  %v325_v43 = vld [vmem:[%s18135_s25 + $0x158] sm:$0xff]   ;;  %v329_v44 = vld [vmem:[%s18135_s25 + $0x160] sm:$0xff]  }
  0x28   : > { %322 = vst [vmem:[%s18140_s26 + $0x150] sm:$0xff] %v321_v42   ;;  %326 = vst [vmem:[%s18140_s26 + $0x158] sm:$0xff] %v325_v43   ;;  %v333_v45 = vld [vmem:[%s18135_s25 + $0x168] sm:$0xff]   ;;  %v337_v46 = vld [vmem:[%s18135_s25 + $0x170] sm:$0xff]  }
  0x29   : > { %330 = vst [vmem:[%s18140_s26 + $0x160] sm:$0xff] %v329_v44   ;;  %v341_v47 = vld [vmem:[%s18135_s25 + $0x178] sm:$0xff]   ;;  %334 = vst [vmem:[%s18140_s26 + $0x168] sm:$0xff] %v333_v45   ;;  %v345_v48 = vld [vmem:[%s18135_s25 + $0x180] sm:$0xff]  }
  0x2a   : > { %338 = vst [vmem:[%s18140_s26 + $0x170] sm:$0xff] %v337_v46   ;;  %342 = vst [vmem:[%s18140_s26 + $0x178] sm:$0xff] %v341_v47   ;;  %v349_v49 = vld [vmem:[%s18135_s25 + $0x188] sm:$0xff]   ;;  %v353_v50 = vld [vmem:[%s18135_s25 + $0x190] sm:$0xff]  }
  0x2b   : > { %346 = vst [vmem:[%s18140_s26 + $0x180] sm:$0xff] %v345_v48   ;;  %350 = vst [vmem:[%s18140_s26 + $0x188] sm:$0xff] %v349_v49   ;;  %v357_v51 = vld [vmem:[%s18135_s25 + $0x198] sm:$0xff]   ;;  %v361_v52 = vld [vmem:[%s18135_s25 + $0x1a0] sm:$0xff]  }
  0x2c   : > { %354 = vst [vmem:[%s18140_s26 + $0x190] sm:$0xff] %v353_v50   ;;  %v365_v53 = vld [vmem:[%s18135_s25 + $0x1a8] sm:$0xff]   ;;  %358 = vst [vmem:[%s18140_s26 + $0x198] sm:$0xff] %v357_v51   ;;  %v369_v54 = vld [vmem:[%s18135_s25 + $0x1b0] sm:$0xff]  }
  0x2d   : > { %362 = vst [vmem:[%s18140_s26 + $0x1a0] sm:$0xff] %v361_v52   ;;  %366 = vst [vmem:[%s18140_s26 + $0x1a8] sm:$0xff] %v365_v53   ;;  %v373_v55 = vld [vmem:[%s18135_s25 + $0x1b8] sm:$0xff]   ;;  %v377_v56 = vld [vmem:[%s18135_s25 + $0x1c0] sm:$0xff]  }
  0x2e   : > { %370 = vst [vmem:[%s18140_s26 + $0x1b0] sm:$0xff] %v369_v54   ;;  %374 = vst [vmem:[%s18140_s26 + $0x1b8] sm:$0xff] %v373_v55   ;;  %v381_v57 = vld [vmem:[%s18135_s25 + $0x1c8] sm:$0xff]   ;;  %v385_v58 = vld [vmem:[%s18135_s25 + $0x1d0] sm:$0xff]  }
  0x2f   : > { %378 = vst [vmem:[%s18140_s26 + $0x1c0] sm:$0xff] %v377_v56   ;;  %v389_v59 = vld [vmem:[%s18135_s25 + $0x1d8] sm:$0xff]   ;;  %382 = vst [vmem:[%s18140_s26 + $0x1c8] sm:$0xff] %v381_v57   ;;  %v393_v60 = vld [vmem:[%s18135_s25 + $0x1e0] sm:$0xff]  }
  0x30   : > { %386 = vst [vmem:[%s18140_s26 + $0x1d0] sm:$0xff] %v385_v58   ;;  %390 = vst [vmem:[%s18140_s26 + $0x1d8] sm:$0xff] %v389_v59   ;;  %v397_v61 = vld [vmem:[%s18135_s25 + $0x1e8] sm:$0xff]   ;;  %v401_v62 = vld [vmem:[%s18135_s25 + $0x1f0] sm:$0xff]  }
  0x31   : > { %394 = vst [vmem:[%s18140_s26 + $0x1e0] sm:$0xff] %v393_v60   ;;  %398 = vst [vmem:[%s18140_s26 + $0x1e8] sm:$0xff] %v397_v61   ;;  %v405_v63 = vld [vmem:[%s18135_s25 + $0x1f8] sm:$0xff]   ;;  %v409_v0 = vld [vmem:[%s18135_s25 + $0x200] sm:$0xff]  }
  0x32   : > { %402 = vst [vmem:[%s18140_s26 + $0x1f0] sm:$0xff] %v401_v62   ;;  %v413_v1 = vld [vmem:[%s18135_s25 + $0x208] sm:$0xff]   ;;  %406 = vst [vmem:[%s18140_s26 + $0x1f8] sm:$0xff] %v405_v63   ;;  %v417_v2 = vld [vmem:[%s18135_s25 + $0x210] sm:$0xff]  }
  0x33   : > { %410 = vst [vmem:[%s18140_s26 + $0x200] sm:$0xff] %v409_v0   ;;  %414 = vst [vmem:[%s18140_s26 + $0x208] sm:$0xff] %v413_v1   ;;  %v421_v3 = vld [vmem:[%s18135_s25 + $0x218] sm:$0xff]   ;;  %v425_v4 = vld [vmem:[%s18135_s25 + $0x220] sm:$0xff]  }
  0x34   : > { %418 = vst [vmem:[%s18140_s26 + $0x210] sm:$0xff] %v417_v2   ;;  %422 = vst [vmem:[%s18140_s26 + $0x218] sm:$0xff] %v421_v3   ;;  %v429_v5 = vld [vmem:[%s18135_s25 + $0x228] sm:$0xff]   ;;  %v433_v6 = vld [vmem:[%s18135_s25 + $0x230] sm:$0xff]  }
  0x35   : > { %426 = vst [vmem:[%s18140_s26 + $0x220] sm:$0xff] %v425_v4   ;;  %v437_v7 = vld [vmem:[%s18135_s25 + $0x238] sm:$0xff]   ;;  %430 = vst [vmem:[%s18140_s26 + $0x228] sm:$0xff] %v429_v5   ;;  %v441_v8 = vld [vmem:[%s18135_s25 + $0x240] sm:$0xff]  }
  0x36   : > { %434 = vst [vmem:[%s18140_s26 + $0x230] sm:$0xff] %v433_v6   ;;  %438 = vst [vmem:[%s18140_s26 + $0x238] sm:$0xff] %v437_v7   ;;  %v445_v9 = vld [vmem:[%s18135_s25 + $0x248] sm:$0xff]   ;;  %v449_v10 = vld [vmem:[%s18135_s25 + $0x250] sm:$0xff]  }
  0x37   : > { %442 = vst [vmem:[%s18140_s26 + $0x240] sm:$0xff] %v441_v8   ;;  %446 = vst [vmem:[%s18140_s26 + $0x248] sm:$0xff] %v445_v9   ;;  %v453_v11 = vld [vmem:[%s18135_s25 + $0x258] sm:$0xff]   ;;  %v457_v12 = vld [vmem:[%s18135_s25 + $0x260] sm:$0xff]  }
  0x38   : > { %450 = vst [vmem:[%s18140_s26 + $0x250] sm:$0xff] %v449_v10   ;;  %v461_v13 = vld [vmem:[%s18135_s25 + $0x268] sm:$0xff]   ;;  %454 = vst [vmem:[%s18140_s26 + $0x258] sm:$0xff] %v453_v11   ;;  %v465_v14 = vld [vmem:[%s18135_s25 + $0x270] sm:$0xff]  }
  0x39   : > { %458 = vst [vmem:[%s18140_s26 + $0x260] sm:$0xff] %v457_v12   ;;  %462 = vst [vmem:[%s18140_s26 + $0x268] sm:$0xff] %v461_v13   ;;  %v469_v15 = vld [vmem:[%s18135_s25 + $0x278] sm:$0xff]   ;;  %v473_v16 = vld [vmem:[%s18135_s25 + $0x280] sm:$0xff]  }
  0x3a   : > { %466 = vst [vmem:[%s18140_s26 + $0x270] sm:$0xff] %v465_v14   ;;  %470 = vst [vmem:[%s18140_s26 + $0x278] sm:$0xff] %v469_v15   ;;  %v477_v17 = vld [vmem:[%s18135_s25 + $0x288] sm:$0xff]   ;;  %v481_v18 = vld [vmem:[%s18135_s25 + $0x290] sm:$0xff]  }
  0x3b   : > { %474 = vst [vmem:[%s18140_s26 + $0x280] sm:$0xff] %v473_v16   ;;  %v485_v19 = vld [vmem:[%s18135_s25 + $0x298] sm:$0xff]   ;;  %478 = vst [vmem:[%s18140_s26 + $0x288] sm:$0xff] %v477_v17   ;;  %v489_v20 = vld [vmem:[%s18135_s25 + $0x2a0] sm:$0xff]  }
  0x3c   : > { %482 = vst [vmem:[%s18140_s26 + $0x290] sm:$0xff] %v481_v18   ;;  %486 = vst [vmem:[%s18140_s26 + $0x298] sm:$0xff] %v485_v19   ;;  %v493_v21 = vld [vmem:[%s18135_s25 + $0x2a8] sm:$0xff]   ;;  %v497_v22 = vld [vmem:[%s18135_s25 + $0x2b0] sm:$0xff]  }
  0x3d   : > { %490 = vst [vmem:[%s18140_s26 + $0x2a0] sm:$0xff] %v489_v20   ;;  %494 = vst [vmem:[%s18140_s26 + $0x2a8] sm:$0xff] %v493_v21   ;;  %v501_v23 = vld [vmem:[%s18135_s25 + $0x2b8] sm:$0xff]   ;;  %v505_v24 = vld [vmem:[%s18135_s25 + $0x2c0] sm:$0xff]  }
  0x3e   : > { %498 = vst [vmem:[%s18140_s26 + $0x2b0] sm:$0xff] %v497_v22   ;;  %v509_v25 = vld [vmem:[%s18135_s25 + $0x2c8] sm:$0xff]   ;;  %502 = vst [vmem:[%s18140_s26 + $0x2b8] sm:$0xff] %v501_v23   ;;  %v513_v26 = vld [vmem:[%s18135_s25 + $0x2d0] sm:$0xff]  }
  0x3f   : > { %506 = vst [vmem:[%s18140_s26 + $0x2c0] sm:$0xff] %v505_v24   ;;  %510 = vst [vmem:[%s18140_s26 + $0x2c8] sm:$0xff] %v509_v25   ;;  %v517_v27 = vld [vmem:[%s18135_s25 + $0x2d8] sm:$0xff]   ;;  %v521_v28 = vld [vmem:[%s18135_s25 + $0x2e0] sm:$0xff]  }
  0x40   : > { %514 = vst [vmem:[%s18140_s26 + $0x2d0] sm:$0xff] %v513_v26   ;;  %518 = vst [vmem:[%s18140_s26 + $0x2d8] sm:$0xff] %v517_v27   ;;  %v525_v29 = vld [vmem:[%s18135_s25 + $0x2e8] sm:$0xff]   ;;  %v529_v30 = vld [vmem:[%s18135_s25 + $0x2f0] sm:$0xff]  }
  0x41   : > { %522 = vst [vmem:[%s18140_s26 + $0x2e0] sm:$0xff] %v521_v28   ;;  %v533_v31 = vld [vmem:[%s18135_s25 + $0x2f8] sm:$0xff]   ;;  %526 = vst [vmem:[%s18140_s26 + $0x2e8] sm:$0xff] %v525_v29   ;;  %v537_v32 = vld [vmem:[%s18135_s25 + $0x300] sm:$0xff]  }
  0x42   : > { %530 = vst [vmem:[%s18140_s26 + $0x2f0] sm:$0xff] %v529_v30   ;;  %534 = vst [vmem:[%s18140_s26 + $0x2f8] sm:$0xff] %v533_v31   ;;  %v541_v33 = vld [vmem:[%s18135_s25 + $0x308] sm:$0xff]   ;;  %v545_v34 = vld [vmem:[%s18135_s25 + $0x620] sm:$0xff]  }
  0x43   : > { %538 = vst [vmem:[%s18140_s26 + $0x300] sm:$0xff] %v537_v32   ;;  %542 = vst [vmem:[%s18140_s26 + $0x308] sm:$0xff] %v541_v33   ;;  %v549_v35 = vld [vmem:[%s18135_s25 + $0x628] sm:$0xff]   ;;  %v553_v36 = vld [vmem:[%s18135_s25 + $0x630] sm:$0xff]  }
  0x44   : > { %546 = vst [vmem:[%s18140_s26 + $0x310] sm:$0xff] %v545_v34   ;;  %v557_v37 = vld [vmem:[%s18135_s25 + $0x638] sm:$0xff]   ;;  %550 = vst [vmem:[%s18140_s26 + $0x318] sm:$0xff] %v549_v35   ;;  %v561_v38 = vld [vmem:[%s18135_s25 + $0x640] sm:$0xff]  }
  0x45   : > { %554 = vst [vmem:[%s18140_s26 + $0x320] sm:$0xff] %v553_v36   ;;  %558 = vst [vmem:[%s18140_s26 + $0x328] sm:$0xff] %v557_v37   ;;  %v565_v39 = vld [vmem:[%s18135_s25 + $0x648] sm:$0xff]   ;;  %v569_v40 = vld [vmem:[%s18135_s25 + $0x650] sm:$0xff]  }
  0x46   : > { %562 = vst [vmem:[%s18140_s26 + $0x330] sm:$0xff] %v561_v38   ;;  %566 = vst [vmem:[%s18140_s26 + $0x338] sm:$0xff] %v565_v39   ;;  %v573_v41 = vld [vmem:[%s18135_s25 + $0x658] sm:$0xff]   ;;  %v577_v42 = vld [vmem:[%s18135_s25 + $0x660] sm:$0xff]  }
  0x47   : > { %570 = vst [vmem:[%s18140_s26 + $0x340] sm:$0xff] %v569_v40   ;;  %v581_v43 = vld [vmem:[%s18135_s25 + $0x668] sm:$0xff]   ;;  %574 = vst [vmem:[%s18140_s26 + $0x348] sm:$0xff] %v573_v41   ;;  %v585_v44 = vld [vmem:[%s18135_s25 + $0x670] sm:$0xff]  }
  0x48   : > { %578 = vst [vmem:[%s18140_s26 + $0x350] sm:$0xff] %v577_v42   ;;  %582 = vst [vmem:[%s18140_s26 + $0x358] sm:$0xff] %v581_v43   ;;  %v589_v45 = vld [vmem:[%s18135_s25 + $0x678] sm:$0xff]   ;;  %v593_v46 = vld [vmem:[%s18135_s25 + $0x680] sm:$0xff]  }
  0x49   : > { %586 = vst [vmem:[%s18140_s26 + $0x360] sm:$0xff] %v585_v44   ;;  %590 = vst [vmem:[%s18140_s26 + $0x368] sm:$0xff] %v589_v45   ;;  %v597_v47 = vld [vmem:[%s18135_s25 + $0x688] sm:$0xff]   ;;  %v601_v48 = vld [vmem:[%s18135_s25 + $0x690] sm:$0xff]  }
  0x4a   : > { %594 = vst [vmem:[%s18140_s26 + $0x370] sm:$0xff] %v593_v46   ;;  %v605_v49 = vld [vmem:[%s18135_s25 + $0x698] sm:$0xff]   ;;  %598 = vst [vmem:[%s18140_s26 + $0x378] sm:$0xff] %v597_v47   ;;  %v609_v50 = vld [vmem:[%s18135_s25 + $0x6a0] sm:$0xff]  }
  0x4b   : > { %602 = vst [vmem:[%s18140_s26 + $0x380] sm:$0xff] %v601_v48   ;;  %606 = vst [vmem:[%s18140_s26 + $0x388] sm:$0xff] %v605_v49   ;;  %v613_v51 = vld [vmem:[%s18135_s25 + $0x6a8] sm:$0xff]   ;;  %v617_v52 = vld [vmem:[%s18135_s25 + $0x6b0] sm:$0xff]  }
  0x4c   : > { %610 = vst [vmem:[%s18140_s26 + $0x390] sm:$0xff] %v609_v50   ;;  %614 = vst [vmem:[%s18140_s26 + $0x398] sm:$0xff] %v613_v51   ;;  %v621_v53 = vld [vmem:[%s18135_s25 + $0x6b8] sm:$0xff]   ;;  %v625_v54 = vld [vmem:[%s18135_s25 + $0x6c0] sm:$0xff]  }
  0x4d   : > { %618 = vst [vmem:[%s18140_s26 + $0x3a0] sm:$0xff] %v617_v52   ;;  %v629_v55 = vld [vmem:[%s18135_s25 + $0x6c8] sm:$0xff]   ;;  %622 = vst [vmem:[%s18140_s26 + $0x3a8] sm:$0xff] %v621_v53   ;;  %v633_v56 = vld [vmem:[%s18135_s25 + $0x6d0] sm:$0xff]  }
  0x4e   : > { %626 = vst [vmem:[%s18140_s26 + $0x3b0] sm:$0xff] %v625_v54   ;;  %630 = vst [vmem:[%s18140_s26 + $0x3b8] sm:$0xff] %v629_v55   ;;  %v637_v57 = vld [vmem:[%s18135_s25 + $0x6d8] sm:$0xff]   ;;  %v641_v58 = vld [vmem:[%s18135_s25 + $0x6e0] sm:$0xff]  }
  0x4f   : > { %634 = vst [vmem:[%s18140_s26 + $0x3c0] sm:$0xff] %v633_v56   ;;  %638 = vst [vmem:[%s18140_s26 + $0x3c8] sm:$0xff] %v637_v57   ;;  %v645_v59 = vld [vmem:[%s18135_s25 + $0x6e8] sm:$0xff]   ;;  %v649_v60 = vld [vmem:[%s18135_s25 + $0x6f0] sm:$0xff]  }
  0x50   : > { %642 = vst [vmem:[%s18140_s26 + $0x3d0] sm:$0xff] %v641_v58   ;;  %v653_v61 = vld [vmem:[%s18135_s25 + $0x6f8] sm:$0xff]   ;;  %646 = vst [vmem:[%s18140_s26 + $0x3d8] sm:$0xff] %v645_v59   ;;  %v657_v62 = vld [vmem:[%s18135_s25 + $0x700] sm:$0xff]  }
  0x51   : > { %650 = vst [vmem:[%s18140_s26 + $0x3e0] sm:$0xff] %v649_v60   ;;  %654 = vst [vmem:[%s18140_s26 + $0x3e8] sm:$0xff] %v653_v61   ;;  %v661_v63 = vld [vmem:[%s18135_s25 + $0x708] sm:$0xff]   ;;  %v665_v0 = vld [vmem:[%s18135_s25 + $0x710] sm:$0xff]  }
  0x52   : > { %658 = vst [vmem:[%s18140_s26 + $0x3f0] sm:$0xff] %v657_v62   ;;  %662 = vst [vmem:[%s18140_s26 + $0x3f8] sm:$0xff] %v661_v63   ;;  %v669_v1 = vld [vmem:[%s18135_s25 + $0x718] sm:$0xff]   ;;  %v673_v2 = vld [vmem:[%s18135_s25 + $0x720] sm:$0xff]  }
  0x53   : > { %666 = vst [vmem:[%s18140_s26 + $0x400] sm:$0xff] %v665_v0   ;;  %v677_v3 = vld [vmem:[%s18135_s25 + $0x728] sm:$0xff]   ;;  %670 = vst [vmem:[%s18140_s26 + $0x408] sm:$0xff] %v669_v1   ;;  %v681_v4 = vld [vmem:[%s18135_s25 + $0x730] sm:$0xff]  }
  0x54   : > { %674 = vst [vmem:[%s18140_s26 + $0x410] sm:$0xff] %v673_v2   ;;  %678 = vst [vmem:[%s18140_s26 + $0x418] sm:$0xff] %v677_v3   ;;  %v685_v5 = vld [vmem:[%s18135_s25 + $0x738] sm:$0xff]   ;;  %v689_v6 = vld [vmem:[%s18135_s25 + $0x740] sm:$0xff]  }
  0x55   : > { %682 = vst [vmem:[%s18140_s26 + $0x420] sm:$0xff] %v681_v4   ;;  %686 = vst [vmem:[%s18140_s26 + $0x428] sm:$0xff] %v685_v5   ;;  %v693_v7 = vld [vmem:[%s18135_s25 + $0x748] sm:$0xff]   ;;  %v697_v8 = vld [vmem:[%s18135_s25 + $0x750] sm:$0xff]  }
  0x56   : > { %690 = vst [vmem:[%s18140_s26 + $0x430] sm:$0xff] %v689_v6   ;;  %v701_v9 = vld [vmem:[%s18135_s25 + $0x758] sm:$0xff]   ;;  %694 = vst [vmem:[%s18140_s26 + $0x438] sm:$0xff] %v693_v7   ;;  %v705_v10 = vld [vmem:[%s18135_s25 + $0x760] sm:$0xff]  }
  0x57   : > { %698 = vst [vmem:[%s18140_s26 + $0x440] sm:$0xff] %v697_v8   ;;  %702 = vst [vmem:[%s18140_s26 + $0x448] sm:$0xff] %v701_v9   ;;  %v709_v11 = vld [vmem:[%s18135_s25 + $0x768] sm:$0xff]   ;;  %v713_v12 = vld [vmem:[%s18135_s25 + $0x770] sm:$0xff]  }
  0x58   : > { %706 = vst [vmem:[%s18140_s26 + $0x450] sm:$0xff] %v705_v10   ;;  %710 = vst [vmem:[%s18140_s26 + $0x458] sm:$0xff] %v709_v11   ;;  %v717_v13 = vld [vmem:[%s18135_s25 + $0x778] sm:$0xff]   ;;  %v721_v14 = vld [vmem:[%s18135_s25 + $0x780] sm:$0xff]  }
  0x59   : > { %714 = vst [vmem:[%s18140_s26 + $0x460] sm:$0xff] %v713_v12   ;;  %v725_v15 = vld [vmem:[%s18135_s25 + $0x788] sm:$0xff]   ;;  %718 = vst [vmem:[%s18140_s26 + $0x468] sm:$0xff] %v717_v13   ;;  %v729_v16 = vld [vmem:[%s18135_s25 + $0x790] sm:$0xff]  }
  0x5a   : > { %722 = vst [vmem:[%s18140_s26 + $0x470] sm:$0xff] %v721_v14   ;;  %726 = vst [vmem:[%s18140_s26 + $0x478] sm:$0xff] %v725_v15   ;;  %v733_v17 = vld [vmem:[%s18135_s25 + $0x798] sm:$0xff]   ;;  %v737_v18 = vld [vmem:[%s18135_s25 + $0x7a0] sm:$0xff]  }
  0x5b   : > { %730 = vst [vmem:[%s18140_s26 + $0x480] sm:$0xff] %v729_v16   ;;  %734 = vst [vmem:[%s18140_s26 + $0x488] sm:$0xff] %v733_v17   ;;  %v741_v19 = vld [vmem:[%s18135_s25 + $0x7a8] sm:$0xff]   ;;  %v745_v20 = vld [vmem:[%s18135_s25 + $0x7b0] sm:$0xff]  }
  0x5c   : > { %738 = vst [vmem:[%s18140_s26 + $0x490] sm:$0xff] %v737_v18   ;;  %v749_v21 = vld [vmem:[%s18135_s25 + $0x7b8] sm:$0xff]   ;;  %742 = vst [vmem:[%s18140_s26 + $0x498] sm:$0xff] %v741_v19   ;;  %v753_v22 = vld [vmem:[%s18135_s25 + $0x7c0] sm:$0xff]  }
  0x5d   : > { %746 = vst [vmem:[%s18140_s26 + $0x4a0] sm:$0xff] %v745_v20   ;;  %750 = vst [vmem:[%s18140_s26 + $0x4a8] sm:$0xff] %v749_v21   ;;  %v757_v23 = vld [vmem:[%s18135_s25 + $0x7c8] sm:$0xff]   ;;  %v761_v24 = vld [vmem:[%s18135_s25 + $0x7d0] sm:$0xff]  }
  0x5e   : > { %754 = vst [vmem:[%s18140_s26 + $0x4b0] sm:$0xff] %v753_v22   ;;  %758 = vst [vmem:[%s18140_s26 + $0x4b8] sm:$0xff] %v757_v23   ;;  %v765_v25 = vld [vmem:[%s18135_s25 + $0x7d8] sm:$0xff]   ;;  %v769_v26 = vld [vmem:[%s18135_s25 + $0x7e0] sm:$0xff]  }
  0x5f   : > { %762 = vst [vmem:[%s18140_s26 + $0x4c0] sm:$0xff] %v761_v24   ;;  %v773_v27 = vld [vmem:[%s18135_s25 + $0x7e8] sm:$0xff]   ;;  %766 = vst [vmem:[%s18140_s26 + $0x4c8] sm:$0xff] %v765_v25   ;;  %v777_v28 = vld [vmem:[%s18135_s25 + $0x7f0] sm:$0xff]  }
  0x60   : > { %770 = vst [vmem:[%s18140_s26 + $0x4d0] sm:$0xff] %v769_v26   ;;  %774 = vst [vmem:[%s18140_s26 + $0x4d8] sm:$0xff] %v773_v27   ;;  %v781_v29 = vld [vmem:[%s18135_s25 + $0x7f8] sm:$0xff]   ;;  %v785_v30 = vld [vmem:[%s18135_s25 + $0x800] sm:$0xff]  }
  0x61   : > { %778 = vst [vmem:[%s18140_s26 + $0x4e0] sm:$0xff] %v777_v28   ;;  %782 = vst [vmem:[%s18140_s26 + $0x4e8] sm:$0xff] %v781_v29   ;;  %v789_v31 = vld [vmem:[%s18135_s25 + $0x808] sm:$0xff]   ;;  %v793_v32 = vld [vmem:[%s18135_s25 + $0x810] sm:$0xff]  }
  0x62   : > { %786 = vst [vmem:[%s18140_s26 + $0x4f0] sm:$0xff] %v785_v30   ;;  %v797_v33 = vld [vmem:[%s18135_s25 + $0x818] sm:$0xff]   ;;  %790 = vst [vmem:[%s18140_s26 + $0x4f8] sm:$0xff] %v789_v31   ;;  %v801_v34 = vld [vmem:[%s18135_s25 + $0x820] sm:$0xff]  }
  0x63   : > { %794 = vst [vmem:[%s18140_s26 + $0x500] sm:$0xff] %v793_v32   ;;  %798 = vst [vmem:[%s18140_s26 + $0x508] sm:$0xff] %v797_v33   ;;  %v805_v35 = vld [vmem:[%s18135_s25 + $0x828] sm:$0xff]   ;;  %v809_v36 = vld [vmem:[%s18135_s25 + $0x830] sm:$0xff]  }
  0x64   : > { %802 = vst [vmem:[%s18140_s26 + $0x510] sm:$0xff] %v801_v34   ;;  %806 = vst [vmem:[%s18140_s26 + $0x518] sm:$0xff] %v805_v35   ;;  %v813_v37 = vld [vmem:[%s18135_s25 + $0x838] sm:$0xff]   ;;  %v817_v38 = vld [vmem:[%s18135_s25 + $0x840] sm:$0xff]  }
  0x65   : > { %810 = vst [vmem:[%s18140_s26 + $0x520] sm:$0xff] %v809_v36   ;;  %v821_v39 = vld [vmem:[%s18135_s25 + $0x848] sm:$0xff]   ;;  %814 = vst [vmem:[%s18140_s26 + $0x528] sm:$0xff] %v813_v37   ;;  %v825_v40 = vld [vmem:[%s18135_s25 + $0x850] sm:$0xff]  }
  0x66   : > { %818 = vst [vmem:[%s18140_s26 + $0x530] sm:$0xff] %v817_v38   ;;  %822 = vst [vmem:[%s18140_s26 + $0x538] sm:$0xff] %v821_v39   ;;  %v829_v41 = vld [vmem:[%s18135_s25 + $0x858] sm:$0xff]   ;;  %v833_v42 = vld [vmem:[%s18135_s25 + $0x860] sm:$0xff]  }
  0x67   : > { %826 = vst [vmem:[%s18140_s26 + $0x540] sm:$0xff] %v825_v40   ;;  %830 = vst [vmem:[%s18140_s26 + $0x548] sm:$0xff] %v829_v41   ;;  %v837_v43 = vld [vmem:[%s18135_s25 + $0x868] sm:$0xff]   ;;  %v841_v44 = vld [vmem:[%s18135_s25 + $0x870] sm:$0xff]  }
  0x68   : > { %834 = vst [vmem:[%s18140_s26 + $0x550] sm:$0xff] %v833_v42   ;;  %v845_v45 = vld [vmem:[%s18135_s25 + $0x878] sm:$0xff]   ;;  %838 = vst [vmem:[%s18140_s26 + $0x558] sm:$0xff] %v837_v43   ;;  %v849_v46 = vld [vmem:[%s18135_s25 + $0x880] sm:$0xff]  }
  0x69   : > { %842 = vst [vmem:[%s18140_s26 + $0x560] sm:$0xff] %v841_v44   ;;  %846 = vst [vmem:[%s18140_s26 + $0x568] sm:$0xff] %v845_v45   ;;  %v853_v47 = vld [vmem:[%s18135_s25 + $0x888] sm:$0xff]   ;;  %v857_v48 = vld [vmem:[%s18135_s25 + $0x890] sm:$0xff]  }
  0x6a   : > { %850 = vst [vmem:[%s18140_s26 + $0x570] sm:$0xff] %v849_v46   ;;  %854 = vst [vmem:[%s18140_s26 + $0x578] sm:$0xff] %v853_v47   ;;  %v861_v49 = vld [vmem:[%s18135_s25 + $0x898] sm:$0xff]   ;;  %v865_v50 = vld [vmem:[%s18135_s25 + $0x8a0] sm:$0xff]  }
  0x6b   : > { %858 = vst [vmem:[%s18140_s26 + $0x580] sm:$0xff] %v857_v48   ;;  %v869_v51 = vld [vmem:[%s18135_s25 + $0x8a8] sm:$0xff]   ;;  %862 = vst [vmem:[%s18140_s26 + $0x588] sm:$0xff] %v861_v49   ;;  %v873_v52 = vld [vmem:[%s18135_s25 + $0x8b0] sm:$0xff]  }
  0x6c   : > { %866 = vst [vmem:[%s18140_s26 + $0x590] sm:$0xff] %v865_v50   ;;  %870 = vst [vmem:[%s18140_s26 + $0x598] sm:$0xff] %v869_v51   ;;  %v877_v53 = vld [vmem:[%s18135_s25 + $0x8b8] sm:$0xff]   ;;  %v881_v54 = vld [vmem:[%s18135_s25 + $0x8c0] sm:$0xff]  }
  0x6d   : > { %874 = vst [vmem:[%s18140_s26 + $0x5a0] sm:$0xff] %v873_v52   ;;  %878 = vst [vmem:[%s18140_s26 + $0x5a8] sm:$0xff] %v877_v53   ;;  %v885_v55 = vld [vmem:[%s18135_s25 + $0x8c8] sm:$0xff]   ;;  %v889_v56 = vld [vmem:[%s18135_s25 + $0x8d0] sm:$0xff]  }
  0x6e   : > { %882 = vst [vmem:[%s18140_s26 + $0x5b0] sm:$0xff] %v881_v54   ;;  %v893_v57 = vld [vmem:[%s18135_s25 + $0x8d8] sm:$0xff]   ;;  %886 = vst [vmem:[%s18140_s26 + $0x5b8] sm:$0xff] %v885_v55   ;;  %v897_v58 = vld [vmem:[%s18135_s25 + $0x8e0] sm:$0xff]  }
  0x6f   : > { %890 = vst [vmem:[%s18140_s26 + $0x5c0] sm:$0xff] %v889_v56   ;;  %894 = vst [vmem:[%s18140_s26 + $0x5c8] sm:$0xff] %v893_v57   ;;  %v901_v59 = vld [vmem:[%s18135_s25 + $0x8e8] sm:$0xff]   ;;  %v905_v60 = vld [vmem:[%s18135_s25 + $0x8f0] sm:$0xff]  }
  0x70   : > { %898 = vst [vmem:[%s18140_s26 + $0x5d0] sm:$0xff] %v897_v58   ;;  %902 = vst [vmem:[%s18140_s26 + $0x5d8] sm:$0xff] %v901_v59   ;;  %v909_v61 = vld [vmem:[%s18135_s25 + $0x8f8] sm:$0xff]   ;;  %v913_v62 = vld [vmem:[%s18135_s25 + $0x900] sm:$0xff]  }
  0x71   : > { %906 = vst [vmem:[%s18140_s26 + $0x5e0] sm:$0xff] %v905_v60   ;;  %v917_v63 = vld [vmem:[%s18135_s25 + $0x908] sm:$0xff]   ;;  %910 = vst [vmem:[%s18140_s26 + $0x5e8] sm:$0xff] %v909_v61   ;;  %v921_v0 = vld [vmem:[%s18135_s25 + $0x910] sm:$0xff]  }
  0x72   : > { %914 = vst [vmem:[%s18140_s26 + $0x5f0] sm:$0xff] %v913_v62   ;;  %918 = vst [vmem:[%s18140_s26 + $0x5f8] sm:$0xff] %v917_v63   ;;  %v925_v1 = vld [vmem:[%s18135_s25 + $0x918] sm:$0xff]   ;;  %v929_v2 = vld [vmem:[%s18135_s25 + $0x920] sm:$0xff]  }
  0x73   : > { %922 = vst [vmem:[%s18140_s26 + $0x600] sm:$0xff] %v921_v0   ;;  %926 = vst [vmem:[%s18140_s26 + $0x608] sm:$0xff] %v925_v1   ;;  %v933_v3 = vld [vmem:[%s18135_s25 + $0x928] sm:$0xff]   ;;  %v937_v4 = vld [vmem:[%s18135_s25 + $0xc40] sm:$0xff]  }
  0x74   : > { %930 = vst [vmem:[%s18140_s26 + $0x610] sm:$0xff] %v929_v2   ;;  %v941_v5 = vld [vmem:[%s18135_s25 + $0xc48] sm:$0xff]   ;;  %934 = vst [vmem:[%s18140_s26 + $0x618] sm:$0xff] %v933_v3   ;;  %v945_v6 = vld [vmem:[%s18135_s25 + $0xc50] sm:$0xff]  }
  0x75   : > { %938 = vst [vmem:[%s18140_s26 + $0x620] sm:$0xff] %v937_v4   ;;  %942 = vst [vmem:[%s18140_s26 + $0x628] sm:$0xff] %v941_v5   ;;  %v949_v7 = vld [vmem:[%s18135_s25 + $0xc58] sm:$0xff]   ;;  %v953_v8 = vld [vmem:[%s18135_s25 + $0xc60] sm:$0xff]  }
  0x76   : > { %946 = vst [vmem:[%s18140_s26 + $0x630] sm:$0xff] %v945_v6   ;;  %950 = vst [vmem:[%s18140_s26 + $0x638] sm:$0xff] %v949_v7   ;;  %v957_v9 = vld [vmem:[%s18135_s25 + $0xc68] sm:$0xff]   ;;  %v961_v10 = vld [vmem:[%s18135_s25 + $0xc70] sm:$0xff]  }
  0x77   : > { %954 = vst [vmem:[%s18140_s26 + $0x640] sm:$0xff] %v953_v8   ;;  %v965_v11 = vld [vmem:[%s18135_s25 + $0xc78] sm:$0xff]   ;;  %958 = vst [vmem:[%s18140_s26 + $0x648] sm:$0xff] %v957_v9   ;;  %v969_v12 = vld [vmem:[%s18135_s25 + $0xc80] sm:$0xff]  }
  0x78   : > { %962 = vst [vmem:[%s18140_s26 + $0x650] sm:$0xff] %v961_v10   ;;  %966 = vst [vmem:[%s18140_s26 + $0x658] sm:$0xff] %v965_v11   ;;  %v973_v13 = vld [vmem:[%s18135_s25 + $0xc88] sm:$0xff]   ;;  %v977_v14 = vld [vmem:[%s18135_s25 + $0xc90] sm:$0xff]  }
  0x79   : > { %970 = vst [vmem:[%s18140_s26 + $0x660] sm:$0xff] %v969_v12   ;;  %974 = vst [vmem:[%s18140_s26 + $0x668] sm:$0xff] %v973_v13   ;;  %v981_v15 = vld [vmem:[%s18135_s25 + $0xc98] sm:$0xff]   ;;  %v985_v16 = vld [vmem:[%s18135_s25 + $0xca0] sm:$0xff]  }
  0x7a   : > { %978 = vst [vmem:[%s18140_s26 + $0x670] sm:$0xff] %v977_v14   ;;  %v989_v17 = vld [vmem:[%s18135_s25 + $0xca8] sm:$0xff]   ;;  %982 = vst [vmem:[%s18140_s26 + $0x678] sm:$0xff] %v981_v15   ;;  %v993_v18 = vld [vmem:[%s18135_s25 + $0xcb0] sm:$0xff]  }
  0x7b   : > { %986 = vst [vmem:[%s18140_s26 + $0x680] sm:$0xff] %v985_v16   ;;  %990 = vst [vmem:[%s18140_s26 + $0x688] sm:$0xff] %v989_v17   ;;  %v997_v19 = vld [vmem:[%s18135_s25 + $0xcb8] sm:$0xff]   ;;  %v1001_v20 = vld [vmem:[%s18135_s25 + $0xcc0] sm:$0xff]  }
  0x7c   : > { %994 = vst [vmem:[%s18140_s26 + $0x690] sm:$0xff] %v993_v18   ;;  %998 = vst [vmem:[%s18140_s26 + $0x698] sm:$0xff] %v997_v19   ;;  %v1005_v21 = vld [vmem:[%s18135_s25 + $0xcc8] sm:$0xff]   ;;  %v1009_v22 = vld [vmem:[%s18135_s25 + $0xcd0] sm:$0xff]  }
  0x7d   : > { %1002 = vst [vmem:[%s18140_s26 + $0x6a0] sm:$0xff] %v1001_v20   ;;  %v1013_v23 = vld [vmem:[%s18135_s25 + $0xcd8] sm:$0xff]   ;;  %1006 = vst [vmem:[%s18140_s26 + $0x6a8] sm:$0xff] %v1005_v21   ;;  %v1017_v24 = vld [vmem:[%s18135_s25 + $0xce0] sm:$0xff]  }
  0x7e   : > { %1010 = vst [vmem:[%s18140_s26 + $0x6b0] sm:$0xff] %v1009_v22   ;;  %1014 = vst [vmem:[%s18140_s26 + $0x6b8] sm:$0xff] %v1013_v23   ;;  %v1021_v25 = vld [vmem:[%s18135_s25 + $0xce8] sm:$0xff]   ;;  %v1025_v26 = vld [vmem:[%s18135_s25 + $0xcf0] sm:$0xff]  }
  0x7f   : > { %1018 = vst [vmem:[%s18140_s26 + $0x6c0] sm:$0xff] %v1017_v24   ;;  %1022 = vst [vmem:[%s18140_s26 + $0x6c8] sm:$0xff] %v1021_v25   ;;  %v1029_v27 = vld [vmem:[%s18135_s25 + $0xcf8] sm:$0xff]   ;;  %v1033_v28 = vld [vmem:[%s18135_s25 + $0xd00] sm:$0xff]  }
  0x80   : > { %1026 = vst [vmem:[%s18140_s26 + $0x6d0] sm:$0xff] %v1025_v26   ;;  %v1037_v29 = vld [vmem:[%s18135_s25 + $0xd08] sm:$0xff]   ;;  %1030 = vst [vmem:[%s18140_s26 + $0x6d8] sm:$0xff] %v1029_v27   ;;  %v1041_v30 = vld [vmem:[%s18135_s25 + $0xd10] sm:$0xff]  }
  0x81   : > { %1034 = vst [vmem:[%s18140_s26 + $0x6e0] sm:$0xff] %v1033_v28   ;;  %1038 = vst [vmem:[%s18140_s26 + $0x6e8] sm:$0xff] %v1037_v29   ;;  %v1045_v31 = vld [vmem:[%s18135_s25 + $0xd18] sm:$0xff]   ;;  %v1049_v32 = vld [vmem:[%s18135_s25 + $0xd20] sm:$0xff]  }
  0x82   : > { %1042 = vst [vmem:[%s18140_s26 + $0x6f0] sm:$0xff] %v1041_v30   ;;  %1046 = vst [vmem:[%s18140_s26 + $0x6f8] sm:$0xff] %v1045_v31   ;;  %v1053_v33 = vld [vmem:[%s18135_s25 + $0xd28] sm:$0xff]   ;;  %v1057_v34 = vld [vmem:[%s18135_s25 + $0xd30] sm:$0xff]  }
  0x83   : > { %1050 = vst [vmem:[%s18140_s26 + $0x700] sm:$0xff] %v1049_v32   ;;  %v1061_v35 = vld [vmem:[%s18135_s25 + $0xd38] sm:$0xff]   ;;  %1054 = vst [vmem:[%s18140_s26 + $0x708] sm:$0xff] %v1053_v33   ;;  %v1065_v36 = vld [vmem:[%s18135_s25 + $0xd40] sm:$0xff]  }
  0x84   : > { %1058 = vst [vmem:[%s18140_s26 + $0x710] sm:$0xff] %v1057_v34   ;;  %1062 = vst [vmem:[%s18140_s26 + $0x718] sm:$0xff] %v1061_v35   ;;  %v1069_v37 = vld [vmem:[%s18135_s25 + $0xd48] sm:$0xff]   ;;  %v1073_v38 = vld [vmem:[%s18135_s25 + $0xd50] sm:$0xff]  }
  0x85   : > { %1066 = vst [vmem:[%s18140_s26 + $0x720] sm:$0xff] %v1065_v36   ;;  %1070 = vst [vmem:[%s18140_s26 + $0x728] sm:$0xff] %v1069_v37   ;;  %v1077_v39 = vld [vmem:[%s18135_s25 + $0xd58] sm:$0xff]   ;;  %v1081_v40 = vld [vmem:[%s18135_s25 + $0xd60] sm:$0xff]  }
  0x86   : > { %1074 = vst [vmem:[%s18140_s26 + $0x730] sm:$0xff] %v1073_v38   ;;  %v1085_v41 = vld [vmem:[%s18135_s25 + $0xd68] sm:$0xff]   ;;  %1078 = vst [vmem:[%s18140_s26 + $0x738] sm:$0xff] %v1077_v39   ;;  %v1089_v42 = vld [vmem:[%s18135_s25 + $0xd70] sm:$0xff]  }
  0x87   : > { %1082 = vst [vmem:[%s18140_s26 + $0x740] sm:$0xff] %v1081_v40   ;;  %1086 = vst [vmem:[%s18140_s26 + $0x748] sm:$0xff] %v1085_v41   ;;  %v1093_v43 = vld [vmem:[%s18135_s25 + $0xd78] sm:$0xff]   ;;  %v1097_v44 = vld [vmem:[%s18135_s25 + $0xd80] sm:$0xff]  }
  0x88   : > { %1090 = vst [vmem:[%s18140_s26 + $0x750] sm:$0xff] %v1089_v42   ;;  %1094 = vst [vmem:[%s18140_s26 + $0x758] sm:$0xff] %v1093_v43   ;;  %v1101_v45 = vld [vmem:[%s18135_s25 + $0xd88] sm:$0xff]   ;;  %v1105_v46 = vld [vmem:[%s18135_s25 + $0xd90] sm:$0xff]  }
  0x89   : > { %1098 = vst [vmem:[%s18140_s26 + $0x760] sm:$0xff] %v1097_v44   ;;  %v1109_v47 = vld [vmem:[%s18135_s25 + $0xd98] sm:$0xff]   ;;  %1102 = vst [vmem:[%s18140_s26 + $0x768] sm:$0xff] %v1101_v45   ;;  %v1113_v48 = vld [vmem:[%s18135_s25 + $0xda0] sm:$0xff]  }
  0x8a   : > { %1106 = vst [vmem:[%s18140_s26 + $0x770] sm:$0xff] %v1105_v46   ;;  %1110 = vst [vmem:[%s18140_s26 + $0x778] sm:$0xff] %v1109_v47   ;;  %v1117_v49 = vld [vmem:[%s18135_s25 + $0xda8] sm:$0xff]   ;;  %v1121_v50 = vld [vmem:[%s18135_s25 + $0xdb0] sm:$0xff]  }
  0x8b   : > { %1114 = vst [vmem:[%s18140_s26 + $0x780] sm:$0xff] %v1113_v48   ;;  %1118 = vst [vmem:[%s18140_s26 + $0x788] sm:$0xff] %v1117_v49   ;;  %v1125_v51 = vld [vmem:[%s18135_s25 + $0xdb8] sm:$0xff]   ;;  %v1129_v52 = vld [vmem:[%s18135_s25 + $0xdc0] sm:$0xff]  }
  0x8c   : > { %1122 = vst [vmem:[%s18140_s26 + $0x790] sm:$0xff] %v1121_v50   ;;  %v1133_v53 = vld [vmem:[%s18135_s25 + $0xdc8] sm:$0xff]   ;;  %1126 = vst [vmem:[%s18140_s26 + $0x798] sm:$0xff] %v1125_v51   ;;  %v1137_v54 = vld [vmem:[%s18135_s25 + $0xdd0] sm:$0xff]  }
  0x8d   : > { %1130 = vst [vmem:[%s18140_s26 + $0x7a0] sm:$0xff] %v1129_v52   ;;  %1134 = vst [vmem:[%s18140_s26 + $0x7a8] sm:$0xff] %v1133_v53   ;;  %v1141_v55 = vld [vmem:[%s18135_s25 + $0xdd8] sm:$0xff]   ;;  %v1145_v56 = vld [vmem:[%s18135_s25 + $0xde0] sm:$0xff]  }
  0x8e   : > { %1138 = vst [vmem:[%s18140_s26 + $0x7b0] sm:$0xff] %v1137_v54   ;;  %1142 = vst [vmem:[%s18140_s26 + $0x7b8] sm:$0xff] %v1141_v55   ;;  %v1149_v57 = vld [vmem:[%s18135_s25 + $0xde8] sm:$0xff]   ;;  %v1153_v58 = vld [vmem:[%s18135_s25 + $0xdf0] sm:$0xff]  }
  0x8f   : > { %1146 = vst [vmem:[%s18140_s26 + $0x7c0] sm:$0xff] %v1145_v56   ;;  %v1157_v59 = vld [vmem:[%s18135_s25 + $0xdf8] sm:$0xff]   ;;  %1150 = vst [vmem:[%s18140_s26 + $0x7c8] sm:$0xff] %v1149_v57   ;;  %v1161_v60 = vld [vmem:[%s18135_s25 + $0xe00] sm:$0xff]  }
  0x90   : > { %1154 = vst [vmem:[%s18140_s26 + $0x7d0] sm:$0xff] %v1153_v58   ;;  %1158 = vst [vmem:[%s18140_s26 + $0x7d8] sm:$0xff] %v1157_v59   ;;  %v1165_v61 = vld [vmem:[%s18135_s25 + $0xe08] sm:$0xff]   ;;  %v1169_v62 = vld [vmem:[%s18135_s25 + $0xe10] sm:$0xff]  }
  0x91   : > { %1162 = vst [vmem:[%s18140_s26 + $0x7e0] sm:$0xff] %v1161_v60   ;;  %1166 = vst [vmem:[%s18140_s26 + $0x7e8] sm:$0xff] %v1165_v61   ;;  %v1173_v63 = vld [vmem:[%s18135_s25 + $0xe18] sm:$0xff]   ;;  %v1177_v0 = vld [vmem:[%s18135_s25 + $0xe20] sm:$0xff]  }
  0x92   : > { %1170 = vst [vmem:[%s18140_s26 + $0x7f0] sm:$0xff] %v1169_v62   ;;  %v1181_v1 = vld [vmem:[%s18135_s25 + $0xe28] sm:$0xff]   ;;  %1174 = vst [vmem:[%s18140_s26 + $0x7f8] sm:$0xff] %v1173_v63   ;;  %v1185_v2 = vld [vmem:[%s18135_s25 + $0xe30] sm:$0xff]  }
  0x93   : > { %1178 = vst [vmem:[%s18140_s26 + $0x800] sm:$0xff] %v1177_v0   ;;  %1182 = vst [vmem:[%s18140_s26 + $0x808] sm:$0xff] %v1181_v1   ;;  %v1189_v3 = vld [vmem:[%s18135_s25 + $0xe38] sm:$0xff]   ;;  %v1193_v4 = vld [vmem:[%s18135_s25 + $0xe40] sm:$0xff]  }
  0x94   : > { %1186 = vst [vmem:[%s18140_s26 + $0x810] sm:$0xff] %v1185_v2   ;;  %1190 = vst [vmem:[%s18140_s26 + $0x818] sm:$0xff] %v1189_v3   ;;  %v1197_v5 = vld [vmem:[%s18135_s25 + $0xe48] sm:$0xff]   ;;  %v1201_v6 = vld [vmem:[%s18135_s25 + $0xe50] sm:$0xff]  }
  0x95   : > { %1194 = vst [vmem:[%s18140_s26 + $0x820] sm:$0xff] %v1193_v4   ;;  %v1205_v7 = vld [vmem:[%s18135_s25 + $0xe58] sm:$0xff]   ;;  %1198 = vst [vmem:[%s18140_s26 + $0x828] sm:$0xff] %v1197_v5   ;;  %v1209_v8 = vld [vmem:[%s18135_s25 + $0xe60] sm:$0xff]  }
  0x96   : > { %1202 = vst [vmem:[%s18140_s26 + $0x830] sm:$0xff] %v1201_v6   ;;  %1206 = vst [vmem:[%s18140_s26 + $0x838] sm:$0xff] %v1205_v7   ;;  %v1213_v9 = vld [vmem:[%s18135_s25 + $0xe68] sm:$0xff]   ;;  %v1217_v10 = vld [vmem:[%s18135_s25 + $0xe70] sm:$0xff]  }
  0x97   : > { %1210 = vst [vmem:[%s18140_s26 + $0x840] sm:$0xff] %v1209_v8   ;;  %1214 = vst [vmem:[%s18140_s26 + $0x848] sm:$0xff] %v1213_v9   ;;  %v1221_v11 = vld [vmem:[%s18135_s25 + $0xe78] sm:$0xff]   ;;  %v1225_v12 = vld [vmem:[%s18135_s25 + $0xe80] sm:$0xff]  }
  0x98   : > { %1218 = vst [vmem:[%s18140_s26 + $0x850] sm:$0xff] %v1217_v10   ;;  %v1229_v13 = vld [vmem:[%s18135_s25 + $0xe88] sm:$0xff]   ;;  %1222 = vst [vmem:[%s18140_s26 + $0x858] sm:$0xff] %v1221_v11   ;;  %v1233_v14 = vld [vmem:[%s18135_s25 + $0xe90] sm:$0xff]  }
  0x99   : > { %1226 = vst [vmem:[%s18140_s26 + $0x860] sm:$0xff] %v1225_v12   ;;  %1230 = vst [vmem:[%s18140_s26 + $0x868] sm:$0xff] %v1229_v13   ;;  %v1237_v15 = vld [vmem:[%s18135_s25 + $0xe98] sm:$0xff]   ;;  %v1241_v16 = vld [vmem:[%s18135_s25 + $0xea0] sm:$0xff]  }
  0x9a   : > { %1234 = vst [vmem:[%s18140_s26 + $0x870] sm:$0xff] %v1233_v14   ;;  %1238 = vst [vmem:[%s18140_s26 + $0x878] sm:$0xff] %v1237_v15   ;;  %v1245_v17 = vld [vmem:[%s18135_s25 + $0xea8] sm:$0xff]   ;;  %v1249_v18 = vld [vmem:[%s18135_s25 + $0xeb0] sm:$0xff]  }
  0x9b   : > { %1242 = vst [vmem:[%s18140_s26 + $0x880] sm:$0xff] %v1241_v16   ;;  %v1253_v19 = vld [vmem:[%s18135_s25 + $0xeb8] sm:$0xff]   ;;  %1246 = vst [vmem:[%s18140_s26 + $0x888] sm:$0xff] %v1245_v17   ;;  %v1257_v20 = vld [vmem:[%s18135_s25 + $0xec0] sm:$0xff]  }
  0x9c   : > { %1250 = vst [vmem:[%s18140_s26 + $0x890] sm:$0xff] %v1249_v18   ;;  %1254 = vst [vmem:[%s18140_s26 + $0x898] sm:$0xff] %v1253_v19   ;;  %v1261_v21 = vld [vmem:[%s18135_s25 + $0xec8] sm:$0xff]   ;;  %v1265_v22 = vld [vmem:[%s18135_s25 + $0xed0] sm:$0xff]  }
  0x9d   : > { %1258 = vst [vmem:[%s18140_s26 + $0x8a0] sm:$0xff] %v1257_v20   ;;  %1262 = vst [vmem:[%s18140_s26 + $0x8a8] sm:$0xff] %v1261_v21   ;;  %v1269_v23 = vld [vmem:[%s18135_s25 + $0xed8] sm:$0xff]   ;;  %v1273_v24 = vld [vmem:[%s18135_s25 + $0xee0] sm:$0xff]  }
  0x9e   : > { %1266 = vst [vmem:[%s18140_s26 + $0x8b0] sm:$0xff] %v1265_v22   ;;  %v1277_v25 = vld [vmem:[%s18135_s25 + $0xee8] sm:$0xff]   ;;  %1270 = vst [vmem:[%s18140_s26 + $0x8b8] sm:$0xff] %v1269_v23   ;;  %v1281_v26 = vld [vmem:[%s18135_s25 + $0xef0] sm:$0xff]  }
  0x9f   : > { %1274 = vst [vmem:[%s18140_s26 + $0x8c0] sm:$0xff] %v1273_v24   ;;  %1278 = vst [vmem:[%s18140_s26 + $0x8c8] sm:$0xff] %v1277_v25   ;;  %v1285_v27 = vld [vmem:[%s18135_s25 + $0xef8] sm:$0xff]   ;;  %v1289_v28 = vld [vmem:[%s18135_s25 + $0xf00] sm:$0xff]  }
  0xa0   : > { %1282 = vst [vmem:[%s18140_s26 + $0x8d0] sm:$0xff] %v1281_v26   ;;  %1286 = vst [vmem:[%s18140_s26 + $0x8d8] sm:$0xff] %v1285_v27   ;;  %v1293_v29 = vld [vmem:[%s18135_s25 + $0xf08] sm:$0xff]   ;;  %v1297_v30 = vld [vmem:[%s18135_s25 + $0xf10] sm:$0xff]  }
  0xa1   : > { %1290 = vst [vmem:[%s18140_s26 + $0x8e0] sm:$0xff] %v1289_v28   ;;  %v1301_v31 = vld [vmem:[%s18135_s25 + $0xf18] sm:$0xff]   ;;  %1294 = vst [vmem:[%s18140_s26 + $0x8e8] sm:$0xff] %v1293_v29   ;;  %v1305_v32 = vld [vmem:[%s18135_s25 + $0xf20] sm:$0xff]  }
  0xa2   : > { %1298 = vst [vmem:[%s18140_s26 + $0x8f0] sm:$0xff] %v1297_v30   ;;  %1302 = vst [vmem:[%s18140_s26 + $0x8f8] sm:$0xff] %v1301_v31   ;;  %v1309_v33 = vld [vmem:[%s18135_s25 + $0xf28] sm:$0xff]   ;;  %v1313_v34 = vld [vmem:[%s18135_s25 + $0xf30] sm:$0xff]  }
  0xa3   : > { %1306 = vst [vmem:[%s18140_s26 + $0x900] sm:$0xff] %v1305_v32   ;;  %1310 = vst [vmem:[%s18140_s26 + $0x908] sm:$0xff] %v1309_v33   ;;  %v1317_v35 = vld [vmem:[%s18135_s25 + $0xf38] sm:$0xff]   ;;  %v1321_v36 = vld [vmem:[%s18135_s25 + $0xf40] sm:$0xff]  }
  0xa4   : > { %1314 = vst [vmem:[%s18140_s26 + $0x910] sm:$0xff] %v1313_v34   ;;  %v1325_v37 = vld [vmem:[%s18135_s25 + $0xf48] sm:$0xff]   ;;  %1318 = vst [vmem:[%s18140_s26 + $0x918] sm:$0xff] %v1317_v35   ;;  %v1329_v38 = vld [vmem:[%s18135_s25 + $0x1260] sm:$0xff]  }
  0xa5   : > { %1322 = vst [vmem:[%s18140_s26 + $0x920] sm:$0xff] %v1321_v36   ;;  %1326 = vst [vmem:[%s18140_s26 + $0x928] sm:$0xff] %v1325_v37   ;;  %v1333_v39 = vld [vmem:[%s18135_s25 + $0x1268] sm:$0xff]   ;;  %v1337_v40 = vld [vmem:[%s18135_s25 + $0x1270] sm:$0xff]  }
  0xa6   : > { %1330 = vst [vmem:[%s18140_s26 + $0x930] sm:$0xff] %v1329_v38   ;;  %1334 = vst [vmem:[%s18140_s26 + $0x938] sm:$0xff] %v1333_v39   ;;  %v1341_v41 = vld [vmem:[%s18135_s25 + $0x1278] sm:$0xff]   ;;  %v1345_v42 = vld [vmem:[%s18135_s25 + $0x1280] sm:$0xff]  }
  0xa7   : > { %1338 = vst [vmem:[%s18140_s26 + $0x940] sm:$0xff] %v1337_v40   ;;  %v1349_v43 = vld [vmem:[%s18135_s25 + $0x1288] sm:$0xff]   ;;  %1342 = vst [vmem:[%s18140_s26 + $0x948] sm:$0xff] %v1341_v41   ;;  %v1353_v44 = vld [vmem:[%s18135_s25 + $0x1290] sm:$0xff]  }
  0xa8   : > { %1346 = vst [vmem:[%s18140_s26 + $0x950] sm:$0xff] %v1345_v42   ;;  %1350 = vst [vmem:[%s18140_s26 + $0x958] sm:$0xff] %v1349_v43   ;;  %v1357_v45 = vld [vmem:[%s18135_s25 + $0x1298] sm:$0xff]   ;;  %v1361_v46 = vld [vmem:[%s18135_s25 + $0x12a0] sm:$0xff]  }
  0xa9   : > { %1354 = vst [vmem:[%s18140_s26 + $0x960] sm:$0xff] %v1353_v44   ;;  %1358 = vst [vmem:[%s18140_s26 + $0x968] sm:$0xff] %v1357_v45   ;;  %v1365_v47 = vld [vmem:[%s18135_s25 + $0x12a8] sm:$0xff]   ;;  %v1369_v48 = vld [vmem:[%s18135_s25 + $0x12b0] sm:$0xff]  }
  0xaa   : > { %1362 = vst [vmem:[%s18140_s26 + $0x970] sm:$0xff] %v1361_v46   ;;  %v1373_v49 = vld [vmem:[%s18135_s25 + $0x12b8] sm:$0xff]   ;;  %1366 = vst [vmem:[%s18140_s26 + $0x978] sm:$0xff] %v1365_v47   ;;  %v1377_v50 = vld [vmem:[%s18135_s25 + $0x12c0] sm:$0xff]  }
  0xab   : > { %1370 = vst [vmem:[%s18140_s26 + $0x980] sm:$0xff] %v1369_v48   ;;  %1374 = vst [vmem:[%s18140_s26 + $0x988] sm:$0xff] %v1373_v49   ;;  %v1381_v51 = vld [vmem:[%s18135_s25 + $0x12c8] sm:$0xff]   ;;  %v1385_v52 = vld [vmem:[%s18135_s25 + $0x12d0] sm:$0xff]  }
  0xac   : > { %1378 = vst [vmem:[%s18140_s26 + $0x990] sm:$0xff] %v1377_v50   ;;  %1382 = vst [vmem:[%s18140_s26 + $0x998] sm:$0xff] %v1381_v51   ;;  %v1389_v53 = vld [vmem:[%s18135_s25 + $0x12d8] sm:$0xff]   ;;  %v1393_v54 = vld [vmem:[%s18135_s25 + $0x12e0] sm:$0xff]  }
  0xad   : > { %1386 = vst [vmem:[%s18140_s26 + $0x9a0] sm:$0xff] %v1385_v52   ;;  %v1397_v55 = vld [vmem:[%s18135_s25 + $0x12e8] sm:$0xff]   ;;  %1390 = vst [vmem:[%s18140_s26 + $0x9a8] sm:$0xff] %v1389_v53   ;;  %v1401_v56 = vld [vmem:[%s18135_s25 + $0x12f0] sm:$0xff]  }
  0xae   : > { %1394 = vst [vmem:[%s18140_s26 + $0x9b0] sm:$0xff] %v1393_v54   ;;  %1398 = vst [vmem:[%s18140_s26 + $0x9b8] sm:$0xff] %v1397_v55   ;;  %v1405_v57 = vld [vmem:[%s18135_s25 + $0x12f8] sm:$0xff]   ;;  %v1409_v58 = vld [vmem:[%s18135_s25 + $0x1300] sm:$0xff]  }
  0xaf   : > { %1402 = vst [vmem:[%s18140_s26 + $0x9c0] sm:$0xff] %v1401_v56   ;;  %1406 = vst [vmem:[%s18140_s26 + $0x9c8] sm:$0xff] %v1405_v57   ;;  %v1413_v59 = vld [vmem:[%s18135_s25 + $0x1308] sm:$0xff]   ;;  %v1417_v60 = vld [vmem:[%s18135_s25 + $0x1310] sm:$0xff]  }
  0xb0   : > { %1410 = vst [vmem:[%s18140_s26 + $0x9d0] sm:$0xff] %v1409_v58   ;;  %v1421_v61 = vld [vmem:[%s18135_s25 + $0x1318] sm:$0xff]   ;;  %1414 = vst [vmem:[%s18140_s26 + $0x9d8] sm:$0xff] %v1413_v59   ;;  %v1425_v62 = vld [vmem:[%s18135_s25 + $0x1320] sm:$0xff]  }
  0xb1   : > { %1418 = vst [vmem:[%s18140_s26 + $0x9e0] sm:$0xff] %v1417_v60   ;;  %1422 = vst [vmem:[%s18140_s26 + $0x9e8] sm:$0xff] %v1421_v61   ;;  %v1429_v63 = vld [vmem:[%s18135_s25 + $0x1328] sm:$0xff]   ;;  %v1433_v0 = vld [vmem:[%s18135_s25 + $0x1330] sm:$0xff]  }
  0xb2   : > { %1426 = vst [vmem:[%s18140_s26 + $0x9f0] sm:$0xff] %v1425_v62   ;;  %1430 = vst [vmem:[%s18140_s26 + $0x9f8] sm:$0xff] %v1429_v63   ;;  %v1437_v1 = vld [vmem:[%s18135_s25 + $0x1338] sm:$0xff]   ;;  %v1441_v2 = vld [vmem:[%s18135_s25 + $0x1340] sm:$0xff]  }
  0xb3   : > { %1434 = vst [vmem:[%s18140_s26 + $0xa00] sm:$0xff] %v1433_v0   ;;  %v1445_v3 = vld [vmem:[%s18135_s25 + $0x1348] sm:$0xff]   ;;  %1438 = vst [vmem:[%s18140_s26 + $0xa08] sm:$0xff] %v1437_v1   ;;  %v1449_v4 = vld [vmem:[%s18135_s25 + $0x1350] sm:$0xff]  }
  0xb4   : > { %1442 = vst [vmem:[%s18140_s26 + $0xa10] sm:$0xff] %v1441_v2   ;;  %1446 = vst [vmem:[%s18140_s26 + $0xa18] sm:$0xff] %v1445_v3   ;;  %v1453_v5 = vld [vmem:[%s18135_s25 + $0x1358] sm:$0xff]   ;;  %v1457_v6 = vld [vmem:[%s18135_s25 + $0x1360] sm:$0xff]  }
  0xb5   : > { %1450 = vst [vmem:[%s18140_s26 + $0xa20] sm:$0xff] %v1449_v4   ;;  %1454 = vst [vmem:[%s18140_s26 + $0xa28] sm:$0xff] %v1453_v5   ;;  %v1461_v7 = vld [vmem:[%s18135_s25 + $0x1368] sm:$0xff]   ;;  %v1465_v8 = vld [vmem:[%s18135_s25 + $0x1370] sm:$0xff]  }
  0xb6   : > { %1458 = vst [vmem:[%s18140_s26 + $0xa30] sm:$0xff] %v1457_v6   ;;  %v1469_v9 = vld [vmem:[%s18135_s25 + $0x1378] sm:$0xff]   ;;  %1462 = vst [vmem:[%s18140_s26 + $0xa38] sm:$0xff] %v1461_v7   ;;  %v1473_v10 = vld [vmem:[%s18135_s25 + $0x1380] sm:$0xff]  }
  0xb7   : > { %1466 = vst [vmem:[%s18140_s26 + $0xa40] sm:$0xff] %v1465_v8   ;;  %1470 = vst [vmem:[%s18140_s26 + $0xa48] sm:$0xff] %v1469_v9   ;;  %v1477_v11 = vld [vmem:[%s18135_s25 + $0x1388] sm:$0xff]   ;;  %v1481_v12 = vld [vmem:[%s18135_s25 + $0x1390] sm:$0xff]  }
  0xb8   : > { %1474 = vst [vmem:[%s18140_s26 + $0xa50] sm:$0xff] %v1473_v10   ;;  %1478 = vst [vmem:[%s18140_s26 + $0xa58] sm:$0xff] %v1477_v11   ;;  %v1485_v13 = vld [vmem:[%s18135_s25 + $0x1398] sm:$0xff]   ;;  %v1489_v14 = vld [vmem:[%s18135_s25 + $0x13a0] sm:$0xff]  }
  0xb9   : > { %1482 = vst [vmem:[%s18140_s26 + $0xa60] sm:$0xff] %v1481_v12   ;;  %v1493_v15 = vld [vmem:[%s18135_s25 + $0x13a8] sm:$0xff]   ;;  %1486 = vst [vmem:[%s18140_s26 + $0xa68] sm:$0xff] %v1485_v13   ;;  %v1497_v16 = vld [vmem:[%s18135_s25 + $0x13b0] sm:$0xff]  }
  0xba   : > { %1490 = vst [vmem:[%s18140_s26 + $0xa70] sm:$0xff] %v1489_v14   ;;  %1494 = vst [vmem:[%s18140_s26 + $0xa78] sm:$0xff] %v1493_v15   ;;  %v1501_v17 = vld [vmem:[%s18135_s25 + $0x13b8] sm:$0xff]   ;;  %v1505_v18 = vld [vmem:[%s18135_s25 + $0x13c0] sm:$0xff]  }
  0xbb   : > { %1498 = vst [vmem:[%s18140_s26 + $0xa80] sm:$0xff] %v1497_v16   ;;  %1502 = vst [vmem:[%s18140_s26 + $0xa88] sm:$0xff] %v1501_v17   ;;  %v1509_v19 = vld [vmem:[%s18135_s25 + $0x13c8] sm:$0xff]   ;;  %v1513_v20 = vld [vmem:[%s18135_s25 + $0x13d0] sm:$0xff]  }
  0xbc   : > { %1506 = vst [vmem:[%s18140_s26 + $0xa90] sm:$0xff] %v1505_v18   ;;  %v1517_v21 = vld [vmem:[%s18135_s25 + $0x13d8] sm:$0xff]   ;;  %1510 = vst [vmem:[%s18140_s26 + $0xa98] sm:$0xff] %v1509_v19   ;;  %v1521_v22 = vld [vmem:[%s18135_s25 + $0x13e0] sm:$0xff]  }
  0xbd   : > { %1514 = vst [vmem:[%s18140_s26 + $0xaa0] sm:$0xff] %v1513_v20   ;;  %1518 = vst [vmem:[%s18140_s26 + $0xaa8] sm:$0xff] %v1517_v21   ;;  %v1525_v23 = vld [vmem:[%s18135_s25 + $0x13e8] sm:$0xff]   ;;  %v1529_v24 = vld [vmem:[%s18135_s25 + $0x13f0] sm:$0xff]  }
  0xbe   : > { %1522 = vst [vmem:[%s18140_s26 + $0xab0] sm:$0xff] %v1521_v22   ;;  %1526 = vst [vmem:[%s18140_s26 + $0xab8] sm:$0xff] %v1525_v23   ;;  %v1533_v25 = vld [vmem:[%s18135_s25 + $0x13f8] sm:$0xff]   ;;  %v1537_v26 = vld [vmem:[%s18135_s25 + $0x1400] sm:$0xff]  }
  0xbf   : > { %1530 = vst [vmem:[%s18140_s26 + $0xac0] sm:$0xff] %v1529_v24   ;;  %v1541_v27 = vld [vmem:[%s18135_s25 + $0x1408] sm:$0xff]   ;;  %1534 = vst [vmem:[%s18140_s26 + $0xac8] sm:$0xff] %v1533_v25   ;;  %v1545_v28 = vld [vmem:[%s18135_s25 + $0x1410] sm:$0xff]  }
  0xc0   : > { %1538 = vst [vmem:[%s18140_s26 + $0xad0] sm:$0xff] %v1537_v26   ;;  %1542 = vst [vmem:[%s18140_s26 + $0xad8] sm:$0xff] %v1541_v27   ;;  %v1549_v29 = vld [vmem:[%s18135_s25 + $0x1418] sm:$0xff]   ;;  %v1553_v30 = vld [vmem:[%s18135_s25 + $0x1420] sm:$0xff]  }
  0xc1   : > { %1546 = vst [vmem:[%s18140_s26 + $0xae0] sm:$0xff] %v1545_v28   ;;  %1550 = vst [vmem:[%s18140_s26 + $0xae8] sm:$0xff] %v1549_v29   ;;  %v1557_v31 = vld [vmem:[%s18135_s25 + $0x1428] sm:$0xff]   ;;  %v1561_v32 = vld [vmem:[%s18135_s25 + $0x1430] sm:$0xff]  }
  0xc2   : > { %1554 = vst [vmem:[%s18140_s26 + $0xaf0] sm:$0xff] %v1553_v30   ;;  %v1565_v33 = vld [vmem:[%s18135_s25 + $0x1438] sm:$0xff]   ;;  %1558 = vst [vmem:[%s18140_s26 + $0xaf8] sm:$0xff] %v1557_v31   ;;  %v1569_v34 = vld [vmem:[%s18135_s25 + $0x1440] sm:$0xff]  }
  0xc3   : > { %1562 = vst [vmem:[%s18140_s26 + $0xb00] sm:$0xff] %v1561_v32   ;;  %1566 = vst [vmem:[%s18140_s26 + $0xb08] sm:$0xff] %v1565_v33   ;;  %v1573_v35 = vld [vmem:[%s18135_s25 + $0x1448] sm:$0xff]   ;;  %v1577_v36 = vld [vmem:[%s18135_s25 + $0x1450] sm:$0xff]  }
  0xc4   : > { %1570 = vst [vmem:[%s18140_s26 + $0xb10] sm:$0xff] %v1569_v34   ;;  %1574 = vst [vmem:[%s18140_s26 + $0xb18] sm:$0xff] %v1573_v35   ;;  %v1581_v37 = vld [vmem:[%s18135_s25 + $0x1458] sm:$0xff]   ;;  %v1585_v38 = vld [vmem:[%s18135_s25 + $0x1460] sm:$0xff]  }
  0xc5   : > { %1578 = vst [vmem:[%s18140_s26 + $0xb20] sm:$0xff] %v1577_v36   ;;  %v1589_v39 = vld [vmem:[%s18135_s25 + $0x1468] sm:$0xff]   ;;  %1582 = vst [vmem:[%s18140_s26 + $0xb28] sm:$0xff] %v1581_v37   ;;  %v1593_v40 = vld [vmem:[%s18135_s25 + $0x1470] sm:$0xff]  }
  0xc6   : > { %1586 = vst [vmem:[%s18140_s26 + $0xb30] sm:$0xff] %v1585_v38   ;;  %1590 = vst [vmem:[%s18140_s26 + $0xb38] sm:$0xff] %v1589_v39   ;;  %v1597_v41 = vld [vmem:[%s18135_s25 + $0x1478] sm:$0xff]   ;;  %v1601_v42 = vld [vmem:[%s18135_s25 + $0x1480] sm:$0xff]  }
  0xc7   : > { %1594 = vst [vmem:[%s18140_s26 + $0xb40] sm:$0xff] %v1593_v40   ;;  %1598 = vst [vmem:[%s18140_s26 + $0xb48] sm:$0xff] %v1597_v41   ;;  %v1605_v43 = vld [vmem:[%s18135_s25 + $0x1488] sm:$0xff]   ;;  %v1609_v44 = vld [vmem:[%s18135_s25 + $0x1490] sm:$0xff]  }
  0xc8   : > { %1602 = vst [vmem:[%s18140_s26 + $0xb50] sm:$0xff] %v1601_v42   ;;  %v1613_v45 = vld [vmem:[%s18135_s25 + $0x1498] sm:$0xff]   ;;  %1606 = vst [vmem:[%s18140_s26 + $0xb58] sm:$0xff] %v1605_v43   ;;  %v1617_v46 = vld [vmem:[%s18135_s25 + $0x14a0] sm:$0xff]  }
  0xc9   : > { %1610 = vst [vmem:[%s18140_s26 + $0xb60] sm:$0xff] %v1609_v44   ;;  %1614 = vst [vmem:[%s18140_s26 + $0xb68] sm:$0xff] %v1613_v45   ;;  %v1621_v47 = vld [vmem:[%s18135_s25 + $0x14a8] sm:$0xff]   ;;  %v1625_v48 = vld [vmem:[%s18135_s25 + $0x14b0] sm:$0xff]  }
  0xca   : > { %1618 = vst [vmem:[%s18140_s26 + $0xb70] sm:$0xff] %v1617_v46   ;;  %1622 = vst [vmem:[%s18140_s26 + $0xb78] sm:$0xff] %v1621_v47   ;;  %v1629_v49 = vld [vmem:[%s18135_s25 + $0x14b8] sm:$0xff]   ;;  %v1633_v50 = vld [vmem:[%s18135_s25 + $0x14c0] sm:$0xff]  }
  0xcb   : > { %1626 = vst [vmem:[%s18140_s26 + $0xb80] sm:$0xff] %v1625_v48   ;;  %v1637_v51 = vld [vmem:[%s18135_s25 + $0x14c8] sm:$0xff]   ;;  %1630 = vst [vmem:[%s18140_s26 + $0xb88] sm:$0xff] %v1629_v49   ;;  %v1641_v52 = vld [vmem:[%s18135_s25 + $0x14d0] sm:$0xff]  }
  0xcc   : > { %1634 = vst [vmem:[%s18140_s26 + $0xb90] sm:$0xff] %v1633_v50   ;;  %1638 = vst [vmem:[%s18140_s26 + $0xb98] sm:$0xff] %v1637_v51   ;;  %v1645_v53 = vld [vmem:[%s18135_s25 + $0x14d8] sm:$0xff]   ;;  %v1649_v54 = vld [vmem:[%s18135_s25 + $0x14e0] sm:$0xff]  }
  0xcd   : > { %1642 = vst [vmem:[%s18140_s26 + $0xba0] sm:$0xff] %v1641_v52   ;;  %1646 = vst [vmem:[%s18140_s26 + $0xba8] sm:$0xff] %v1645_v53   ;;  %v1653_v55 = vld [vmem:[%s18135_s25 + $0x14e8] sm:$0xff]   ;;  %v1657_v56 = vld [vmem:[%s18135_s25 + $0x14f0] sm:$0xff]  }
  0xce   : > { %1650 = vst [vmem:[%s18140_s26 + $0xbb0] sm:$0xff] %v1649_v54   ;;  %v1661_v57 = vld [vmem:[%s18135_s25 + $0x14f8] sm:$0xff]   ;;  %1654 = vst [vmem:[%s18140_s26 + $0xbb8] sm:$0xff] %v1653_v55   ;;  %v1665_v58 = vld [vmem:[%s18135_s25 + $0x1500] sm:$0xff]  }
  0xcf   : > { %1658 = vst [vmem:[%s18140_s26 + $0xbc0] sm:$0xff] %v1657_v56   ;;  %1662 = vst [vmem:[%s18140_s26 + $0xbc8] sm:$0xff] %v1661_v57   ;;  %v1669_v59 = vld [vmem:[%s18135_s25 + $0x1508] sm:$0xff]   ;;  %v1673_v60 = vld [vmem:[%s18135_s25 + $0x1510] sm:$0xff]  }
  0xd0   : > { %1666 = vst [vmem:[%s18140_s26 + $0xbd0] sm:$0xff] %v1665_v58   ;;  %1670 = vst [vmem:[%s18140_s26 + $0xbd8] sm:$0xff] %v1669_v59   ;;  %v1677_v61 = vld [vmem:[%s18135_s25 + $0x1518] sm:$0xff]   ;;  %v1681_v62 = vld [vmem:[%s18135_s25 + $0x1520] sm:$0xff]  }
  0xd1   : > { %1674 = vst [vmem:[%s18140_s26 + $0xbe0] sm:$0xff] %v1673_v60   ;;  %v1685_v63 = vld [vmem:[%s18135_s25 + $0x1528] sm:$0xff]   ;;  %1678 = vst [vmem:[%s18140_s26 + $0xbe8] sm:$0xff] %v1677_v61   ;;  %v1689_v0 = vld [vmem:[%s18135_s25 + $0x1530] sm:$0xff]  }
  0xd2   : > { %1682 = vst [vmem:[%s18140_s26 + $0xbf0] sm:$0xff] %v1681_v62   ;;  %1686 = vst [vmem:[%s18140_s26 + $0xbf8] sm:$0xff] %v1685_v63   ;;  %v1693_v1 = vld [vmem:[%s18135_s25 + $0x1538] sm:$0xff]   ;;  %v1697_v2 = vld [vmem:[%s18135_s25 + $0x1540] sm:$0xff]  }
  0xd3   : > { %1690 = vst [vmem:[%s18140_s26 + $0xc00] sm:$0xff] %v1689_v0   ;;  %1694 = vst [vmem:[%s18140_s26 + $0xc08] sm:$0xff] %v1693_v1   ;;  %v1701_v3 = vld [vmem:[%s18135_s25 + $0x1548] sm:$0xff]   ;;  %v1705_v4 = vld [vmem:[%s18135_s25 + $0x1550] sm:$0xff]  }
  0xd4   : > { %1698 = vst [vmem:[%s18140_s26 + $0xc10] sm:$0xff] %v1697_v2   ;;  %v1709_v5 = vld [vmem:[%s18135_s25 + $0x1558] sm:$0xff]   ;;  %1702 = vst [vmem:[%s18140_s26 + $0xc18] sm:$0xff] %v1701_v3   ;;  %v1713_v6 = vld [vmem:[%s18135_s25 + $0x1560] sm:$0xff]  }
  0xd5   : > { %1706 = vst [vmem:[%s18140_s26 + $0xc20] sm:$0xff] %v1705_v4   ;;  %1710 = vst [vmem:[%s18140_s26 + $0xc28] sm:$0xff] %v1709_v5   ;;  %v1717_v7 = vld [vmem:[%s18135_s25 + $0x1568] sm:$0xff]  }
  0xd6   : > { %1714 = vst [vmem:[%s18140_s26 + $0xc30] sm:$0xff] %v1713_v6   ;;  %1718 = vst [vmem:[%s18140_s26 + $0xc38] sm:$0xff] %v1717_v7  }
  0xd7 PF: > { %p15011_p5 = scmp.ge.s32.totalorder %s18078_s14, 1  ;;  %p6476_p6 = scmp.lt.s32.totalorder %s18078_s14, 3 }
  0xd9   : > { %p6477_p7 = pnand %p15011_p5, %p6476_p6 }
  0xdb   : > { %6480 = sbr.rel (%p6477_p7) target bundleno = 1247 (0x4df), region = 80 }
  0xe2   : > { %v17657_v8 = vld [vmem:[%s22112_s1] sm:$0xff]   ;;  %v17658_v9 = vld [vmem:[%s22112_s1 + $0x8] sm:$0xff]   ;;  %vm7534_vm0 = vcmask 1044480   ;;  %v17659_v10 = vld [vmem:[%s22112_s1 + $0x10] sm:$0xff]   ;;  %s6483_s6 = sand.u32 1, %s18070_s12   ;;  %vm7535_vm1 = vcmask 1045504  }
  0xe3   : > { %16806 = vmatprep.subr.bf16.mxu0 %v17657_v8  ;;  %17012 = vmatprep.subr.bf16.mxu1 %v17657_v8  ;;  %v18080_v11 = vmov 65535   ;;  %s17631_s7 = smul.u32 3136, %s6483_s6  ;;  %v17660_v13 = vld [vmem:[%s22112_s1 + $0x18] sm:$0xff]   ;;  %v17661_v14 = vld [vmem:[%s22112_s1 + $0x20] sm:$0x3f]   ;;  %vm7239_vm2 = vcmask 613376  }
  0xe4   : > { %16807 = vmatpush3.bf16.msra.mxu0 %v17657_v8  ;;  %17013 = vmatpush3.bf16.msra.mxu1 %v17657_v8  ;;  %v7536_v12 = vsel %vm7534_vm0, 4294967295, %v18080_v11  ;;  %s6507_s12 = smul.u32 196, %s15006_s15  ;;  %vm14739_vm3 = vcmask 64512  }
  0xe5   : > { %16808 = vmatprep.subr.bf16.mxu0 %v17658_v9  ;;  %17014 = vmatprep.subr.bf16.mxu1 %v17658_v9  ;;  %v7537_v15 = vsel %vm7535_vm1, %v7536_v12, 0  ;;  %s18941_s17 = scalar_lea.vmem [#allocation2], %s17631_s7 }
  0xe6   : > { %v17662_v16 = vld [vmem:[%s18941_s17] sm:$0xff]   ;;  %v17663_v17 = vld [vmem:[%s18941_s17 + $0x310] sm:$0xff]   ;;  %v7539_v18 = vand.u32 %v17661_v14, %v7537_v15  ;;  %v17664_v19 = vld [vmem:[%s18941_s17 + $0x8] sm:$0xff]   ;;  %p6508_p8 = scmp.lt.s32.totalorder %s6507_s12, 391 }
  0xe7   : > { %16816 = vmatprep.mubr.msk.bf16.mxu0 %vm7239_vm2, %v17662_v16  ;;  %17022 = vmatprep.mubr.msk.bf16.mxu1 %vm7239_vm2, %v17663_v17  ;;  %v17665_v20 = vld [vmem:[%s18941_s17 + $0x318] sm:$0xff]   ;;  %v17666_v21 = vld [vmem:[%s18941_s17 + $0x10] sm:$0xff]   ;;  %v17667_v22 = vld [vmem:[%s18941_s17 + $0x320] sm:$0xff]  }
  0xe8   : > { %16809 = vmatpush3.bf16.msra.mxu0 %v17658_v9  ;;  %17015 = vmatpush3.bf16.msra.mxu1 %v17658_v9  ;;  %v17668_v23 = vld [vmem:[%s18941_s17 + $0x18] sm:$0xff]   ;;  %v17669_v24 = vld [vmem:[%s18941_s17 + $0x328] sm:$0xff]   ;;  %v17670_v25 = vld [vmem:[%s18941_s17 + $0x20] sm:$0xff]   ;;  %s23356_s12 = smov (!%p6508_p8, %s6507_s12), 391 }
  0xe9   : > { %16810 = vmatprep.subr.bf16.mxu0 %v17659_v10  ;;  %17016 = vmatprep.subr.bf16.mxu1 %v17659_v10  ;;  %v17671_v26 = vld [vmem:[%s18941_s17 + $0x330] sm:$0xff]   ;;  %v17672_v27 = vld [vmem:[%s18941_s17 + $0x28] sm:$0xff]   ;;  %v17673_v28 = vld [vmem:[%s18941_s17 + $0x338] sm:$0xff]   ;;  %s15012_s18 = sshll.u32 %s23356_s12, 3 }
  0xea   : > { %v17674_v29 = vld [vmem:[%s18941_s17 + $0x30] sm:$0xff]   ;;  %v17675_v30 = vld [vmem:[%s18941_s17 + $0x340] sm:$0xff]   ;;  %v17676_v31 = vld [vmem:[%s18941_s17 + $0x38] sm:$0xff]   ;;  %s20760_s22 = scalar_lea.vmem %s22114_s3, %s15012_s18 }
  0xeb   : > { %v17677_v32 = vld [vmem:[%s18941_s17 + $0x348] sm:$0xff]   ;;  %v17678_v33 = vld [vmem:[%s18941_s17 + $0x40] sm:$0xff]   ;;  %v17679_v34 = vld [vmem:[%s18941_s17 + $0x350] sm:$0xff]  }
  0xec   : > { %16811 = vmatpush3.bf16.msra.mxu0 %v17659_v10  ;;  %17017 = vmatpush3.bf16.msra.mxu1 %v17659_v10  ;;  %v17680_v35 = vld [vmem:[%s18941_s17 + $0x48] sm:$0xff]   ;;  %v17681_v36 = vld [vmem:[%s18941_s17 + $0x358] sm:$0xff]   ;;  %v17682_v37 = vld [vmem:[%s18941_s17 + $0x50] sm:$0xff]  }
  0xed   : > { %16812 = vmatprep.subr.bf16.mxu0 %v17660_v13  ;;  %17018 = vmatprep.subr.bf16.mxu1 %v17660_v13  ;;  %v17683_v38 = vld [vmem:[%s18941_s17 + $0x360] sm:$0xff]   ;;  %v17684_v39 = vld [vmem:[%s18941_s17 + $0x58] sm:$0xff]   ;;  %v17685_v40 = vld [vmem:[%s18941_s17 + $0x368] sm:$0xff]  }
  0xee   : > { %v17686_v41 = vld [vmem:[%s18941_s17 + $0x60] sm:$0xff]   ;;  %v17687_v42 = vld [vmem:[%s18941_s17 + $0x370] sm:$0xff]   ;;  %v17688_v43 = vld [vmem:[%s18941_s17 + $0x68] sm:$0xff]  }
  0xef   : > { %v17689_v44 = vld [vmem:[%s18941_s17 + $0x378] sm:$0xff]   ;;  %v17690_v45 = vld [vmem:[%s18941_s17 + $0x70] sm:$0xff]   ;;  %v17691_v46 = vld [vmem:[%s18941_s17 + $0x380] sm:$0xff]  }
  0xf0   : > { %16813 = vmatpush3.bf16.msra.mxu0 %v17660_v13  ;;  %17019 = vmatpush3.bf16.msra.mxu1 %v17660_v13  ;;  %v17692_v47 = vld [vmem:[%s18941_s17 + $0x78] sm:$0xff]   ;;  %v17693_v48 = vld [vmem:[%s18941_s17 + $0x388] sm:$0xff]   ;;  %v17694_v49 = vld [vmem:[%s18941_s17 + $0x80] sm:$0xff]  }
  0xf1   : > { %16814 = vmatprep.subr.bf16.mxu0 %v7539_v18  ;;  %17020 = vmatprep.subr.bf16.mxu1 %v7539_v18  ;;  %v17695_v50 = vld [vmem:[%s18941_s17 + $0x390] sm:$0xff]   ;;  %v17696_v51 = vld [vmem:[%s18941_s17 + $0x88] sm:$0xff]   ;;  %v17697_v52 = vld [vmem:[%s18941_s17 + $0x398] sm:$0xff]  }
  0xf2   : > { %v17698_v53 = vld [vmem:[%s18941_s17 + $0x90] sm:$0xff]   ;;  %v17699_v54 = vld [vmem:[%s18941_s17 + $0x3a0] sm:$0xff]   ;;  %v17700_v55 = vld [vmem:[%s18941_s17 + $0x98] sm:$0xff]  }
  0xf3   : > { %v17701_v56 = vld [vmem:[%s18941_s17 + $0x3a8] sm:$0xff]   ;;  %v17702_v57 = vld [vmem:[%s18941_s17 + $0xa0] sm:$0xff]   ;;  %v17703_v58 = vld [vmem:[%s18941_s17 + $0x3b0] sm:$0xff]  }
  0xf4   : > { %16815 = vmatpush3.bf16.msra.mxu0 %v7539_v18  ;;  %17021 = vmatpush3.bf16.msra.mxu1 %v7539_v18  ;;  %v17704_v59 = vld [vmem:[%s18941_s17 + $0xa8] sm:$0xff]   ;;  %v17705_v60 = vld [vmem:[%s18941_s17 + $0x3b8] sm:$0xff]   ;;  %v17706_v61 = vld [vmem:[%s18941_s17 + $0xb0] sm:$0xff]  }
  0xf5   : > { %17218 = vmatprep.subr.bf16.mxu0 %v17657_v8  ;;  %17424 = vmatprep.subr.bf16.mxu1 %v17657_v8  ;;  %v17707_v62 = vld [vmem:[%s18941_s17 + $0x3c0] sm:$0xff]   ;;  %v17708_v63 = vld [vmem:[%s18941_s17 + $0xb8] sm:$0xff]   ;;  %v17709_v0 = vld [vmem:[%s18941_s17 + $0x3c8] sm:$0xff]  }
  0xf6   : > { %v17710_v1 = vld [vmem:[%s18941_s17 + $0xc0] sm:$0xff]   ;;  %v17711_v2 = vld [vmem:[%s18941_s17 + $0x3d0] sm:$0xff]   ;;  %v17712_v3 = vld [vmem:[%s18941_s17 + $0xc8] sm:$0xff]  }
  0xf7   : > { %16817 = vmatmul.mubr.msk.bf16.vlgmr.msra.gmra.mrb[0].mxu0 %vm7239_vm2, %v17664_v19  ;;  %17023 = vmatmul.mubr.msk.bf16.vlgmr.msra.gmra.mrb[0].mxu1 %vm7239_vm2, %v17665_v20  ;;  %v17713_v4 = vld [vmem:[%s18941_s17 + $0x3d8] sm:$0xff]   ;;  %v17714_v5 = vld [vmem:[%s18941_s17 + $0xd0] sm:$0xff]   ;;  %v17715_v6 = vld [vmem:[%s18941_s17 + $0x3e0] sm:$0xff]  }
  0xf8   : > { %17219 = vmatpush3.bf16.msra.mxu0 %v17657_v8  ;;  %17425 = vmatpush3.bf16.msra.mxu1 %v17657_v8  ;;  %v17716_v7 = vld [vmem:[%s18941_s17 + $0xd8] sm:$0xff]   ;;  %v17717_v8 = vld [vmem:[%s18941_s17 + $0x3e8] sm:$0xff]   ;;  %v17723_v14 = vld [vmem:[%s18941_s17 + $0x400] sm:$0xff]  }
  0xf9   : > { %16820 = vmatprep.mubr.msk.bf16.mxu0 %vm7239_vm2, %v17666_v21  ;;  %17026 = vmatprep.mubr.msk.bf16.mxu1 %vm7239_vm2, %v17667_v22  ;;  %v17720_v11 = vld [vmem:[%s18941_s17 + $0xe8] sm:$0xff]   ;;  %v17721_v12 = vld [vmem:[%s18941_s17 + $0x3f8] sm:$0xff]   ;;  %v17726_v17 = vld [vmem:[%s18941_s17 + $0x100] sm:$0xff]  }
  0xfa   : > { %17220 = vmatprep.subr.bf16.mxu0 %v17658_v9  ;;  %17426 = vmatprep.subr.bf16.mxu1 %v17658_v9  ;;  %v17724_v15 = vld [vmem:[%s18941_s17 + $0xf8] sm:$0xff]   ;;  %v17725_v16 = vld [vmem:[%s18941_s17 + $0x408] sm:$0xff]   ;;  %v17730_v21 = vld [vmem:[%s18941_s17 + $0x110] sm:$0xff]  }
  0xfb   : > { %v17728_v19 = vld [vmem:[%s18941_s17 + $0x108] sm:$0xff]   ;;  %v17729_v20 = vld [vmem:[%s18941_s17 + $0x418] sm:$0xff]   ;;  %v17731_v22 = vld [vmem:[%s18941_s17 + $0x420] sm:$0xff]  }
  0xfc   : > { %17221 = vmatpush3.bf16.msra.mxu0 %v17658_v9  ;;  %17427 = vmatpush3.bf16.msra.mxu1 %v17658_v9  ;;  %v17718_v9 = vld [vmem:[%s18941_s17 + $0xe0] sm:$0xff]  }
  0xfd   : > { %17222 = vmatprep.subr.bf16.mxu0 %v17659_v10  ;;  %17428 = vmatprep.subr.bf16.mxu1 %v17659_v10 }
  0xff   : > { %16821 = vmatmul.mubr.msk.bf16.gmra.mrb[4].mxu0 %vm7239_vm2, %v17668_v23  ;;  %17027 = vmatmul.mubr.msk.bf16.gmra.mrb[4].mxu1 %vm7239_vm2, %v17669_v24  ;;  %v17732_v23 = vld [vmem:[%s18941_s17 + $0x118] sm:$0xff]   ;;  %v17733_v24 = vld [vmem:[%s18941_s17 + $0x428] sm:$0xff]  }
 0x100   : > { %16824 = vmatprep.mubr.msk.bf16.mxu0 %vm7239_vm2, %v17670_v25  ;;  %17030 = vmatprep.mubr.msk.bf16.mxu1 %vm7239_vm2, %v17671_v26  ;;  %v17734_v25 = vld [vmem:[%s18941_s17 + $0x120] sm:$0xff]   ;;  %v17735_v26 = vld [vmem:[%s18941_s17 + $0x430] sm:$0xff]  }
 0x101   : > { %17223 = vmatpush3.bf16.msra.mxu0 %v17659_v10  ;;  %17429 = vmatpush3.bf16.msra.mxu1 %v17659_v10  ;;  %v17719_v10 = vld [vmem:[%s18941_s17 + $0x3f0] sm:$0xff]  }
 0x102   : > { %17224 = vmatprep.subr.bf16.mxu0 %v17660_v13  ;;  %17430 = vmatprep.subr.bf16.mxu1 %v17660_v13 }
 0x105   : > { %17225 = vmatpush3.bf16.msra.mxu0 %v17660_v13  ;;  %17431 = vmatpush3.bf16.msra.mxu1 %v17660_v13  ;;  %v17722_v13 = vld [vmem:[%s18941_s17 + $0xf0] sm:$0xff]  }
 0x106   : > { %17226 = vmatprep.subr.bf16.mxu0 %v7539_v18  ;;  %17432 = vmatprep.subr.bf16.mxu1 %v7539_v18 }
 0x107   : > { %16825 = vmatmul.mubr.msk.bf16.gmra.mrb[8].mxu0 %vm7239_vm2, %v17672_v27  ;;  %17031 = vmatmul.mubr.msk.bf16.gmra.mrb[8].mxu1 %vm7239_vm2, %v17673_v28  ;;  %v17736_v27 = vld [vmem:[%s18941_s17 + $0x128] sm:$0xff]   ;;  %v17737_v28 = vld [vmem:[%s18941_s17 + $0x438] sm:$0xff]  }
 0x108   : > { %16828 = vmatprep.mubr.msk.bf16.mxu0 %vm7239_vm2, %v17674_v29  ;;  %17034 = vmatprep.mubr.msk.bf16.mxu1 %vm7239_vm2, %v17675_v30  ;;  %v17738_v29 = vld [vmem:[%s18941_s17 + $0x130] sm:$0xff]   ;;  %v17739_v30 = vld [vmem:[%s18941_s17 + $0x440] sm:$0xff]  }
 0x109   : > { %17227 = vmatpush3.bf16.msra.mxu0 %v7539_v18  ;;  %17433 = vmatpush3.bf16.msra.mxu1 %v7539_v18  ;;  %v17727_v18 = vld [vmem:[%s18941_s17 + $0x410] sm:$0xff]  }
 0x10f   : > { %16829 = vmatmul.mubr.msk.bf16.gmra.mrb[12].mxu0 %vm7239_vm2, %v17676_v31  ;;  %17035 = vmatmul.mubr.msk.bf16.gmra.mrb[12].mxu1 %vm7239_vm2, %v17677_v32  ;;  %v17740_v31 = vld [vmem:[%s18941_s17 + $0x138] sm:$0xff]   ;;  %v17741_v32 = vld [vmem:[%s18941_s17 + $0x448] sm:$0xff]  }
 0x110   : > { %16832 = vmatprep.mubr.msk.bf16.mxu0 %vm7239_vm2, %v17678_v33  ;;  %17038 = vmatprep.mubr.msk.bf16.mxu1 %vm7239_vm2, %v17679_v34  ;;  %v17742_v33 = vld [vmem:[%s18941_s17 + $0x140] sm:$0xff]   ;;  %v17743_v34 = vld [vmem:[%s18941_s17 + $0x450] sm:$0xff]  }
 0x117   : > { %16833 = vmatmul.mubr.msk.bf16.gmra.mrb[16].mxu0 %vm7239_vm2, %v17680_v35  ;;  %17039 = vmatmul.mubr.msk.bf16.gmra.mrb[16].mxu1 %vm7239_vm2, %v17681_v36  ;;  %v17744_v35 = vld [vmem:[%s18941_s17 + $0x148] sm:$0xff]   ;;  %v17745_v36 = vld [vmem:[%s18941_s17 + $0x458] sm:$0xff]  }
 0x118   : > { %16836 = vmatprep.mubr.msk.bf16.mxu0 %vm7239_vm2, %v17682_v37  ;;  %17042 = vmatprep.mubr.msk.bf16.mxu1 %vm7239_vm2, %v17683_v38  ;;  %v17746_v37 = vld [vmem:[%s18941_s17 + $0x150] sm:$0xff]   ;;  %v17747_v38 = vld [vmem:[%s18941_s17 + $0x460] sm:$0xff]  }
 0x11f   : > { %16837 = vmatmul.mubr.msk.bf16.gmra.mrb[20].mxu0 %vm7239_vm2, %v17684_v39  ;;  %17043 = vmatmul.mubr.msk.bf16.gmra.mrb[20].mxu1 %vm7239_vm2, %v17685_v40  ;;  %v17748_v39 = vld [vmem:[%s18941_s17 + $0x158] sm:$0xff]   ;;  %v17749_v40 = vld [vmem:[%s18941_s17 + $0x468] sm:$0xff]  }
 0x120   : > { %16840 = vmatprep.mubr.msk.bf16.mxu0 %vm7239_vm2, %v17686_v41  ;;  %17046 = vmatprep.mubr.msk.bf16.mxu1 %vm7239_vm2, %v17687_v42  ;;  %v17750_v41 = vld [vmem:[%s18941_s17 + $0x160] sm:$0xff]   ;;  %v17751_v42 = vld [vmem:[%s18941_s17 + $0x470] sm:$0xff]  }
 0x127   : > { %16841 = vmatmul.mubr.msk.bf16.gmra.mrb[24].mxu0 %vm7239_vm2, %v17688_v43  ;;  %17047 = vmatmul.mubr.msk.bf16.gmra.mrb[24].mxu1 %vm7239_vm2, %v17689_v44  ;;  %v17752_v43 = vld [vmem:[%s18941_s17 + $0x168] sm:$0xff]   ;;  %v17753_v44 = vld [vmem:[%s18941_s17 + $0x478] sm:$0xff]  }
 0x128   : > { %16844 = vmatprep.mubr.msk.bf16.mxu0 %vm7239_vm2, %v17690_v45  ;;  %17050 = vmatprep.mubr.msk.bf16.mxu1 %vm7239_vm2, %v17691_v46  ;;  %v17754_v45 = vld [vmem:[%s18941_s17 + $0x170] sm:$0xff]   ;;  %v17755_v46 = vld [vmem:[%s18941_s17 + $0x480] sm:$0xff]  }
 0x12f   : > { %16845 = vmatmul.mubr.msk.bf16.gmra.mrb[28].mxu0 %vm7239_vm2, %v17692_v47  ;;  %17051 = vmatmul.mubr.msk.bf16.gmra.mrb[28].mxu1 %vm7239_vm2, %v17693_v48  ;;  %v17756_v47 = vld [vmem:[%s18941_s17 + $0x178] sm:$0xff]   ;;  %v17757_v48 = vld [vmem:[%s18941_s17 + $0x488] sm:$0xff]  }
 0x130   : > { %16848 = vmatprep.mubr.msk.bf16.mxu0 %vm7239_vm2, %v17694_v49  ;;  %17054 = vmatprep.mubr.msk.bf16.mxu1 %vm7239_vm2, %v17695_v50  ;;  %v17758_v49 = vld [vmem:[%s18941_s17 + $0x180] sm:$0xff]   ;;  %v17759_v50 = vld [vmem:[%s18941_s17 + $0x490] sm:$0xff]  }
 0x137   : > { %16849 = vmatmul.mubr.msk.bf16.gmra.mrb[32].mxu0 %vm7239_vm2, %v17696_v51  ;;  %17055 = vmatmul.mubr.msk.bf16.gmra.mrb[32].mxu1 %vm7239_vm2, %v17697_v52  ;;  %v17760_v51 = vld [vmem:[%s18941_s17 + $0x188] sm:$0xff]   ;;  %v17761_v52 = vld [vmem:[%s18941_s17 + $0x498] sm:$0xff]  }
 0x138   : > { %16852 = vmatprep.mubr.msk.bf16.mxu0 %vm7239_vm2, %v17698_v53  ;;  %17058 = vmatprep.mubr.msk.bf16.mxu1 %vm7239_vm2, %v17699_v54  ;;  %v17762_v53 = vld [vmem:[%s18941_s17 + $0x190] sm:$0xff]   ;;  %v17763_v54 = vld [vmem:[%s18941_s17 + $0x4a0] sm:$0xff]  }
 0x13f   : > { %16853 = vmatmul.mubr.msk.bf16.gmra.mrb[36].mxu0 %vm7239_vm2, %v17700_v55  ;;  %17059 = vmatmul.mubr.msk.bf16.gmra.mrb[36].mxu1 %vm7239_vm2, %v17701_v56  ;;  %v17764_v55 = vld [vmem:[%s18941_s17 + $0x198] sm:$0xff]   ;;  %v17765_v56 = vld [vmem:[%s18941_s17 + $0x4a8] sm:$0xff]  }
 0x140   : > { %16856 = vmatprep.mubr.msk.bf16.mxu0 %vm7239_vm2, %v17702_v57  ;;  %17062 = vmatprep.mubr.msk.bf16.mxu1 %vm7239_vm2, %v17703_v58  ;;  %v17766_v57 = vld [vmem:[%s18941_s17 + $0x1a0] sm:$0xff]   ;;  %v17767_v58 = vld [vmem:[%s18941_s17 + $0x4b0] sm:$0xff]  }
 0x147   : > { %16857 = vmatmul.mubr.msk.bf16.gmra.mrb[40].mxu0 %vm7239_vm2, %v17704_v59  ;;  %17063 = vmatmul.mubr.msk.bf16.gmra.mrb[40].mxu1 %vm7239_vm2, %v17705_v60  ;;  %v17768_v59 = vld [vmem:[%s18941_s17 + $0x1a8] sm:$0xff]   ;;  %v17769_v60 = vld [vmem:[%s18941_s17 + $0x4b8] sm:$0xff]  }
 0x148   : > { %16860 = vmatprep.mubr.msk.bf16.mxu0 %vm7239_vm2, %v17706_v61  ;;  %17066 = vmatprep.mubr.msk.bf16.mxu1 %vm7239_vm2, %v17707_v62  ;;  %v17770_v61 = vld [vmem:[%s18941_s17 + $0x1b0] sm:$0xff]   ;;  %v17771_v62 = vld [vmem:[%s18941_s17 + $0x4c0] sm:$0xff]  }
 0x14f   : > { %16861 = vmatmul.mubr.msk.bf16.gmra.mrb[44].mxu0 %vm7239_vm2, %v17708_v63  ;;  %17067 = vmatmul.mubr.msk.bf16.gmra.mrb[44].mxu1 %vm7239_vm2, %v17709_v0  ;;  %v17772_v63 = vld [vmem:[%s18941_s17 + $0x1b8] sm:$0xff]   ;;  %v17773_v0 = vld [vmem:[%s18941_s17 + $0x4c8] sm:$0xff]  }
 0x150   : > { %16864 = vmatprep.mubr.msk.bf16.mxu0 %vm7239_vm2, %v17710_v1  ;;  %17070 = vmatprep.mubr.msk.bf16.mxu1 %vm7239_vm2, %v17711_v2 }
 0x157   : > { %16865 = vmatmul.mubr.msk.bf16.gmra.mrb[48].mxu0 %vm7239_vm2, %v17712_v3  ;;  %17071 = vmatmul.mubr.msk.bf16.gmra.mrb[48].mxu1 %vm7239_vm2, %v17713_v4 }
 0x158   : > { %16868 = vmatprep.mubr.msk.bf16.mxu0 %vm7239_vm2, %v17714_v5  ;;  %17074 = vmatprep.mubr.msk.bf16.mxu1 %vm7239_vm2, %v17715_v6  ;;  %v17801_v5 = vld [vmem:[%s18941_s17 + $0x538] sm:$0xff]  }
 0x15f   : > { %16869 = vmatmul.mubr.msk.bf16.gmra.mrb[52].mxu0 %vm7239_vm2, %v17716_v7  ;;  %17075 = vmatmul.mubr.msk.bf16.gmra.mrb[52].mxu1 %vm7239_vm2, %v17717_v8  ;;  %v17774_v8 = vld [vmem:[%s18941_s17 + $0x1c0] sm:$0xff]  }
 0x160   : > { %16872 = vmatprep.mubr.msk.bf16.mxu0 %vm7239_vm2, %v17718_v9  ;;  %17078 = vmatprep.mubr.msk.bf16.mxu1 %vm7239_vm2, %v17719_v10  ;;  %v17775_v9 = vld [vmem:[%s18941_s17 + $0x4d0] sm:$0xff]  }
 0x167   : > { %16873 = vmatmul.mubr.msk.bf16.gmra.mrb[56].mxu0 %vm7239_vm2, %v17720_v11  ;;  %17079 = vmatmul.mubr.msk.bf16.gmra.mrb[56].mxu1 %vm7239_vm2, %v17721_v12 }
 0x168   : > { %16876 = vmatprep.mubr.msk.bf16.mxu0 %vm7239_vm2, %v17722_v13  ;;  %17082 = vmatprep.mubr.msk.bf16.mxu1 %vm7239_vm2, %v17723_v14 }
 0x16f   : > { %16877 = vmatmul.mubr.msk.bf16.gmra.mrb[60].mxu0 %vm7239_vm2, %v17724_v15  ;;  %17083 = vmatmul.mubr.msk.bf16.gmra.mrb[60].mxu1 %vm7239_vm2, %v17725_v16  ;;  %v17776_v15 = vld [vmem:[%s18941_s17 + $0x1c8] sm:$0xff]   ;;  %v17777_v16 = vld [vmem:[%s18941_s17 + $0x4d8] sm:$0xff]  }
 0x170   : > { %16880 = vmatprep.mubr.msk.bf16.mxu0 %vm7239_vm2, %v17726_v17  ;;  %17086 = vmatprep.mubr.msk.bf16.mxu1 %vm7239_vm2, %v17727_v18 }
 0x177   : > { %16881 = vmatmul.mubr.msk.bf16.gmra.mrb[64].mxu0 %vm7239_vm2, %v17728_v19  ;;  %17087 = vmatmul.mubr.msk.bf16.gmra.mrb[64].mxu1 %vm7239_vm2, %v17729_v20 }
 0x178   : > { %16884 = vmatprep.mubr.msk.bf16.mxu0 %vm7239_vm2, %v17730_v21  ;;  %17090 = vmatprep.mubr.msk.bf16.mxu1 %vm7239_vm2, %v17731_v22  ;;  %v17800_v21 = vld [vmem:[%s18941_s17 + $0x228] sm:$0xff]  }
 0x17f   : > { %16885 = vmatmul.mubr.msk.bf16.gmra.mrb[68].mxu0 %vm7239_vm2, %v17732_v23  ;;  %17091 = vmatmul.mubr.msk.bf16.gmra.mrb[68].mxu1 %vm7239_vm2, %v17733_v24  ;;  %v17778_v24 = vld [vmem:[%s18941_s17 + $0x1d0] sm:$0xff]  }
 0x180   : > { %16888 = vmatprep.mubr.msk.bf16.mxu0 %vm7239_vm2, %v17734_v25  ;;  %17094 = vmatprep.mubr.msk.bf16.mxu1 %vm7239_vm2, %v17735_v26  ;;  %v17779_v25 = vld [vmem:[%s18941_s17 + $0x4e0] sm:$0xff]  }
 0x187   : > { %16889 = vmatmul.mubr.msk.bf16.gmra.mrb[72].mxu0 %vm7239_vm2, %v17736_v27  ;;  %17095 = vmatmul.mubr.msk.bf16.gmra.mrb[72].mxu1 %vm7239_vm2, %v17737_v28 }
 0x188   : > { %16892 = vmatprep.mubr.msk.bf16.mxu0 %vm7239_vm2, %v17738_v29  ;;  %17098 = vmatprep.mubr.msk.bf16.mxu1 %vm7239_vm2, %v17739_v30 }
 0x18f   : > { %16893 = vmatmul.mubr.msk.bf16.gmra.mrb[76].mxu0 %vm7239_vm2, %v17740_v31  ;;  %17099 = vmatmul.mubr.msk.bf16.gmra.mrb[76].mxu1 %vm7239_vm2, %v17741_v32  ;;  %v17780_v31 = vld [vmem:[%s18941_s17 + $0x1d8] sm:$0xff]   ;;  %v17781_v32 = vld [vmem:[%s18941_s17 + $0x4e8] sm:$0xff]  }
 0x190   : > { %16896 = vmatprep.mubr.msk.bf16.mxu0 %vm7239_vm2, %v17742_v33  ;;  %17102 = vmatprep.mubr.msk.bf16.mxu1 %vm7239_vm2, %v17743_v34 }
 0x197   : > { %16897 = vmatmul.mubr.msk.bf16.gmra.mrb[80].mxu0 %vm7239_vm2, %v17744_v35  ;;  %17103 = vmatmul.mubr.msk.bf16.gmra.mrb[80].mxu1 %vm7239_vm2, %v17745_v36 }
 0x198   : > { %16900 = vmatprep.mubr.msk.bf16.mxu0 %vm7239_vm2, %v17746_v37  ;;  %17106 = vmatprep.mubr.msk.bf16.mxu1 %vm7239_vm2, %v17747_v38  ;;  %v17797_v37 = vld [vmem:[%s18941_s17 + $0x528] sm:$0xff]  }
 0x19f   : > { %16901 = vmatmul.mubr.msk.bf16.gmra.mrb[84].mxu0 %vm7239_vm2, %v17748_v39  ;;  %17107 = vmatmul.mubr.msk.bf16.gmra.mrb[84].mxu1 %vm7239_vm2, %v17749_v40  ;;  %v17782_v40 = vld [vmem:[%s18941_s17 + $0x1e0] sm:$0xff]  }
 0x1a0   : > { %16904 = vmatprep.mubr.msk.bf16.mxu0 %vm7239_vm2, %v17750_v41  ;;  %17110 = vmatprep.mubr.msk.bf16.mxu1 %vm7239_vm2, %v17751_v42  ;;  %v17783_v41 = vld [vmem:[%s18941_s17 + $0x4f0] sm:$0xff]  }
 0x1a7   : > { %16905 = vmatmul.mubr.msk.bf16.gmra.mrb[88].mxu0 %vm7239_vm2, %v17752_v43  ;;  %17111 = vmatmul.mubr.msk.bf16.gmra.mrb[88].mxu1 %vm7239_vm2, %v17753_v44 }
 0x1a8   : > { %16908 = vmatprep.mubr.msk.bf16.mxu0 %vm7239_vm2, %v17754_v45  ;;  %17114 = vmatprep.mubr.msk.bf16.mxu1 %vm7239_vm2, %v17755_v46 }
 0x1af   : > { %16909 = vmatmul.mubr.msk.bf16.gmra.mrb[92].mxu0 %vm7239_vm2, %v17756_v47  ;;  %17115 = vmatmul.mubr.msk.bf16.gmra.mrb[92].mxu1 %vm7239_vm2, %v17757_v48  ;;  %v17784_v47 = vld [vmem:[%s18941_s17 + $0x1e8] sm:$0xff]   ;;  %v17785_v48 = vld [vmem:[%s18941_s17 + $0x4f8] sm:$0xff]  }
 0x1b0   : > { %16912 = vmatprep.mubr.msk.bf16.mxu0 %vm7239_vm2, %v17758_v49  ;;  %17118 = vmatprep.mubr.msk.bf16.mxu1 %vm7239_vm2, %v17759_v50 }
 0x1b7   : > { %16913 = vmatmul.mubr.msk.bf16.gmra.mrb[96].mxu0 %vm7239_vm2, %v17760_v51  ;;  %17119 = vmatmul.mubr.msk.bf16.gmra.mrb[96].mxu1 %vm7239_vm2, %v17761_v52 }
 0x1b8   : > { %16916 = vmatprep.mubr.msk.bf16.mxu0 %vm7239_vm2, %v17762_v53  ;;  %17122 = vmatprep.mubr.msk.bf16.mxu1 %vm7239_vm2, %v17763_v54  ;;  %v17796_v53 = vld [vmem:[%s18941_s17 + $0x218] sm:$0xff]  }
 0x1bf   : > { %16917 = vmatmul.mubr.msk.bf16.gmra.mrb[100].mxu0 %vm7239_vm2, %v17764_v55  ;;  %17123 = vmatmul.mubr.msk.bf16.gmra.mrb[100].mxu1 %vm7239_vm2, %v17765_v56  ;;  %v17786_v56 = vld [vmem:[%s18941_s17 + $0x1f0] sm:$0xff]  }
 0x1c0   : > { %16920 = vmatprep.mubr.msk.bf16.mxu0 %vm7239_vm2, %v17766_v57  ;;  %17126 = vmatprep.mubr.msk.bf16.mxu1 %vm7239_vm2, %v17767_v58  ;;  %v17787_v57 = vld [vmem:[%s18941_s17 + $0x500] sm:$0xff]  }
 0x1c7   : > { %16921 = vmatmul.mubr.msk.bf16.gmra.mrb[104].mxu0 %vm7239_vm2, %v17768_v59  ;;  %17127 = vmatmul.mubr.msk.bf16.gmra.mrb[104].mxu1 %vm7239_vm2, %v17769_v60 }
 0x1c8   : > { %16924 = vmatprep.mubr.msk.bf16.mxu0 %vm7239_vm2, %v17770_v61  ;;  %17130 = vmatprep.mubr.msk.bf16.mxu1 %vm7239_vm2, %v17771_v62 }
 0x1ca   : > { %v19165_v1 = vpop.f32.mrb[0].mxu0  ;;  %v19167_v2 = vpop.f32.mrb[0].mxu1 }
 0x1cb   : > { %v19169_v3 = vpop.f32.mrb[1].mxu0  ;;  %v19171_v4 = vpop.f32.mrb[1].mxu1 }
 0x1cc   : > { %v19175_v6 = vpop.f32.mrb[2].mxu0  ;;  %v19177_v7 = vpop.f32.mrb[2].mxu1 }
 0x1cd   : > { %v19183_v11 = vpop.f32.mrb[3].mxu0  ;;  %v19185_v12 = vpop.f32.mrb[3].mxu1 }
 0x1cf   : > { %16925 = vmatmul.mubr.msk.bf16.gmra.mrb[108].mxu0 %vm7239_vm2, %v17772_v63  ;;  %17131 = vmatmul.mubr.msk.bf16.gmra.mrb[108].mxu1 %vm7239_vm2, %v17773_v0  ;;  %v17788_v63 = vld [vmem:[%s18941_s17 + $0x1f8] sm:$0xff]   ;;  %v17789_v0 = vld [vmem:[%s18941_s17 + $0x508] sm:$0xff]  }
 0x1d0   : > { %16928 = vmatprep.mubr.msk.bf16.mxu0 %vm7239_vm2, %v17774_v8  ;;  %17134 = vmatprep.mubr.msk.bf16.mxu1 %vm7239_vm2, %v17775_v9 }
 0x1d2   : > { %v19197_v17 = vpop.f32.mrb[4].mxu0  ;;  %v19199_v18 = vpop.f32.mrb[4].mxu1 }
 0x1d3   : > { %v19201_v19 = vpop.f32.mrb[5].mxu0  ;;  %v19203_v20 = vpop.f32.mrb[5].mxu1 }
 0x1d4   : > { %v19207_v22 = vpop.f32.mrb[6].mxu0  ;;  %v19209_v23 = vpop.f32.mrb[6].mxu1 }
 0x1d5   : > { %v19215_v27 = vpop.f32.mrb[7].mxu0  ;;  %v19217_v28 = vpop.f32.mrb[7].mxu1 }
 0x1d7   : > { %16929 = vmatmul.mubr.msk.bf16.gmra.mrb[112].mxu0 %vm7239_vm2, %v17776_v15  ;;  %17135 = vmatmul.mubr.msk.bf16.gmra.mrb[112].mxu1 %vm7239_vm2, %v17777_v16 }
 0x1d8   : > { %16932 = vmatprep.mubr.msk.bf16.mxu0 %vm7239_vm2, %v17778_v24  ;;  %17138 = vmatprep.mubr.msk.bf16.mxu1 %vm7239_vm2, %v17779_v25  ;;  %v17793_v24 = vld [vmem:[%s18941_s17 + $0x518] sm:$0xff]  }
 0x1da   : > { %v19229_v33 = vpop.f32.mrb[8].mxu0  ;;  %v19231_v34 = vpop.f32.mrb[8].mxu1 }
 0x1db   : > { %v19233_v35 = vpop.f32.mrb[9].mxu0  ;;  %v19235_v36 = vpop.f32.mrb[9].mxu1 }
 0x1dc   : > { %v19239_v38 = vpop.f32.mrb[10].mxu0  ;;  %v19241_v39 = vpop.f32.mrb[10].mxu1 }
 0x1dd   : > { %v19247_v43 = vpop.f32.mrb[11].mxu0  ;;  %v19249_v44 = vpop.f32.mrb[11].mxu1 }
 0x1df   : > { %16933 = vmatmul.mubr.msk.bf16.gmra.mrb[116].mxu0 %vm7239_vm2, %v17780_v31  ;;  %17139 = vmatmul.mubr.msk.bf16.gmra.mrb[116].mxu1 %vm7239_vm2, %v17781_v32  ;;  %v17790_v32 = vld [vmem:[%s18941_s17 + $0x200] sm:$0xff]  }
 0x1e0   : > { %16936 = vmatprep.mubr.msk.bf16.mxu0 %vm7239_vm2, %v17782_v40  ;;  %17142 = vmatprep.mubr.msk.bf16.mxu1 %vm7239_vm2, %v17783_v41  ;;  %v17791_v40 = vld [vmem:[%s18941_s17 + $0x510] sm:$0xff]   ;;  %v17792_v41 = vld [vmem:[%s18941_s17 + $0x208] sm:$0xff]  }
 0x1e2   : > { %v19261_v49 = vpop.f32.mrb[12].mxu0  ;;  %v19263_v50 = vpop.f32.mrb[12].mxu1 }
 0x1e3   : > { %v19265_v51 = vpop.f32.mrb[13].mxu0  ;;  %v19267_v52 = vpop.f32.mrb[13].mxu1 }
 0x1e4   : > { %v19271_v54 = vpop.f32.mrb[14].mxu0  ;;  %v19273_v55 = vpop.f32.mrb[14].mxu1 }
 0x1e5   : > { %v19279_v59 = vpop.f32.mrb[15].mxu0  ;;  %v19281_v60 = vpop.f32.mrb[15].mxu1 }
 0x1e7   : > { %16937 = vmatmul.mubr.msk.bf16.gmra.mrb[120].mxu0 %vm7239_vm2, %v17784_v47  ;;  %17143 = vmatmul.mubr.msk.bf16.gmra.mrb[120].mxu1 %vm7239_vm2, %v17785_v48 }
 0x1e8   : > { %16940 = vmatprep.mubr.msk.bf16.mxu0 %vm7239_vm2, %v17786_v56  ;;  %17146 = vmatprep.mubr.msk.bf16.mxu1 %vm7239_vm2, %v17787_v57  ;;  %v17795_v57 = vld [vmem:[%s18941_s17 + $0x520] sm:$0xff]  }
 0x1ea   : > { %v19293_v8 = vpop.f32.mrb[16].mxu0  ;;  %v19295_v9 = vpop.f32.mrb[16].mxu1 }
 0x1eb   : > { %v19297_v15 = vpop.f32.mrb[17].mxu0  ;;  %v19299_v16 = vpop.f32.mrb[17].mxu1 }
 0x1ec   : > { %v19303_v25 = vpop.f32.mrb[18].mxu0  ;;  %v19305_v31 = vpop.f32.mrb[18].mxu1 }
 0x1ed   : > { %v19311_v47 = vpop.f32.mrb[19].mxu0  ;;  %v19313_v48 = vpop.f32.mrb[19].mxu1 }
 0x1ef   : > { %16941 = vmatmul.mubr.msk.bf16.gmra.mrb[124].mxu0 %vm7239_vm2, %v17788_v63  ;;  %17147 = vmatmul.mubr.msk.bf16.gmra.mrb[124].mxu1 %vm7239_vm2, %v17789_v0  ;;  %v17799_v63 = vld [vmem:[%s18941_s17 + $0x530] sm:$0xff]  }
 0x1f0   : > { %16944 = vmatprep.mubr.msk.bf16.mxu0 %vm7239_vm2, %v17790_v32  ;;  %17150 = vmatprep.mubr.msk.bf16.mxu1 %vm7239_vm2, %v17791_v40  ;;  %v17794_v40 = vld [vmem:[%s18941_s17 + $0x210] sm:$0xff]  }
 0x1f2   : > { %v19325_v62 = vpop.f32.mrb[20].mxu0  ;;  %v19327_v61 = vpop.f32.mrb[20].mxu1 }
 0x1f3   : > { %v19329_v58 = vpop.f32.mrb[21].mxu0  ;;  %v19331_v56 = vpop.f32.mrb[21].mxu1 }
 0x1f4   : > { %v19335_v0 = vpop.f32.mrb[22].mxu0  ;;  %v19337_v32 = vpop.f32.mrb[22].mxu1 }
 0x1f5   : > { %22462 = vst [vmem:[#allocation3_spill] sm:$0xff] %v19337_v32  ;;  %v19343_v46 = vpop.f32.mrb[23].mxu0  ;;  %v19345_v45 = vpop.f32.mrb[23].mxu1 }
 0x1f6   : > { %22463 = vst [vmem:[#allocation4_spill] sm:$0xff] %v19343_v46  ;;  %22464 = vst [vmem:[#allocation5_spill] sm:$0xff] %v19345_v45  ;;  %v22812_v46 = vmax.f32 %v19183_v11, %v19185_v12 }
 0x1f7   : > { %16945 = vmatmul.mubr.msk.bf16.gmra.mrb[128].mxu0 %vm7239_vm2, %v17792_v41  ;;  %17151 = vmatmul.mubr.msk.bf16.gmra.mrb[128].mxu1 %vm7239_vm2, %v17793_v24  ;;  %v17803_v41 = vld [vmem:[%s18941_s17 + $0x540] sm:$0xff]  }
 0x1f8   : > { %16948 = vmatprep.mubr.msk.bf16.mxu0 %vm7239_vm2, %v17794_v40  ;;  %17154 = vmatprep.mubr.msk.bf16.mxu1 %vm7239_vm2, %v17795_v57  ;;  %v17798_v57 = vld [vmem:[%s18941_s17 + $0x220] sm:$0xff]  }
 0x1fa   : > { %v19357_v30 = vpop.f32.mrb[24].mxu0  ;;  %v19359_v29 = vpop.f32.mrb[24].mxu1 }
 0x1fb   : > { %22465 = vst [vmem:[#allocation6_spill] sm:$0xff] %v19357_v30  ;;  %22466 = vst [vmem:[#allocation7_spill] sm:$0xff] %v19359_v29  ;;  %v19361_v26 = vpop.f32.mrb[25].mxu0  ;;  %v19363_v42 = vpop.f32.mrb[25].mxu1 }
 0x1fc   : > { %22467 = vst [vmem:[#allocation8_spill] sm:$0xff] %v19361_v26  ;;  %22468 = vst [vmem:[#allocation9_spill] sm:$0xff] %v19363_v42  ;;  %v19367_v24 = vpop.f32.mrb[26].mxu0  ;;  %v19369_v40 = vpop.f32.mrb[26].mxu1 }
 0x1fd   : > { %22469 = vst [vmem:[#allocation10_spill] sm:$0xff] %v19367_v24  ;;  %22470 = vst [vmem:[#allocation11_spill] sm:$0xff] %v19369_v40  ;;  %v19375_v14 = vpop.f32.mrb[27].mxu0  ;;  %v19377_v13 = vpop.f32.mrb[27].mxu1 }
 0x1fe   : > { %22471 = vst [vmem:[#allocation12_spill] sm:$0xff] %v19375_v14  ;;  %22472 = vst [vmem:[#allocation13_spill] sm:$0xff] %v19377_v13  ;;  %v17804_v13 = vld [vmem:[%s18941_s17 + $0x238] sm:$0xff]  }
 0x1ff   : > { %16949 = vmatmul.mubr.msk.bf16.gmra.mrb[132].mxu0 %vm7239_vm2, %v17796_v53  ;;  %17155 = vmatmul.mubr.msk.bf16.gmra.mrb[132].mxu1 %vm7239_vm2, %v17797_v37  ;;  %v17807_v53 = vld [vmem:[%s18941_s17 + $0x550] sm:$0xff]  }
 0x200   : > { %16952 = vmatprep.mubr.msk.bf16.mxu0 %vm7239_vm2, %v17798_v57  ;;  %17158 = vmatprep.mubr.msk.bf16.mxu1 %vm7239_vm2, %v17799_v63  ;;  %v17802_v63 = vld [vmem:[%s18941_s17 + $0x230] sm:$0xff]  }
 0x202   : > { %v19389_v42 = vpop.f32.mrb[28].mxu0  ;;  %v19391_v26 = vpop.f32.mrb[28].mxu1 }
 0x203   : > { %22473 = vst [vmem:[#allocation14_spill] sm:$0xff] %v19389_v42  ;;  %22474 = vst [vmem:[#allocation15_spill] sm:$0xff] %v19391_v26  ;;  %v19393_v29 = vpop.f32.mrb[29].mxu0  ;;  %v19395_v10 = vpop.f32.mrb[29].mxu1 }
 0x204   : > { %22475 = vst [vmem:[#allocation16_spill] sm:$0xff] %v19393_v29  ;;  %22476 = vst [vmem:[#allocation17_spill] sm:$0xff] %v19395_v10  ;;  %v19399_v37 = vpop.f32.mrb[30].mxu0  ;;  %v19401_v57 = vpop.f32.mrb[30].mxu1  ;;  %v17805_v10 = vld [vmem:[%s18941_s17 + $0x548] sm:$0xff]  }
 0x205   : > { %22477 = vst [vmem:[#allocation18_spill] sm:$0xff] %v19399_v37  ;;  %22478 = vst [vmem:[#allocation19_spill] sm:$0xff] %v19401_v57  ;;  %v19407_v14 = vpop.f32.mrb[31].mxu0  ;;  %v19409_v40 = vpop.f32.mrb[31].mxu1 }
 0x206   : > { %22479 = vst [vmem:[#allocation20_spill] sm:$0xff] %v19407_v14  ;;  %22480 = vst [vmem:[#allocation21_spill] sm:$0xff] %v19409_v40  ;;  %v17808_v40 = vld [vmem:[%s18941_s17 + $0x248] sm:$0xff]  }
 0x207   : > { %16953 = vmatmul.mubr.msk.bf16.gmra.mrb[136].mxu0 %vm7239_vm2, %v17800_v21  ;;  %17159 = vmatmul.mubr.msk.bf16.gmra.mrb[136].mxu1 %vm7239_vm2, %v17801_v5  ;;  %v17811_v21 = vld [vmem:[%s18941_s17 + $0x560] sm:$0xff]  }
 0x208   : > { %16956 = vmatprep.mubr.msk.bf16.mxu0 %vm7239_vm2, %v17802_v63  ;;  %17162 = vmatprep.mubr.msk.bf16.mxu1 %vm7239_vm2, %v17803_v41  ;;  %v17806_v41 = vld [vmem:[%s18941_s17 + $0x240] sm:$0xff]  }
 0x20a   : > { %v19421_v29 = vpop.f32.mrb[32].mxu0  ;;  %v19423_v26 = vpop.f32.mrb[32].mxu1 }
 0x20b   : > { %22481 = vst [vmem:[#allocation22_spill] sm:$0xff] %v19421_v29  ;;  %22482 = vst [vmem:[#allocation23_spill] sm:$0xff] %v19423_v26  ;;  %v19425_v42 = vpop.f32.mrb[33].mxu0  ;;  %v19427_v24 = vpop.f32.mrb[33].mxu1 }
 0x20c   : > { %22483 = vst [vmem:[#allocation24_spill] sm:$0xff] %v19425_v42  ;;  %22484 = vst [vmem:[#allocation25_spill] sm:$0xff] %v19427_v24  ;;  %v19431_v5 = vpop.f32.mrb[34].mxu0  ;;  %v19433_v63 = vpop.f32.mrb[34].mxu1  ;;  %v17809_v24 = vld [vmem:[%s18941_s17 + $0x558] sm:$0xff]  }
 0x20d   : > { %22485 = vst [vmem:[#allocation26_spill] sm:$0xff] %v19431_v5  ;;  %22486 = vst [vmem:[#allocation27_spill] sm:$0xff] %v19433_v63  ;;  %v19439_v14 = vpop.f32.mrb[35].mxu0  ;;  %v19441_v57 = vpop.f32.mrb[35].mxu1 }
 0x20e   : > { %22487 = vst [vmem:[#allocation28_spill] sm:$0xff] %v19439_v14  ;;  %22488 = vst [vmem:[#allocation29_spill] sm:$0xff] %v19441_v57  ;;  %v17812_v57 = vld [vmem:[%s18941_s17 + $0x258] sm:$0xff]  }
 0x20f   : > { %16957 = vmatmul.mubr.msk.bf16.gmra.mrb[140].mxu0 %vm7239_vm2, %v17804_v13  ;;  %17163 = vmatmul.mubr.msk.bf16.gmra.mrb[140].mxu1 %vm7239_vm2, %v17805_v10  ;;  %v17815_v13 = vld [vmem:[%s18941_s17 + $0x570] sm:$0xff]  }
 0x210   : > { %16960 = vmatprep.mubr.msk.bf16.mxu0 %vm7239_vm2, %v17806_v41  ;;  %17166 = vmatprep.mubr.msk.bf16.mxu1 %vm7239_vm2, %v17807_v53  ;;  %v17810_v53 = vld [vmem:[%s18941_s17 + $0x250] sm:$0xff]  }
 0x212   : > { %v19453_v42 = vpop.f32.mrb[36].mxu0  ;;  %v19455_v26 = vpop.f32.mrb[36].mxu1 }
 0x213   : > { %22489 = vst [vmem:[#allocation30_spill] sm:$0xff] %v19453_v42  ;;  %22490 = vst [vmem:[#allocation31_spill] sm:$0xff] %v19455_v26  ;;  %v19457_v29 = vpop.f32.mrb[37].mxu0  ;;  %v19459_v37 = vpop.f32.mrb[37].mxu1 }
 0x214   : > { %22491 = vst [vmem:[#allocation32_spill] sm:$0xff] %v19457_v29  ;;  %22492 = vst [vmem:[#allocation33_spill] sm:$0xff] %v19459_v37  ;;  %v19463_v10 = vpop.f32.mrb[38].mxu0  ;;  %v19465_v41 = vpop.f32.mrb[38].mxu1  ;;  %v17813_v37 = vld [vmem:[%s18941_s17 + $0x568] sm:$0xff]  }
 0x215   : > { %22493 = vst [vmem:[#allocation34_spill] sm:$0xff] %v19463_v10  ;;  %22494 = vst [vmem:[#allocation35_spill] sm:$0xff] %v19465_v41  ;;  %v19471_v14 = vpop.f32.mrb[39].mxu0  ;;  %v19473_v63 = vpop.f32.mrb[39].mxu1 }
 0x216   : > { %22495 = vst [vmem:[#allocation36_spill] sm:$0xff] %v19471_v14  ;;  %22496 = vst [vmem:[#allocation37_spill] sm:$0xff] %v19473_v63  ;;  %v17816_v63 = vld [vmem:[%s18941_s17 + $0x268] sm:$0xff]  }
 0x217   : > { %16961 = vmatmul.mubr.msk.bf16.gmra.mrb[144].mxu0 %vm7239_vm2, %v17808_v40  ;;  %17167 = vmatmul.mubr.msk.bf16.gmra.mrb[144].mxu1 %vm7239_vm2, %v17809_v24  ;;  %v17819_v40 = vld [vmem:[%s18941_s17 + $0x580] sm:$0xff]  }
 0x218   : > { %16964 = vmatprep.mubr.msk.bf16.mxu0 %vm7239_vm2, %v17810_v53  ;;  %17170 = vmatprep.mubr.msk.bf16.mxu1 %vm7239_vm2, %v17811_v21  ;;  %v17814_v21 = vld [vmem:[%s18941_s17 + $0x260] sm:$0xff]  }
 0x21a   : > { %v19485_v29 = vpop.f32.mrb[40].mxu0  ;;  %v19487_v26 = vpop.f32.mrb[40].mxu1 }
 0x21b   : > { %22497 = vst [vmem:[#allocation38_spill] sm:$0xff] %v19485_v29  ;;  %22498 = vst [vmem:[#allocation39_spill] sm:$0xff] %v19487_v26  ;;  %v19489_v42 = vpop.f32.mrb[41].mxu0  ;;  %v19491_v5 = vpop.f32.mrb[41].mxu1 }
 0x21c   : > { %22499 = vst [vmem:[#allocation40_spill] sm:$0xff] %v19489_v42  ;;  %22500 = vst [vmem:[#allocation41_spill] sm:$0xff] %v19491_v5  ;;  %v19495_v24 = vpop.f32.mrb[42].mxu0  ;;  %v19497_v53 = vpop.f32.mrb[42].mxu1  ;;  %v17817_v5 = vld [vmem:[%s18941_s17 + $0x578] sm:$0xff]  }
 0x21d   : > { %22501 = vst [vmem:[#allocation42_spill] sm:$0xff] %v19495_v24  ;;  %22502 = vst [vmem:[#allocation43_spill] sm:$0xff] %v19497_v53  ;;  %v19503_v14 = vpop.f32.mrb[43].mxu0  ;;  %v19505_v41 = vpop.f32.mrb[43].mxu1 }
 0x21e   : > { %22503 = vst [vmem:[#allocation44_spill] sm:$0xff] %v19503_v14  ;;  %22504 = vst [vmem:[#allocation45_spill] sm:$0xff] %v19505_v41  ;;  %v17820_v41 = vld [vmem:[%s18941_s17 + $0x278] sm:$0xff]  }
 0x21f   : > { %16965 = vmatmul.mubr.msk.bf16.gmra.mrb[148].mxu0 %vm7239_vm2, %v17812_v57  ;;  %17171 = vmatmul.mubr.msk.bf16.gmra.mrb[148].mxu1 %vm7239_vm2, %v17813_v37  ;;  %v17823_v57 = vld [vmem:[%s18941_s17 + $0x590] sm:$0xff]  }
 0x220   : > { %16968 = vmatprep.mubr.msk.bf16.mxu0 %vm7239_vm2, %v17814_v21  ;;  %17174 = vmatprep.mubr.msk.bf16.mxu1 %vm7239_vm2, %v17815_v13  ;;  %v17818_v13 = vld [vmem:[%s18941_s17 + $0x270] sm:$0xff]  }
 0x222   : > { %v19517_v42 = vpop.f32.mrb[44].mxu0  ;;  %v19519_v26 = vpop.f32.mrb[44].mxu1 }
 0x223   : > { %22505 = vst [vmem:[#allocation46_spill] sm:$0xff] %v19517_v42  ;;  %22506 = vst [vmem:[#allocation47_spill] sm:$0xff] %v19519_v26  ;;  %v19521_v29 = vpop.f32.mrb[45].mxu0  ;;  %v19523_v10 = vpop.f32.mrb[45].mxu1 }
 0x224   : > { %22507 = vst [vmem:[#allocation48_spill] sm:$0xff] %v19521_v29  ;;  %22508 = vst [vmem:[#allocation49_spill] sm:$0xff] %v19523_v10  ;;  %v19527_v37 = vpop.f32.mrb[46].mxu0  ;;  %v19529_v21 = vpop.f32.mrb[46].mxu1  ;;  %v17821_v10 = vld [vmem:[%s18941_s17 + $0x588] sm:$0xff]  }
 0x225   : > { %22509 = vst [vmem:[#allocation50_spill] sm:$0xff] %v19527_v37  ;;  %22510 = vst [vmem:[#allocation51_spill] sm:$0xff] %v19529_v21  ;;  %v19535_v14 = vpop.f32.mrb[47].mxu0  ;;  %v19537_v53 = vpop.f32.mrb[47].mxu1 }
 0x226   : > { %22511 = vst [vmem:[#allocation52_spill] sm:$0xff] %v19535_v14  ;;  %22512 = vst [vmem:[#allocation53_spill] sm:$0xff] %v19537_v53  ;;  %v17824_v53 = vld [vmem:[%s18941_s17 + $0x288] sm:$0xff]  }
 0x227   : > { %16969 = vmatmul.mubr.msk.bf16.gmra.mrb[152].mxu0 %vm7239_vm2, %v17816_v63  ;;  %17175 = vmatmul.mubr.msk.bf16.gmra.mrb[152].mxu1 %vm7239_vm2, %v17817_v5  ;;  %v17827_v63 = vld [vmem:[%s18941_s17 + $0x5a0] sm:$0xff]  }
 0x228   : > { %16972 = vmatprep.mubr.msk.bf16.mxu0 %vm7239_vm2, %v17818_v13  ;;  %17178 = vmatprep.mubr.msk.bf16.mxu1 %vm7239_vm2, %v17819_v40  ;;  %v17822_v40 = vld [vmem:[%s18941_s17 + $0x280] sm:$0xff]  }
 0x22a   : > { %v19549_v29 = vpop.f32.mrb[48].mxu0  ;;  %v19551_v26 = vpop.f32.mrb[48].mxu1 }
 0x22b   : > { %22513 = vst [vmem:[#allocation54_spill] sm:$0xff] %v19549_v29  ;;  %22514 = vst [vmem:[#allocation55_spill] sm:$0xff] %v19551_v26  ;;  %v19553_v42 = vpop.f32.mrb[49].mxu0  ;;  %v19555_v24 = vpop.f32.mrb[49].mxu1 }
 0x22c   : > { %22515 = vst [vmem:[#allocation56_spill] sm:$0xff] %v19553_v42  ;;  %22516 = vst [vmem:[#allocation57_spill] sm:$0xff] %v19555_v24  ;;  %v19559_v5 = vpop.f32.mrb[50].mxu0  ;;  %v19561_v13 = vpop.f32.mrb[50].mxu1  ;;  %v17825_v24 = vld [vmem:[%s18941_s17 + $0x598] sm:$0xff]  }
 0x22d   : > { %22517 = vst [vmem:[#allocation58_spill] sm:$0xff] %v19559_v5  ;;  %22518 = vst [vmem:[#allocation59_spill] sm:$0xff] %v19561_v13  ;;  %v19567_v14 = vpop.f32.mrb[51].mxu0  ;;  %v19569_v21 = vpop.f32.mrb[51].mxu1 }
 0x22e   : > { %22519 = vst [vmem:[#allocation60_spill] sm:$0xff] %v19567_v14  ;;  %22520 = vst [vmem:[#allocation61_spill] sm:$0xff] %v19569_v21  ;;  %v17828_v21 = vld [vmem:[%s18941_s17 + $0x298] sm:$0xff]  }
 0x22f   : > { %16973 = vmatmul.mubr.msk.bf16.gmra.mrb[156].mxu0 %vm7239_vm2, %v17820_v41  ;;  %17179 = vmatmul.mubr.msk.bf16.gmra.mrb[156].mxu1 %vm7239_vm2, %v17821_v10  ;;  %v17831_v41 = vld [vmem:[%s18941_s17 + $0x5b0] sm:$0xff]  }
 0x230   : > { %16976 = vmatprep.mubr.msk.bf16.mxu0 %vm7239_vm2, %v17822_v40  ;;  %17182 = vmatprep.mubr.msk.bf16.mxu1 %vm7239_vm2, %v17823_v57  ;;  %v17826_v57 = vld [vmem:[%s18941_s17 + $0x290] sm:$0xff]  }
 0x232   : > { %v19581_v42 = vpop.f32.mrb[52].mxu0  ;;  %v19583_v26 = vpop.f32.mrb[52].mxu1 }
 0x233   : > { %22521 = vst [vmem:[#allocation62_spill] sm:$0xff] %v19581_v42  ;;  %22522 = vst [vmem:[#allocation63_spill] sm:$0xff] %v19583_v26  ;;  %v19585_v29 = vpop.f32.mrb[53].mxu0  ;;  %v19587_v37 = vpop.f32.mrb[53].mxu1 }
 0x234   : > { %22523 = vst [vmem:[#allocation64_spill] sm:$0xff] %v19585_v29  ;;  %22524 = vst [vmem:[#allocation65_spill] sm:$0xff] %v19587_v37  ;;  %v19591_v10 = vpop.f32.mrb[54].mxu0  ;;  %v19593_v40 = vpop.f32.mrb[54].mxu1  ;;  %v17829_v37 = vld [vmem:[%s18941_s17 + $0x5a8] sm:$0xff]  }
 0x235   : > { %22525 = vst [vmem:[#allocation66_spill] sm:$0xff] %v19591_v10  ;;  %22526 = vst [vmem:[#allocation67_spill] sm:$0xff] %v19593_v40  ;;  %v19599_v14 = vpop.f32.mrb[55].mxu0  ;;  %v19601_v13 = vpop.f32.mrb[55].mxu1 }
 0x236   : > { %22527 = vst [vmem:[#allocation68_spill] sm:$0xff] %v19599_v14  ;;  %22528 = vst [vmem:[#allocation69_spill] sm:$0xff] %v19601_v13  ;;  %v17832_v13 = vld [vmem:[%s18941_s17 + $0x2a8] sm:$0xff]  }
 0x237   : > { %16977 = vmatmul.mubr.msk.bf16.gmra.mrb[160].mxu0 %vm7239_vm2, %v17824_v53  ;;  %17183 = vmatmul.mubr.msk.bf16.gmra.mrb[160].mxu1 %vm7239_vm2, %v17825_v24  ;;  %v17908_v53 = vld [vmem:[%s18941_s17 + $0x6e8] sm:$0xff]  }
 0x238   : > { %16980 = vmatprep.mubr.msk.bf16.mxu0 %vm7239_vm2, %v17826_v57  ;;  %17186 = vmatprep.mubr.msk.bf16.mxu1 %vm7239_vm2, %v17827_v63  ;;  %v17830_v63 = vld [vmem:[%s18941_s17 + $0x2a0] sm:$0xff]  }
 0x23a   : > { %v19613_v29 = vpop.f32.mrb[56].mxu0  ;;  %v19615_v26 = vpop.f32.mrb[56].mxu1 }
 0x23b   : > { %22529 = vst [vmem:[#allocation70_spill] sm:$0xff] %v19613_v29  ;;  %22530 = vst [vmem:[#allocation71_spill] sm:$0xff] %v19615_v26  ;;  %v19617_v42 = vpop.f32.mrb[57].mxu0  ;;  %v19619_v5 = vpop.f32.mrb[57].mxu1 }
 0x23c   : > { %22531 = vst [vmem:[#allocation72_spill] sm:$0xff] %v19617_v42  ;;  %22532 = vst [vmem:[#allocation73_spill] sm:$0xff] %v19619_v5  ;;  %v19623_v24 = vpop.f32.mrb[58].mxu0  ;;  %v19625_v57 = vpop.f32.mrb[58].mxu1  ;;  %v17833_v5 = vld [vmem:[%s18941_s17 + $0x5b8] sm:$0xff]  }
 0x23d   : > { %22533 = vst [vmem:[#allocation74_spill] sm:$0xff] %v19623_v24  ;;  %22534 = vst [vmem:[#allocation75_spill] sm:$0xff] %v19625_v57  ;;  %v19631_v14 = vpop.f32.mrb[59].mxu0  ;;  %v19633_v40 = vpop.f32.mrb[59].mxu1  ;;  %v17836_v24 = vld [vmem:[%s18941_s17 + $0x2b8] sm:$0xff]  }
 0x23e   : > { %22535 = vst [vmem:[#allocation76_spill] sm:$0xff] %v19631_v14  ;;  %22536 = vst [vmem:[#allocation77_spill] sm:$0xff] %v19633_v40 }
 0x23f   : > { %16981 = vmatmul.mubr.msk.bf16.gmra.mrb[164].mxu0 %vm7239_vm2, %v17828_v21  ;;  %17187 = vmatmul.mubr.msk.bf16.gmra.mrb[164].mxu1 %vm7239_vm2, %v17829_v37 }
 0x240   : > { %16984 = vmatprep.mubr.msk.bf16.mxu0 %vm7239_vm2, %v17830_v63  ;;  %17190 = vmatprep.mubr.msk.bf16.mxu1 %vm7239_vm2, %v17831_v41  ;;  %v17834_v63 = vld [vmem:[%s18941_s17 + $0x2b0] sm:$0xff]   ;;  %v17835_v41 = vld [vmem:[%s18941_s17 + $0x5c0] sm:$0xff]  }
 0x242   : > { %v19645_v42 = vpop.f32.mrb[60].mxu0  ;;  %v19647_v26 = vpop.f32.mrb[60].mxu1 }
 0x243   : > { %22537 = vst [vmem:[#allocation78_spill] sm:$0xff] %v19645_v42  ;;  %22538 = vst [vmem:[#allocation79_spill] sm:$0xff] %v19647_v26  ;;  %v19649_v29 = vpop.f32.mrb[61].mxu0  ;;  %v19651_v10 = vpop.f32.mrb[61].mxu1  ;;  %v17840_v42 = vld [vmem:[%s18941_s17 + $0x2c8] sm:$0xff]  }
 0x244   : > { %22539 = vst [vmem:[#allocation80_spill] sm:$0xff] %v19649_v29  ;;  %22540 = vst [vmem:[#allocation81_spill] sm:$0xff] %v19651_v10  ;;  %v19655_v21 = vpop.f32.mrb[62].mxu0  ;;  %v19657_v37 = vpop.f32.mrb[62].mxu1 }
 0x245   : > { %22541 = vst [vmem:[#allocation82_spill] sm:$0xff] %v19655_v21  ;;  %22542 = vst [vmem:[#allocation83_spill] sm:$0xff] %v19657_v37  ;;  %v19663_v14 = vpop.f32.mrb[63].mxu0  ;;  %v19665_v57 = vpop.f32.mrb[63].mxu1  ;;  %v17837_v37 = vld [vmem:[%s18941_s17 + $0x5c8] sm:$0xff]  }
 0x246   : > { %22543 = vst [vmem:[#allocation84_spill] sm:$0xff] %v19663_v14  ;;  %22544 = vst [vmem:[#allocation85_spill] sm:$0xff] %v19665_v57 }
 0x247   : > { %16985 = vmatmul.mubr.msk.bf16.gmra.mrb[168].mxu0 %vm7239_vm2, %v17832_v13  ;;  %17191 = vmatmul.mubr.msk.bf16.gmra.mrb[168].mxu1 %vm7239_vm2, %v17833_v5 }
 0x248   : > { %16988 = vmatprep.mubr.msk.bf16.mxu0 %vm7239_vm2, %v17834_v63  ;;  %17194 = vmatprep.mubr.msk.bf16.mxu1 %vm7239_vm2, %v17835_v41  ;;  %v17838_v63 = vld [vmem:[%s18941_s17 + $0x2c0] sm:$0xff]   ;;  %v17839_v41 = vld [vmem:[%s18941_s17 + $0x5d0] sm:$0xff]  }
 0x24a   : > { %v19675_v40 = vpop.f32.mrb[64].mxu0  ;;  %v19677_v10 = vpop.f32.mrb[64].mxu1 }
 0x24b   : > { %22545 = vst [vmem:[#allocation86_spill] sm:$0xff] %v19675_v40  ;;  %22546 = vst [vmem:[#allocation87_spill] sm:$0xff] %v19677_v10  ;;  %v19679_v29 = vpop.f32.mrb[65].mxu0  ;;  %v19681_v26 = vpop.f32.mrb[65].mxu1  ;;  %v17844_v40 = vld [vmem:[%s18941_s17 + $0x2d8] sm:$0xff]  }
 0x24c   : > { %22547 = vst [vmem:[#allocation88_spill] sm:$0xff] %v19679_v29  ;;  %22548 = vst [vmem:[#allocation89_spill] sm:$0xff] %v19681_v26  ;;  %v19687_v13 = vpop.f32.mrb[66].mxu0  ;;  %v19689_v5 = vpop.f32.mrb[66].mxu1 }
 0x24d   : > { %22549 = vst [vmem:[#allocation90_spill] sm:$0xff] %v19687_v13  ;;  %22550 = vst [vmem:[#allocation91_spill] sm:$0xff] %v19689_v5  ;;  %v19695_v14 = vpop.f32.mrb[67].mxu0  ;;  %v19697_v21 = vpop.f32.mrb[67].mxu1  ;;  %v17841_v5 = vld [vmem:[%s18941_s17 + $0x5d8] sm:$0xff]  }
 0x24e   : > { %22551 = vst [vmem:[#allocation92_spill] sm:$0xff] %v19695_v14  ;;  %22552 = vst [vmem:[#allocation93_spill] sm:$0xff] %v19697_v21 }
 0x24f   : > { %16989 = vmatmul.mubr.msk.bf16.gmra.mrb[172].mxu0 %vm7239_vm2, %v17836_v24  ;;  %17195 = vmatmul.mubr.msk.bf16.gmra.mrb[172].mxu1 %vm7239_vm2, %v17837_v37 }
 0x250   : > { %16992 = vmatprep.mubr.msk.bf16.mxu0 %vm7239_vm2, %v17838_v63  ;;  %17198 = vmatprep.mubr.msk.bf16.mxu1 %vm7239_vm2, %v17839_v41  ;;  %v17842_v63 = vld [vmem:[%s18941_s17 + $0x2d0] sm:$0xff]   ;;  %v17843_v41 = vld [vmem:[%s18941_s17 + $0x5e0] sm:$0xff]  }
 0x252   : > { %v19707_v57 = vpop.f32.mrb[68].mxu0  ;;  %v19709_v26 = vpop.f32.mrb[68].mxu1 }
 0x253   : > { %22553 = vst [vmem:[#allocation94_spill] sm:$0xff] %v19707_v57  ;;  %22554 = vst [vmem:[#allocation95_spill] sm:$0xff] %v19709_v26  ;;  %v19711_v29 = vpop.f32.mrb[69].mxu0  ;;  %v19713_v10 = vpop.f32.mrb[69].mxu1  ;;  %v17848_v57 = vld [vmem:[%s18941_s17 + $0x2e8] sm:$0xff]  }
 0x254   : > { %22555 = vst [vmem:[#allocation96_spill] sm:$0xff] %v19711_v29  ;;  %22556 = vst [vmem:[#allocation97_spill] sm:$0xff] %v19713_v10  ;;  %v19719_v24 = vpop.f32.mrb[70].mxu0  ;;  %v19721_v37 = vpop.f32.mrb[70].mxu1 }
 0x255   : > { %22557 = vst [vmem:[#allocation98_spill] sm:$0xff] %v19719_v24  ;;  %22558 = vst [vmem:[#allocation99_spill] sm:$0xff] %v19721_v37  ;;  %v19727_v14 = vpop.f32.mrb[71].mxu0  ;;  %v19729_v13 = vpop.f32.mrb[71].mxu1  ;;  %v17845_v37 = vld [vmem:[%s18941_s17 + $0x5e8] sm:$0xff]  }
 0x256   : > { %22559 = vst [vmem:[#allocation100_spill] sm:$0xff] %v19727_v14  ;;  %22560 = vst [vmem:[#allocation101_spill] sm:$0xff] %v19729_v13 }
 0x257   : > { %16993 = vmatmul.mubr.msk.bf16.gmra.mrb[176].mxu0 %vm7239_vm2, %v17840_v42  ;;  %17199 = vmatmul.mubr.msk.bf16.gmra.mrb[176].mxu1 %vm7239_vm2, %v17841_v5 }
 0x258   : > { %16996 = vmatprep.mubr.msk.bf16.mxu0 %vm7239_vm2, %v17842_v63  ;;  %17202 = vmatprep.mubr.msk.bf16.mxu1 %vm7239_vm2, %v17843_v41  ;;  %v17846_v63 = vld [vmem:[%s18941_s17 + $0x2e0] sm:$0xff]   ;;  %v17847_v41 = vld [vmem:[%s18941_s17 + $0x5f0] sm:$0xff]  }
 0x25a   : > { %v19739_v21 = vpop.f32.mrb[72].mxu0  ;;  %v19741_v10 = vpop.f32.mrb[72].mxu1 }
 0x25b   : > { %22561 = vst [vmem:[#allocation102_spill] sm:$0xff] %v19739_v21  ;;  %22562 = vst [vmem:[#allocation103_spill] sm:$0xff] %v19741_v10  ;;  %v19743_v29 = vpop.f32.mrb[73].mxu0  ;;  %v19745_v26 = vpop.f32.mrb[73].mxu1  ;;  %v17852_v21 = vld [vmem:[%s18941_s17 + $0x2f8] sm:$0xff]  }
 0x25c   : > { %22563 = vst [vmem:[#allocation104_spill] sm:$0xff] %v19743_v29  ;;  %22564 = vst [vmem:[#allocation105_spill] sm:$0xff] %v19745_v26  ;;  %v19751_v42 = vpop.f32.mrb[74].mxu0  ;;  %v19753_v5 = vpop.f32.mrb[74].mxu1 }
 0x25d   : > { %22565 = vst [vmem:[#allocation106_spill] sm:$0xff] %v19751_v42  ;;  %22566 = vst [vmem:[#allocation107_spill] sm:$0xff] %v19753_v5  ;;  %v19759_v14 = vpop.f32.mrb[75].mxu0  ;;  %v19761_v24 = vpop.f32.mrb[75].mxu1  ;;  %v17849_v5 = vld [vmem:[%s18941_s17 + $0x5f8] sm:$0xff]  }
 0x25e   : > { %22567 = vst [vmem:[#allocation108_spill] sm:$0xff] %v19759_v14  ;;  %22568 = vst [vmem:[#allocation109_spill] sm:$0xff] %v19761_v24 }
 0x25f   : > { %16997 = vmatmul.mubr.msk.bf16.gmra.mrb[180].mxu0 %vm7239_vm2, %v17844_v40  ;;  %17203 = vmatmul.mubr.msk.bf16.gmra.mrb[180].mxu1 %vm7239_vm2, %v17845_v37 }
 0x260   : > { %17000 = vmatprep.mubr.msk.bf16.mxu0 %vm7239_vm2, %v17846_v63  ;;  %17206 = vmatprep.mubr.msk.bf16.mxu1 %vm7239_vm2, %v17847_v41  ;;  %v17850_v63 = vld [vmem:[%s18941_s17 + $0x2f0] sm:$0xff]   ;;  %v17851_v41 = vld [vmem:[%s18941_s17 + $0x600] sm:$0xff]  }
 0x262   : > { %v19771_v13 = vpop.f32.mrb[76].mxu0  ;;  %v19773_v26 = vpop.f32.mrb[76].mxu1 }
 0x263   : > { %22569 = vst [vmem:[#allocation110_spill] sm:$0xff] %v19771_v13  ;;  %22570 = vst [vmem:[#allocation111_spill] sm:$0xff] %v19773_v26  ;;  %v19775_v29 = vpop.f32.mrb[77].mxu0  ;;  %v19777_v10 = vpop.f32.mrb[77].mxu1  ;;  %v17856_v13 = vld [vmem:[%s18941_s17 + $0x308] sm:$0xff]  }
 0x264   : > { %22571 = vst [vmem:[#allocation112_spill] sm:$0xff] %v19775_v29  ;;  %22572 = vst [vmem:[#allocation113_spill] sm:$0xff] %v19777_v10  ;;  %v19783_v40 = vpop.f32.mrb[78].mxu0  ;;  %v19785_v37 = vpop.f32.mrb[78].mxu1 }
 0x265   : > { %22573 = vst [vmem:[#allocation114_spill] sm:$0xff] %v19783_v40  ;;  %22574 = vst [vmem:[#allocation115_spill] sm:$0xff] %v19785_v37  ;;  %v19791_v14 = vpop.f32.mrb[79].mxu0  ;;  %v19793_v42 = vpop.f32.mrb[79].mxu1  ;;  %v17853_v37 = vld [vmem:[%s18941_s17 + $0x608] sm:$0xff]  }
 0x266   : > { %22575 = vst [vmem:[#allocation116_spill] sm:$0xff] %v19791_v14  ;;  %22576 = vst [vmem:[#allocation117_spill] sm:$0xff] %v19793_v42 }
 0x267   : > { %17001 = vmatmul.mubr.msk.bf16.gmra.mrb[184].mxu0 %vm7239_vm2, %v17848_v57  ;;  %17207 = vmatmul.mubr.msk.bf16.gmra.mrb[184].mxu1 %vm7239_vm2, %v17849_v5 }
 0x268   : > { %17004 = vmatprep.mubr.msk.bf16.mxu0 %vm7239_vm2, %v17850_v63  ;;  %17210 = vmatprep.mubr.msk.bf16.mxu1 %vm7239_vm2, %v17851_v41  ;;  %v17854_v63 = vld [vmem:[%s18941_s17 + $0x300] sm:$0xff]   ;;  %v17855_v41 = vld [vmem:[%s18941_s17 + $0x610] sm:$0xff]  }
 0x26a   : > { %v19803_v24 = vpop.f32.mrb[80].mxu0  ;;  %v19805_v10 = vpop.f32.mrb[80].mxu1 }
 0x26b   : > { %22577 = vst [vmem:[#allocation118_spill] sm:$0xff] %v19803_v24  ;;  %22578 = vst [vmem:[#allocation119_spill] sm:$0xff] %v19805_v10  ;;  %v19807_v29 = vpop.f32.mrb[81].mxu0  ;;  %v19809_v26 = vpop.f32.mrb[81].mxu1  ;;  %v17860_v24 = vld [vmem:[%s18941_s17 + $0x628] sm:$0xff]  }
 0x26c   : > { %22579 = vst [vmem:[#allocation120_spill] sm:$0xff] %v19807_v29  ;;  %22580 = vst [vmem:[#allocation121_spill] sm:$0xff] %v19809_v26  ;;  %v19815_v57 = vpop.f32.mrb[82].mxu0  ;;  %v19817_v5 = vpop.f32.mrb[82].mxu1 }
 0x26d   : > { %22581 = vst [vmem:[#allocation122_spill] sm:$0xff] %v19815_v57  ;;  %22582 = vst [vmem:[#allocation123_spill] sm:$0xff] %v19817_v5  ;;  %v19823_v14 = vpop.f32.mrb[83].mxu0  ;;  %v19825_v40 = vpop.f32.mrb[83].mxu1  ;;  %v17857_v5 = vld [vmem:[%s18941_s17 + $0x618] sm:$0xff]  }
 0x26e   : > { %22583 = vst [vmem:[#allocation124_spill] sm:$0xff] %v19823_v14  ;;  %22584 = vst [vmem:[#allocation125_spill] sm:$0xff] %v19825_v40 }
 0x26f   : > { %17005 = vmatmul.mubr.msk.bf16.gmra.mrb[188].mxu0 %vm7239_vm2, %v17852_v21  ;;  %17211 = vmatmul.mubr.msk.bf16.gmra.mrb[188].mxu1 %vm7239_vm2, %v17853_v37 }
 0x270   : > { %17008 = vmatprep.mubr.msk.bf16.mxu0 %vm7239_vm2, %v17854_v63  ;;  %17214 = vmatprep.mubr.msk.bf16.mxu1 %vm7239_vm2, %v17855_v41  ;;  %v17858_v63 = vld [vmem:[%s18941_s17 + $0x620] sm:$0xff]   ;;  %v17859_v41 = vld [vmem:[%s18941_s17 + $0x930] sm:$0xff]  }
 0x272   : > { %v19835_v42 = vpop.f32.mrb[84].mxu0  ;;  %v19837_v26 = vpop.f32.mrb[84].mxu1 }
 0x273   : > { %22585 = vst [vmem:[#allocation126_spill] sm:$0xff] %v19835_v42  ;;  %22586 = vst [vmem:[#allocation127_spill] sm:$0xff] %v19837_v26  ;;  %v19839_v29 = vpop.f32.mrb[85].mxu0  ;;  %v19841_v10 = vpop.f32.mrb[85].mxu1  ;;  %v17864_v42 = vld [vmem:[%s18941_s17 + $0x638] sm:$0xff]  }
 0x274   : > { %22587 = vst [vmem:[#allocation128_spill] sm:$0xff] %v19839_v29  ;;  %22588 = vst [vmem:[#allocation129_spill] sm:$0xff] %v19841_v10  ;;  %v19847_v21 = vpop.f32.mrb[86].mxu0  ;;  %v19849_v37 = vpop.f32.mrb[86].mxu1 }
 0x275   : > { %22589 = vst [vmem:[#allocation130_spill] sm:$0xff] %v19847_v21  ;;  %22590 = vst [vmem:[#allocation131_spill] sm:$0xff] %v19849_v37  ;;  %v19855_v14 = vpop.f32.mrb[87].mxu0  ;;  %v19857_v57 = vpop.f32.mrb[87].mxu1  ;;  %v17861_v37 = vld [vmem:[%s18941_s17 + $0x938] sm:$0xff]  }
 0x276   : > { %22591 = vst [vmem:[#allocation132_spill] sm:$0xff] %v19855_v14  ;;  %22592 = vst [vmem:[#allocation133_spill] sm:$0xff] %v19857_v57 }
 0x277   : > { %17009 = vmatmul.mubr.msk.bf16.gmra.mrb[192].mxu0 %vm7239_vm2, %v17856_v13  ;;  %17215 = vmatmul.mubr.msk.bf16.gmra.mrb[192].mxu1 %vm7239_vm2, %v17857_v5 }
 0x278   : > { %17228 = vmatprep.mubr.msk.bf16.mxu0 %vm7239_vm2, %v17858_v63  ;;  %17434 = vmatprep.mubr.msk.bf16.mxu1 %vm7239_vm2, %v17859_v41  ;;  %v17862_v63 = vld [vmem:[%s18941_s17 + $0x630] sm:$0xff]   ;;  %v17863_v41 = vld [vmem:[%s18941_s17 + $0x940] sm:$0xff]  }
 0x27a   : > { %v19867_v40 = vpop.f32.mrb[88].mxu0  ;;  %v19869_v10 = vpop.f32.mrb[88].mxu1 }
 0x27b   : > { %22593 = vst [vmem:[#allocation134_spill] sm:$0xff] %v19867_v40  ;;  %22594 = vst [vmem:[#allocation135_spill] sm:$0xff] %v19869_v10  ;;  %v19871_v29 = vpop.f32.mrb[89].mxu0  ;;  %v19873_v26 = vpop.f32.mrb[89].mxu1  ;;  %v17868_v40 = vld [vmem:[%s18941_s17 + $0x648] sm:$0xff]  }
 0x27c   : > { %22595 = vst [vmem:[#allocation136_spill] sm:$0xff] %v19871_v29  ;;  %22596 = vst [vmem:[#allocation137_spill] sm:$0xff] %v19873_v26  ;;  %v19879_v13 = vpop.f32.mrb[90].mxu0  ;;  %v19881_v5 = vpop.f32.mrb[90].mxu1 }
 0x27d   : > { %22597 = vst [vmem:[#allocation138_spill] sm:$0xff] %v19879_v13  ;;  %22598 = vst [vmem:[#allocation139_spill] sm:$0xff] %v19881_v5  ;;  %v19887_v14 = vpop.f32.mrb[91].mxu0  ;;  %v19889_v21 = vpop.f32.mrb[91].mxu1  ;;  %v17865_v5 = vld [vmem:[%s18941_s17 + $0x948] sm:$0xff]  }
 0x27e   : > { %22599 = vst [vmem:[#allocation140_spill] sm:$0xff] %v19887_v14  ;;  %22600 = vst [vmem:[#allocation141_spill] sm:$0xff] %v19889_v21 }
 0x27f   : > { %17229 = vmatmul.mubr.msk.bf16.vlgmr.msra.gmra.mrb[196].mxu0 %vm7239_vm2, %v17860_v24  ;;  %17435 = vmatmul.mubr.msk.bf16.vlgmr.msra.gmra.mrb[196].mxu1 %vm7239_vm2, %v17861_v37 }
 0x280   : > { %17232 = vmatprep.mubr.msk.bf16.mxu0 %vm7239_vm2, %v17862_v63  ;;  %17438 = vmatprep.mubr.msk.bf16.mxu1 %vm7239_vm2, %v17863_v41  ;;  %v17866_v63 = vld [vmem:[%s18941_s17 + $0x640] sm:$0xff]   ;;  %v17867_v41 = vld [vmem:[%s18941_s17 + $0x950] sm:$0xff]  }
 0x282   : > { %v19899_v57 = vpop.f32.mrb[92].mxu0  ;;  %v19901_v26 = vpop.f32.mrb[92].mxu1 }
 0x283   : > { %22601 = vst [vmem:[#allocation142_spill] sm:$0xff] %v19899_v57  ;;  %22602 = vst [vmem:[#allocation143_spill] sm:$0xff] %v19901_v26  ;;  %v19903_v29 = vpop.f32.mrb[93].mxu0  ;;  %v19905_v10 = vpop.f32.mrb[93].mxu1  ;;  %v17872_v57 = vld [vmem:[%s18941_s17 + $0x658] sm:$0xff]  }
 0x284   : > { %22603 = vst [vmem:[#allocation144_spill] sm:$0xff] %v19903_v29  ;;  %22604 = vst [vmem:[#allocation145_spill] sm:$0xff] %v19905_v10  ;;  %v19911_v24 = vpop.f32.mrb[94].mxu0  ;;  %v19913_v37 = vpop.f32.mrb[94].mxu1 }
 0x285   : > { %22605 = vst [vmem:[#allocation146_spill] sm:$0xff] %v19911_v24  ;;  %22606 = vst [vmem:[#allocation147_spill] sm:$0xff] %v19913_v37  ;;  %v19919_v14 = vpop.f32.mrb[95].mxu0  ;;  %v19921_v13 = vpop.f32.mrb[95].mxu1  ;;  %v17869_v37 = vld [vmem:[%s18941_s17 + $0x958] sm:$0xff]  }
 0x286   : > { %22607 = vst [vmem:[#allocation148_spill] sm:$0xff] %v19919_v14  ;;  %22608 = vst [vmem:[#allocation149_spill] sm:$0xff] %v19921_v13 }
 0x287   : > { %17233 = vmatmul.mubr.msk.bf16.gmra.mrb[200].mxu0 %vm7239_vm2, %v17864_v42  ;;  %17439 = vmatmul.mubr.msk.bf16.gmra.mrb[200].mxu1 %vm7239_vm2, %v17865_v5 }
 0x288   : > { %17236 = vmatprep.mubr.msk.bf16.mxu0 %vm7239_vm2, %v17866_v63  ;;  %17442 = vmatprep.mubr.msk.bf16.mxu1 %vm7239_vm2, %v17867_v41  ;;  %v17870_v63 = vld [vmem:[%s18941_s17 + $0x650] sm:$0xff]   ;;  %v17871_v41 = vld [vmem:[%s18941_s17 + $0x960] sm:$0xff]  }
 0x28a   : > { %v19931_v21 = vpop.f32.mrb[96].mxu0  ;;  %v19933_v10 = vpop.f32.mrb[96].mxu1 }
 0x28b   : > { %22609 = vst [vmem:[#allocation150_spill] sm:$0xff] %v19931_v21  ;;  %22610 = vst [vmem:[#allocation151_spill] sm:$0xff] %v19933_v10  ;;  %v19935_v29 = vpop.f32.mrb[97].mxu0  ;;  %v19937_v26 = vpop.f32.mrb[97].mxu1  ;;  %v17876_v21 = vld [vmem:[%s18941_s17 + $0x668] sm:$0xff]  }
 0x28c   : > { %22611 = vst [vmem:[#allocation152_spill] sm:$0xff] %v19935_v29  ;;  %22612 = vst [vmem:[#allocation153_spill] sm:$0xff] %v19937_v26  ;;  %v19943_v42 = vpop.f32.mrb[98].mxu0  ;;  %v19945_v5 = vpop.f32.mrb[98].mxu1 }
 0x28d   : > { %22613 = vst [vmem:[#allocation154_spill] sm:$0xff] %v19943_v42  ;;  %22614 = vst [vmem:[#allocation155_spill] sm:$0xff] %v19945_v5  ;;  %v19951_v14 = vpop.f32.mrb[99].mxu0  ;;  %v19953_v24 = vpop.f32.mrb[99].mxu1  ;;  %v17873_v5 = vld [vmem:[%s18941_s17 + $0x968] sm:$0xff]  }
 0x28e   : > { %22615 = vst [vmem:[#allocation156_spill] sm:$0xff] %v19951_v14  ;;  %22616 = vst [vmem:[#allocation157_spill] sm:$0xff] %v19953_v24 }
 0x28f   : > { %17237 = vmatmul.mubr.msk.bf16.gmra.mrb[204].mxu0 %vm7239_vm2, %v17868_v40  ;;  %17443 = vmatmul.mubr.msk.bf16.gmra.mrb[204].mxu1 %vm7239_vm2, %v17869_v37 }
 0x290   : > { %17240 = vmatprep.mubr.msk.bf16.mxu0 %vm7239_vm2, %v17870_v63  ;;  %17446 = vmatprep.mubr.msk.bf16.mxu1 %vm7239_vm2, %v17871_v41  ;;  %v17874_v63 = vld [vmem:[%s18941_s17 + $0x660] sm:$0xff]   ;;  %v17875_v41 = vld [vmem:[%s18941_s17 + $0x970] sm:$0xff]  }
 0x292   : > { %v19963_v13 = vpop.f32.mrb[100].mxu0  ;;  %v19965_v26 = vpop.f32.mrb[100].mxu1 }
 0x293   : > { %22617 = vst [vmem:[#allocation158_spill] sm:$0xff] %v19963_v13  ;;  %22618 = vst [vmem:[#allocation159_spill] sm:$0xff] %v19965_v26  ;;  %v19967_v29 = vpop.f32.mrb[101].mxu0  ;;  %v19969_v10 = vpop.f32.mrb[101].mxu1  ;;  %v17880_v13 = vld [vmem:[%s18941_s17 + $0x678] sm:$0xff]  }
 0x294   : > { %22619 = vst [vmem:[#allocation160_spill] sm:$0xff] %v19967_v29  ;;  %22620 = vst [vmem:[#allocation161_spill] sm:$0xff] %v19969_v10  ;;  %v19975_v40 = vpop.f32.mrb[102].mxu0  ;;  %v19977_v37 = vpop.f32.mrb[102].mxu1 }
 0x295   : > { %22621 = vst [vmem:[#allocation162_spill] sm:$0xff] %v19975_v40  ;;  %22622 = vst [vmem:[#allocation163_spill] sm:$0xff] %v19977_v37  ;;  %v19983_v14 = vpop.f32.mrb[103].mxu0  ;;  %v19985_v42 = vpop.f32.mrb[103].mxu1  ;;  %v17877_v37 = vld [vmem:[%s18941_s17 + $0x978] sm:$0xff]  }
 0x296   : > { %22623 = vst [vmem:[#allocation164_spill] sm:$0xff] %v19983_v14  ;;  %22624 = vst [vmem:[#allocation165_spill] sm:$0xff] %v19985_v42 }
 0x297   : > { %17241 = vmatmul.mubr.msk.bf16.gmra.mrb[208].mxu0 %vm7239_vm2, %v17872_v57  ;;  %17447 = vmatmul.mubr.msk.bf16.gmra.mrb[208].mxu1 %vm7239_vm2, %v17873_v5 }
 0x298   : > { %17244 = vmatprep.mubr.msk.bf16.mxu0 %vm7239_vm2, %v17874_v63  ;;  %17450 = vmatprep.mubr.msk.bf16.mxu1 %vm7239_vm2, %v17875_v41  ;;  %v17878_v63 = vld [vmem:[%s18941_s17 + $0x670] sm:$0xff]   ;;  %v17879_v41 = vld [vmem:[%s18941_s17 + $0x980] sm:$0xff]  }
 0x29a   : > { %v19995_v24 = vpop.f32.mrb[104].mxu0  ;;  %v19997_v10 = vpop.f32.mrb[104].mxu1 }
 0x29b   : > { %22625 = vst [vmem:[#allocation166_spill] sm:$0xff] %v19995_v24  ;;  %22626 = vst [vmem:[#allocation167_spill] sm:$0xff] %v19997_v10  ;;  %v19999_v29 = vpop.f32.mrb[105].mxu0  ;;  %v20001_v26 = vpop.f32.mrb[105].mxu1  ;;  %v17884_v24 = vld [vmem:[%s18941_s17 + $0x688] sm:$0xff]  }
 0x29c   : > { %22627 = vst [vmem:[#allocation168_spill] sm:$0xff] %v19999_v29  ;;  %22628 = vst [vmem:[#allocation169_spill] sm:$0xff] %v20001_v26  ;;  %v20007_v57 = vpop.f32.mrb[106].mxu0  ;;  %v20009_v5 = vpop.f32.mrb[106].mxu1 }
 0x29d   : > { %22629 = vst [vmem:[#allocation170_spill] sm:$0xff] %v20007_v57  ;;  %22630 = vst [vmem:[#allocation171_spill] sm:$0xff] %v20009_v5  ;;  %v20015_v14 = vpop.f32.mrb[107].mxu0  ;;  %v20017_v40 = vpop.f32.mrb[107].mxu1  ;;  %v17881_v5 = vld [vmem:[%s18941_s17 + $0x988] sm:$0xff]  }
 0x29e   : > { %22631 = vst [vmem:[#allocation172_spill] sm:$0xff] %v20015_v14  ;;  %22632 = vst [vmem:[#allocation173_spill] sm:$0xff] %v20017_v40 }
 0x29f   : > { %17245 = vmatmul.mubr.msk.bf16.gmra.mrb[212].mxu0 %vm7239_vm2, %v17876_v21  ;;  %17451 = vmatmul.mubr.msk.bf16.gmra.mrb[212].mxu1 %vm7239_vm2, %v17877_v37 }
 0x2a0   : > { %17248 = vmatprep.mubr.msk.bf16.mxu0 %vm7239_vm2, %v17878_v63  ;;  %17454 = vmatprep.mubr.msk.bf16.mxu1 %vm7239_vm2, %v17879_v41  ;;  %v17882_v63 = vld [vmem:[%s18941_s17 + $0x680] sm:$0xff]   ;;  %v17883_v41 = vld [vmem:[%s18941_s17 + $0x990] sm:$0xff]  }
 0x2a2   : > { %v20027_v42 = vpop.f32.mrb[108].mxu0  ;;  %v20029_v26 = vpop.f32.mrb[108].mxu1 }
 0x2a3   : > { %22633 = vst [vmem:[#allocation174_spill] sm:$0xff] %v20027_v42  ;;  %22634 = vst [vmem:[#allocation175_spill] sm:$0xff] %v20029_v26  ;;  %v20031_v29 = vpop.f32.mrb[109].mxu0  ;;  %v20033_v10 = vpop.f32.mrb[109].mxu1  ;;  %v17888_v42 = vld [vmem:[%s18941_s17 + $0x698] sm:$0xff]  }
 0x2a4   : > { %22635 = vst [vmem:[#allocation176_spill] sm:$0xff] %v20031_v29  ;;  %22636 = vst [vmem:[#allocation177_spill] sm:$0xff] %v20033_v10  ;;  %v20039_v21 = vpop.f32.mrb[110].mxu0  ;;  %v20041_v37 = vpop.f32.mrb[110].mxu1 }
 0x2a5   : > { %22637 = vst [vmem:[#allocation178_spill] sm:$0xff] %v20039_v21  ;;  %22638 = vst [vmem:[#allocation179_spill] sm:$0xff] %v20041_v37  ;;  %v20047_v14 = vpop.f32.mrb[111].mxu0  ;;  %v20049_v57 = vpop.f32.mrb[111].mxu1  ;;  %v17885_v37 = vld [vmem:[%s18941_s17 + $0x998] sm:$0xff]  }
 0x2a6   : > { %22639 = vst [vmem:[#allocation180_spill] sm:$0xff] %v20047_v14  ;;  %22640 = vst [vmem:[#allocation181_spill] sm:$0xff] %v20049_v57 }
 0x2a7   : > { %17249 = vmatmul.mubr.msk.bf16.gmra.mrb[216].mxu0 %vm7239_vm2, %v17880_v13  ;;  %17455 = vmatmul.mubr.msk.bf16.gmra.mrb[216].mxu1 %vm7239_vm2, %v17881_v5 }
 0x2a8   : > { %17252 = vmatprep.mubr.msk.bf16.mxu0 %vm7239_vm2, %v17882_v63  ;;  %17458 = vmatprep.mubr.msk.bf16.mxu1 %vm7239_vm2, %v17883_v41  ;;  %v17886_v63 = vld [vmem:[%s18941_s17 + $0x690] sm:$0xff]   ;;  %v17887_v41 = vld [vmem:[%s18941_s17 + $0x9a0] sm:$0xff]  }
 0x2aa   : > { %v20059_v40 = vpop.f32.mrb[112].mxu0  ;;  %v20061_v10 = vpop.f32.mrb[112].mxu1 }
 0x2ab   : > { %22641 = vst [vmem:[#allocation182_spill] sm:$0xff] %v20059_v40  ;;  %22642 = vst [vmem:[#allocation183_spill] sm:$0xff] %v20061_v10  ;;  %v20063_v29 = vpop.f32.mrb[113].mxu0  ;;  %v20065_v26 = vpop.f32.mrb[113].mxu1  ;;  %v17892_v40 = vld [vmem:[%s18941_s17 + $0x6a8] sm:$0xff]  }
 0x2ac   : > { %22643 = vst [vmem:[#allocation184_spill] sm:$0xff] %v20063_v29  ;;  %22644 = vst [vmem:[#allocation185_spill] sm:$0xff] %v20065_v26  ;;  %v20071_v13 = vpop.f32.mrb[114].mxu0  ;;  %v20073_v5 = vpop.f32.mrb[114].mxu1 }
 0x2ad   : > { %22645 = vst [vmem:[#allocation186_spill] sm:$0xff] %v20071_v13  ;;  %22646 = vst [vmem:[#allocation187_spill] sm:$0xff] %v20073_v5  ;;  %v20079_v14 = vpop.f32.mrb[115].mxu0  ;;  %v20081_v21 = vpop.f32.mrb[115].mxu1  ;;  %v17889_v5 = vld [vmem:[%s18941_s17 + $0x9a8] sm:$0xff]  }
 0x2ae   : > { %22647 = vst [vmem:[#allocation188_spill] sm:$0xff] %v20079_v14  ;;  %22648 = vst [vmem:[#allocation189_spill] sm:$0xff] %v20081_v21 }
 0x2af   : > { %17253 = vmatmul.mubr.msk.bf16.gmra.mrb[220].mxu0 %vm7239_vm2, %v17884_v24  ;;  %17459 = vmatmul.mubr.msk.bf16.gmra.mrb[220].mxu1 %vm7239_vm2, %v17885_v37 }
 0x2b0   : > { %17256 = vmatprep.mubr.msk.bf16.mxu0 %vm7239_vm2, %v17886_v63  ;;  %17462 = vmatprep.mubr.msk.bf16.mxu1 %vm7239_vm2, %v17887_v41  ;;  %v17890_v63 = vld [vmem:[%s18941_s17 + $0x6a0] sm:$0xff]   ;;  %v17891_v41 = vld [vmem:[%s18941_s17 + $0x9b0] sm:$0xff]  }
 0x2b2   : > { %v20091_v57 = vpop.f32.mrb[116].mxu0  ;;  %v20093_v26 = vpop.f32.mrb[116].mxu1 }
 0x2b3   : > { %22649 = vst [vmem:[#allocation190_spill] sm:$0xff] %v20091_v57  ;;  %22650 = vst [vmem:[#allocation191_spill] sm:$0xff] %v20093_v26  ;;  %v20095_v29 = vpop.f32.mrb[117].mxu0  ;;  %v20097_v10 = vpop.f32.mrb[117].mxu1  ;;  %v17896_v57 = vld [vmem:[%s18941_s17 + $0x6b8] sm:$0xff]  }
 0x2b4   : > { %22651 = vst [vmem:[#allocation192_spill] sm:$0xff] %v20095_v29  ;;  %22652 = vst [vmem:[#allocation193_spill] sm:$0xff] %v20097_v10  ;;  %v20103_v24 = vpop.f32.mrb[118].mxu0  ;;  %v20105_v37 = vpop.f32.mrb[118].mxu1 }
 0x2b5   : > { %22653 = vst [vmem:[#allocation194_spill] sm:$0xff] %v20103_v24  ;;  %22654 = vst [vmem:[#allocation195_spill] sm:$0xff] %v20105_v37  ;;  %v20111_v14 = vpop.f32.mrb[119].mxu0  ;;  %v20113_v13 = vpop.f32.mrb[119].mxu1  ;;  %v17893_v37 = vld [vmem:[%s18941_s17 + $0x9b8] sm:$0xff]  }
 0x2b6   : > { %22655 = vst [vmem:[#allocation196_spill] sm:$0xff] %v20111_v14  ;;  %22656 = vst [vmem:[#allocation197_spill] sm:$0xff] %v20113_v13 }
 0x2b7   : > { %17257 = vmatmul.mubr.msk.bf16.gmra.mrb[224].mxu0 %vm7239_vm2, %v17888_v42  ;;  %17463 = vmatmul.mubr.msk.bf16.gmra.mrb[224].mxu1 %vm7239_vm2, %v17889_v5 }
 0x2b8   : > { %17260 = vmatprep.mubr.msk.bf16.mxu0 %vm7239_vm2, %v17890_v63  ;;  %17466 = vmatprep.mubr.msk.bf16.mxu1 %vm7239_vm2, %v17891_v41  ;;  %v17894_v63 = vld [vmem:[%s18941_s17 + $0x6b0] sm:$0xff]   ;;  %v17895_v41 = vld [vmem:[%s18941_s17 + $0x9c0] sm:$0xff]  }
 0x2ba   : > { %v20123_v21 = vpop.f32.mrb[120].mxu0  ;;  %v20125_v10 = vpop.f32.mrb[120].mxu1 }
 0x2bb   : > { %22657 = vst [vmem:[#allocation198_spill] sm:$0xff] %v20123_v21  ;;  %22658 = vst [vmem:[#allocation199_spill] sm:$0xff] %v20125_v10  ;;  %v20127_v29 = vpop.f32.mrb[121].mxu0  ;;  %v20129_v26 = vpop.f32.mrb[121].mxu1  ;;  %v17900_v21 = vld [vmem:[%s18941_s17 + $0x6c8] sm:$0xff]  }
 0x2bc   : > { %22659 = vst [vmem:[#allocation200_spill] sm:$0xff] %v20127_v29  ;;  %22660 = vst [vmem:[#allocation201_spill] sm:$0xff] %v20129_v26  ;;  %v20135_v42 = vpop.f32.mrb[122].mxu0  ;;  %v20137_v5 = vpop.f32.mrb[122].mxu1 }
 0x2bd   : > { %22661 = vst [vmem:[#allocation202_spill] sm:$0xff] %v20135_v42  ;;  %22662 = vst [vmem:[#allocation203_spill] sm:$0xff] %v20137_v5  ;;  %v20143_v14 = vpop.f32.mrb[123].mxu0  ;;  %v20145_v24 = vpop.f32.mrb[123].mxu1  ;;  %v17897_v5 = vld [vmem:[%s18941_s17 + $0x9c8] sm:$0xff]  }
 0x2be   : > { %22663 = vst [vmem:[#allocation204_spill] sm:$0xff] %v20143_v14  ;;  %22664 = vst [vmem:[#allocation205_spill] sm:$0xff] %v20145_v24 }
 0x2bf   : > { %17261 = vmatmul.mubr.msk.bf16.gmra.mrb[228].mxu0 %vm7239_vm2, %v17892_v40  ;;  %17467 = vmatmul.mubr.msk.bf16.gmra.mrb[228].mxu1 %vm7239_vm2, %v17893_v37 }
 0x2c0   : > { %17264 = vmatprep.mubr.msk.bf16.mxu0 %vm7239_vm2, %v17894_v63  ;;  %17470 = vmatprep.mubr.msk.bf16.mxu1 %vm7239_vm2, %v17895_v41  ;;  %v17898_v63 = vld [vmem:[%s18941_s17 + $0x6c0] sm:$0xff]   ;;  %v17899_v41 = vld [vmem:[%s18941_s17 + $0x9d0] sm:$0xff]  }
 0x2c2   : > { %v20155_v13 = vpop.f32.mrb[124].mxu0  ;;  %v20157_v26 = vpop.f32.mrb[124].mxu1 }
 0x2c3   : > { %22665 = vst [vmem:[#allocation206_spill] sm:$0xff] %v20155_v13  ;;  %22666 = vst [vmem:[#allocation207_spill] sm:$0xff] %v20157_v26  ;;  %v20159_v29 = vpop.f32.mrb[125].mxu0  ;;  %v20161_v10 = vpop.f32.mrb[125].mxu1  ;;  %v17904_v13 = vld [vmem:[%s18941_s17 + $0x6d8] sm:$0xff]  }
 0x2c4   : > { %22667 = vst [vmem:[#allocation208_spill] sm:$0xff] %v20159_v29  ;;  %22668 = vst [vmem:[#allocation209_spill] sm:$0xff] %v20161_v10  ;;  %v20167_v40 = vpop.f32.mrb[126].mxu0  ;;  %v20169_v37 = vpop.f32.mrb[126].mxu1 }
 0x2c5   : > { %22669 = vst [vmem:[#allocation210_spill] sm:$0xff] %v20167_v40  ;;  %22670 = vst [vmem:[#allocation211_spill] sm:$0xff] %v20169_v37  ;;  %v20175_v14 = vpop.f32.mrb[127].mxu0  ;;  %v20177_v42 = vpop.f32.mrb[127].mxu1  ;;  %v17901_v37 = vld [vmem:[%s18941_s17 + $0x9d8] sm:$0xff]  }
 0x2c6   : > { %22671 = vst [vmem:[#allocation212_spill] sm:$0xff] %v20175_v14  ;;  %22672 = vst [vmem:[#allocation213_spill] sm:$0xff] %v20177_v42 }
 0x2c7   : > { %17265 = vmatmul.mubr.msk.bf16.gmra.mrb[232].mxu0 %vm7239_vm2, %v17896_v57  ;;  %17471 = vmatmul.mubr.msk.bf16.gmra.mrb[232].mxu1 %vm7239_vm2, %v17897_v5 }
 0x2c8   : > { %17268 = vmatprep.mubr.msk.bf16.mxu0 %vm7239_vm2, %v17898_v63  ;;  %17474 = vmatprep.mubr.msk.bf16.mxu1 %vm7239_vm2, %v17899_v41  ;;  %v17902_v63 = vld [vmem:[%s18941_s17 + $0x6d0] sm:$0xff]   ;;  %v17903_v41 = vld [vmem:[%s18941_s17 + $0x9e0] sm:$0xff]  }
 0x2ca   : > { %v20187_v24 = vpop.f32.mrb[128].mxu0  ;;  %v20189_v10 = vpop.f32.mrb[128].mxu1 }
 0x2cb   : > { %22673 = vst [vmem:[#allocation214_spill] sm:$0xff] %v20187_v24  ;;  %22674 = vst [vmem:[#allocation215_spill] sm:$0xff] %v20189_v10  ;;  %v20191_v29 = vpop.f32.mrb[129].mxu0  ;;  %v20193_v26 = vpop.f32.mrb[129].mxu1 }
 0x2cc   : > { %22675 = vst [vmem:[#allocation216_spill] sm:$0xff] %v20191_v29  ;;  %22676 = vst [vmem:[#allocation217_spill] sm:$0xff] %v20193_v26  ;;  %v20199_v57 = vpop.f32.mrb[130].mxu0  ;;  %v20201_v5 = vpop.f32.mrb[130].mxu1 }
 0x2cd   : > { %22677 = vst [vmem:[#allocation218_spill] sm:$0xff] %v20199_v57  ;;  %22678 = vst [vmem:[#allocation219_spill] sm:$0xff] %v20201_v5  ;;  %v20207_v14 = vpop.f32.mrb[131].mxu0  ;;  %v20209_v40 = vpop.f32.mrb[131].mxu1  ;;  %v17905_v5 = vld [vmem:[%s18941_s17 + $0x9e8] sm:$0xff]  }
 0x2ce   : > { %22679 = vst [vmem:[#allocation220_spill] sm:$0xff] %v20207_v14  ;;  %22680 = vst [vmem:[#allocation221_spill] sm:$0xff] %v20209_v40 }
 0x2cf   : > { %17269 = vmatmul.mubr.msk.bf16.gmra.mrb[236].mxu0 %vm7239_vm2, %v17900_v21  ;;  %17475 = vmatmul.mubr.msk.bf16.gmra.mrb[236].mxu1 %vm7239_vm2, %v17901_v37 }
 0x2d0   : > { %17272 = vmatprep.mubr.msk.bf16.mxu0 %vm7239_vm2, %v17902_v63  ;;  %17478 = vmatprep.mubr.msk.bf16.mxu1 %vm7239_vm2, %v17903_v41  ;;  %v17906_v63 = vld [vmem:[%s18941_s17 + $0x6e0] sm:$0xff]   ;;  %v17907_v41 = vld [vmem:[%s18941_s17 + $0x9f0] sm:$0xff]  }
 0x2d2   : > { %v20219_v42 = vpop.f32.mrb[132].mxu0  ;;  %v20221_v26 = vpop.f32.mrb[132].mxu1 }
 0x2d3   : > { %22681 = vst [vmem:[#allocation222_spill] sm:$0xff] %v20219_v42  ;;  %22682 = vst [vmem:[#allocation223_spill] sm:$0xff] %v20221_v26  ;;  %v20223_v29 = vpop.f32.mrb[133].mxu0  ;;  %v20225_v10 = vpop.f32.mrb[133].mxu1  ;;  %v17970_v26 = vld [vmem:[%s18941_s17 + $0x7e0] sm:$0xff]   ;;  %v17971_v42 = vld [vmem:[%s18941_s17 + $0xaf0] sm:$0xff]  }
 0x2d4   : > { %22683 = vst [vmem:[#allocation224_spill] sm:$0xff] %v20223_v29  ;;  %22684 = vst [vmem:[#allocation225_spill] sm:$0xff] %v20225_v10  ;;  %v20231_v21 = vpop.f32.mrb[134].mxu0  ;;  %v20233_v37 = vpop.f32.mrb[134].mxu1  ;;  %v17912_v29 = vld [vmem:[%s18941_s17 + $0x6f8] sm:$0xff]  }
 0x2d5   : > { %22685 = vst [vmem:[#allocation226_spill] sm:$0xff] %v20231_v21  ;;  %22686 = vst [vmem:[#allocation227_spill] sm:$0xff] %v20233_v37  ;;  %v20239_v14 = vpop.f32.mrb[135].mxu0  ;;  %v20241_v57 = vpop.f32.mrb[135].mxu1 }
 0x2d6   : > { %22687 = vst [vmem:[#allocation228_spill] sm:$0xff] %v20239_v14  ;;  %22688 = vst [vmem:[#allocation229_spill] sm:$0xff] %v20241_v57  ;;  %v17909_v57 = vld [vmem:[%s18941_s17 + $0x9f8] sm:$0xff]   ;;  %v17911_v14 = vld [vmem:[%s18941_s17 + $0xa00] sm:$0xff]  }
 0x2d7   : > { %17273 = vmatmul.mubr.msk.bf16.gmra.mrb[240].mxu0 %vm7239_vm2, %v17904_v13  ;;  %17479 = vmatmul.mubr.msk.bf16.gmra.mrb[240].mxu1 %vm7239_vm2, %v17905_v5 }
 0x2d8   : > { %17276 = vmatprep.mubr.msk.bf16.mxu0 %vm7239_vm2, %v17906_v63  ;;  %17482 = vmatprep.mubr.msk.bf16.mxu1 %vm7239_vm2, %v17907_v41  ;;  %v17910_v41 = vld [vmem:[%s18941_s17 + $0x6f0] sm:$0xff]  }
 0x2da   : > { %v20251_v40 = vpop.f32.mrb[136].mxu0  ;;  %v20253_v10 = vpop.f32.mrb[136].mxu1 }
 0x2db   : > { %22689 = vst [vmem:[#allocation230_spill] sm:$0xff] %v20251_v40  ;;  %22690 = vst [vmem:[#allocation231_spill] sm:$0xff] %v20253_v10  ;;  %v20257_v37 = vpop.f32.mrb[137].mxu0  ;;  %v20259_v21 = vpop.f32.mrb[137].mxu1 }
 0x2dc   : > { %22691 = vst [vmem:[#allocation232_spill] sm:$0xff] %v20257_v37  ;;  %22692 = vst [vmem:[#allocation233_spill] sm:$0xff] %v20259_v21  ;;  %v20265_v5 = vpop.f32.mrb[138].mxu0  ;;  %v20267_v63 = vpop.f32.mrb[138].mxu1  ;;  %v17916_v37 = vld [vmem:[%s18941_s17 + $0x708] sm:$0xff]  }
 0x2dd   : > { %22693 = vst [vmem:[#allocation234_spill] sm:$0xff] %v20265_v5  ;;  %22694 = vst [vmem:[#allocation235_spill] sm:$0xff] %v20267_v63  ;;  %v20273_v10 = vpop.f32.mrb[139].mxu0  ;;  %v20275_v40 = vpop.f32.mrb[139].mxu1 }
 0x2de   : > { %22695 = vst [vmem:[#allocation236_spill] sm:$0xff] %v20273_v10  ;;  %22696 = vst [vmem:[#allocation237_spill] sm:$0xff] %v20275_v40  ;;  %v17913_v40 = vld [vmem:[%s18941_s17 + $0xa08] sm:$0xff]   ;;  %v17915_v10 = vld [vmem:[%s18941_s17 + $0xa10] sm:$0xff]  }
 0x2df   : > { %17277 = vmatmul.mubr.msk.bf16.gmra.mrb[244].mxu0 %vm7239_vm2, %v17908_v53  ;;  %17483 = vmatmul.mubr.msk.bf16.gmra.mrb[244].mxu1 %vm7239_vm2, %v17909_v57 }
 0x2e0   : > { %17280 = vmatprep.mubr.msk.bf16.mxu0 %vm7239_vm2, %v17910_v41  ;;  %17486 = vmatprep.mubr.msk.bf16.mxu1 %vm7239_vm2, %v17911_v14  ;;  %v17914_v14 = vld [vmem:[%s18941_s17 + $0x700] sm:$0xff]  }
 0x2e2   : > { %v20283_v13 = vpop.f32.mrb[140].mxu0  ;;  %v20285_v24 = vpop.f32.mrb[140].mxu1 }
 0x2e3   : > { %22697 = vst [vmem:[#allocation238_spill] sm:$0xff] %v20283_v13  ;;  %22698 = vst [vmem:[#allocation239_spill] sm:$0xff] %v20285_v24  ;;  %v20289_v5 = vpop.f32.mrb[141].mxu0  ;;  %v20291_v21 = vpop.f32.mrb[141].mxu1 }
 0x2e4   : > { %22699 = vst [vmem:[#allocation240_spill] sm:$0xff] %v20289_v5  ;;  %22700 = vst [vmem:[#allocation241_spill] sm:$0xff] %v20291_v21  ;;  %v20297_v57 = vpop.f32.mrb[142].mxu0  ;;  %v20299_v41 = vpop.f32.mrb[142].mxu1  ;;  %v17920_v5 = vld [vmem:[%s18941_s17 + $0x718] sm:$0xff]  }
 0x2e5   : > { %22701 = vst [vmem:[#allocation242_spill] sm:$0xff] %v20297_v57  ;;  %22702 = vst [vmem:[#allocation243_spill] sm:$0xff] %v20299_v41  ;;  %v20305_v24 = vpop.f32.mrb[143].mxu0  ;;  %v20307_v13 = vpop.f32.mrb[143].mxu1 }
 0x2e6   : > { %22703 = vst [vmem:[#allocation244_spill] sm:$0xff] %v20305_v24  ;;  %22704 = vst [vmem:[#allocation245_spill] sm:$0xff] %v20307_v13  ;;  %v17917_v13 = vld [vmem:[%s18941_s17 + $0xa18] sm:$0xff]   ;;  %v17919_v24 = vld [vmem:[%s18941_s17 + $0xa20] sm:$0xff]  }
 0x2e7   : > { %17281 = vmatmul.mubr.msk.bf16.gmra.mrb[248].mxu0 %vm7239_vm2, %v17912_v29  ;;  %17487 = vmatmul.mubr.msk.bf16.gmra.mrb[248].mxu1 %vm7239_vm2, %v17913_v40 }
 0x2e8   : > { %17284 = vmatprep.mubr.msk.bf16.mxu0 %vm7239_vm2, %v17914_v14  ;;  %17490 = vmatprep.mubr.msk.bf16.mxu1 %vm7239_vm2, %v17915_v10  ;;  %v17918_v10 = vld [vmem:[%s18941_s17 + $0x710] sm:$0xff]  }
 0x2ea   : > { %v20315_v53 = vpop.f32.mrb[144].mxu0  ;;  %v20317_v63 = vpop.f32.mrb[144].mxu1 }
 0x2eb   : > { %22705 = vst [vmem:[#allocation246_spill] sm:$0xff] %v20315_v53  ;;  %22706 = vst [vmem:[#allocation247_spill] sm:$0xff] %v20317_v63  ;;  %v20321_v57 = vpop.f32.mrb[145].mxu0  ;;  %v20323_v21 = vpop.f32.mrb[145].mxu1 }
 0x2ec   : > { %22707 = vst [vmem:[#allocation248_spill] sm:$0xff] %v20321_v57  ;;  %22708 = vst [vmem:[#allocation249_spill] sm:$0xff] %v20323_v21  ;;  %v20329_v40 = vpop.f32.mrb[146].mxu0  ;;  %v20331_v14 = vpop.f32.mrb[146].mxu1  ;;  %v17924_v57 = vld [vmem:[%s18941_s17 + $0x728] sm:$0xff]  }
 0x2ed   : > { %22709 = vst [vmem:[#allocation250_spill] sm:$0xff] %v20329_v40  ;;  %22710 = vst [vmem:[#allocation251_spill] sm:$0xff] %v20331_v14  ;;  %v20337_v63 = vpop.f32.mrb[147].mxu0  ;;  %v20339_v53 = vpop.f32.mrb[147].mxu1 }
 0x2ee   : > { %22711 = vst [vmem:[#allocation252_spill] sm:$0xff] %v20337_v63  ;;  %22712 = vst [vmem:[#allocation253_spill] sm:$0xff] %v20339_v53  ;;  %v17921_v53 = vld [vmem:[%s18941_s17 + $0xa28] sm:$0xff]   ;;  %v17923_v63 = vld [vmem:[%s18941_s17 + $0xa30] sm:$0xff]  }
 0x2ef   : > { %17285 = vmatmul.mubr.msk.bf16.gmra.mrb[252].mxu0 %vm7239_vm2, %v17916_v37  ;;  %17491 = vmatmul.mubr.msk.bf16.gmra.mrb[252].mxu1 %vm7239_vm2, %v17917_v13 }
 0x2f0   : > { %17288 = vmatprep.mubr.msk.bf16.mxu0 %vm7239_vm2, %v17918_v10  ;;  %17494 = vmatprep.mubr.msk.bf16.mxu1 %vm7239_vm2, %v17919_v24  ;;  %v17922_v24 = vld [vmem:[%s18941_s17 + $0x720] sm:$0xff]  }
 0x2f2   : > { %v20347_v29 = vpop.f32.mrb[148].mxu0  ;;  %v20349_v41 = vpop.f32.mrb[148].mxu1 }
 0x2f3   : > { %22713 = vst [vmem:[#allocation254_spill] sm:$0xff] %v20347_v29  ;;  %22714 = vst [vmem:[#allocation255_spill] sm:$0xff] %v20349_v41  ;;  %v20353_v40 = vpop.f32.mrb[149].mxu0  ;;  %v20355_v21 = vpop.f32.mrb[149].mxu1 }
 0x2f4   : > { %22715 = vst [vmem:[#allocation256_spill] sm:$0xff] %v20353_v40  ;;  %22716 = vst [vmem:[#allocation257_spill] sm:$0xff] %v20355_v21  ;;  %v20361_v13 = vpop.f32.mrb[150].mxu0  ;;  %v20363_v10 = vpop.f32.mrb[150].mxu1  ;;  %v17928_v40 = vld [vmem:[%s18941_s17 + $0x738] sm:$0xff]  }
 0x2f5   : > { %22717 = vst [vmem:[#allocation258_spill] sm:$0xff] %v20361_v13  ;;  %22718 = vst [vmem:[#allocation259_spill] sm:$0xff] %v20363_v10  ;;  %v20369_v41 = vpop.f32.mrb[151].mxu0  ;;  %v20371_v29 = vpop.f32.mrb[151].mxu1 }
 0x2f6   : > { %22719 = vst [vmem:[#allocation260_spill] sm:$0xff] %v20369_v41  ;;  %22720 = vst [vmem:[#allocation261_spill] sm:$0xff] %v20371_v29  ;;  %v17925_v29 = vld [vmem:[%s18941_s17 + $0xa38] sm:$0xff]   ;;  %v17927_v41 = vld [vmem:[%s18941_s17 + $0xa40] sm:$0xff]  }
 0x2f7   : > { %17289 = vmatmul.mubr.msk.bf16.gmra.mrb[0].mxu0 %vm7239_vm2, %v17920_v5  ;;  %17495 = vmatmul.mubr.msk.bf16.gmra.mrb[0].mxu1 %vm7239_vm2, %v17921_v53 }
 0x2f8   : > { %17292 = vmatprep.mubr.msk.bf16.mxu0 %vm7239_vm2, %v17922_v24  ;;  %17498 = vmatprep.mubr.msk.bf16.mxu1 %vm7239_vm2, %v17923_v63  ;;  %v17926_v63 = vld [vmem:[%s18941_s17 + $0x730] sm:$0xff]  }
 0x2fa   : > { %v20379_v37 = vpop.f32.mrb[152].mxu0  ;;  %v20381_v14 = vpop.f32.mrb[152].mxu1 }
 0x2fb   : > { %22721 = vst [vmem:[#allocation262_spill] sm:$0xff] %v20379_v37  ;;  %22722 = vst [vmem:[#allocation263_spill] sm:$0xff] %v20381_v14  ;;  %v20385_v13 = vpop.f32.mrb[153].mxu0  ;;  %v20387_v21 = vpop.f32.mrb[153].mxu1 }
 0x2fc   : > { %22723 = vst [vmem:[#allocation264_spill] sm:$0xff] %v20385_v13  ;;  %22724 = vst [vmem:[#allocation265_spill] sm:$0xff] %v20387_v21  ;;  %v20393_v53 = vpop.f32.mrb[154].mxu0  ;;  %v20395_v24 = vpop.f32.mrb[154].mxu1  ;;  %v17932_v13 = vld [vmem:[%s18941_s17 + $0x748] sm:$0xff]  }
 0x2fd   : > { %22725 = vst [vmem:[#allocation266_spill] sm:$0xff] %v20393_v53  ;;  %22726 = vst [vmem:[#allocation267_spill] sm:$0xff] %v20395_v24  ;;  %v20401_v14 = vpop.f32.mrb[155].mxu0  ;;  %v20403_v37 = vpop.f32.mrb[155].mxu1 }
 0x2fe   : > { %22727 = vst [vmem:[#allocation268_spill] sm:$0xff] %v20401_v14  ;;  %22728 = vst [vmem:[#allocation269_spill] sm:$0xff] %v20403_v37  ;;  %v17929_v37 = vld [vmem:[%s18941_s17 + $0xa48] sm:$0xff]   ;;  %v17931_v14 = vld [vmem:[%s18941_s17 + $0xa50] sm:$0xff]  }
 0x2ff   : > { %17293 = vmatmul.mubr.msk.bf16.gmra.mrb[4].mxu0 %vm7239_vm2, %v17924_v57  ;;  %17499 = vmatmul.mubr.msk.bf16.gmra.mrb[4].mxu1 %vm7239_vm2, %v17925_v29 }
 0x300   : > { %17296 = vmatprep.mubr.msk.bf16.mxu0 %vm7239_vm2, %v17926_v63  ;;  %17502 = vmatprep.mubr.msk.bf16.mxu1 %vm7239_vm2, %v17927_v41  ;;  %v17930_v41 = vld [vmem:[%s18941_s17 + $0x740] sm:$0xff]  }
 0x302   : > { %v20411_v5 = vpop.f32.mrb[156].mxu0  ;;  %v20413_v10 = vpop.f32.mrb[156].mxu1 }
 0x303   : > { %22729 = vst [vmem:[#allocation270_spill] sm:$0xff] %v20411_v5  ;;  %22730 = vst [vmem:[#allocation271_spill] sm:$0xff] %v20413_v10  ;;  %v20417_v53 = vpop.f32.mrb[157].mxu0  ;;  %v20419_v21 = vpop.f32.mrb[157].mxu1 }
 0x304   : > { %22731 = vst [vmem:[#allocation272_spill] sm:$0xff] %v20417_v53  ;;  %22732 = vst [vmem:[#allocation273_spill] sm:$0xff] %v20419_v21  ;;  %v20425_v29 = vpop.f32.mrb[158].mxu0  ;;  %v20427_v63 = vpop.f32.mrb[158].mxu1  ;;  %v17936_v53 = vld [vmem:[%s18941_s17 + $0x758] sm:$0xff]  }
 0x305   : > { %22733 = vst [vmem:[#allocation274_spill] sm:$0xff] %v20425_v29  ;;  %22734 = vst [vmem:[#allocation275_spill] sm:$0xff] %v20427_v63  ;;  %v20433_v10 = vpop.f32.mrb[159].mxu0  ;;  %v20435_v5 = vpop.f32.mrb[159].mxu1 }
 0x306   : > { %22735 = vst [vmem:[#allocation276_spill] sm:$0xff] %v20433_v10  ;;  %22736 = vst [vmem:[#allocation277_spill] sm:$0xff] %v20435_v5  ;;  %v17933_v5 = vld [vmem:[%s18941_s17 + $0xa58] sm:$0xff]   ;;  %v17935_v10 = vld [vmem:[%s18941_s17 + $0xa60] sm:$0xff]  }
 0x307   : > { %17297 = vmatmul.mubr.msk.bf16.gmra.mrb[8].mxu0 %vm7239_vm2, %v17928_v40  ;;  %17503 = vmatmul.mubr.msk.bf16.gmra.mrb[8].mxu1 %vm7239_vm2, %v17929_v37 }
 0x308   : > { %17300 = vmatprep.mubr.msk.bf16.mxu0 %vm7239_vm2, %v17930_v41  ;;  %17506 = vmatprep.mubr.msk.bf16.mxu1 %vm7239_vm2, %v17931_v14  ;;  %v17934_v14 = vld [vmem:[%s18941_s17 + $0x750] sm:$0xff]  }
 0x30a   : > { %v20443_v57 = vpop.f32.mrb[160].mxu0  ;;  %v20445_v24 = vpop.f32.mrb[160].mxu1 }
 0x30b   : > { %22737 = vst [vmem:[#allocation278_spill] sm:$0xff] %v20443_v57  ;;  %22738 = vst [vmem:[#allocation279_spill] sm:$0xff] %v20445_v24  ;;  %v20449_v29 = vpop.f32.mrb[161].mxu0  ;;  %v20451_v21 = vpop.f32.mrb[161].mxu1 }
 0x30c   : > { %22739 = vst [vmem:[#allocation280_spill] sm:$0xff] %v20449_v29  ;;  %22740 = vst [vmem:[#allocation281_spill] sm:$0xff] %v20451_v21  ;;  %v20457_v37 = vpop.f32.mrb[162].mxu0  ;;  %v20459_v41 = vpop.f32.mrb[162].mxu1  ;;  %v17940_v29 = vld [vmem:[%s18941_s17 + $0x768] sm:$0xff]  }
 0x30d   : > { %22741 = vst [vmem:[#allocation282_spill] sm:$0xff] %v20457_v37  ;;  %22742 = vst [vmem:[#allocation283_spill] sm:$0xff] %v20459_v41  ;;  %v20465_v24 = vpop.f32.mrb[163].mxu0  ;;  %v20467_v57 = vpop.f32.mrb[163].mxu1 }
 0x30e   : > { %22743 = vst [vmem:[#allocation284_spill] sm:$0xff] %v20465_v24  ;;  %22744 = vst [vmem:[#allocation285_spill] sm:$0xff] %v20467_v57  ;;  %v17937_v57 = vld [vmem:[%s18941_s17 + $0xa68] sm:$0xff]   ;;  %v17939_v24 = vld [vmem:[%s18941_s17 + $0xa70] sm:$0xff]  }
 0x30f   : > { %17301 = vmatmul.mubr.msk.bf16.gmra.mrb[12].mxu0 %vm7239_vm2, %v17932_v13  ;;  %17507 = vmatmul.mubr.msk.bf16.gmra.mrb[12].mxu1 %vm7239_vm2, %v17933_v5 }
 0x310   : > { %17304 = vmatprep.mubr.msk.bf16.mxu0 %vm7239_vm2, %v17934_v14  ;;  %17510 = vmatprep.mubr.msk.bf16.mxu1 %vm7239_vm2, %v17935_v10  ;;  %v17938_v10 = vld [vmem:[%s18941_s17 + $0x760] sm:$0xff]  }
 0x312   : > { %v20475_v40 = vpop.f32.mrb[164].mxu0  ;;  %v20477_v63 = vpop.f32.mrb[164].mxu1 }
 0x313   : > { %22745 = vst [vmem:[#allocation286_spill] sm:$0xff] %v20475_v40  ;;  %22746 = vst [vmem:[#allocation287_spill] sm:$0xff] %v20477_v63  ;;  %v20481_v37 = vpop.f32.mrb[165].mxu0  ;;  %v20483_v21 = vpop.f32.mrb[165].mxu1 }
 0x314   : > { %22747 = vst [vmem:[#allocation288_spill] sm:$0xff] %v20481_v37  ;;  %22748 = vst [vmem:[#allocation289_spill] sm:$0xff] %v20483_v21  ;;  %v20489_v5 = vpop.f32.mrb[166].mxu0  ;;  %v20491_v14 = vpop.f32.mrb[166].mxu1  ;;  %v17944_v37 = vld [vmem:[%s18941_s17 + $0x778] sm:$0xff]  }
 0x315   : > { %22749 = vst [vmem:[#allocation290_spill] sm:$0xff] %v20489_v5  ;;  %22750 = vst [vmem:[#allocation291_spill] sm:$0xff] %v20491_v14  ;;  %v20497_v63 = vpop.f32.mrb[167].mxu0  ;;  %v20499_v40 = vpop.f32.mrb[167].mxu1 }
 0x316   : > { %22751 = vst [vmem:[#allocation292_spill] sm:$0xff] %v20497_v63  ;;  %22752 = vst [vmem:[#allocation293_spill] sm:$0xff] %v20499_v40  ;;  %v17941_v40 = vld [vmem:[%s18941_s17 + $0xa78] sm:$0xff]   ;;  %v17943_v63 = vld [vmem:[%s18941_s17 + $0xa80] sm:$0xff]  }
 0x317   : > { %17305 = vmatmul.mubr.msk.bf16.gmra.mrb[16].mxu0 %vm7239_vm2, %v17936_v53  ;;  %17511 = vmatmul.mubr.msk.bf16.gmra.mrb[16].mxu1 %vm7239_vm2, %v17937_v57 }
 0x318   : > { %17308 = vmatprep.mubr.msk.bf16.mxu0 %vm7239_vm2, %v17938_v10  ;;  %17514 = vmatprep.mubr.msk.bf16.mxu1 %vm7239_vm2, %v17939_v24  ;;  %v17942_v24 = vld [vmem:[%s18941_s17 + $0x770] sm:$0xff]  }
 0x31a   : > { %v20507_v13 = vpop.f32.mrb[168].mxu0  ;;  %v20509_v41 = vpop.f32.mrb[168].mxu1 }
 0x31b   : > { %22753 = vst [vmem:[#allocation294_spill] sm:$0xff] %v20507_v13  ;;  %22754 = vst [vmem:[#allocation295_spill] sm:$0xff] %v20509_v41  ;;  %v20513_v5 = vpop.f32.mrb[169].mxu0  ;;  %v20515_v21 = vpop.f32.mrb[169].mxu1 }
 0x31c   : > { %22755 = vst [vmem:[#allocation296_spill] sm:$0xff] %v20513_v5  ;;  %22756 = vst [vmem:[#allocation297_spill] sm:$0xff] %v20515_v21  ;;  %v20521_v57 = vpop.f32.mrb[170].mxu0  ;;  %v20523_v10 = vpop.f32.mrb[170].mxu1  ;;  %v17948_v5 = vld [vmem:[%s18941_s17 + $0x788] sm:$0xff]  }
 0x31d   : > { %22757 = vst [vmem:[#allocation298_spill] sm:$0xff] %v20521_v57  ;;  %22758 = vst [vmem:[#allocation299_spill] sm:$0xff] %v20523_v10  ;;  %v20529_v41 = vpop.f32.mrb[171].mxu0  ;;  %v20531_v13 = vpop.f32.mrb[171].mxu1 }
 0x31e   : > { %22759 = vst [vmem:[#allocation300_spill] sm:$0xff] %v20529_v41  ;;  %22760 = vst [vmem:[#allocation301_spill] sm:$0xff] %v20531_v13  ;;  %v17945_v13 = vld [vmem:[%s18941_s17 + $0xa88] sm:$0xff]   ;;  %v17947_v41 = vld [vmem:[%s18941_s17 + $0xa90] sm:$0xff]  }
 0x31f   : > { %17309 = vmatmul.mubr.msk.bf16.gmra.mrb[20].mxu0 %vm7239_vm2, %v17940_v29  ;;  %17515 = vmatmul.mubr.msk.bf16.gmra.mrb[20].mxu1 %vm7239_vm2, %v17941_v40 }
 0x320   : > { %17312 = vmatprep.mubr.msk.bf16.mxu0 %vm7239_vm2, %v17942_v24  ;;  %17518 = vmatprep.mubr.msk.bf16.mxu1 %vm7239_vm2, %v17943_v63  ;;  %v17946_v63 = vld [vmem:[%s18941_s17 + $0x780] sm:$0xff]  }
 0x322   : > { %v20539_v53 = vpop.f32.mrb[172].mxu0  ;;  %v20541_v14 = vpop.f32.mrb[172].mxu1 }
 0x323   : > { %22761 = vst [vmem:[#allocation302_spill] sm:$0xff] %v20539_v53  ;;  %22762 = vst [vmem:[#allocation303_spill] sm:$0xff] %v20541_v14  ;;  %v20545_v57 = vpop.f32.mrb[173].mxu0  ;;  %v20547_v21 = vpop.f32.mrb[173].mxu1 }
 0x324   : > { %22763 = vst [vmem:[#allocation304_spill] sm:$0xff] %v20545_v57  ;;  %22764 = vst [vmem:[#allocation305_spill] sm:$0xff] %v20547_v21  ;;  %v20553_v40 = vpop.f32.mrb[174].mxu0  ;;  %v20555_v24 = vpop.f32.mrb[174].mxu1  ;;  %v17952_v57 = vld [vmem:[%s18941_s17 + $0x798] sm:$0xff]  }
 0x325   : > { %22765 = vst [vmem:[#allocation306_spill] sm:$0xff] %v20553_v40  ;;  %22766 = vst [vmem:[#allocation307_spill] sm:$0xff] %v20555_v24  ;;  %v20561_v14 = vpop.f32.mrb[175].mxu0  ;;  %v20563_v53 = vpop.f32.mrb[175].mxu1 }
 0x326   : > { %22767 = vst [vmem:[#allocation308_spill] sm:$0xff] %v20561_v14  ;;  %22768 = vst [vmem:[#allocation309_spill] sm:$0xff] %v20563_v53  ;;  %v17949_v53 = vld [vmem:[%s18941_s17 + $0xa98] sm:$0xff]   ;;  %v17951_v14 = vld [vmem:[%s18941_s17 + $0xaa0] sm:$0xff]  }
 0x327   : > { %17313 = vmatmul.mubr.msk.bf16.gmra.mrb[24].mxu0 %vm7239_vm2, %v17944_v37  ;;  %17519 = vmatmul.mubr.msk.bf16.gmra.mrb[24].mxu1 %vm7239_vm2, %v17945_v13 }
 0x328   : > { %17316 = vmatprep.mubr.msk.bf16.mxu0 %vm7239_vm2, %v17946_v63  ;;  %17522 = vmatprep.mubr.msk.bf16.mxu1 %vm7239_vm2, %v17947_v41  ;;  %v17950_v41 = vld [vmem:[%s18941_s17 + $0x790] sm:$0xff]  }
 0x32a   : > { %v20571_v29 = vpop.f32.mrb[176].mxu0  ;;  %v20573_v10 = vpop.f32.mrb[176].mxu1 }
 0x32b   : > { %22769 = vst [vmem:[#allocation310_spill] sm:$0xff] %v20571_v29  ;;  %22770 = vst [vmem:[#allocation311_spill] sm:$0xff] %v20573_v10  ;;  %v20577_v40 = vpop.f32.mrb[177].mxu0  ;;  %v20579_v21 = vpop.f32.mrb[177].mxu1 }
 0x32c   : > { %22771 = vst [vmem:[#allocation312_spill] sm:$0xff] %v20577_v40  ;;  %22772 = vst [vmem:[#allocation313_spill] sm:$0xff] %v20579_v21  ;;  %v20585_v13 = vpop.f32.mrb[178].mxu0  ;;  %v20587_v63 = vpop.f32.mrb[178].mxu1  ;;  %v17956_v40 = vld [vmem:[%s18941_s17 + $0x7a8] sm:$0xff]  }
 0x32d   : > { %22773 = vst [vmem:[#allocation314_spill] sm:$0xff] %v20585_v13  ;;  %22774 = vst [vmem:[#allocation315_spill] sm:$0xff] %v20587_v63  ;;  %v20593_v10 = vpop.f32.mrb[179].mxu0  ;;  %v20595_v29 = vpop.f32.mrb[179].mxu1 }
 0x32e   : > { %22775 = vst [vmem:[#allocation316_spill] sm:$0xff] %v20593_v10  ;;  %22776 = vst [vmem:[#allocation317_spill] sm:$0xff] %v20595_v29  ;;  %v17953_v29 = vld [vmem:[%s18941_s17 + $0xaa8] sm:$0xff]   ;;  %v17955_v10 = vld [vmem:[%s18941_s17 + $0xab0] sm:$0xff]  }
 0x32f   : > { %17317 = vmatmul.mubr.msk.bf16.gmra.mrb[28].mxu0 %vm7239_vm2, %v17948_v5  ;;  %17523 = vmatmul.mubr.msk.bf16.gmra.mrb[28].mxu1 %vm7239_vm2, %v17949_v53 }
 0x330   : > { %17320 = vmatprep.mubr.msk.bf16.mxu0 %vm7239_vm2, %v17950_v41  ;;  %17526 = vmatprep.mubr.msk.bf16.mxu1 %vm7239_vm2, %v17951_v14  ;;  %v17954_v14 = vld [vmem:[%s18941_s17 + $0x7a0] sm:$0xff]  }
 0x332   : > { %v20603_v37 = vpop.f32.mrb[180].mxu0  ;;  %v20605_v24 = vpop.f32.mrb[180].mxu1 }
 0x333   : > { %22777 = vst [vmem:[#allocation318_spill] sm:$0xff] %v20603_v37  ;;  %22778 = vst [vmem:[#allocation319_spill] sm:$0xff] %v20605_v24  ;;  %v20609_v13 = vpop.f32.mrb[181].mxu0  ;;  %v20611_v21 = vpop.f32.mrb[181].mxu1 }
 0x334   : > { %22779 = vst [vmem:[#allocation320_spill] sm:$0xff] %v20609_v13  ;;  %22780 = vst [vmem:[#allocation321_spill] sm:$0xff] %v20611_v21  ;;  %v20617_v53 = vpop.f32.mrb[182].mxu0  ;;  %v20619_v41 = vpop.f32.mrb[182].mxu1  ;;  %v17960_v13 = vld [vmem:[%s18941_s17 + $0x7b8] sm:$0xff]  }
 0x335   : > { %22781 = vst [vmem:[#allocation322_spill] sm:$0xff] %v20617_v53  ;;  %22782 = vst [vmem:[#allocation323_spill] sm:$0xff] %v20619_v41  ;;  %v20625_v24 = vpop.f32.mrb[183].mxu0  ;;  %v20627_v37 = vpop.f32.mrb[183].mxu1 }
 0x336   : > { %22783 = vst [vmem:[#allocation324_spill] sm:$0xff] %v20625_v24  ;;  %22784 = vst [vmem:[#allocation325_spill] sm:$0xff] %v20627_v37  ;;  %v17957_v37 = vld [vmem:[%s18941_s17 + $0xab8] sm:$0xff]   ;;  %v17959_v24 = vld [vmem:[%s18941_s17 + $0xac0] sm:$0xff]  }
 0x337   : > { %17321 = vmatmul.mubr.msk.bf16.gmra.mrb[32].mxu0 %vm7239_vm2, %v17952_v57  ;;  %17527 = vmatmul.mubr.msk.bf16.gmra.mrb[32].mxu1 %vm7239_vm2, %v17953_v29 }
 0x338   : > { %17324 = vmatprep.mubr.msk.bf16.mxu0 %vm7239_vm2, %v17954_v14  ;;  %17530 = vmatprep.mubr.msk.bf16.mxu1 %vm7239_vm2, %v17955_v10  ;;  %v17958_v10 = vld [vmem:[%s18941_s17 + $0x7b0] sm:$0xff]  }
 0x33a   : > { %v20635_v5 = vpop.f32.mrb[184].mxu0  ;;  %v20637_v63 = vpop.f32.mrb[184].mxu1 }
 0x33b   : > { %22785 = vst [vmem:[#allocation326_spill] sm:$0xff] %v20635_v5  ;;  %22786 = vst [vmem:[#allocation327_spill] sm:$0xff] %v20637_v63  ;;  %v20641_v53 = vpop.f32.mrb[185].mxu0  ;;  %v20643_v21 = vpop.f32.mrb[185].mxu1 }
 0x33c   : > { %22787 = vst [vmem:[#allocation328_spill] sm:$0xff] %v20641_v53  ;;  %22788 = vst [vmem:[#allocation329_spill] sm:$0xff] %v20643_v21  ;;  %v20649_v29 = vpop.f32.mrb[186].mxu0  ;;  %v20651_v14 = vpop.f32.mrb[186].mxu1 }
 0x33d   : > { %22789 = vst [vmem:[#allocation330_spill] sm:$0xff] %v20649_v29  ;;  %22790 = vst [vmem:[#allocation331_spill] sm:$0xff] %v20651_v14  ;;  %v20657_v63 = vpop.f32.mrb[187].mxu0  ;;  %v20659_v5 = vpop.f32.mrb[187].mxu1 }
 0x33e   : > { %22791 = vst [vmem:[#allocation332_spill] sm:$0xff] %v20657_v63  ;;  %22792 = vst [vmem:[#allocation333_spill] sm:$0xff] %v20659_v5  ;;  %v17962_v5 = vld [vmem:[%s18941_s17 + $0x7c0] sm:$0xff]   ;;  %v17963_v63 = vld [vmem:[%s18941_s17 + $0xad0] sm:$0xff]  }
 0x33f   : > { %17325 = vmatmul.mubr.msk.bf16.gmra.mrb[36].mxu0 %vm7239_vm2, %v17956_v40  ;;  %17531 = vmatmul.mubr.msk.bf16.gmra.mrb[36].mxu1 %vm7239_vm2, %v17957_v37  ;;  %v17961_v40 = vld [vmem:[%s18941_s17 + $0xac8] sm:$0xff]  }
 0x340   : > { %17328 = vmatprep.mubr.msk.bf16.mxu0 %vm7239_vm2, %v17958_v10  ;;  %17534 = vmatprep.mubr.msk.bf16.mxu1 %vm7239_vm2, %v17959_v24 }
 0x342   : > { %v20667_v57 = vpop.f32.mrb[188].mxu0  ;;  %v20669_v41 = vpop.f32.mrb[188].mxu1 }
 0x343   : > { %22793 = vst [vmem:[#allocation334_spill] sm:$0xff] %v20667_v57  ;;  %22794 = vst [vmem:[#allocation335_spill] sm:$0xff] %v20669_v41  ;;  %v20673_v29 = vpop.f32.mrb[189].mxu0  ;;  %v20675_v21 = vpop.f32.mrb[189].mxu1 }
 0x344   : > { %22795 = vst [vmem:[#allocation336_spill] sm:$0xff] %v20673_v29  ;;  %22796 = vst [vmem:[#allocation337_spill] sm:$0xff] %v20675_v21  ;;  %v20681_v10 = vpop.f32.mrb[190].mxu0  ;;  %v20683_v24 = vpop.f32.mrb[190].mxu1  ;;  %v17967_v21 = vld [vmem:[%s18941_s17 + $0xae0] sm:$0xff]  }
 0x345   : > { %22797 = vst [vmem:[#allocation338_spill] sm:$0xff] %v20681_v10  ;;  %22798 = vst [vmem:[#allocation339_spill] sm:$0xff] %v20683_v24  ;;  %v20689_v41 = vpop.f32.mrb[191].mxu0  ;;  %v20691_v57 = vpop.f32.mrb[191].mxu1  ;;  %v17966_v10 = vld [vmem:[%s18941_s17 + $0x7d0] sm:$0xff]  }
 0x346   : > { %22799 = vst [vmem:[#allocation340_spill] sm:$0xff] %v20689_v41  ;;  %22800 = vst [vmem:[#allocation341_spill] sm:$0xff] %v20691_v57  ;;  %v17965_v41 = vld [vmem:[%s18941_s17 + $0xad8] sm:$0xff]  }
 0x347   : > { %17329 = vmatmul.mubr.msk.bf16.gmra.mrb[40].mxu0 %vm7239_vm2, %v17960_v13  ;;  %17535 = vmatmul.mubr.msk.bf16.gmra.mrb[40].mxu1 %vm7239_vm2, %v17961_v40  ;;  %v17964_v13 = vld [vmem:[%s18941_s17 + $0x7c8] sm:$0xff]  }
 0x348   : > { %17332 = vmatprep.mubr.msk.bf16.mxu0 %vm7239_vm2, %v17962_v5  ;;  %17538 = vmatprep.mubr.msk.bf16.mxu1 %vm7239_vm2, %v17963_v63 }
 0x34a   : > { %v20701_v14 = vpop.f32.mrb[192].mxu0  ;;  %v20703_v37 = vpop.f32.mrb[192].mxu1 }
 0x34b   : > { %22801 = vst [vmem:[#allocation342_spill] sm:$0xff] %v20701_v14  ;;  %22802 = vst [vmem:[#allocation343_spill] sm:$0xff] %v20703_v37  ;;  %v20707_v53 = vpop.f32.mrb[193].mxu0  ;;  %v20709_v57 = vpop.f32.mrb[193].mxu1  ;;  %v17968_v14 = vld [vmem:[%s18941_s17 + $0x7d8] sm:$0xff]  }
 0x34c   : > { %22803 = vst [vmem:[#allocation344_spill] sm:$0xff] %v20707_v53  ;;  %22804 = vst [vmem:[#allocation345_spill] sm:$0xff] %v20709_v57  ;;  %v20715_v40 = vpop.f32.mrb[194].mxu0  ;;  %v20717_v63 = vpop.f32.mrb[194].mxu1 }
 0x34d   : > { %22805 = vst [vmem:[#allocation346_spill] sm:$0xff] %v20715_v40  ;;  %22806 = vst [vmem:[#allocation347_spill] sm:$0xff] %v20717_v63  ;;  %v20723_v24 = vpop.f32.mrb[195].mxu0  ;;  %v20725_v37 = vpop.f32.mrb[195].mxu1  ;;  %v22809_v63 = vmax.f32 %v19165_v1, %v19167_v2  ;;  %v22811_v2 = vmax.f32 %v19175_v6, %v19177_v7 }
 0x34e   : > { %22807 = vst [vmem:[#allocation348_spill] sm:$0xff] %v20723_v24  ;;  %22808 = vst [vmem:[#allocation349_spill] sm:$0xff] %v20725_v37  ;;  %v17969_v37 = vld [vmem:[%s18941_s17 + $0xae8] sm:$0xff]  }
 0x34f   : > { %17333 = vmatmul.mubr.msk.bf16.gmra.mrb[44].mxu0 %vm7239_vm2, %v17964_v13  ;;  %17539 = vmatmul.mubr.msk.bf16.gmra.mrb[44].mxu1 %vm7239_vm2, %v17965_v41  ;;  %v20741_v41 = vld [vmem:[%s22113_s2] ss:$0 sm:$0xff] }
 0x350   : > { %17336 = vmatprep.mubr.msk.bf16.mxu0 %vm7239_vm2, %v17966_v10  ;;  %17542 = vmatprep.mubr.msk.bf16.mxu1 %vm7239_vm2, %v17967_v21  ;;  %v22810_v10 = vmax.f32 %v19169_v3, %v19171_v4 }
 0x352   : > { %v17230_v29 = vpop.f32.mrb[196].mxu0  ;;  %v17436_v5 = vpop.f32.mrb[196].mxu1 }
 0x353   : > { %v12152_v40 = vmax.f32 %v22809_v63, %v17230_v29  ;;  %v11367_v57 = vpop.f32.mrb[197].mxu0  ;;  %v13361_v53 = vpop.f32.mrb[197].mxu1 }
 0x354   : > { %v12150_v21 = vmax.f32 %v22810_v10, %v11367_v57  ;;  %v17231_v13 = vpop.f32.mrb[198].mxu0  ;;  %v17437_v24 = vpop.f32.mrb[198].mxu1 }
 0x355   : > { %v14146_v1 = vmax.f32 %v12152_v40, %v17436_v5  ;;  %v12153_v29 = vmax.f32 %v22811_v2, %v17231_v13  ;;  %v11370_v63 = vpop.f32.mrb[199].mxu0  ;;  %v13364_v30 = vpop.f32.mrb[199].mxu1  ;;  %v22814_v40 = vmax.f32 %v19201_v19, %v19203_v20  ;;  %v17975_v2 = vld [vmem:[%s18941_s17 + $0xb00] sm:$0xff]   ;;  %v22816_v19 = vmax.f32 %v19215_v27, %v19217_v28 }
 0x356   : > { %v14144_v45 = vmax.f32 %v12150_v21, %v13361_v53  ;;  %v12151_v32 = vmax.f32 %v22812_v46, %v11370_v63 }
 0x357   : > { %v14349_v3 = vadd.f32 %v20741_v41, %v14146_v1  ;;  %v14147_v4 = vmax.f32 %v12153_v29, %v17437_v24  ;;  %17337 = vmatmul.mubr.msk.bf16.gmra.mrb[48].mxu0 %vm7239_vm2, %v17968_v14  ;;  %17543 = vmatmul.mubr.msk.bf16.gmra.mrb[48].mxu1 %vm7239_vm2, %v17969_v37  ;;  %v17972_v37 = vld [vmem:[%s18941_s17 + $0x7e8] sm:$0xff]   ;;  %v17973_v24 = vld [vmem:[%s18941_s17 + $0xaf8] sm:$0xff]   ;;  %v17974_v1 = vld [vmem:[%s18941_s17 + $0x7f0] sm:$0xff]  }
 0x358   : > { %v14347_v6 = vadd.f32 %v20741_v41, %v14144_v45  ;;  %v14145_v7 = vmax.f32 %v12151_v32, %v13364_v30  ;;  %17340 = vmatprep.mubr.msk.bf16.mxu0 %vm7239_vm2, %v17970_v26  ;;  %17546 = vmatprep.mubr.msk.bf16.mxu1 %vm7239_vm2, %v17971_v42  ;;  %v22813_v30 = vmax.f32 %v19197_v17, %v19199_v18 }
 0x359   : > { %v14545_v11 = vmax.f32 %v14349_v3, 0.0  ;;  %v14350_v12 = vadd.f32 %v20741_v41, %v14147_v4  ;;  %v22815_v18 = vmax.f32 %v19207_v22, %v19209_v23 }
 0x35a   : > { %v14543_v46 = vmax.f32 %v14347_v6, 0.0  ;;  %v14348_v53 = vadd.f32 %v20741_v41, %v14145_v7  ;;  %v17234_v57 = vpop.f32.mrb[200].mxu0  ;;  %v17440_v14 = vpop.f32.mrb[200].mxu1 }
 0x35b   : > { %14742 = vst.msk [vmem:[%s20760_s22 + $0x10] sm:$0xff] %vm14739_vm3, %v14545_v11  ;;  %v14546_v45 = vmax.f32 %v14350_v12, 0.0  ;;  %v12156_v26 = vmax.f32 %v22813_v30, %v17234_v57  ;;  %v11383_v32 = vpop.f32.mrb[201].mxu0  ;;  %v13377_v42 = vpop.f32.mrb[201].mxu1 }
 0x35c   : > { %14740 = vst.msk [vmem:[%s20760_s22] sm:$0xff] %vm14739_vm3, %v14543_v46  ;;  %v14544_v5 = vmax.f32 %v14348_v53, 0.0  ;;  %v12154_v10 = vmax.f32 %v22814_v40, %v11383_v32  ;;  %v17235_v21 = vpop.f32.mrb[202].mxu0  ;;  %v17441_v13 = vpop.f32.mrb[202].mxu1  ;;  %v17976_v32 = vld [vmem:[%s18941_s17 + $0x7f8] sm:$0xff]  }
 0x35d   : > { %14743 = vst.msk [vmem:[%s20760_s22 + $0x18] sm:$0xff] %vm14739_vm3, %v14546_v45  ;;  %v14150_v17 = vmax.f32 %v12156_v26, %v17440_v14  ;;  %v12157_v29 = vmax.f32 %v22815_v18, %v17235_v21  ;;  %v11386_v63 = vpop.f32.mrb[203].mxu0  ;;  %v13380_v3 = vpop.f32.mrb[203].mxu1  ;;  %v22817_v14 = vmax.f32 %v19229_v33, %v19231_v34  ;;  %v17978_v21 = vld [vmem:[%s18941_s17 + $0x800] sm:$0xff]   ;;  %v22819_v34 = vmax.f32 %v19239_v38, %v19241_v39 }
 0x35e   : > { %14741 = vst.msk [vmem:[%s20760_s22 + $0x8] sm:$0xff] %vm14739_vm3, %v14544_v5  ;;  %v14148_v4 = vmax.f32 %v12154_v10, %v13377_v42  ;;  %v12155_v20 = vmax.f32 %v22816_v19, %v11386_v63  ;;  %v17977_v42 = vld [vmem:[%s18941_s17 + $0xb08] sm:$0xff]  }
 0x35f   : > { %v14353_v6 = vadd.f32 %v20741_v41, %v14150_v17  ;;  %v14151_v7 = vmax.f32 %v12157_v29, %v17441_v13  ;;  %17341 = vmatmul.mubr.msk.bf16.gmra.mrb[52].mxu0 %vm7239_vm2, %v17972_v37  ;;  %17547 = vmatmul.mubr.msk.bf16.gmra.mrb[52].mxu1 %vm7239_vm2, %v17973_v24  ;;  %v22818_v24 = vmax.f32 %v19233_v35, %v19235_v36  ;;  %v17979_v13 = vld [vmem:[%s18941_s17 + $0xb10] sm:$0xff]  }
 0x360   : > { %v14351_v22 = vadd.f32 %v20741_v41, %v14148_v4  ;;  %v14149_v23 = vmax.f32 %v12155_v20, %v13380_v3  ;;  %17344 = vmatprep.mubr.msk.bf16.mxu0 %vm7239_vm2, %v17974_v1  ;;  %17550 = vmatprep.mubr.msk.bf16.mxu1 %vm7239_vm2, %v17975_v2  ;;  %v22820_v35 = vmax.f32 %v19247_v43, %v19249_v44 }
 0x361   : > { %v14549_v27 = vmax.f32 %v14353_v6, 0.0  ;;  %v14354_v28 = vadd.f32 %v20741_v41, %v14151_v7  ;;  %v22821_v7 = vmax.f32 %v19261_v49, %v19263_v50  ;;  %v22823_v50 = vmax.f32 %v19271_v54, %v19273_v55 }
 0x362   : > { %v14547_v11 = vmax.f32 %v14351_v22, 0.0  ;;  %v14352_v12 = vadd.f32 %v20741_v41, %v14149_v23  ;;  %v17238_v46 = vpop.f32.mrb[204].mxu0  ;;  %v17444_v53 = vpop.f32.mrb[204].mxu1 }
 0x363   : > { %14746 = vst.msk [vmem:[%s20760_s22 + $0x30] sm:$0xff] %vm14739_vm3, %v14549_v27  ;;  %v14550_v57 = vmax.f32 %v14354_v28, 0.0  ;;  %v12160_v45 = vmax.f32 %v22817_v14, %v17238_v46  ;;  %v11399_v30 = vpop.f32.mrb[205].mxu0  ;;  %v13393_v26 = vpop.f32.mrb[205].mxu1  ;;  %v17980_v28 = vld [vmem:[%s18941_s17 + $0x808] sm:$0xff]   ;;  %v22822_v46 = vmax.f32 %v19265_v51, %v19267_v52  ;;  %v22824_v51 = vmax.f32 %v19279_v59, %v19281_v60 }
 0x364   : > { %14744 = vst.msk [vmem:[%s20760_s22 + $0x20] sm:$0xff] %vm14739_vm3, %v14547_v11  ;;  %v14548_v37 = vmax.f32 %v14352_v12, 0.0  ;;  %v12158_v5 = vmax.f32 %v22818_v24, %v11399_v30  ;;  %v17239_v40 = vpop.f32.mrb[206].mxu0  ;;  %v17445_v10 = vpop.f32.mrb[206].mxu1  ;;  %v17981_v11 = vld [vmem:[%s18941_s17 + $0xb18] sm:$0xff]   ;;  %v17983_v30 = vld [vmem:[%s18941_s17 + $0xb20] sm:$0xff]  }
 0x365   : > { %14747 = vst.msk [vmem:[%s20760_s22 + $0x38] sm:$0xff] %vm14739_vm3, %v14550_v57  ;;  %v14154_v33 = vmax.f32 %v12160_v45, %v17444_v53  ;;  %v12161_v1 = vmax.f32 %v22819_v34, %v17239_v40  ;;  %v11402_v2 = vpop.f32.mrb[207].mxu0  ;;  %v13396_v17 = vpop.f32.mrb[207].mxu1  ;;  %v17982_v45 = vld [vmem:[%s18941_s17 + $0x810] sm:$0xff]   ;;  %v22825_v34 = vmax.f32 %v19293_v8, %v19295_v9  ;;  %v22827_v9 = vmax.f32 %v19303_v25, %v19305_v31 }
 0x366   : > { %14745 = vst.msk [vmem:[%s20760_s22 + $0x28] sm:$0xff] %vm14739_vm3, %v14548_v37  ;;  %v14152_v18 = vmax.f32 %v12158_v5, %v13393_v26  ;;  %v12159_v36 = vmax.f32 %v22820_v35, %v11402_v2  ;;  %v17985_v35 = vld [vmem:[%s18941_s17 + $0xb28] sm:$0xff]  }
 0x367   : > { %v14357_v29 = vadd.f32 %v20741_v41, %v14154_v33  ;;  %v14155_v63 = vmax.f32 %v12161_v1, %v17445_v10  ;;  %17345 = vmatmul.mubr.msk.bf16.gmra.mrb[56].mxu0 %vm7239_vm2, %v17976_v32  ;;  %17551 = vmatmul.mubr.msk.bf16.gmra.mrb[56].mxu1 %vm7239_vm2, %v17977_v42 }
 0x368   : > { %v14355_v38 = vadd.f32 %v20741_v41, %v14152_v18  ;;  %v14153_v39 = vmax.f32 %v12159_v36, %v13396_v17  ;;  %17348 = vmatprep.mubr.msk.bf16.mxu0 %vm7239_vm2, %v17978_v21  ;;  %17554 = vmatprep.mubr.msk.bf16.mxu1 %vm7239_vm2, %v17979_v13  ;;  %v17984_v18 = vld [vmem:[%s18941_s17 + $0x818] sm:$0xff]  }
 0x369   : > { %v14553_v43 = vmax.f32 %v14357_v29, 0.0  ;;  %v14358_v44 = vadd.f32 %v20741_v41, %v14155_v63  ;;  %v22826_v29 = vmax.f32 %v19297_v15, %v19299_v16  ;;  %v22828_v15 = vmax.f32 %v19311_v47, %v19313_v48 }
 0x36a   : > { %v14551_v3 = vmax.f32 %v14355_v38, 0.0  ;;  %v14356_v4 = vadd.f32 %v20741_v41, %v14153_v39  ;;  %v17242_v19 = vpop.f32.mrb[208].mxu0  ;;  %v17448_v20 = vpop.f32.mrb[208].mxu1 }
 0x36b   : > { %14750 = vst.msk [vmem:[%s20760_s22 + $0x50] sm:$0xff] %vm14739_vm3, %v14553_v43  ;;  %v14554_v6 = vmax.f32 %v14358_v44, 0.0  ;;  %v12164_v22 = vmax.f32 %v22821_v7, %v17242_v19  ;;  %v11415_v23 = vpop.f32.mrb[209].mxu0  ;;  %v13409_v27 = vpop.f32.mrb[209].mxu1  ;;  %v17986_v43 = vld [vmem:[%s18941_s17 + $0x820] sm:$0xff]   ;;  %v17987_v44 = vld [vmem:[%s18941_s17 + $0xb30] sm:$0xff]  }
 0x36c   : > { %14748 = vst.msk [vmem:[%s20760_s22 + $0x40] sm:$0xff] %vm14739_vm3, %v14551_v3  ;;  %v14552_v12 = vmax.f32 %v14356_v4, 0.0  ;;  %v12162_v53 = vmax.f32 %v22822_v46, %v11415_v23  ;;  %v17243_v57 = vpop.f32.mrb[210].mxu0  ;;  %v17449_v14 = vpop.f32.mrb[210].mxu1 }
 0x36d   : > { %14751 = vst.msk [vmem:[%s20760_s22 + $0x58] sm:$0xff] %vm14739_vm3, %v14554_v6  ;;  %v14158_v49 = vmax.f32 %v12164_v22, %v17448_v20  ;;  %v12165_v26 = vmax.f32 %v22823_v50, %v17243_v57  ;;  %v11418_v32 = vpop.f32.mrb[211].mxu0  ;;  %v13412_v42 = vpop.f32.mrb[211].mxu1 }
 0x36e   : > { %14749 = vst.msk [vmem:[%s20760_s22 + $0x48] sm:$0xff] %vm14739_vm3, %v14552_v12  ;;  %v14156_v37 = vmax.f32 %v12162_v53, %v13409_v27  ;;  %v12163_v52 = vmax.f32 %v22824_v51, %v11418_v32  ;;  %v22829_v12 = vmax.f32 %v19325_v62, %v19327_v61  ;;  %v22831_v62 = vld [vmem:[#allocation3_spill] sm:$0xff] }
 0x36f   : > { %v14361_v24 = vadd.f32 %v20741_v41, %v14158_v49  ;;  %v14159_v5 = vmax.f32 %v12165_v26, %v17449_v14  ;;  %17349 = vmatmul.mubr.msk.bf16.gmra.mrb[60].mxu0 %vm7239_vm2, %v17980_v28  ;;  %17555 = vmatmul.mubr.msk.bf16.gmra.mrb[60].mxu1 %vm7239_vm2, %v17981_v11  ;;  %v17988_v14 = vld [vmem:[%s18941_s17 + $0x828] sm:$0xff]   ;;  %v22830_v49 = vmax.f32 %v19329_v58, %v19331_v56 }
 0x370   : > { %v14359_v54 = vadd.f32 %v20741_v41, %v14156_v37  ;;  %v14157_v55 = vmax.f32 %v12163_v52, %v13412_v42  ;;  %17352 = vmatprep.mubr.msk.bf16.mxu0 %vm7239_vm2, %v17982_v45  ;;  %17558 = vmatprep.mubr.msk.bf16.mxu1 %vm7239_vm2, %v17983_v30  ;;  %v17989_v45 = vld [vmem:[%s18941_s17 + $0xb38] sm:$0xff]   ;;  %v17990_v42 = vld [vmem:[%s18941_s17 + $0x830] sm:$0xff]   ;;  %v17991_v37 = vld [vmem:[%s18941_s17 + $0xb40] sm:$0xff]   ;;  %v22832_v51 = vmax.f32 %v19335_v0, %v22831_v62 }
 0x371   : > { %v14557_v59 = vmax.f32 %v14361_v24, 0.0  ;;  %v14362_v60 = vadd.f32 %v20741_v41, %v14159_v5 }
 0x372   : > { %v14555_v40 = vmax.f32 %v14359_v54, 0.0  ;;  %v14360_v10 = vadd.f32 %v20741_v41, %v14157_v55  ;;  %v17246_v21 = vpop.f32.mrb[212].mxu0  ;;  %v17452_v13 = vpop.f32.mrb[212].mxu1  ;;  %v22833_v55 = vld [vmem:[#allocation4_spill] sm:$0xff] }
 0x373   : > { %14754 = vst.msk [vmem:[%s20760_s22 + $0x70] sm:$0xff] %vm14739_vm3, %v14557_v59  ;;  %v14558_v33 = vmax.f32 %v14362_v60, 0.0  ;;  %v12168_v1 = vmax.f32 %v22825_v34, %v17246_v21  ;;  %v11431_v2 = vpop.f32.mrb[213].mxu0  ;;  %v13425_v17 = vpop.f32.mrb[213].mxu1  ;;  %v22834_v59 = vld [vmem:[#allocation5_spill] sm:$0xff] }
 0x374   : > { %14752 = vst.msk [vmem:[%s20760_s22 + $0x60] sm:$0xff] %vm14739_vm3, %v14555_v40  ;;  %v14556_v36 = vmax.f32 %v14360_v10, 0.0  ;;  %v12166_v63 = vmax.f32 %v22826_v29, %v11431_v2  ;;  %v17247_v38 = vpop.f32.mrb[214].mxu0  ;;  %v17453_v39 = vpop.f32.mrb[214].mxu1  ;;  %v22835_v58 = vmax.f32 %v22833_v55, %v22834_v59  ;;  %v22851_v59 = vld [vmem:[#allocation16_spill] sm:$0xff] }
 0x375   : > { %14755 = vst.msk [vmem:[%s20760_s22 + $0x78] sm:$0xff] %vm14739_vm3, %v14558_v33  ;;  %v14162_v8 = vmax.f32 %v12168_v1, %v17452_v13  ;;  %v12169_v3 = vmax.f32 %v22827_v9, %v17247_v38  ;;  %v11434_v4 = vpop.f32.mrb[215].mxu0  ;;  %v13428_v19 = vpop.f32.mrb[215].mxu1  ;;  %v22840_v9 = vld [vmem:[#allocation9_spill] sm:$0xff] }
 0x376   : > { %14753 = vst.msk [vmem:[%s20760_s22 + $0x68] sm:$0xff] %vm14739_vm3, %v14556_v36  ;;  %v14160_v20 = vmax.f32 %v12166_v63, %v13425_v17  ;;  %v12167_v16 = vmax.f32 %v22828_v15, %v11434_v4  ;;  %v17994_v15 = vld [vmem:[%s18941_s17 + $0x840] sm:$0xff]  }
 0x377   : > { %v14365_v6 = vadd.f32 %v20741_v41, %v14162_v8  ;;  %v14163_v7 = vmax.f32 %v12169_v3, %v17453_v39  ;;  %17353 = vmatmul.mubr.msk.bf16.gmra.mrb[64].mxu0 %vm7239_vm2, %v17984_v18  ;;  %17559 = vmatmul.mubr.msk.bf16.gmra.mrb[64].mxu1 %vm7239_vm2, %v17985_v35  ;;  %v22836_v18 = vld [vmem:[#allocation6_spill] sm:$0xff]  ;;  %v22837_v35 = vld [vmem:[#allocation7_spill] sm:$0xff]  ;;  %v22839_v8 = vld [vmem:[#allocation8_spill] sm:$0xff] }
 0x378   : > { %v14363_v25 = vadd.f32 %v20741_v41, %v14160_v20  ;;  %v14161_v31 = vmax.f32 %v12167_v16, %v13428_v19  ;;  %17356 = vmatprep.mubr.msk.bf16.mxu0 %vm7239_vm2, %v17986_v43  ;;  %17562 = vmatprep.mubr.msk.bf16.mxu1 %vm7239_vm2, %v17987_v44  ;;  %v22838_v36 = vmax.f32 %v22836_v18, %v22837_v35  ;;  %v17992_v39 = vld [vmem:[%s18941_s17 + $0x838] sm:$0xff]   ;;  %v17993_v43 = vld [vmem:[%s18941_s17 + $0xb48] sm:$0xff]   ;;  %v17995_v16 = vld [vmem:[%s18941_s17 + $0xb50] sm:$0xff]  }
 0x379   : > { %v14561_v47 = vmax.f32 %v14365_v6, 0.0  ;;  %v14366_v48 = vadd.f32 %v20741_v41, %v14163_v7  ;;  %v22841_v3 = vmax.f32 %v22839_v8, %v22840_v9  ;;  %v22842_v7 = vld [vmem:[#allocation10_spill] sm:$0xff] }
 0x37a   : > { %v14559_v22 = vmax.f32 %v14363_v25, 0.0  ;;  %v14364_v23 = vadd.f32 %v20741_v41, %v14161_v31  ;;  %v17250_v27 = vpop.f32.mrb[216].mxu0  ;;  %v17456_v28 = vpop.f32.mrb[216].mxu1  ;;  %v22843_v25 = vld [vmem:[#allocation11_spill] sm:$0xff] }
 0x37b   : > { %14758 = vst.msk [vmem:[%s20760_s22 + $0x90] sm:$0xff] %vm14739_vm3, %v14561_v47  ;;  %v14562_v11 = vmax.f32 %v14366_v48, 0.0  ;;  %v12172_v46 = vmax.f32 %v22829_v12, %v17250_v27  ;;  %v11447_v53 = vpop.f32.mrb[217].mxu0  ;;  %v13441_v57 = vpop.f32.mrb[217].mxu1  ;;  %v22844_v31 = vmax.f32 %v22842_v7, %v22843_v25  ;;  %v22845_v27 = vld [vmem:[#allocation12_spill] sm:$0xff]  ;;  %v22861_v7 = vld [vmem:[#allocation23_spill] sm:$0xff] }
 0x37c   : > { %14756 = vst.msk [vmem:[%s20760_s22 + $0x80] sm:$0xff] %vm14739_vm3, %v14559_v22  ;;  %v14560_v30 = vmax.f32 %v14364_v23, 0.0  ;;  %v12170_v50 = vmax.f32 %v22830_v49, %v11447_v53  ;;  %v17251_v26 = vpop.f32.mrb[218].mxu0  ;;  %v17457_v32 = vpop.f32.mrb[218].mxu1 }
 0x37d   : > { %14759 = vst.msk [vmem:[%s20760_s22 + $0x98] sm:$0xff] %vm14739_vm3, %v14562_v11  ;;  %v14166_v61 = vmax.f32 %v12172_v46, %v17456_v28  ;;  %v12173_v52 = vmax.f32 %v22832_v51, %v17251_v26  ;;  %v11450_v24 = vpop.f32.mrb[219].mxu0  ;;  %v13444_v5 = vpop.f32.mrb[219].mxu1  ;;  %v22846_v28 = vld [vmem:[#allocation13_spill] sm:$0xff] }
 0x37e   : > { %14757 = vst.msk [vmem:[%s20760_s22 + $0x88] sm:$0xff] %vm14739_vm3, %v14560_v30  ;;  %v14164_v54 = vmax.f32 %v12170_v50, %v13441_v57  ;;  %v12171_v56 = vmax.f32 %v22835_v58, %v11450_v24  ;;  %v22847_v11 = vmax.f32 %v22845_v27, %v22846_v28  ;;  %v22852_v58 = vld [vmem:[#allocation17_spill] sm:$0xff]  ;;  %v22863_v28 = vld [vmem:[#allocation24_spill] sm:$0xff] }
 0x37f   : > { %v14369_v60 = vadd.f32 %v20741_v41, %v14166_v61  ;;  %v14167_v40 = vmax.f32 %v12173_v52, %v17457_v32  ;;  %17357 = vmatmul.mubr.msk.bf16.gmra.mrb[68].mxu0 %vm7239_vm2, %v17988_v14  ;;  %17563 = vmatmul.mubr.msk.bf16.gmra.mrb[68].mxu1 %vm7239_vm2, %v17989_v45  ;;  %v22849_v61 = vld [vmem:[#allocation15_spill] sm:$0xff] }
 0x380   : > { %v14367_v0 = vadd.f32 %v20741_v41, %v14164_v54  ;;  %v14165_v10 = vmax.f32 %v12171_v56, %v13444_v5  ;;  %17360 = vmatprep.mubr.msk.bf16.mxu0 %vm7239_vm2, %v17990_v42  ;;  %17566 = vmatprep.mubr.msk.bf16.mxu1 %vm7239_vm2, %v17991_v37  ;;  %v22848_v37 = vld [vmem:[#allocation14_spill] sm:$0xff]  ;;  %v17996_v5 = vld [vmem:[%s18941_s17 + $0x848] sm:$0xff]   ;;  %v22853_v56 = vmax.f32 %v22851_v59, %v22852_v58 }
 0x381   : > { %v14565_v21 = vmax.f32 %v14369_v60, 0.0  ;;  %v14370_v13 = vadd.f32 %v20741_v41, %v14167_v40  ;;  %v22850_v62 = vmax.f32 %v22848_v37, %v22849_v61  ;;  %v17997_v54 = vld [vmem:[%s18941_s17 + $0xb58] sm:$0xff]  }
 0x382   : > { %v14563_v33 = vmax.f32 %v14367_v0, 0.0  ;;  %v14368_v34 = vadd.f32 %v20741_v41, %v14165_v10  ;;  %v17254_v1 = vpop.f32.mrb[220].mxu0  ;;  %v17460_v2 = vpop.f32.mrb[220].mxu1  ;;  %v17998_v10 = vld [vmem:[%s18941_s17 + $0x850] sm:$0xff]  }
 0x383   : > { %14762 = vst.msk [vmem:[%s20760_s22 + $0xb0] sm:$0xff] %vm14739_vm3, %v14565_v21  ;;  %v14566_v17 = vmax.f32 %v14370_v13, 0.0  ;;  %v12176_v29 = vmax.f32 %v22838_v36, %v17254_v1  ;;  %v11463_v63 = vpop.f32.mrb[221].mxu0  ;;  %v13457_v38 = vpop.f32.mrb[221].mxu1  ;;  %v17999_v21 = vld [vmem:[%s18941_s17 + $0xb60] sm:$0xff]   ;;  %v22857_v36 = vld [vmem:[#allocation20_spill] sm:$0xff] }
 0x384   : > { %14760 = vst.msk [vmem:[%s20760_s22 + $0xa0] sm:$0xff] %vm14739_vm3, %v14563_v33  ;;  %v14564_v44 = vmax.f32 %v14368_v34, 0.0  ;;  %v12174_v4 = vmax.f32 %v22841_v3, %v11463_v63  ;;  %v17255_v19 = vpop.f32.mrb[222].mxu0  ;;  %v17461_v20 = vpop.f32.mrb[222].mxu1  ;;  %v22854_v33 = vld [vmem:[#allocation18_spill] sm:$0xff]  ;;  %v22855_v34 = vld [vmem:[#allocation19_spill] sm:$0xff] }
 0x385   : > { %14763 = vst.msk [vmem:[%s20760_s22 + $0xb8] sm:$0xff] %vm14739_vm3, %v14566_v17  ;;  %v14170_v6 = vmax.f32 %v12176_v29, %v17460_v2  ;;  %v12177_v47 = vmax.f32 %v22844_v31, %v17255_v19  ;;  %v11466_v48 = vpop.f32.mrb[223].mxu0  ;;  %v13460_v22 = vpop.f32.mrb[223].mxu1  ;;  %v22856_v1 = vmax.f32 %v22854_v33, %v22855_v34  ;;  %v22858_v29 = vld [vmem:[#allocation21_spill] sm:$0xff]  ;;  %v22873_v33 = vld [vmem:[#allocation31_spill] sm:$0xff] }
 0x386   : > { %14761 = vst.msk [vmem:[%s20760_s22 + $0xa8] sm:$0xff] %vm14739_vm3, %v14564_v44  ;;  %v14168_v23 = vmax.f32 %v12174_v4, %v13457_v38  ;;  %v12175_v12 = vmax.f32 %v22847_v11, %v11466_v48  ;;  %v22859_v63 = vmax.f32 %v22857_v36, %v22858_v29  ;;  %v22864_v11 = vld [vmem:[#allocation25_spill] sm:$0xff]  ;;  %v22875_v29 = vld [vmem:[#allocation32_spill] sm:$0xff] }
 0x387   : > { %v14373_v46 = vadd.f32 %v20741_v41, %v14170_v6  ;;  %v14171_v53 = vmax.f32 %v12177_v47, %v17461_v20  ;;  %17361 = vmatmul.mubr.msk.bf16.gmra.mrb[72].mxu0 %vm7239_vm2, %v17992_v39  ;;  %17567 = vmatmul.mubr.msk.bf16.gmra.mrb[72].mxu1 %vm7239_vm2, %v17993_v43  ;;  %v22860_v6 = vld [vmem:[#allocation22_spill] sm:$0xff] }
 0x388   : > { %v14371_v57 = vadd.f32 %v20741_v41, %v14168_v23  ;;  %v14169_v14 = vmax.f32 %v12175_v12, %v13460_v22  ;;  %17364 = vmatprep.mubr.msk.bf16.mxu0 %vm7239_vm2, %v17994_v15  ;;  %17570 = vmatprep.mubr.msk.bf16.mxu1 %vm7239_vm2, %v17995_v16  ;;  %v22862_v25 = vmax.f32 %v22860_v6, %v22861_v7  ;;  %v18000_v22 = vld [vmem:[%s18941_s17 + $0x858] sm:$0xff]   ;;  %v18001_v23 = vld [vmem:[%s18941_s17 + $0xb68] sm:$0xff]  }
 0x389   : > { %v14569_v45 = vmax.f32 %v14373_v46, 0.0  ;;  %v14374_v30 = vadd.f32 %v20741_v41, %v14171_v53  ;;  %v22865_v12 = vmax.f32 %v22863_v28, %v22864_v11 }
 0x38a   : > { %v14567_v49 = vmax.f32 %v14371_v57, 0.0  ;;  %v14372_v50 = vadd.f32 %v20741_v41, %v14169_v14  ;;  %v17258_v26 = vpop.f32.mrb[224].mxu0  ;;  %v17464_v32 = vpop.f32.mrb[224].mxu1  ;;  %v18002_v14 = vld [vmem:[%s18941_s17 + $0x860] sm:$0xff]  }
 0x38b   : > { %14766 = vst.msk [vmem:[%s20760_s22 + $0xd0] sm:$0xff] %vm14739_vm3, %v14569_v45  ;;  %v14570_v42 = vmax.f32 %v14374_v30, 0.0  ;;  %v12180_v51 = vmax.f32 %v22850_v62, %v17258_v26  ;;  %v11479_v52 = vpop.f32.mrb[225].mxu0  ;;  %v13473_v24 = vpop.f32.mrb[225].mxu1  ;;  %v18003_v45 = vld [vmem:[%s18941_s17 + $0xb70] sm:$0xff]   ;;  %v22869_v62 = vld [vmem:[#allocation28_spill] sm:$0xff] }
 0x38c   : > { %14764 = vst.msk [vmem:[%s20760_s22 + $0xc0] sm:$0xff] %vm14739_vm3, %v14567_v49  ;;  %v14568_v55 = vmax.f32 %v14372_v50, 0.0  ;;  %v12178_v60 = vmax.f32 %v22853_v56, %v11479_v52  ;;  %v17259_v40 = vpop.f32.mrb[226].mxu0  ;;  %v17465_v0 = vpop.f32.mrb[226].mxu1  ;;  %v22866_v49 = vld [vmem:[#allocation26_spill] sm:$0xff]  ;;  %v22867_v50 = vld [vmem:[#allocation27_spill] sm:$0xff] }
 0x38d   : > { %14767 = vst.msk [vmem:[%s20760_s22 + $0xd8] sm:$0xff] %vm14739_vm3, %v14570_v42  ;;  %v14174_v13 = vmax.f32 %v12180_v51, %v17464_v32  ;;  %v12181_v2 = vmax.f32 %v22856_v1, %v17259_v40  ;;  %v11482_v17 = vpop.f32.mrb[227].mxu0  ;;  %v13476_v18 = vpop.f32.mrb[227].mxu1  ;;  %v22868_v26 = vmax.f32 %v22866_v49, %v22867_v50  ;;  %v22870_v51 = vld [vmem:[#allocation29_spill] sm:$0xff]  ;;  %v22885_v49 = vld [vmem:[#allocation39_spill] sm:$0xff] }
 0x38e   : > { %14765 = vst.msk [vmem:[%s20760_s22 + $0xc8] sm:$0xff] %vm14739_vm3, %v14568_v55  ;;  %v14172_v35 = vmax.f32 %v12178_v60, %v13473_v24  ;;  %v12179_v38 = vmax.f32 %v22859_v63, %v11482_v17  ;;  %v22871_v52 = vmax.f32 %v22869_v62, %v22870_v51  ;;  %v22876_v63 = vld [vmem:[#allocation33_spill] sm:$0xff]  ;;  %v22887_v51 = vld [vmem:[#allocation40_spill] sm:$0xff] }
 0x38f   : > { %v14377_v39 = vadd.f32 %v20741_v41, %v14174_v13  ;;  %v14175_v43 = vmax.f32 %v12181_v2, %v17465_v0  ;;  %17365 = vmatmul.mubr.msk.bf16.gmra.mrb[76].mxu0 %vm7239_vm2, %v17996_v5  ;;  %17571 = vmatmul.mubr.msk.bf16.gmra.mrb[76].mxu1 %vm7239_vm2, %v17997_v54  ;;  %v22872_v13 = vld [vmem:[#allocation30_spill] sm:$0xff] }
 0x390   : > { %v14375_v44 = vadd.f32 %v20741_v41, %v14172_v35  ;;  %v14173_v8 = vmax.f32 %v12179_v38, %v13476_v18  ;;  %17368 = vmatprep.mubr.msk.bf16.mxu0 %vm7239_vm2, %v17998_v10  ;;  %17574 = vmatprep.mubr.msk.bf16.mxu1 %vm7239_vm2, %v17999_v21  ;;  %v22874_v34 = vmax.f32 %v22872_v13, %v22873_v33  ;;  %v18004_v18 = vld [vmem:[%s18941_s17 + $0x868] sm:$0xff]   ;;  %v18005_v35 = vld [vmem:[%s18941_s17 + $0xb78] sm:$0xff]  }
 0x391   : > { %v14573_v9 = vmax.f32 %v14377_v39, 0.0  ;;  %v14378_v3 = vadd.f32 %v20741_v41, %v14175_v43  ;;  %v22877_v38 = vmax.f32 %v22875_v29, %v22876_v63 }
 0x392   : > { %v14571_v4 = vmax.f32 %v14375_v44, 0.0  ;;  %v14376_v19 = vadd.f32 %v20741_v41, %v14173_v8  ;;  %v17262_v20 = vpop.f32.mrb[228].mxu0  ;;  %v17468_v15 = vpop.f32.mrb[228].mxu1  ;;  %v18006_v8 = vld [vmem:[%s18941_s17 + $0x870] sm:$0xff]  }
 0x393   : > { %14770 = vst.msk [vmem:[%s20760_s22 + $0xf0] sm:$0xff] %vm14739_vm3, %v14573_v9  ;;  %v14574_v16 = vmax.f32 %v14378_v3, 0.0  ;;  %v12184_v31 = vmax.f32 %v22862_v25, %v17262_v20  ;;  %v11495_v47 = vpop.f32.mrb[229].mxu0  ;;  %v13489_v48 = vpop.f32.mrb[229].mxu1  ;;  %v18007_v9 = vld [vmem:[%s18941_s17 + $0xb80] sm:$0xff]   ;;  %v22881_v25 = vld [vmem:[#allocation36_spill] sm:$0xff] }
 0x394   : > { %14768 = vst.msk [vmem:[%s20760_s22 + $0xe0] sm:$0xff] %vm14739_vm3, %v14571_v4  ;;  %v14572_v27 = vmax.f32 %v14376_v19, 0.0  ;;  %v12182_v46 = vmax.f32 %v22865_v12, %v11495_v47  ;;  %v17263_v53 = vpop.f32.mrb[230].mxu0  ;;  %v17469_v57 = vpop.f32.mrb[230].mxu1  ;;  %v22878_v4 = vld [vmem:[#allocation34_spill] sm:$0xff]  ;;  %v22879_v19 = vld [vmem:[#allocation35_spill] sm:$0xff] }
 0x395   : > { %14771 = vst.msk [vmem:[%s20760_s22 + $0xf8] sm:$0xff] %vm14739_vm3, %v14574_v16  ;;  %v14178_v30 = vmax.f32 %v12184_v31, %v17468_v15  ;;  %v12185_v32 = vmax.f32 %v22868_v26, %v17263_v53  ;;  %v11498_v42 = vpop.f32.mrb[231].mxu0  ;;  %v13492_v37 = vpop.f32.mrb[231].mxu1  ;;  %v22880_v20 = vmax.f32 %v22878_v4, %v22879_v19  ;;  %v22882_v31 = vld [vmem:[#allocation37_spill] sm:$0xff]  ;;  %v22897_v4 = vld [vmem:[#allocation47_spill] sm:$0xff] }
 0x396   : > { %14769 = vst.msk [vmem:[%s20760_s22 + $0xe8] sm:$0xff] %vm14739_vm3, %v14572_v27  ;;  %v14176_v61 = vmax.f32 %v12182_v46, %v13489_v48  ;;  %v12183_v24 = vmax.f32 %v22871_v52, %v11498_v42  ;;  %v22883_v47 = vmax.f32 %v22881_v25, %v22882_v31  ;;  %v22888_v52 = vld [vmem:[#allocation41_spill] sm:$0xff]  ;;  %v22899_v31 = vld [vmem:[#allocation48_spill] sm:$0xff] }
 0x397   : > { %v14381_v5 = vadd.f32 %v20741_v41, %v14178_v30  ;;  %v14179_v54 = vmax.f32 %v12185_v32, %v17469_v57  ;;  %17369 = vmatmul.mubr.msk.bf16.gmra.mrb[80].mxu0 %vm7239_vm2, %v18000_v22  ;;  %17575 = vmatmul.mubr.msk.bf16.gmra.mrb[80].mxu1 %vm7239_vm2, %v18001_v23  ;;  %v22884_v30 = vld [vmem:[#allocation38_spill] sm:$0xff] }
 0x398   : > { %v14379_v55 = vadd.f32 %v20741_v41, %v14176_v61  ;;  %v14177_v59 = vmax.f32 %v12183_v24, %v13492_v37  ;;  %17372 = vmatprep.mubr.msk.bf16.mxu0 %vm7239_vm2, %v18002_v14  ;;  %17578 = vmatprep.mubr.msk.bf16.mxu1 %vm7239_vm2, %v18003_v45  ;;  %v22886_v50 = vmax.f32 %v22884_v30, %v22885_v49  ;;  %v18008_v37 = vld [vmem:[%s18941_s17 + $0x878] sm:$0xff]   ;;  %v18009_v61 = vld [vmem:[%s18941_s17 + $0xb88] sm:$0xff]  }
 0x399   : > { %v14577_v58 = vmax.f32 %v14381_v5, 0.0  ;;  %v14382_v56 = vadd.f32 %v20741_v41, %v14179_v54  ;;  %v22889_v24 = vmax.f32 %v22887_v51, %v22888_v52 }
 0x39a   : > { %v14575_v60 = vmax.f32 %v14379_v55, 0.0  ;;  %v14380_v40 = vadd.f32 %v20741_v41, %v14177_v59  ;;  %v17266_v0 = vpop.f32.mrb[232].mxu0  ;;  %v17472_v10 = vpop.f32.mrb[232].mxu1  ;;  %v18010_v59 = vld [vmem:[%s18941_s17 + $0x880] sm:$0xff]  }
 0x39b   : > { %14774 = vst.msk [vmem:[%s20760_s22 + $0x110] sm:$0xff] %vm14739_vm3, %v14577_v58  ;;  %v14578_v21 = vmax.f32 %v14382_v56, 0.0  ;;  %v12188_v1 = vmax.f32 %v22874_v34, %v17266_v0  ;;  %v11511_v2 = vpop.f32.mrb[233].mxu0  ;;  %v13505_v17 = vpop.f32.mrb[233].mxu1  ;;  %v18011_v58 = vld [vmem:[%s18941_s17 + $0xb90] sm:$0xff]   ;;  %v22893_v34 = vld [vmem:[#allocation44_spill] sm:$0xff] }
 0x39c   : > { %14772 = vst.msk [vmem:[%s20760_s22 + $0x100] sm:$0xff] %vm14739_vm3, %v14575_v60  ;;  %v14576_v36 = vmax.f32 %v14380_v40, 0.0  ;;  %v12186_v39 = vmax.f32 %v22877_v38, %v11511_v2  ;;  %v17267_v43 = vpop.f32.mrb[234].mxu0  ;;  %v17473_v44 = vpop.f32.mrb[234].mxu1  ;;  %v22890_v60 = vld [vmem:[#allocation42_spill] sm:$0xff]  ;;  %v22891_v40 = vld [vmem:[#allocation43_spill] sm:$0xff] }
 0x39d   : > { %14775 = vst.msk [vmem:[%s20760_s22 + $0x118] sm:$0xff] %vm14739_vm3, %v14578_v21  ;;  %v14182_v3 = vmax.f32 %v12188_v1, %v17472_v10  ;;  %v12189_v15 = vmax.f32 %v22880_v20, %v17267_v43  ;;  %v11514_v16 = vpop.f32.mrb[235].mxu0  ;;  %v13508_v6 = vpop.f32.mrb[235].mxu1  ;;  %v22892_v0 = vmax.f32 %v22890_v60, %v22891_v40  ;;  %v22894_v1 = vld [vmem:[#allocation45_spill] sm:$0xff]  ;;  %v22909_v60 = vld [vmem:[#allocation55_spill] sm:$0xff] }
 0x39e   : > { %14773 = vst.msk [vmem:[%s20760_s22 + $0x108] sm:$0xff] %vm14739_vm3, %v14576_v36  ;;  %v14180_v7 = vmax.f32 %v12186_v39, %v13505_v17  ;;  %v12187_v48 = vmax.f32 %v22883_v47, %v11514_v16  ;;  %v22895_v2 = vmax.f32 %v22893_v34, %v22894_v1  ;;  %v22900_v47 = vld [vmem:[#allocation49_spill] sm:$0xff]  ;;  %v22911_v1 = vld [vmem:[#allocation56_spill] sm:$0xff] }
 0x39f   : > { %v14385_v22 = vadd.f32 %v20741_v41, %v14182_v3  ;;  %v14183_v23 = vmax.f32 %v12189_v15, %v17473_v44  ;;  %17373 = vmatmul.mubr.msk.bf16.gmra.mrb[84].mxu0 %vm7239_vm2, %v18004_v18  ;;  %17579 = vmatmul.mubr.msk.bf16.gmra.mrb[84].mxu1 %vm7239_vm2, %v18005_v35  ;;  %v22896_v3 = vld [vmem:[#allocation46_spill] sm:$0xff] }
 0x3a0   : > { %v14383_v27 = vadd.f32 %v20741_v41, %v14180_v7  ;;  %v14181_v28 = vmax.f32 %v12187_v48, %v13508_v6  ;;  %17376 = vmatprep.mubr.msk.bf16.mxu0 %vm7239_vm2, %v18006_v8  ;;  %17582 = vmatprep.mubr.msk.bf16.mxu1 %vm7239_vm2, %v18007_v9  ;;  %v22898_v19 = vmax.f32 %v22896_v3, %v22897_v4  ;;  %v18012_v6 = vld [vmem:[%s18941_s17 + $0x888] sm:$0xff]   ;;  %v18013_v7 = vld [vmem:[%s18941_s17 + $0xb98] sm:$0xff]  }
 0x3a1   : > { %v14581_v11 = vmax.f32 %v14385_v22, 0.0  ;;  %v14386_v12 = vadd.f32 %v20741_v41, %v14183_v23  ;;  %v22901_v48 = vmax.f32 %v22899_v31, %v22900_v47 }
 0x3a2   : > { %v14579_v46 = vmax.f32 %v14383_v27, 0.0  ;;  %v14384_v53 = vadd.f32 %v20741_v41, %v14181_v28  ;;  %v17270_v57 = vpop.f32.mrb[236].mxu0  ;;  %v17476_v14 = vpop.f32.mrb[236].mxu1  ;;  %v18014_v28 = vld [vmem:[%s18941_s17 + $0x890] sm:$0xff]  }
 0x3a3   : > { %14778 = vst.msk [vmem:[%s20760_s22 + $0x130] sm:$0xff] %vm14739_vm3, %v14581_v11  ;;  %v14582_v45 = vmax.f32 %v14386_v12, 0.0  ;;  %v12192_v26 = vmax.f32 %v22886_v50, %v17270_v57  ;;  %v11527_v32 = vpop.f32.mrb[237].mxu0  ;;  %v13521_v42 = vpop.f32.mrb[237].mxu1  ;;  %v18015_v11 = vld [vmem:[%s18941_s17 + $0xba0] sm:$0xff]   ;;  %v22905_v50 = vld [vmem:[#allocation52_spill] sm:$0xff] }
 0x3a4   : > { %14776 = vst.msk [vmem:[%s20760_s22 + $0x120] sm:$0xff] %vm14739_vm3, %v14579_v46  ;;  %v14580_v62 = vmax.f32 %v14384_v53, 0.0  ;;  %v12190_v5 = vmax.f32 %v22889_v24, %v11527_v32  ;;  %v17271_v54 = vpop.f32.mrb[238].mxu0  ;;  %v17477_v55 = vpop.f32.mrb[238].mxu1  ;;  %v22902_v46 = vld [vmem:[#allocation50_spill] sm:$0xff]  ;;  %v22903_v53 = vld [vmem:[#allocation51_spill] sm:$0xff] }
 0x3a5   : > { %14779 = vst.msk [vmem:[%s20760_s22 + $0x138] sm:$0xff] %vm14739_vm3, %v14582_v45  ;;  %v14186_v56 = vmax.f32 %v12192_v26, %v17476_v14  ;;  %v12193_v10 = vmax.f32 %v22892_v0, %v17271_v54  ;;  %v11530_v21 = vpop.f32.mrb[239].mxu0  ;;  %v13524_v13 = vpop.f32.mrb[239].mxu1  ;;  %v22904_v57 = vmax.f32 %v22902_v46, %v22903_v53  ;;  %v22906_v26 = vld [vmem:[#allocation53_spill] sm:$0xff]  ;;  %v22921_v46 = vld [vmem:[#allocation63_spill] sm:$0xff] }
 0x3a6   : > { %14777 = vst.msk [vmem:[%s20760_s22 + $0x128] sm:$0xff] %vm14739_vm3, %v14580_v62  ;;  %v14184_v33 = vmax.f32 %v12190_v5, %v13521_v42  ;;  %v12191_v17 = vmax.f32 %v22895_v2, %v11530_v21  ;;  %v22907_v32 = vmax.f32 %v22905_v50, %v22906_v26  ;;  %v22912_v2 = vld [vmem:[#allocation57_spill] sm:$0xff]  ;;  %v22923_v26 = vld [vmem:[#allocation64_spill] sm:$0xff] }
 0x3a7   : > { %v14389_v18 = vadd.f32 %v20741_v41, %v14186_v56  ;;  %v14187_v35 = vmax.f32 %v12193_v10, %v17477_v55  ;;  %17377 = vmatmul.mubr.msk.bf16.gmra.mrb[88].mxu0 %vm7239_vm2, %v18008_v37  ;;  %17583 = vmatmul.mubr.msk.bf16.gmra.mrb[88].mxu1 %vm7239_vm2, %v18009_v61  ;;  %v22908_v56 = vld [vmem:[#allocation54_spill] sm:$0xff] }
 0x3a8   : > { %v14387_v36 = vadd.f32 %v20741_v41, %v14184_v33  ;;  %v14185_v29 = vmax.f32 %v12191_v17, %v13524_v13  ;;  %17380 = vmatprep.mubr.msk.bf16.mxu0 %vm7239_vm2, %v18010_v59  ;;  %17586 = vmatprep.mubr.msk.bf16.mxu1 %vm7239_vm2, %v18011_v58  ;;  %v22910_v40 = vmax.f32 %v22908_v56, %v22909_v60  ;;  %v18016_v13 = vld [vmem:[%s18941_s17 + $0x898] sm:$0xff]   ;;  %v18017_v33 = vld [vmem:[%s18941_s17 + $0xba8] sm:$0xff]  }
 0x3a9   : > { %v14585_v63 = vmax.f32 %v14389_v18, 0.0  ;;  %v14390_v38 = vadd.f32 %v20741_v41, %v14187_v35  ;;  %v22913_v17 = vmax.f32 %v22911_v1, %v22912_v2 }
 0x3aa   : > { %v14583_v39 = vmax.f32 %v14387_v36, 0.0  ;;  %v14388_v43 = vadd.f32 %v20741_v41, %v14185_v29  ;;  %v17274_v44 = vpop.f32.mrb[240].mxu0  ;;  %v17480_v8 = vpop.f32.mrb[240].mxu1  ;;  %v18018_v29 = vld [vmem:[%s18941_s17 + $0x8a0] sm:$0xff]  }
 0x3ab   : > { %14782 = vst.msk [vmem:[%s20760_s22 + $0x150] sm:$0xff] %vm14739_vm3, %v14585_v63  ;;  %v14586_v9 = vmax.f32 %v14390_v38, 0.0  ;;  %v12196_v20 = vmax.f32 %v22898_v19, %v17274_v44  ;;  %v11543_v15 = vpop.f32.mrb[241].mxu0  ;;  %v13537_v16 = vpop.f32.mrb[241].mxu1  ;;  %v18019_v63 = vld [vmem:[%s18941_s17 + $0xbb0] sm:$0xff]   ;;  %v22917_v19 = vld [vmem:[#allocation60_spill] sm:$0xff] }
 0x3ac   : > { %14780 = vst.msk [vmem:[%s20760_s22 + $0x140] sm:$0xff] %vm14739_vm3, %v14583_v39  ;;  %v14584_v25 = vmax.f32 %v14388_v43, 0.0  ;;  %v12194_v22 = vmax.f32 %v22901_v48, %v11543_v15  ;;  %v17275_v23 = vpop.f32.mrb[242].mxu0  ;;  %v17481_v27 = vpop.f32.mrb[242].mxu1  ;;  %v22914_v39 = vld [vmem:[#allocation58_spill] sm:$0xff]  ;;  %v22915_v43 = vld [vmem:[#allocation59_spill] sm:$0xff] }
 0x3ad   : > { %14783 = vst.msk [vmem:[%s20760_s22 + $0x158] sm:$0xff] %vm14739_vm3, %v14586_v9  ;;  %v14190_v12 = vmax.f32 %v12196_v20, %v17480_v8  ;;  %v12197_v14 = vmax.f32 %v22904_v57, %v17275_v23  ;;  %v11546_v45 = vpop.f32.mrb[243].mxu0  ;;  %v13540_v30 = vpop.f32.mrb[243].mxu1  ;;  %v22916_v44 = vmax.f32 %v22914_v39, %v22915_v43  ;;  %v22918_v20 = vld [vmem:[#allocation61_spill] sm:$0xff]  ;;  %v22933_v39 = vld [vmem:[#allocation71_spill] sm:$0xff] }
 0x3ae   : > { %14781 = vst.msk [vmem:[%s20760_s22 + $0x148] sm:$0xff] %vm14739_vm3, %v14584_v25  ;;  %v14188_v49 = vmax.f32 %v12194_v22, %v13537_v16  ;;  %v12195_v42 = vmax.f32 %v22907_v32, %v11546_v45  ;;  %v22919_v15 = vmax.f32 %v22917_v19, %v22918_v20  ;;  %v22924_v32 = vld [vmem:[#allocation65_spill] sm:$0xff] }
 0x3af   : > { %v14393_v37 = vadd.f32 %v20741_v41, %v14190_v12  ;;  %v14191_v61 = vmax.f32 %v12197_v14, %v17481_v27  ;;  %17381 = vmatmul.mubr.msk.bf16.gmra.mrb[92].mxu0 %vm7239_vm2, %v18012_v6  ;;  %17587 = vmatmul.mubr.msk.bf16.gmra.mrb[92].mxu1 %vm7239_vm2, %v18013_v7  ;;  %v22920_v12 = vld [vmem:[#allocation62_spill] sm:$0xff]  ;;  %v22936_v20 = vld [vmem:[#allocation73_spill] sm:$0xff] }
 0x3b0   : > { %v14391_v62 = vadd.f32 %v20741_v41, %v14188_v49  ;;  %v14189_v51 = vmax.f32 %v12195_v42, %v13540_v30  ;;  %17384 = vmatprep.mubr.msk.bf16.mxu0 %vm7239_vm2, %v18014_v28  ;;  %17590 = vmatprep.mubr.msk.bf16.mxu1 %vm7239_vm2, %v18015_v11  ;;  %v22922_v53 = vmax.f32 %v22920_v12, %v22921_v46  ;;  %v18020_v30 = vld [vmem:[%s18941_s17 + $0x8a8] sm:$0xff]   ;;  %v18021_v49 = vld [vmem:[%s18941_s17 + $0xbb8] sm:$0xff]  }
 0x3b1   : > { %v14589_v52 = vmax.f32 %v14393_v37, 0.0  ;;  %v14394_v24 = vadd.f32 %v20741_v41, %v14191_v61  ;;  %v22925_v42 = vmax.f32 %v22923_v26, %v22924_v32  ;;  %v22941_v46 = vld [vmem:[#allocation76_spill] sm:$0xff] }
 0x3b2   : > { %v14587_v5 = vmax.f32 %v14391_v62, 0.0  ;;  %v14392_v54 = vadd.f32 %v20741_v41, %v14189_v51  ;;  %v17278_v55 = vpop.f32.mrb[244].mxu0  ;;  %v17484_v59 = vpop.f32.mrb[244].mxu1  ;;  %v18022_v51 = vld [vmem:[%s18941_s17 + $0x8b0] sm:$0xff]  }
 0x3b3   : > { %14786 = vst.msk [vmem:[%s20760_s22 + $0x170] sm:$0xff] %vm14739_vm3, %v14589_v52  ;;  %v14590_v58 = vmax.f32 %v14394_v24, 0.0  ;;  %v12200_v0 = vmax.f32 %v22910_v40, %v17278_v55  ;;  %v11559_v10 = vpop.f32.mrb[245].mxu0  ;;  %v13553_v21 = vpop.f32.mrb[245].mxu1  ;;  %v18023_v52 = vld [vmem:[%s18941_s17 + $0xbc0] sm:$0xff]   ;;  %v22929_v40 = vld [vmem:[#allocation68_spill] sm:$0xff] }
 0x3b4   : > { %14784 = vst.msk [vmem:[%s20760_s22 + $0x160] sm:$0xff] %vm14739_vm3, %v14587_v5  ;;  %v14588_v34 = vmax.f32 %v14392_v54, 0.0  ;;  %v12198_v18 = vmax.f32 %v22913_v17, %v11559_v10  ;;  %v17279_v35 = vpop.f32.mrb[246].mxu0  ;;  %v17485_v36 = vpop.f32.mrb[246].mxu1  ;;  %v22926_v5 = vld [vmem:[#allocation66_spill] sm:$0xff]  ;;  %v22927_v54 = vld [vmem:[#allocation67_spill] sm:$0xff] }
 0x3b5   : > { %14787 = vst.msk [vmem:[%s20760_s22 + $0x178] sm:$0xff] %vm14739_vm3, %v14590_v58  ;;  %v14194_v38 = vmax.f32 %v12200_v0, %v17484_v59  ;;  %v12201_v8 = vmax.f32 %v22916_v44, %v17279_v35  ;;  %v11562_v9 = vpop.f32.mrb[247].mxu0  ;;  %v13556_v3 = vpop.f32.mrb[247].mxu1  ;;  %v22928_v55 = vmax.f32 %v22926_v5, %v22927_v54  ;;  %v22930_v0 = vld [vmem:[#allocation69_spill] sm:$0xff]  ;;  %v22945_v5 = vld [vmem:[#allocation79_spill] sm:$0xff] }
 0x3b6   : > { %14785 = vst.msk [vmem:[%s20760_s22 + $0x168] sm:$0xff] %vm14739_vm3, %v14588_v34  ;;  %v14192_v4 = vmax.f32 %v12198_v18, %v13553_v21  ;;  %v12199_v16 = vmax.f32 %v22919_v15, %v11562_v9  ;;  %v22931_v10 = vmax.f32 %v22929_v40, %v22930_v0  ;;  %v22947_v0 = vld [vmem:[#allocation80_spill] sm:$0xff] }
 0x3b7   : > { %v14397_v6 = vadd.f32 %v20741_v41, %v14194_v38  ;;  %v14195_v7 = vmax.f32 %v12201_v8, %v17485_v36  ;;  %17385 = vmatmul.mubr.msk.bf16.gmra.mrb[96].mxu0 %vm7239_vm2, %v18016_v13  ;;  %17591 = vmatmul.mubr.msk.bf16.gmra.mrb[96].mxu1 %vm7239_vm2, %v18017_v33  ;;  %v22932_v38 = vld [vmem:[#allocation70_spill] sm:$0xff] }
 0x3b8   : > { %v14395_v25 = vadd.f32 %v20741_v41, %v14192_v4  ;;  %v14193_v31 = vmax.f32 %v12199_v16, %v13556_v3  ;;  %17388 = vmatprep.mubr.msk.bf16.mxu0 %vm7239_vm2, %v18018_v29  ;;  %17594 = vmatprep.mubr.msk.bf16.mxu1 %vm7239_vm2, %v18019_v63  ;;  %v22934_v43 = vmax.f32 %v22932_v38, %v22933_v39  ;;  %v18024_v3 = vld [vmem:[%s18941_s17 + $0x8b8] sm:$0xff]   ;;  %v18025_v4 = vld [vmem:[%s18941_s17 + $0xbc8] sm:$0xff]  }
 0x3b9   : > { %v14593_v47 = vmax.f32 %v14397_v6, 0.0  ;;  %v14398_v48 = vadd.f32 %v20741_v41, %v14195_v7 }
 0x3ba   : > { %v14591_v22 = vmax.f32 %v14395_v25, 0.0  ;;  %v14396_v23 = vadd.f32 %v20741_v41, %v14193_v31  ;;  %v17282_v27 = vpop.f32.mrb[248].mxu0  ;;  %v17488_v28 = vpop.f32.mrb[248].mxu1  ;;  %v18026_v25 = vld [vmem:[%s18941_s17 + $0x8c0] sm:$0xff]   ;;  %v18027_v31 = vld [vmem:[%s18941_s17 + $0xbd0] sm:$0xff]  }
 0x3bb   : > { %14790 = vst.msk [vmem:[%s20760_s22 + $0x190] sm:$0xff] %vm14739_vm3, %v14593_v47  ;;  %v14594_v11 = vmax.f32 %v14398_v48, 0.0  ;;  %v12204_v57 = vmax.f32 %v22922_v53, %v17282_v27  ;;  %v11575_v14 = vpop.f32.mrb[249].mxu0  ;;  %v13569_v45 = vpop.f32.mrb[249].mxu1  ;;  %v22938_v48 = vld [vmem:[#allocation74_spill] sm:$0xff]  ;;  %v22942_v53 = vld [vmem:[#allocation77_spill] sm:$0xff] }
 0x3bc   : > { %14788 = vst.msk [vmem:[%s20760_s22 + $0x180] sm:$0xff] %vm14739_vm3, %v14591_v22  ;;  %v14592_v50 = vmax.f32 %v14396_v23, 0.0  ;;  %v12202_v37 = vmax.f32 %v22925_v42, %v11575_v14  ;;  %v17283_v61 = vpop.f32.mrb[250].mxu0  ;;  %v17489_v62 = vpop.f32.mrb[250].mxu1  ;;  %v22939_v22 = vld [vmem:[#allocation75_spill] sm:$0xff] }
 0x3bd   : > { %14791 = vst.msk [vmem:[%s20760_s22 + $0x198] sm:$0xff] %vm14739_vm3, %v14594_v11  ;;  %v14198_v24 = vmax.f32 %v12204_v57, %v17488_v28  ;;  %v12205_v59 = vmax.f32 %v22928_v55, %v17283_v61  ;;  %v11578_v58 = vpop.f32.mrb[251].mxu0  ;;  %v13572_v56 = vpop.f32.mrb[251].mxu1  ;;  %v22940_v23 = vmax.f32 %v22938_v48, %v22939_v22  ;;  %v22943_v57 = vmax.f32 %v22941_v46, %v22942_v53  ;;  %v22957_v48 = vld [vmem:[#allocation87_spill] sm:$0xff]  ;;  %v22959_v53 = vld [vmem:[#allocation88_spill] sm:$0xff] }
 0x3be   : > { %14789 = vst.msk [vmem:[%s20760_s22 + $0x188] sm:$0xff] %vm14739_vm3, %v14592_v50  ;;  %v14196_v60 = vmax.f32 %v12202_v37, %v13569_v45  ;;  %v12203_v21 = vmax.f32 %v22931_v10, %v11578_v58  ;;  %v21210_v45 = vld [vmem:[%s22113_s2] ss:$0 sm:$0xff]  ;;  %v22948_v10 = vld [vmem:[#allocation81_spill] sm:$0xff] }
 0x3bf   : > { %v14401_v13 = vadd.f32 %v20741_v41, %v14198_v24  ;;  %v14199_v33 = vmax.f32 %v12205_v59, %v17489_v62  ;;  %17389 = vmatmul.mubr.msk.bf16.gmra.mrb[100].mxu0 %vm7239_vm2, %v18020_v30  ;;  %17595 = vmatmul.mubr.msk.bf16.gmra.mrb[100].mxu1 %vm7239_vm2, %v18021_v49  ;;  %v22944_v24 = vld [vmem:[#allocation78_spill] sm:$0xff] }
 0x3c0   : > { %v14399_v34 = vadd.f32 %v20741_v41, %v14196_v60  ;;  %v14197_v1 = vmax.f32 %v12203_v21, %v13572_v56  ;;  %17392 = vmatprep.mubr.msk.bf16.mxu0 %vm7239_vm2, %v18022_v51  ;;  %17598 = vmatprep.mubr.msk.bf16.mxu1 %vm7239_vm2, %v18023_v52  ;;  %v22946_v54 = vmax.f32 %v22944_v24, %v22945_v5  ;;  %v18028_v56 = vld [vmem:[%s18941_s17 + $0x8c8] sm:$0xff]   ;;  %v18029_v60 = vld [vmem:[%s18941_s17 + $0xbd8] sm:$0xff]  }
 0x3c1   : > { %v14597_v2 = vmax.f32 %v14401_v13, 0.0  ;;  %v14402_v17 = vadd.f32 %v20741_v41, %v14199_v33  ;;  %v22949_v21 = vmax.f32 %v22947_v0, %v22948_v10 }
 0x3c2   : > { %v14595_v18 = vmax.f32 %v14399_v34, 0.0  ;;  %v14400_v35 = vadd.f32 %v20741_v41, %v14197_v1  ;;  %v17286_v36 = vpop.f32.mrb[252].mxu0  ;;  %v17492_v29 = vpop.f32.mrb[252].mxu1  ;;  %v22935_v41 = vld [vmem:[#allocation72_spill] sm:$0xff]  ;;  %v18030_v1 = vld [vmem:[%s18941_s17 + $0x8d0] sm:$0xff]  }
 0x3c3   : > { %14794 = vst.msk [vmem:[%s20760_s22 + $0x1b0] sm:$0xff] %vm14739_vm3, %v14597_v2  ;;  %v14598_v63 = vmax.f32 %v14402_v17, 0.0  ;;  %v12208_v44 = vmax.f32 %v22934_v43, %v17286_v36  ;;  %v11591_v8 = vpop.f32.mrb[253].mxu0  ;;  %v13585_v9 = vpop.f32.mrb[253].mxu1  ;;  %v22937_v15 = vmax.f32 %v22935_v41, %v22936_v20  ;;  %v18031_v2 = vld [vmem:[%s18941_s17 + $0xbe0] sm:$0xff]   ;;  %v22953_v43 = vld [vmem:[#allocation84_spill] sm:$0xff] }
 0x3c4   : > { %14792 = vst.msk [vmem:[%s20760_s22 + $0x1a0] sm:$0xff] %vm14739_vm3, %v14595_v18  ;;  %v14596_v19 = vmax.f32 %v14400_v35, 0.0  ;;  %v17287_v6 = vpop.f32.mrb[254].mxu0  ;;  %v17493_v7 = vpop.f32.mrb[254].mxu1  ;;  %v22950_v18 = vld [vmem:[#allocation82_spill] sm:$0xff]  ;;  %v22951_v35 = vld [vmem:[#allocation83_spill] sm:$0xff] }
 0x3c5   : > { %v12206_v16 = vmax.f32 %v22937_v15, %v11591_v8  ;;  %14795 = vst.msk [vmem:[%s20760_s22 + $0x1b8] sm:$0xff] %vm14739_vm3, %v14598_v63  ;;  %v14202_v47 = vmax.f32 %v12208_v44, %v17492_v29  ;;  %v12209_v27 = vmax.f32 %v22940_v23, %v17287_v6  ;;  %v11594_v28 = vpop.f32.mrb[255].mxu0  ;;  %v13588_v11 = vpop.f32.mrb[255].mxu1  ;;  %v22952_v36 = vmax.f32 %v22950_v18, %v22951_v35  ;;  %v22954_v44 = vld [vmem:[#allocation85_spill] sm:$0xff]  ;;  %v22969_v18 = vld [vmem:[#allocation95_spill] sm:$0xff] }
 0x3c6   : > { %14793 = vst.msk [vmem:[%s20760_s22 + $0x1a8] sm:$0xff] %vm14739_vm3, %v14596_v19  ;;  %v12207_v14 = vmax.f32 %v22943_v57, %v11594_v28  ;;  %v22955_v8 = vmax.f32 %v22953_v43, %v22954_v44  ;;  %v22960_v57 = vld [vmem:[#allocation89_spill] sm:$0xff]  ;;  %v22971_v44 = vld [vmem:[#allocation96_spill] sm:$0xff] }
 0x3c7   : > { %v14200_v12 = vmax.f32 %v12206_v16, %v13585_v9  ;;  %v14405_v30 = vadd.f32 %v21210_v45, %v14202_v47  ;;  %v14203_v49 = vmax.f32 %v12209_v27, %v17493_v7  ;;  %17393 = vmatmul.mubr.msk.bf16.gmra.mrb[104].mxu0 %vm7239_vm2, %v18024_v3  ;;  %17599 = vmatmul.mubr.msk.bf16.gmra.mrb[104].mxu1 %vm7239_vm2, %v18025_v4  ;;  %v22956_v47 = vld [vmem:[#allocation86_spill] sm:$0xff] }
 0x3c8   : > { %v14201_v26 = vmax.f32 %v12207_v14, %v13588_v11  ;;  %17396 = vmatprep.mubr.msk.bf16.mxu0 %vm7239_vm2, %v18026_v25  ;;  %17602 = vmatprep.mubr.msk.bf16.mxu1 %vm7239_vm2, %v18027_v31  ;;  %v22958_v22 = vmax.f32 %v22956_v47, %v22957_v48  ;;  %v18032_v11 = vld [vmem:[%s18941_s17 + $0x8d8] sm:$0xff]   ;;  %v22961_v14 = vmax.f32 %v22959_v53, %v22960_v57 }
 0x3c9   : > { %v14403_v50 = vadd.f32 %v21210_v45, %v14200_v12  ;;  %v14601_v32 = vmax.f32 %v14405_v30, 0.0  ;;  %v14406_v42 = vadd.f32 %v21210_v45, %v14203_v49  ;;  %v18033_v12 = vld [vmem:[%s18941_s17 + $0xbe8] sm:$0xff]  }
 0x3ca   : > { %v14404_v61 = vadd.f32 %v21210_v45, %v14201_v26  ;;  %v17290_v62 = vpop.f32.mrb[0].mxu0  ;;  %v17496_v51 = vpop.f32.mrb[0].mxu1  ;;  %v18034_v26 = vld [vmem:[%s18941_s17 + $0x8e0] sm:$0xff]  }
 0x3cb   : > { %v14599_v37 = vmax.f32 %v14403_v50, 0.0  ;;  %14798 = vst.msk [vmem:[%s20760_s22 + $0x1d0] sm:$0xff] %vm14739_vm3, %v14601_v32  ;;  %v14602_v52 = vmax.f32 %v14406_v42, 0.0  ;;  %v12212_v55 = vmax.f32 %v22946_v54, %v17290_v62  ;;  %v11607_v59 = vpop.f32.mrb[1].mxu0  ;;  %v13601_v58 = vpop.f32.mrb[1].mxu1  ;;  %v18035_v32 = vld [vmem:[%s18941_s17 + $0xbf0] sm:$0xff]  }
 0x3cc   : > { %v14600_v40 = vmax.f32 %v14404_v61, 0.0  ;;  %v12210_v13 = vmax.f32 %v22949_v21, %v11607_v59  ;;  %v17291_v33 = vpop.f32.mrb[2].mxu0  ;;  %v17497_v34 = vpop.f32.mrb[2].mxu1  ;;  %v22963_v61 = vld [vmem:[#allocation91_spill] sm:$0xff]  ;;  %v22965_v54 = vld [vmem:[#allocation92_spill] sm:$0xff] }
 0x3cd   : > { %14796 = vst.msk [vmem:[%s20760_s22 + $0x1c0] sm:$0xff] %vm14739_vm3, %v14599_v37  ;;  %14799 = vst.msk [vmem:[%s20760_s22 + $0x1d8] sm:$0xff] %vm14739_vm3, %v14602_v52  ;;  %v14206_v17 = vmax.f32 %v12212_v55, %v17496_v51  ;;  %v12213_v29 = vmax.f32 %v22952_v36, %v17291_v33  ;;  %v11610_v63 = vpop.f32.mrb[3].mxu0  ;;  %v13604_v38 = vpop.f32.mrb[3].mxu1  ;;  %v22962_v37 = vld [vmem:[#allocation90_spill] sm:$0xff]  ;;  %v22966_v55 = vld [vmem:[#allocation93_spill] sm:$0xff] }
 0x3ce   : > { %14797 = vst.msk [vmem:[%s20760_s22 + $0x1c8] sm:$0xff] %vm14739_vm3, %v14600_v40  ;;  %v14204_v39 = vmax.f32 %v12210_v13, %v13601_v58  ;;  %v12211_v9 = vmax.f32 %v22955_v8, %v11610_v63  ;;  %v22964_v62 = vmax.f32 %v22962_v37, %v22963_v61  ;;  %v22967_v59 = vmax.f32 %v22965_v54, %v22966_v55  ;;  %v22972_v8 = vld [vmem:[#allocation97_spill] sm:$0xff]  ;;  %v22981_v37 = vld [vmem:[#allocation103_spill] sm:$0xff]  ;;  %v22983_v55 = vld [vmem:[#allocation104_spill] sm:$0xff] }
 0x3cf   : > { %v14409_v3 = vadd.f32 %v21210_v45, %v14206_v17  ;;  %v14207_v4 = vmax.f32 %v12213_v29, %v17497_v34  ;;  %17397 = vmatmul.mubr.msk.bf16.gmra.mrb[108].mxu0 %vm7239_vm2, %v18028_v56  ;;  %17603 = vmatmul.mubr.msk.bf16.gmra.mrb[108].mxu1 %vm7239_vm2, %v18029_v60  ;;  %v22968_v17 = vld [vmem:[#allocation94_spill] sm:$0xff] }
 0x3d0   : > { %v14407_v19 = vadd.f32 %v21210_v45, %v14204_v39  ;;  %v14205_v41 = vmax.f32 %v12211_v9, %v13604_v38  ;;  %17400 = vmatprep.mubr.msk.bf16.mxu0 %vm7239_vm2, %v18030_v1  ;;  %17606 = vmatprep.mubr.msk.bf16.mxu1 %vm7239_vm2, %v18031_v2  ;;  %v22970_v35 = vmax.f32 %v22968_v17, %v22969_v18  ;;  %v18036_v38 = vld [vmem:[%s18941_s17 + $0x8e8] sm:$0xff]   ;;  %v18037_v39 = vld [vmem:[%s18941_s17 + $0xbf8] sm:$0xff]  }
 0x3d1   : > { %v14605_v20 = vmax.f32 %v14409_v3, 0.0  ;;  %v14410_v15 = vadd.f32 %v21210_v45, %v14207_v4  ;;  %v22973_v9 = vmax.f32 %v22971_v44, %v22972_v8 }
 0x3d2   : > { %v14603_v16 = vmax.f32 %v14407_v19, 0.0  ;;  %v14408_v6 = vadd.f32 %v21210_v45, %v14205_v41  ;;  %v17294_v7 = vpop.f32.mrb[4].mxu0  ;;  %v17500_v25 = vpop.f32.mrb[4].mxu1  ;;  %v18038_v41 = vld [vmem:[%s18941_s17 + $0x8f0] sm:$0xff]  }
 0x3d3   : > { %14802 = vst.msk [vmem:[%s20760_s22 + $0x1f0] sm:$0xff] %vm14739_vm3, %v14605_v20  ;;  %v14606_v31 = vmax.f32 %v14410_v15, 0.0  ;;  %v12216_v23 = vmax.f32 %v22958_v22, %v17294_v7  ;;  %v11623_v27 = vpop.f32.mrb[5].mxu0  ;;  %v13617_v28 = vpop.f32.mrb[5].mxu1  ;;  %v18039_v20 = vld [vmem:[%s18941_s17 + $0xc00] sm:$0xff]   ;;  %v22977_v22 = vld [vmem:[#allocation100_spill] sm:$0xff] }
 0x3d4   : > { %14800 = vst.msk [vmem:[%s20760_s22 + $0x1e0] sm:$0xff] %vm14739_vm3, %v14603_v16  ;;  %v14604_v46 = vmax.f32 %v14408_v6, 0.0  ;;  %v12214_v30 = vmax.f32 %v22961_v14, %v11623_v27  ;;  %v17295_v49 = vpop.f32.mrb[6].mxu0  ;;  %v17501_v50 = vpop.f32.mrb[6].mxu1  ;;  %v22974_v16 = vld [vmem:[#allocation98_spill] sm:$0xff]  ;;  %v22975_v6 = vld [vmem:[#allocation99_spill] sm:$0xff] }
 0x3d5   : > { %14803 = vst.msk [vmem:[%s20760_s22 + $0x1f8] sm:$0xff] %vm14739_vm3, %v14606_v31  ;;  %v14210_v42 = vmax.f32 %v12216_v23, %v17500_v25  ;;  %v12217_v51 = vmax.f32 %v22964_v62, %v17295_v49  ;;  %v11626_v52 = vpop.f32.mrb[7].mxu0  ;;  %v13620_v24 = vpop.f32.mrb[7].mxu1  ;;  %v22976_v7 = vmax.f32 %v22974_v16, %v22975_v6  ;;  %v22978_v23 = vld [vmem:[#allocation101_spill] sm:$0xff]  ;;  %v22993_v16 = vld [vmem:[#allocation111_spill] sm:$0xff] }
 0x3d6   : > { %14801 = vst.msk [vmem:[%s20760_s22 + $0x1e8] sm:$0xff] %vm14739_vm3, %v14604_v46  ;;  %v14208_v5 = vmax.f32 %v12214_v30, %v13617_v28  ;;  %v12215_v58 = vmax.f32 %v22967_v59, %v11626_v52  ;;  %v22979_v27 = vmax.f32 %v22977_v22, %v22978_v23  ;;  %v22984_v59 = vld [vmem:[#allocation105_spill] sm:$0xff]  ;;  %v22995_v23 = vld [vmem:[#allocation112_spill] sm:$0xff] }
 0x3d7   : > { %v14413_v56 = vadd.f32 %v21210_v45, %v14210_v42  ;;  %v14211_v60 = vmax.f32 %v12217_v51, %v17501_v50  ;;  %17401 = vmatmul.mubr.msk.bf16.gmra.mrb[112].mxu0 %vm7239_vm2, %v18032_v11  ;;  %17607 = vmatmul.mubr.msk.bf16.gmra.mrb[112].mxu1 %vm7239_vm2, %v18033_v12  ;;  %v22980_v42 = vld [vmem:[#allocation102_spill] sm:$0xff] }
 0x3d8   : > { %v14411_v40 = vadd.f32 %v21210_v45, %v14208_v5  ;;  %v14209_v0 = vmax.f32 %v12215_v58, %v13620_v24  ;;  %17404 = vmatprep.mubr.msk.bf16.mxu0 %vm7239_vm2, %v18034_v26  ;;  %17610 = vmatprep.mubr.msk.bf16.mxu1 %vm7239_vm2, %v18035_v32  ;;  %v22982_v61 = vmax.f32 %v22980_v42, %v22981_v37  ;;  %v18040_v24 = vld [vmem:[%s18941_s17 + $0x8f8] sm:$0xff]   ;;  %v18041_v5 = vld [vmem:[%s18941_s17 + $0xc08] sm:$0xff]  }
 0x3d9   : > { %v14609_v10 = vmax.f32 %v14413_v56, 0.0  ;;  %v14414_v21 = vadd.f32 %v21210_v45, %v14211_v60  ;;  %v22985_v58 = vmax.f32 %v22983_v55, %v22984_v59 }
 0x3da   : > { %v14607_v13 = vmax.f32 %v14411_v40, 0.0  ;;  %v14412_v33 = vadd.f32 %v21210_v45, %v14209_v0  ;;  %v17298_v34 = vpop.f32.mrb[8].mxu0  ;;  %v17504_v1 = vpop.f32.mrb[8].mxu1  ;;  %v18042_v0 = vld [vmem:[%s18941_s17 + $0x900] sm:$0xff]  }
 0x3db   : > { %14806 = vst.msk [vmem:[%s20760_s22 + $0x210] sm:$0xff] %vm14739_vm3, %v14609_v10  ;;  %v14610_v2 = vmax.f32 %v14414_v21, 0.0  ;;  %v12220_v36 = vmax.f32 %v22970_v35, %v17298_v34  ;;  %v11639_v29 = vpop.f32.mrb[9].mxu0  ;;  %v13633_v63 = vpop.f32.mrb[9].mxu1  ;;  %v18043_v10 = vld [vmem:[%s18941_s17 + $0xc10] sm:$0xff]   ;;  %v22989_v35 = vld [vmem:[#allocation108_spill] sm:$0xff] }
 0x3dc   : > { %14804 = vst.msk [vmem:[%s20760_s22 + $0x200] sm:$0xff] %vm14739_vm3, %v14607_v13  ;;  %v14608_v43 = vmax.f32 %v14412_v33, 0.0  ;;  %v12218_v3 = vmax.f32 %v22973_v9, %v11639_v29  ;;  %v17299_v4 = vpop.f32.mrb[10].mxu0  ;;  %v17505_v19 = vpop.f32.mrb[10].mxu1  ;;  %v22986_v13 = vld [vmem:[#allocation106_spill] sm:$0xff]  ;;  %v22987_v33 = vld [vmem:[#allocation107_spill] sm:$0xff] }
 0x3dd   : > { %14807 = vst.msk [vmem:[%s20760_s22 + $0x218] sm:$0xff] %vm14739_vm3, %v14610_v2  ;;  %v14214_v15 = vmax.f32 %v12220_v36, %v17504_v1  ;;  %v12221_v25 = vmax.f32 %v22976_v7, %v17299_v4  ;;  %v11642_v31 = vpop.f32.mrb[11].mxu0  ;;  %v13636_v47 = vpop.f32.mrb[11].mxu1  ;;  %v22988_v34 = vmax.f32 %v22986_v13, %v22987_v33  ;;  %v22990_v36 = vld [vmem:[#allocation109_spill] sm:$0xff]  ;;  %v23005_v13 = vld [vmem:[#allocation119_spill] sm:$0xff] }
 0x3de   : > { %14805 = vst.msk [vmem:[%s20760_s22 + $0x208] sm:$0xff] %vm14739_vm3, %v14608_v43  ;;  %v14212_v48 = vmax.f32 %v12218_v3, %v13633_v63  ;;  %v12219_v28 = vmax.f32 %v22979_v27, %v11642_v31  ;;  %v22991_v29 = vmax.f32 %v22989_v35, %v22990_v36  ;;  %v22996_v27 = vld [vmem:[#allocation113_spill] sm:$0xff]  ;;  %v23007_v36 = vld [vmem:[#allocation120_spill] sm:$0xff] }
 0x3df   : > { %v14417_v11 = vadd.f32 %v21210_v45, %v14214_v15  ;;  %v14215_v12 = vmax.f32 %v12221_v25, %v17505_v19  ;;  %17405 = vmatmul.mubr.msk.bf16.gmra.mrb[116].mxu0 %vm7239_vm2, %v18036_v38  ;;  %17611 = vmatmul.mubr.msk.bf16.gmra.mrb[116].mxu1 %vm7239_vm2, %v18037_v39  ;;  %v22992_v15 = vld [vmem:[#allocation110_spill] sm:$0xff] }
 0x3e0   : > { %v14415_v46 = vadd.f32 %v21210_v45, %v14212_v48  ;;  %v14213_v53 = vmax.f32 %v12219_v28, %v13636_v47  ;;  %17408 = vmatprep.mubr.msk.bf16.mxu0 %vm7239_vm2, %v18038_v41  ;;  %17614 = vmatprep.mubr.msk.bf16.mxu1 %vm7239_vm2, %v18039_v20  ;;  %v22994_v6 = vmax.f32 %v22992_v15, %v22993_v16  ;;  %v18044_v47 = vld [vmem:[%s18941_s17 + $0x908] sm:$0xff]   ;;  %v18045_v48 = vld [vmem:[%s18941_s17 + $0xc18] sm:$0xff]  }
 0x3e1   : > { %v14613_v57 = vmax.f32 %v14417_v11, 0.0  ;;  %v14418_v14 = vadd.f32 %v21210_v45, %v14215_v12  ;;  %v22997_v28 = vmax.f32 %v22995_v23, %v22996_v27 }
 0x3e2   : > { %v14611_v30 = vmax.f32 %v14415_v46, 0.0  ;;  %v14416_v49 = vadd.f32 %v21210_v45, %v14213_v53  ;;  %v17302_v50 = vpop.f32.mrb[12].mxu0  ;;  %v17508_v26 = vpop.f32.mrb[12].mxu1  ;;  %v18046_v53 = vld [vmem:[%s18941_s17 + $0x910] sm:$0xff]  }
 0x3e3   : > { %14810 = vst.msk [vmem:[%s20760_s22 + $0x230] sm:$0xff] %vm14739_vm3, %v14613_v57  ;;  %v14614_v32 = vmax.f32 %v14418_v14, 0.0  ;;  %v12224_v62 = vmax.f32 %v22982_v61, %v17302_v50  ;;  %v11655_v51 = vpop.f32.mrb[13].mxu0  ;;  %v13649_v52 = vpop.f32.mrb[13].mxu1  ;;  %v18047_v57 = vld [vmem:[%s18941_s17 + $0xc20] sm:$0xff]   ;;  %v23001_v61 = vld [vmem:[#allocation116_spill] sm:$0xff] }
 0x3e4   : > { %14808 = vst.msk [vmem:[%s20760_s22 + $0x220] sm:$0xff] %vm14739_vm3, %v14611_v30  ;;  %v14612_v54 = vmax.f32 %v14416_v49, 0.0  ;;  %v12222_v56 = vmax.f32 %v22985_v58, %v11655_v51  ;;  %v17303_v60 = vpop.f32.mrb[14].mxu0  ;;  %v17509_v40 = vpop.f32.mrb[14].mxu1  ;;  %v22998_v30 = vld [vmem:[#allocation114_spill] sm:$0xff]  ;;  %v22999_v49 = vld [vmem:[#allocation115_spill] sm:$0xff] }
 0x3e5   : > { %14811 = vst.msk [vmem:[%s20760_s22 + $0x238] sm:$0xff] %vm14739_vm3, %v14614_v32  ;;  %v14218_v21 = vmax.f32 %v12224_v62, %v17508_v26  ;;  %v12225_v1 = vmax.f32 %v22988_v34, %v17303_v60  ;;  %v11658_v2 = vpop.f32.mrb[15].mxu0  ;;  %v13652_v17 = vpop.f32.mrb[15].mxu1  ;;  %v23000_v50 = vmax.f32 %v22998_v30, %v22999_v49  ;;  %v23002_v62 = vld [vmem:[#allocation117_spill] sm:$0xff]  ;;  %v23017_v30 = vld [vmem:[#allocation127_spill] sm:$0xff] }
 0x3e6   : > { %14809 = vst.msk [vmem:[%s20760_s22 + $0x228] sm:$0xff] %vm14739_vm3, %v14612_v54  ;;  %v14216_v18 = vmax.f32 %v12222_v56, %v13649_v52  ;;  %v12223_v63 = vmax.f32 %v22991_v29, %v11658_v2  ;;  %v23003_v51 = vmax.f32 %v23001_v61, %v23002_v62  ;;  %v23008_v29 = vld [vmem:[#allocation121_spill] sm:$0xff]  ;;  %v23019_v62 = vld [vmem:[#allocation128_spill] sm:$0xff] }
 0x3e7   : > { %v14421_v38 = vadd.f32 %v21210_v45, %v14218_v21  ;;  %v14219_v39 = vmax.f32 %v12225_v1, %v17509_v40  ;;  %17409 = vmatmul.mubr.msk.bf16.gmra.mrb[120].mxu0 %vm7239_vm2, %v18040_v24  ;;  %17615 = vmatmul.mubr.msk.bf16.gmra.mrb[120].mxu1 %vm7239_vm2, %v18041_v5  ;;  %v23004_v21 = vld [vmem:[#allocation118_spill] sm:$0xff] }
 0x3e8   : > { %v14419_v43 = vadd.f32 %v21210_v45, %v14216_v18  ;;  %v14217_v44 = vmax.f32 %v12223_v63, %v13652_v17  ;;  %17412 = vmatprep.mubr.msk.bf16.mxu0 %vm7239_vm2, %v18042_v0  ;;  %17618 = vmatprep.mubr.msk.bf16.mxu1 %vm7239_vm2, %v18043_v10  ;;  %v23006_v33 = vmax.f32 %v23004_v21, %v23005_v13  ;;  %v18048_v17 = vld [vmem:[%s18941_s17 + $0x918] sm:$0xff]   ;;  %v18049_v18 = vld [vmem:[%s18941_s17 + $0xc28] sm:$0xff]   ;;  %v23026_v13 = vld [vmem:[#allocation133_spill] sm:$0xff] }
 0x3e9   : > { %v14617_v8 = vmax.f32 %v14421_v38, 0.0  ;;  %v14422_v9 = vadd.f32 %v21210_v45, %v14219_v39  ;;  %v23009_v63 = vmax.f32 %v23007_v36, %v23008_v29  ;;  %v23025_v21 = vld [vmem:[#allocation132_spill] sm:$0xff] }
 0x3ea   : > { %v14615_v3 = vmax.f32 %v14419_v43, 0.0  ;;  %v14420_v4 = vadd.f32 %v21210_v45, %v14217_v44  ;;  %v17306_v19 = vpop.f32.mrb[16].mxu0  ;;  %v17512_v41 = vpop.f32.mrb[16].mxu1  ;;  %v18050_v44 = vld [vmem:[%s18941_s17 + $0x920] sm:$0xff]  }
 0x3eb   : > { %14814 = vst.msk [vmem:[%s20760_s22 + $0x250] sm:$0xff] %vm14739_vm3, %v14617_v8  ;;  %v14618_v20 = vmax.f32 %v14422_v9, 0.0  ;;  %v12228_v7 = vmax.f32 %v22994_v6, %v17306_v19  ;;  %v11671_v25 = vpop.f32.mrb[17].mxu0  ;;  %v13665_v31 = vpop.f32.mrb[17].mxu1  ;;  %v18051_v8 = vld [vmem:[%s18941_s17 + $0xc30] sm:$0xff]   ;;  %v23013_v6 = vld [vmem:[#allocation124_spill] sm:$0xff] }
 0x3ec   : > { %14812 = vst.msk [vmem:[%s20760_s22 + $0x240] sm:$0xff] %vm14739_vm3, %v14615_v3  ;;  %v14616_v22 = vmax.f32 %v14420_v4, 0.0  ;;  %v12226_v11 = vmax.f32 %v22997_v28, %v11671_v25  ;;  %v17307_v12 = vpop.f32.mrb[18].mxu0  ;;  %v17513_v46 = vpop.f32.mrb[18].mxu1  ;;  %v23010_v3 = vld [vmem:[#allocation122_spill] sm:$0xff]  ;;  %v23011_v4 = vld [vmem:[#allocation123_spill] sm:$0xff] }
 0x3ed   : > { %14815 = vst.msk [vmem:[%s20760_s22 + $0x258] sm:$0xff] %vm14739_vm3, %v14618_v20  ;;  %v14222_v14 = vmax.f32 %v12228_v7, %v17512_v41  ;;  %v12229_v26 = vmax.f32 %v23000_v50, %v17307_v12  ;;  %v11674_v32 = vpop.f32.mrb[19].mxu0  ;;  %v13668_v42 = vpop.f32.mrb[19].mxu1  ;;  %v23012_v19 = vmax.f32 %v23010_v3, %v23011_v4  ;;  %v23014_v7 = vld [vmem:[#allocation125_spill] sm:$0xff] }
 0x3ee   : > { %14813 = vst.msk [vmem:[%s20760_s22 + $0x248] sm:$0xff] %vm14739_vm3, %v14616_v22  ;;  %v14220_v37 = vmax.f32 %v12226_v11, %v13665_v31  ;;  %v12227_v52 = vmax.f32 %v23003_v51, %v11674_v32  ;;  %v23015_v25 = vmax.f32 %v23013_v6, %v23014_v7  ;;  %v23020_v51 = vld [vmem:[#allocation129_spill] sm:$0xff] }
 0x3ef   : > { %v14425_v24 = vadd.f32 %v21210_v45, %v14222_v14  ;;  %v14223_v5 = vmax.f32 %v12229_v26, %v17513_v46  ;;  %17413 = vmatmul.mubr.msk.bf16.gmra.mrb[124].mxu0 %vm7239_vm2, %v18044_v47  ;;  %17619 = vmatmul.mubr.msk.bf16.gmra.mrb[124].mxu1 %vm7239_vm2, %v18045_v48  ;;  %v23016_v14 = vld [vmem:[#allocation126_spill] sm:$0xff] }
 0x3f0   : > { %v14423_v54 = vadd.f32 %v21210_v45, %v14220_v37  ;;  %v14221_v55 = vmax.f32 %v12227_v52, %v13668_v42  ;;  %17416 = vmatprep.mubr.msk.bf16.mxu0 %vm7239_vm2, %v18046_v53  ;;  %17622 = vmatprep.mubr.msk.bf16.mxu1 %vm7239_vm2, %v18047_v57  ;;  %v23018_v49 = vmax.f32 %v23016_v14, %v23017_v30  ;;  %v18052_v42 = vld [vmem:[%s18941_s17 + $0x928] sm:$0xff]   ;;  %v18053_v37 = vld [vmem:[%s18941_s17 + $0xc38] sm:$0xff]  }
 0x3f1   : > { %v14621_v59 = vmax.f32 %v14425_v24, 0.0  ;;  %v14426_v58 = vadd.f32 %v21210_v45, %v14223_v5  ;;  %v23021_v52 = vmax.f32 %v23019_v62, %v23020_v51 }
 0x3f2   : > { %v14619_v56 = vmax.f32 %v14423_v54, 0.0  ;;  %v14424_v60 = vadd.f32 %v21210_v45, %v14221_v55  ;;  %v17310_v40 = vpop.f32.mrb[20].mxu0  ;;  %v17516_v0 = vpop.f32.mrb[20].mxu1 }
 0x3f3   : > { %14818 = vst.msk [vmem:[%s20760_s22 + $0x270] sm:$0xff] %vm14739_vm3, %v14621_v59  ;;  %v14622_v10 = vmax.f32 %v14426_v58, 0.0  ;;  %v12232_v34 = vmax.f32 %v23006_v33, %v17310_v40  ;;  %v11687_v1 = vpop.f32.mrb[21].mxu0  ;;  %v13681_v2 = vpop.f32.mrb[21].mxu1  ;;  %v23022_v59 = vld [vmem:[#allocation130_spill] sm:$0xff]  ;;  %v23023_v58 = vld [vmem:[#allocation131_spill] sm:$0xff]  ;;  %v23027_v33 = vmax.f32 %v23025_v21, %v23026_v13 }
 0x3f4   : > { %14816 = vst.msk [vmem:[%s20760_s22 + $0x260] sm:$0xff] %vm14739_vm3, %v14619_v56  ;;  %v14620_v35 = vmax.f32 %v14424_v60, 0.0  ;;  %v12230_v38 = vmax.f32 %v23009_v63, %v11687_v1  ;;  %v17311_v39 = vpop.f32.mrb[22].mxu0  ;;  %v17517_v43 = vpop.f32.mrb[22].mxu1  ;;  %v23024_v56 = vmax.f32 %v23022_v59, %v23023_v58 }
 0x3f5   : > { %14819 = vst.msk [vmem:[%s20760_s22 + $0x278] sm:$0xff] %vm14739_vm3, %v14622_v10  ;;  %v14226_v9 = vmax.f32 %v12232_v34, %v17516_v0  ;;  %v12233_v41 = vmax.f32 %v23012_v19, %v17311_v39  ;;  %v11690_v20 = vpop.f32.mrb[23].mxu0  ;;  %v13684_v15 = vpop.f32.mrb[23].mxu1 }
 0x3f6   : > { %14817 = vst.msk [vmem:[%s20760_s22 + $0x268] sm:$0xff] %vm14739_vm3, %v14620_v35  ;;  %v14224_v16 = vmax.f32 %v12230_v38, %v13681_v2  ;;  %v12231_v31 = vmax.f32 %v23015_v25, %v11690_v20  ;;  %v23031_v20 = vld [vmem:[#allocation136_spill] sm:$0xff] }
 0x3f7   : > { %v14429_v47 = vadd.f32 %v21210_v45, %v14226_v9  ;;  %v14227_v48 = vmax.f32 %v12233_v41, %v17517_v43  ;;  %17417 = vmatmul.mubr.msk.bf16.gmra.mrb[128].mxu0 %vm7239_vm2, %v18048_v17  ;;  %17623 = vmatmul.mubr.msk.bf16.gmra.mrb[128].mxu1 %vm7239_vm2, %v18049_v18 }
 0x3f8   : > { %v14427_v22 = vadd.f32 %v21210_v45, %v14224_v16  ;;  %v14225_v23 = vmax.f32 %v12231_v31, %v13684_v15  ;;  %17420 = vmatprep.mubr.msk.bf16.mxu0 %vm7239_vm2, %v18050_v44  ;;  %17626 = vmatprep.mubr.msk.bf16.mxu1 %vm7239_vm2, %v18051_v8  ;;  %v23028_v44 = vld [vmem:[#allocation134_spill] sm:$0xff]  ;;  %v23029_v8 = vld [vmem:[#allocation135_spill] sm:$0xff]  ;;  %v23032_v15 = vld [vmem:[#allocation137_spill] sm:$0xff] }
 0x3f9   : > { %v14625_v27 = vmax.f32 %v14429_v47, 0.0  ;;  %v14430_v28 = vadd.f32 %v21210_v45, %v14227_v48  ;;  %v23030_v9 = vmax.f32 %v23028_v44, %v23029_v8  ;;  %v23033_v16 = vmax.f32 %v23031_v20, %v23032_v15  ;;  %v23034_v47 = vld [vmem:[#allocation138_spill] sm:$0xff]  ;;  %v23035_v48 = vld [vmem:[#allocation139_spill] sm:$0xff] }
 0x3fa   : > { %v14623_v11 = vmax.f32 %v14427_v22, 0.0  ;;  %v14428_v12 = vadd.f32 %v21210_v45, %v14225_v23  ;;  %v17314_v46 = vpop.f32.mrb[24].mxu0  ;;  %v17520_v53 = vpop.f32.mrb[24].mxu1  ;;  %v23036_v22 = vmax.f32 %v23034_v47, %v23035_v48 }
 0x3fb   : > { %14822 = vst.msk [vmem:[%s20760_s22 + $0x290] sm:$0xff] %vm14739_vm3, %v14625_v27  ;;  %v14626_v57 = vmax.f32 %v14430_v28, 0.0  ;;  %v12236_v50 = vmax.f32 %v23018_v49, %v17314_v46  ;;  %v11703_v26 = vpop.f32.mrb[25].mxu0  ;;  %v13697_v32 = vpop.f32.mrb[25].mxu1  ;;  %v23038_v46 = vld [vmem:[#allocation141_spill] sm:$0xff] }
 0x3fc   : > { %14820 = vst.msk [vmem:[%s20760_s22 + $0x280] sm:$0xff] %vm14739_vm3, %v14623_v11  ;;  %v14624_v61 = vmax.f32 %v14428_v12, 0.0  ;;  %v12234_v24 = vmax.f32 %v23021_v52, %v11703_v26  ;;  %v17315_v5 = vpop.f32.mrb[26].mxu0  ;;  %v17521_v54 = vpop.f32.mrb[26].mxu1  ;;  %v23037_v12 = vld [vmem:[#allocation140_spill] sm:$0xff]  ;;  %v23040_v52 = vld [vmem:[#allocation142_spill] sm:$0xff] }
 0x3fd   : > { %14823 = vst.msk [vmem:[%s20760_s22 + $0x298] sm:$0xff] %vm14739_vm3, %v14626_v57  ;;  %v14230_v55 = vmax.f32 %v12236_v50, %v17520_v53  ;;  %v12237_v60 = vmax.f32 %v23024_v56, %v17315_v5  ;;  %v11706_v40 = vpop.f32.mrb[27].mxu0  ;;  %v13700_v0 = vpop.f32.mrb[27].mxu1  ;;  %v23039_v53 = vmax.f32 %v23037_v12, %v23038_v46  ;;  %v23043_v56 = vld [vmem:[#allocation144_spill] sm:$0xff] }
 0x3fe   : > { %14821 = vst.msk [vmem:[%s20760_s22 + $0x288] sm:$0xff] %vm14739_vm3, %v14624_v61  ;;  %v14228_v10 = vmax.f32 %v12234_v24, %v13697_v32  ;;  %v12235_v34 = vmax.f32 %v23027_v33, %v11706_v40  ;;  %v23041_v24 = vld [vmem:[#allocation143_spill] sm:$0xff]  ;;  %v23046_v33 = vld [vmem:[#allocation146_spill] sm:$0xff] }
 0x3ff   : > { %v14433_v1 = vadd.f32 %v21210_v45, %v14230_v55  ;;  %v14231_v2 = vmax.f32 %v12237_v60, %v17521_v54  ;;  %17421 = vmatmul.mubr.msk.bf16.gmra.mrb[132].mxu0 %vm7239_vm2, %v18052_v42  ;;  %17627 = vmatmul.mubr.msk.bf16.gmra.mrb[132].mxu1 %vm7239_vm2, %v18053_v37  ;;  %v23042_v5 = vmax.f32 %v23040_v52, %v23041_v24  ;;  %v23044_v60 = vld [vmem:[#allocation145_spill] sm:$0xff] }
 0x400   : > { %v14431_v17 = vadd.f32 %v21210_v45, %v14228_v10  ;;  %v14229_v18 = vmax.f32 %v12235_v34, %v13700_v0  ;;  %v23045_v40 = vmax.f32 %v23043_v56, %v23044_v60  ;;  %v23047_v34 = vld [vmem:[#allocation147_spill] sm:$0xff] }
 0x401   : > { %v14629_v35 = vmax.f32 %v14433_v1, 0.0  ;;  %v14434_v36 = vadd.f32 %v21210_v45, %v14231_v2  ;;  %v23048_v1 = vmax.f32 %v23046_v33, %v23047_v34 }
 0x402   : > { %v14627_v29 = vmax.f32 %v14431_v17, 0.0  ;;  %v14432_v63 = vadd.f32 %v21210_v45, %v14229_v18  ;;  %v17318_v38 = vpop.f32.mrb[28].mxu0  ;;  %v17524_v39 = vpop.f32.mrb[28].mxu1 }
 0x403   : > { %14826 = vst.msk [vmem:[%s20760_s22 + $0x2b0] sm:$0xff] %vm14739_vm3, %v14629_v35  ;;  %v14630_v43 = vmax.f32 %v14434_v36, 0.0  ;;  %v12240_v3 = vmax.f32 %v23030_v9, %v17318_v38  ;;  %v11719_v4 = vpop.f32.mrb[29].mxu0  ;;  %v13713_v19 = vpop.f32.mrb[29].mxu1  ;;  %v23049_v36 = vld [vmem:[#allocation148_spill] sm:$0xff] }
 0x404   : > { %14824 = vst.msk [vmem:[%s20760_s22 + $0x2a0] sm:$0xff] %vm14739_vm3, %v14627_v29  ;;  %v14628_v41 = vmax.f32 %v14432_v63, 0.0  ;;  %v12238_v6 = vmax.f32 %v23033_v16, %v11719_v4  ;;  %v17319_v7 = vpop.f32.mrb[30].mxu0  ;;  %v17525_v25 = vpop.f32.mrb[30].mxu1  ;;  %v23050_v29 = vld [vmem:[#allocation149_spill] sm:$0xff]  ;;  %v23052_v16 = vld [vmem:[#allocation150_spill] sm:$0xff] }
 0x405   : > { %14827 = vst.msk [vmem:[%s20760_s22 + $0x2b8] sm:$0xff] %vm14739_vm3, %v14630_v43  ;;  %v14234_v31 = vmax.f32 %v12240_v3, %v17524_v39  ;;  %v12241_v23 = vmax.f32 %v23036_v22, %v17319_v7  ;;  %v11722_v27 = vpop.f32.mrb[31].mxu0  ;;  %v13716_v28 = vpop.f32.mrb[31].mxu1  ;;  %v23051_v63 = vmax.f32 %v23049_v36, %v23050_v29  ;;  %v23055_v22 = vld [vmem:[#allocation152_spill] sm:$0xff] }
 0x406   : > { %14825 = vst.msk [vmem:[%s20760_s22 + $0x2a8] sm:$0xff] %vm14739_vm3, %v14628_v41  ;;  %v14232_v11 = vmax.f32 %v12238_v6, %v13713_v19  ;;  %v12239_v57 = vmax.f32 %v23039_v53, %v11722_v27  ;;  %v23053_v6 = vld [vmem:[#allocation151_spill] sm:$0xff]  ;;  %v23058_v53 = vld [vmem:[#allocation154_spill] sm:$0xff] }
 0x407   : > { %v14437_v14 = vadd.f32 %v21210_v45, %v14234_v31  ;;  %v14235_v30 = vmax.f32 %v12241_v23, %v17525_v25  ;;  %v23054_v7 = vmax.f32 %v23052_v16, %v23053_v6  ;;  %v23056_v23 = vld [vmem:[#allocation153_spill] sm:$0xff] }
 0x408   : > { %v14435_v49 = vadd.f32 %v21210_v45, %v14232_v11  ;;  %v14233_v50 = vmax.f32 %v12239_v57, %v13716_v28  ;;  %v23057_v27 = vmax.f32 %v23055_v22, %v23056_v23  ;;  %v23059_v57 = vld [vmem:[#allocation155_spill] sm:$0xff] }
 0x409   : > { %v14633_v26 = vmax.f32 %v14437_v14, 0.0  ;;  %v14438_v32 = vadd.f32 %v21210_v45, %v14235_v30  ;;  %v23060_v14 = vmax.f32 %v23058_v53, %v23059_v57 }
 0x40a   : > { %v14631_v42 = vmax.f32 %v14435_v49, 0.0  ;;  %v14436_v37 = vadd.f32 %v21210_v45, %v14233_v50  ;;  %v17322_v61 = vpop.f32.mrb[32].mxu0  ;;  %v17528_v62 = vpop.f32.mrb[32].mxu1 }
 0x40b   : > { %14830 = vst.msk [vmem:[%s20760_s22 + $0x2d0] sm:$0xff] %vm14739_vm3, %v14633_v26  ;;  %v14634_v51 = vmax.f32 %v14438_v32, 0.0  ;;  %v12244_v54 = vmax.f32 %v23042_v5, %v17322_v61  ;;  %v11735_v55 = vpop.f32.mrb[33].mxu0  ;;  %v13729_v59 = vpop.f32.mrb[33].mxu1  ;;  %v23061_v32 = vld [vmem:[#allocation156_spill] sm:$0xff] }
 0x40c   : > { %14828 = vst.msk [vmem:[%s20760_s22 + $0x2c0] sm:$0xff] %vm14739_vm3, %v14631_v42  ;;  %v14632_v58 = vmax.f32 %v14436_v37, 0.0  ;;  %v12242_v0 = vmax.f32 %v23045_v40, %v11735_v55  ;;  %v17323_v10 = vpop.f32.mrb[34].mxu0  ;;  %v17529_v21 = vpop.f32.mrb[34].mxu1  ;;  %v23062_v42 = vld [vmem:[#allocation157_spill] sm:$0xff]  ;;  %v23064_v40 = vld [vmem:[#allocation158_spill] sm:$0xff] }
 0x40d   : > { %14831 = vst.msk [vmem:[%s20760_s22 + $0x2d8] sm:$0xff] %vm14739_vm3, %v14634_v51  ;;  %v14238_v13 = vmax.f32 %v12244_v54, %v17528_v62  ;;  %v12245_v2 = vmax.f32 %v23048_v1, %v17323_v10  ;;  %v11738_v17 = vpop.f32.mrb[35].mxu0  ;;  %v13732_v18 = vpop.f32.mrb[35].mxu1  ;;  %v23063_v37 = vmax.f32 %v23061_v32, %v23062_v42  ;;  %v23067_v1 = vld [vmem:[#allocation160_spill] sm:$0xff] }
 0x40e   : > { %14829 = vst.msk [vmem:[%s20760_s22 + $0x2c8] sm:$0xff] %vm14739_vm3, %v14632_v58  ;;  %v14236_v35 = vmax.f32 %v12242_v0, %v13729_v59  ;;  %v12243_v38 = vmax.f32 %v23051_v63, %v11738_v17  ;;  %v23065_v0 = vld [vmem:[#allocation159_spill] sm:$0xff]  ;;  %v23070_v63 = vld [vmem:[#allocation162_spill] sm:$0xff] }
 0x40f   : > { %v14441_v39 = vadd.f32 %v21210_v45, %v14238_v13  ;;  %v14239_v43 = vmax.f32 %v12245_v2, %v17529_v21  ;;  %v23066_v10 = vmax.f32 %v23064_v40, %v23065_v0  ;;  %v23068_v2 = vld [vmem:[#allocation161_spill] sm:$0xff] }
 0x410   : > { %v14439_v44 = vadd.f32 %v21210_v45, %v14236_v35  ;;  %v14237_v8 = vmax.f32 %v12243_v38, %v13732_v18  ;;  %v23069_v17 = vmax.f32 %v23067_v1, %v23068_v2  ;;  %v23071_v38 = vld [vmem:[#allocation163_spill] sm:$0xff] }
 0x411   : > { %v14637_v9 = vmax.f32 %v14441_v39, 0.0  ;;  %v14442_v3 = vadd.f32 %v21210_v45, %v14239_v43  ;;  %v23072_v39 = vmax.f32 %v23070_v63, %v23071_v38 }
 0x412   : > { %v14635_v4 = vmax.f32 %v14439_v44, 0.0  ;;  %v14440_v19 = vadd.f32 %v21210_v45, %v14237_v8  ;;  %v17326_v41 = vpop.f32.mrb[36].mxu0  ;;  %v17532_v20 = vpop.f32.mrb[36].mxu1 }
 0x413   : > { %14834 = vst.msk [vmem:[%s20760_s22 + $0x2f0] sm:$0xff] %vm14739_vm3, %v14637_v9  ;;  %v14638_v15 = vmax.f32 %v14442_v3, 0.0  ;;  %v12248_v25 = vmax.f32 %v23054_v7, %v17326_v41  ;;  %v11751_v31 = vpop.f32.mrb[37].mxu0  ;;  %v13745_v47 = vpop.f32.mrb[37].mxu1  ;;  %v23073_v3 = vld [vmem:[#allocation164_spill] sm:$0xff] }
 0x414   : > { %14832 = vst.msk [vmem:[%s20760_s22 + $0x2e0] sm:$0xff] %vm14739_vm3, %v14635_v4  ;;  %v14636_v48 = vmax.f32 %v14440_v19, 0.0  ;;  %v12246_v28 = vmax.f32 %v23057_v27, %v11751_v31  ;;  %v17327_v11 = vpop.f32.mrb[38].mxu0  ;;  %v17533_v12 = vpop.f32.mrb[38].mxu1  ;;  %v23074_v4 = vld [vmem:[#allocation165_spill] sm:$0xff]  ;;  %v23076_v27 = vld [vmem:[#allocation166_spill] sm:$0xff] }
 0x415   : > { %14835 = vst.msk [vmem:[%s20760_s22 + $0x2f8] sm:$0xff] %vm14739_vm3, %v14638_v15  ;;  %v14242_v46 = vmax.f32 %v12248_v25, %v17532_v20  ;;  %v12249_v30 = vmax.f32 %v23060_v14, %v17327_v11  ;;  %v11754_v49 = vpop.f32.mrb[39].mxu0  ;;  %v13748_v50 = vpop.f32.mrb[39].mxu1  ;;  %v23075_v19 = vmax.f32 %v23073_v3, %v23074_v4  ;;  %v23079_v14 = vld [vmem:[#allocation168_spill] sm:$0xff] }
 0x416   : > { %14833 = vst.msk [vmem:[%s20760_s22 + $0x2e8] sm:$0xff] %vm14739_vm3, %v14636_v48  ;;  %v14240_v26 = vmax.f32 %v12246_v28, %v13745_v47  ;;  %v12247_v61 = vmax.f32 %v23063_v37, %v11754_v49  ;;  %v23077_v28 = vld [vmem:[#allocation167_spill] sm:$0xff]  ;;  %v23082_v37 = vld [vmem:[#allocation170_spill] sm:$0xff] }
 0x417   : > { %v14445_v62 = vadd.f32 %v21210_v45, %v14242_v46  ;;  %v14243_v51 = vmax.f32 %v12249_v30, %v17533_v12  ;;  %v23078_v11 = vmax.f32 %v23076_v27, %v23077_v28  ;;  %v23080_v30 = vld [vmem:[#allocation169_spill] sm:$0xff] }
 0x418   : > { %v14443_v52 = vadd.f32 %v21210_v45, %v14240_v26  ;;  %v14241_v24 = vmax.f32 %v12247_v61, %v13748_v50  ;;  %v23081_v49 = vmax.f32 %v23079_v14, %v23080_v30  ;;  %v23083_v61 = vld [vmem:[#allocation171_spill] sm:$0xff] }
 0x419   : > { %v14641_v5 = vmax.f32 %v14445_v62, 0.0  ;;  %v14446_v54 = vadd.f32 %v21210_v45, %v14243_v51  ;;  %v23084_v62 = vmax.f32 %v23082_v37, %v23083_v61 }
 0x41a   : > { %v14639_v55 = vmax.f32 %v14443_v52, 0.0  ;;  %v14444_v59 = vadd.f32 %v21210_v45, %v14241_v24  ;;  %v17330_v58 = vpop.f32.mrb[40].mxu0  ;;  %v17536_v56 = vpop.f32.mrb[40].mxu1 }
 0x41b   : > { %14838 = vst.msk [vmem:[%s20760_s22 + $0x310] sm:$0xff] %vm14739_vm3, %v14641_v5  ;;  %v14642_v60 = vmax.f32 %v14446_v54, 0.0  ;;  %v12252_v21 = vmax.f32 %v23066_v10, %v17330_v58  ;;  %v11767_v13 = vpop.f32.mrb[41].mxu0  ;;  %v13761_v33 = vpop.f32.mrb[41].mxu1  ;;  %v23085_v54 = vld [vmem:[#allocation172_spill] sm:$0xff] }
 0x41c   : > { %14836 = vst.msk [vmem:[%s20760_s22 + $0x300] sm:$0xff] %vm14739_vm3, %v14639_v55  ;;  %v14640_v34 = vmax.f32 %v14444_v59, 0.0  ;;  %v12250_v18 = vmax.f32 %v23069_v17, %v11767_v13  ;;  %v17331_v35 = vpop.f32.mrb[42].mxu0  ;;  %v17537_v36 = vpop.f32.mrb[42].mxu1  ;;  %v23086_v55 = vld [vmem:[#allocation173_spill] sm:$0xff]  ;;  %v23088_v17 = vld [vmem:[#allocation174_spill] sm:$0xff] }
 0x41d   : > { %14839 = vst.msk [vmem:[%s20760_s22 + $0x318] sm:$0xff] %vm14739_vm3, %v14642_v60  ;;  %v14246_v29 = vmax.f32 %v12252_v21, %v17536_v56  ;;  %v12253_v43 = vmax.f32 %v23072_v39, %v17331_v35  ;;  %v11770_v44 = vpop.f32.mrb[43].mxu0  ;;  %v13764_v8 = vpop.f32.mrb[43].mxu1  ;;  %v23087_v59 = vmax.f32 %v23085_v54, %v23086_v55  ;;  %v23091_v39 = vld [vmem:[#allocation176_spill] sm:$0xff] }
 0x41e   : > { %14837 = vst.msk [vmem:[%s20760_s22 + $0x308] sm:$0xff] %vm14739_vm3, %v14640_v34  ;;  %v14244_v9 = vmax.f32 %v12250_v18, %v13761_v33  ;;  %v12251_v41 = vmax.f32 %v23075_v19, %v11770_v44  ;;  %v23089_v18 = vld [vmem:[#allocation175_spill] sm:$0xff]  ;;  %v23094_v19 = vld [vmem:[#allocation178_spill] sm:$0xff] }
 0x41f   : > { %v14449_v20 = vadd.f32 %v21210_v45, %v14246_v29  ;;  %v14247_v15 = vmax.f32 %v12253_v43, %v17537_v36  ;;  %v23090_v35 = vmax.f32 %v23088_v17, %v23089_v18  ;;  %v23092_v43 = vld [vmem:[#allocation177_spill] sm:$0xff] }
 0x420   : > { %v14447_v16 = vadd.f32 %v21210_v45, %v14244_v9  ;;  %v14245_v6 = vmax.f32 %v12251_v41, %v13764_v8  ;;  %v23093_v44 = vmax.f32 %v23091_v39, %v23092_v43  ;;  %v23095_v41 = vld [vmem:[#allocation179_spill] sm:$0xff] }
 0x421   : > { %v14645_v7 = vmax.f32 %v14449_v20, 0.0  ;;  %v14450_v25 = vadd.f32 %v21210_v45, %v14247_v15  ;;  %v23096_v20 = vmax.f32 %v23094_v19, %v23095_v41 }
 0x422   : > { %v14643_v31 = vmax.f32 %v14447_v16, 0.0  ;;  %v14448_v47 = vadd.f32 %v21210_v45, %v14245_v6  ;;  %v17334_v48 = vpop.f32.mrb[44].mxu0  ;;  %v17540_v22 = vpop.f32.mrb[44].mxu1 }
 0x423   : > { %14842 = vst.msk [vmem:[%s20760_s22 + $0x330] sm:$0xff] %vm14739_vm3, %v14645_v7  ;;  %v14646_v23 = vmax.f32 %v14450_v25, 0.0  ;;  %v12256_v12 = vmax.f32 %v23078_v11, %v17334_v48  ;;  %v11783_v46 = vpop.f32.mrb[45].mxu0  ;;  %v13777_v53 = vpop.f32.mrb[45].mxu1  ;;  %v23097_v25 = vld [vmem:[#allocation180_spill] sm:$0xff] }
 0x424   : > { %14840 = vst.msk [vmem:[%s20760_s22 + $0x320] sm:$0xff] %vm14739_vm3, %v14643_v31  ;;  %v14644_v57 = vmax.f32 %v14448_v47, 0.0  ;;  %v12254_v50 = vmax.f32 %v23081_v49, %v11783_v46  ;;  %v17335_v26 = vpop.f32.mrb[46].mxu0  ;;  %v17541_v32 = vpop.f32.mrb[46].mxu1  ;;  %v23098_v31 = vld [vmem:[#allocation181_spill] sm:$0xff]  ;;  %v23100_v49 = vld [vmem:[#allocation182_spill] sm:$0xff] }
 0x425   : > { %14843 = vst.msk [vmem:[%s20760_s22 + $0x338] sm:$0xff] %vm14739_vm3, %v14646_v23  ;;  %v14250_v42 = vmax.f32 %v12256_v12, %v17540_v22  ;;  %v12257_v51 = vmax.f32 %v23084_v62, %v17335_v26  ;;  %v11786_v52 = vpop.f32.mrb[47].mxu0  ;;  %v13780_v24 = vpop.f32.mrb[47].mxu1  ;;  %v23099_v47 = vmax.f32 %v23097_v25, %v23098_v31  ;;  %v23103_v62 = vld [vmem:[#allocation184_spill] sm:$0xff] }
 0x426   : > { %14841 = vst.msk [vmem:[%s20760_s22 + $0x328] sm:$0xff] %vm14739_vm3, %v14644_v57  ;;  %v14248_v5 = vmax.f32 %v12254_v50, %v13777_v53  ;;  %v12255_v58 = vmax.f32 %v23087_v59, %v11786_v52  ;;  %v23101_v50 = vld [vmem:[#allocation183_spill] sm:$0xff]  ;;  %v23106_v59 = vld [vmem:[#allocation186_spill] sm:$0xff] }
 0x427   : > { %v14453_v56 = vadd.f32 %v21210_v45, %v14250_v42  ;;  %v14251_v60 = vmax.f32 %v12257_v51, %v17541_v32  ;;  %v23102_v26 = vmax.f32 %v23100_v49, %v23101_v50  ;;  %v23104_v51 = vld [vmem:[#allocation185_spill] sm:$0xff] }
 0x428   : > { %v14451_v40 = vadd.f32 %v21210_v45, %v14248_v5  ;;  %v14249_v0 = vmax.f32 %v12255_v58, %v13780_v24  ;;  %v23105_v52 = vmax.f32 %v23103_v62, %v23104_v51  ;;  %v23107_v58 = vld [vmem:[#allocation187_spill] sm:$0xff] }
 0x429   : > { %v14649_v10 = vmax.f32 %v14453_v56, 0.0  ;;  %v14454_v21 = vadd.f32 %v21210_v45, %v14251_v60  ;;  %v23108_v56 = vmax.f32 %v23106_v59, %v23107_v58 }
 0x42a   : > { %v14647_v13 = vmax.f32 %v14451_v40, 0.0  ;;  %v14452_v33 = vadd.f32 %v21210_v45, %v14249_v0  ;;  %v17338_v34 = vpop.f32.mrb[48].mxu0  ;;  %v17544_v1 = vpop.f32.mrb[48].mxu1 }
 0x42b   : > { %14846 = vst.msk [vmem:[%s20760_s22 + $0x350] sm:$0xff] %vm14739_vm3, %v14649_v10  ;;  %v14650_v2 = vmax.f32 %v14454_v21, 0.0  ;;  %v12260_v36 = vmax.f32 %v23090_v35, %v17338_v34  ;;  %v11799_v29 = vpop.f32.mrb[49].mxu0  ;;  %v13793_v63 = vpop.f32.mrb[49].mxu1  ;;  %v23109_v21 = vld [vmem:[#allocation188_spill] sm:$0xff] }
 0x42c   : > { %14844 = vst.msk [vmem:[%s20760_s22 + $0x340] sm:$0xff] %vm14739_vm3, %v14647_v13  ;;  %v14648_v38 = vmax.f32 %v14452_v33, 0.0  ;;  %v12258_v8 = vmax.f32 %v23093_v44, %v11799_v29  ;;  %v17339_v9 = vpop.f32.mrb[50].mxu0  ;;  %v17545_v3 = vpop.f32.mrb[50].mxu1  ;;  %v23110_v13 = vld [vmem:[#allocation189_spill] sm:$0xff]  ;;  %v23112_v44 = vld [vmem:[#allocation190_spill] sm:$0xff] }
 0x42d   : > { %14847 = vst.msk [vmem:[%s20760_s22 + $0x358] sm:$0xff] %vm14739_vm3, %v14650_v2  ;;  %v14254_v4 = vmax.f32 %v12260_v36, %v17544_v1  ;;  %v12261_v15 = vmax.f32 %v23096_v20, %v17339_v9  ;;  %v11802_v16 = vpop.f32.mrb[51].mxu0  ;;  %v13796_v6 = vpop.f32.mrb[51].mxu1  ;;  %v23111_v33 = vmax.f32 %v23109_v21, %v23110_v13  ;;  %v23115_v20 = vld [vmem:[#allocation192_spill] sm:$0xff] }
 0x42e   : > { %14845 = vst.msk [vmem:[%s20760_s22 + $0x348] sm:$0xff] %vm14739_vm3, %v14648_v38  ;;  %v14252_v7 = vmax.f32 %v12258_v8, %v13793_v63  ;;  %v12259_v48 = vmax.f32 %v23099_v47, %v11802_v16  ;;  %v23113_v8 = vld [vmem:[#allocation191_spill] sm:$0xff]  ;;  %v23118_v47 = vld [vmem:[#allocation194_spill] sm:$0xff] }
 0x42f   : > { %v14457_v22 = vadd.f32 %v21210_v45, %v14254_v4  ;;  %v14255_v23 = vmax.f32 %v12261_v15, %v17545_v3  ;;  %v23114_v9 = vmax.f32 %v23112_v44, %v23113_v8  ;;  %v23116_v15 = vld [vmem:[#allocation193_spill] sm:$0xff] }
 0x430   : > { %v14455_v27 = vadd.f32 %v21210_v45, %v14252_v7  ;;  %v14253_v28 = vmax.f32 %v12259_v48, %v13796_v6  ;;  %v23117_v16 = vmax.f32 %v23115_v20, %v23116_v15  ;;  %v23119_v48 = vld [vmem:[#allocation195_spill] sm:$0xff] }
 0x431   : > { %v14653_v11 = vmax.f32 %v14457_v22, 0.0  ;;  %v14458_v12 = vadd.f32 %v21210_v45, %v14255_v23  ;;  %v23120_v22 = vmax.f32 %v23118_v47, %v23119_v48 }
 0x432   : > { %v14651_v46 = vmax.f32 %v14455_v27, 0.0  ;;  %v14456_v53 = vadd.f32 %v21210_v45, %v14253_v28  ;;  %v17342_v57 = vpop.f32.mrb[52].mxu0  ;;  %v17548_v14 = vpop.f32.mrb[52].mxu1 }
 0x433   : > { %14850 = vst.msk [vmem:[%s20760_s22 + $0x370] sm:$0xff] %vm14739_vm3, %v14653_v11  ;;  %v14654_v30 = vmax.f32 %v14458_v12, 0.0  ;;  %v12264_v32 = vmax.f32 %v23102_v26, %v17342_v57  ;;  %v11815_v42 = vpop.f32.mrb[53].mxu0  ;;  %v13809_v37 = vpop.f32.mrb[53].mxu1  ;;  %v23121_v12 = vld [vmem:[#allocation196_spill] sm:$0xff] }
 0x434   : > { %14848 = vst.msk [vmem:[%s20760_s22 + $0x360] sm:$0xff] %vm14739_vm3, %v14651_v46  ;;  %v14652_v61 = vmax.f32 %v14456_v53, 0.0  ;;  %v12262_v24 = vmax.f32 %v23105_v52, %v11815_v42  ;;  %v17343_v5 = vpop.f32.mrb[54].mxu0  ;;  %v17549_v54 = vpop.f32.mrb[54].mxu1  ;;  %v23122_v46 = vld [vmem:[#allocation197_spill] sm:$0xff]  ;;  %v23124_v52 = vld [vmem:[#allocation198_spill] sm:$0xff] }
 0x435   : > { %14851 = vst.msk [vmem:[%s20760_s22 + $0x378] sm:$0xff] %vm14739_vm3, %v14654_v30  ;;  %v14258_v55 = vmax.f32 %v12264_v32, %v17548_v14  ;;  %v12265_v60 = vmax.f32 %v23108_v56, %v17343_v5  ;;  %v11818_v40 = vpop.f32.mrb[55].mxu0  ;;  %v13812_v0 = vpop.f32.mrb[55].mxu1  ;;  %v23123_v53 = vmax.f32 %v23121_v12, %v23122_v46  ;;  %v23127_v56 = vld [vmem:[#allocation200_spill] sm:$0xff]  ;;  %v23142_v46 = vld [vmem:[#allocation210_spill] sm:$0xff] }
 0x436   : > { %14849 = vst.msk [vmem:[%s20760_s22 + $0x368] sm:$0xff] %vm14739_vm3, %v14652_v61  ;;  %v14256_v10 = vmax.f32 %v12262_v24, %v13809_v37  ;;  %v12263_v34 = vmax.f32 %v23111_v33, %v11818_v40  ;;  %v23125_v24 = vld [vmem:[#allocation199_spill] sm:$0xff]  ;;  %v23130_v33 = vld [vmem:[#allocation202_spill] sm:$0xff] }
 0x437   : > { %v14461_v1 = vadd.f32 %v21210_v45, %v14258_v55  ;;  %v14259_v2 = vmax.f32 %v12265_v60, %v17549_v54  ;;  %v23126_v5 = vmax.f32 %v23124_v52, %v23125_v24  ;;  %v23128_v60 = vld [vmem:[#allocation201_spill] sm:$0xff] }
 0x438   : > { %v14459_v17 = vadd.f32 %v21210_v45, %v14256_v10  ;;  %v14257_v18 = vmax.f32 %v12263_v34, %v13812_v0  ;;  %v23129_v40 = vmax.f32 %v23127_v56, %v23128_v60  ;;  %v23131_v34 = vld [vmem:[#allocation203_spill] sm:$0xff] }
 0x439   : > { %v14657_v35 = vmax.f32 %v14461_v1, 0.0  ;;  %v14462_v36 = vadd.f32 %v21210_v45, %v14259_v2  ;;  %v23132_v1 = vmax.f32 %v23130_v33, %v23131_v34 }
 0x43a   : > { %v14655_v29 = vmax.f32 %v14459_v17, 0.0  ;;  %v14460_v63 = vadd.f32 %v21210_v45, %v14257_v18  ;;  %v17346_v38 = vpop.f32.mrb[56].mxu0  ;;  %v17552_v39 = vpop.f32.mrb[56].mxu1 }
 0x43b   : > { %14854 = vst.msk [vmem:[%s20760_s22 + $0x390] sm:$0xff] %vm14739_vm3, %v14657_v35  ;;  %v14658_v43 = vmax.f32 %v14462_v36, 0.0  ;;  %v12268_v3 = vmax.f32 %v23114_v9, %v17346_v38  ;;  %v11831_v4 = vpop.f32.mrb[57].mxu0  ;;  %v13825_v19 = vpop.f32.mrb[57].mxu1  ;;  %v23133_v36 = vld [vmem:[#allocation204_spill] sm:$0xff] }
 0x43c   : > { %14852 = vst.msk [vmem:[%s20760_s22 + $0x380] sm:$0xff] %vm14739_vm3, %v14655_v29  ;;  %v14656_v41 = vmax.f32 %v14460_v63, 0.0  ;;  %v12266_v6 = vmax.f32 %v23117_v16, %v11831_v4  ;;  %v17347_v7 = vpop.f32.mrb[58].mxu0  ;;  %v17553_v25 = vpop.f32.mrb[58].mxu1  ;;  %v23134_v29 = vld [vmem:[#allocation205_spill] sm:$0xff]  ;;  %v23136_v16 = vld [vmem:[#allocation206_spill] sm:$0xff] }
 0x43d   : > { %14855 = vst.msk [vmem:[%s20760_s22 + $0x398] sm:$0xff] %vm14739_vm3, %v14658_v43  ;;  %v14262_v31 = vmax.f32 %v12268_v3, %v17552_v39  ;;  %v12269_v23 = vmax.f32 %v23120_v22, %v17347_v7  ;;  %v11834_v27 = vpop.f32.mrb[59].mxu0  ;;  %v13828_v28 = vpop.f32.mrb[59].mxu1  ;;  %v23135_v63 = vmax.f32 %v23133_v36, %v23134_v29  ;;  %v23139_v22 = vld [vmem:[#allocation208_spill] sm:$0xff] }
 0x43e   : > { %14853 = vst.msk [vmem:[%s20760_s22 + $0x388] sm:$0xff] %vm14739_vm3, %v14656_v41  ;;  %v14260_v11 = vmax.f32 %v12266_v6, %v13825_v19  ;;  %v12267_v57 = vmax.f32 %v23123_v53, %v11834_v27  ;;  %v23137_v6 = vld [vmem:[#allocation207_spill] sm:$0xff] }
 0x43f   : > { %v14465_v14 = vadd.f32 %v21210_v45, %v14262_v31  ;;  %v14263_v30 = vmax.f32 %v12269_v23, %v17553_v25  ;;  %v23138_v7 = vmax.f32 %v23136_v16, %v23137_v6  ;;  %v23140_v23 = vld [vmem:[#allocation209_spill] sm:$0xff]  ;;  %v23143_v53 = vld [vmem:[#allocation211_spill] sm:$0xff] }
 0x440   : > { %v14463_v49 = vadd.f32 %v21210_v45, %v14260_v11  ;;  %v14261_v50 = vmax.f32 %v12267_v57, %v13828_v28  ;;  %v23141_v27 = vmax.f32 %v23139_v22, %v23140_v23  ;;  %v23144_v57 = vmax.f32 %v23142_v46, %v23143_v53 }
 0x441   : > { %v14661_v26 = vmax.f32 %v14465_v14, 0.0  ;;  %v14466_v32 = vadd.f32 %v21210_v45, %v14263_v30 }
 0x442   : > { %v14659_v42 = vmax.f32 %v14463_v49, 0.0  ;;  %v14464_v37 = vadd.f32 %v21210_v45, %v14261_v50  ;;  %v17350_v61 = vpop.f32.mrb[60].mxu0  ;;  %v17556_v62 = vpop.f32.mrb[60].mxu1 }
 0x443   : > { %14858 = vst.msk [vmem:[%s20760_s22 + $0x3b0] sm:$0xff] %vm14739_vm3, %v14661_v26  ;;  %v14662_v51 = vmax.f32 %v14466_v32, 0.0  ;;  %v12272_v54 = vmax.f32 %v23126_v5, %v17350_v61  ;;  %v11847_v55 = vpop.f32.mrb[61].mxu0  ;;  %v13841_v59 = vpop.f32.mrb[61].mxu1  ;;  %v23145_v26 = vld [vmem:[#allocation212_spill] sm:$0xff]  ;;  %v23146_v32 = vld [vmem:[#allocation213_spill] sm:$0xff] }
 0x444   : > { %14856 = vst.msk [vmem:[%s20760_s22 + $0x3a0] sm:$0xff] %vm14739_vm3, %v14659_v42  ;;  %v14660_v58 = vmax.f32 %v14464_v37, 0.0  ;;  %v12270_v0 = vmax.f32 %v23129_v40, %v11847_v55  ;;  %v17351_v10 = vpop.f32.mrb[62].mxu0  ;;  %v17557_v21 = vpop.f32.mrb[62].mxu1  ;;  %v23147_v42 = vmax.f32 %v23145_v26, %v23146_v32  ;;  %v21679_v61 = vld [vmem:[%s22113_s2] ss:$0 sm:$0xff] }
 0x445   : > { %14859 = vst.msk [vmem:[%s20760_s22 + $0x3b8] sm:$0xff] %vm14739_vm3, %v14662_v51  ;;  %v14266_v13 = vmax.f32 %v12272_v54, %v17556_v62  ;;  %v12273_v2 = vmax.f32 %v23132_v1, %v17351_v10  ;;  %v11850_v17 = vpop.f32.mrb[63].mxu0  ;;  %v13844_v18 = vpop.f32.mrb[63].mxu1  ;;  %v23148_v40 = vld [vmem:[#allocation214_spill] sm:$0xff]  ;;  %v23151_v1 = vld [vmem:[#allocation216_spill] sm:$0xff] }
 0x446   : > { %14857 = vst.msk [vmem:[%s20760_s22 + $0x3a8] sm:$0xff] %vm14739_vm3, %v14660_v58  ;;  %v14264_v35 = vmax.f32 %v12270_v0, %v13841_v59  ;;  %v12271_v38 = vmax.f32 %v23135_v63, %v11850_v17  ;;  %v23149_v0 = vld [vmem:[#allocation215_spill] sm:$0xff]  ;;  %v23154_v63 = vld [vmem:[#allocation218_spill] sm:$0xff] }
 0x447   : > { %v14469_v39 = vadd.f32 %v21210_v45, %v14266_v13  ;;  %v14267_v43 = vmax.f32 %v12273_v2, %v17557_v21  ;;  %v23150_v10 = vmax.f32 %v23148_v40, %v23149_v0  ;;  %v23152_v2 = vld [vmem:[#allocation217_spill] sm:$0xff] }
 0x448   : > { %v14467_v44 = vadd.f32 %v21210_v45, %v14264_v35  ;;  %v14265_v8 = vmax.f32 %v12271_v38, %v13844_v18  ;;  %v23153_v17 = vmax.f32 %v23151_v1, %v23152_v2  ;;  %v23155_v38 = vld [vmem:[#allocation219_spill] sm:$0xff] }
 0x449   : > { %v14665_v9 = vmax.f32 %v14469_v39, 0.0  ;;  %v14470_v3 = vadd.f32 %v21210_v45, %v14267_v43  ;;  %v23156_v39 = vmax.f32 %v23154_v63, %v23155_v38 }
 0x44a   : > { %v14663_v4 = vmax.f32 %v14467_v44, 0.0  ;;  %v14468_v19 = vadd.f32 %v21210_v45, %v14265_v8  ;;  %v17354_v41 = vpop.f32.mrb[64].mxu0  ;;  %v17560_v20 = vpop.f32.mrb[64].mxu1 }
 0x44b   : > { %14862 = vst.msk [vmem:[%s20760_s22 + $0x3d0] sm:$0xff] %vm14739_vm3, %v14665_v9  ;;  %v14666_v15 = vmax.f32 %v14470_v3, 0.0  ;;  %v12276_v25 = vmax.f32 %v23138_v7, %v17354_v41  ;;  %v11863_v31 = vpop.f32.mrb[65].mxu0  ;;  %v13857_v47 = vpop.f32.mrb[65].mxu1  ;;  %v23157_v3 = vld [vmem:[#allocation220_spill] sm:$0xff] }
 0x44c   : > { %14860 = vst.msk [vmem:[%s20760_s22 + $0x3c0] sm:$0xff] %vm14739_vm3, %v14663_v4  ;;  %v14664_v48 = vmax.f32 %v14468_v19, 0.0  ;;  %v12274_v28 = vmax.f32 %v23141_v27, %v11863_v31  ;;  %v17355_v45 = vpop.f32.mrb[66].mxu0  ;;  %v17561_v11 = vpop.f32.mrb[66].mxu1  ;;  %v23158_v4 = vld [vmem:[#allocation221_spill] sm:$0xff]  ;;  %v23160_v27 = vld [vmem:[#allocation222_spill] sm:$0xff] }
 0x44d   : > { %14863 = vst.msk [vmem:[%s20760_s22 + $0x3d8] sm:$0xff] %vm14739_vm3, %v14666_v15  ;;  %v14270_v12 = vmax.f32 %v12276_v25, %v17560_v20  ;;  %v12277_v14 = vmax.f32 %v23144_v57, %v17355_v45  ;;  %v11866_v30 = vpop.f32.mrb[67].mxu0  ;;  %v13860_v49 = vpop.f32.mrb[67].mxu1  ;;  %v23159_v19 = vmax.f32 %v23157_v3, %v23158_v4  ;;  %v23163_v57 = vld [vmem:[#allocation224_spill] sm:$0xff] }
 0x44e   : > { %14861 = vst.msk [vmem:[%s20760_s22 + $0x3c8] sm:$0xff] %vm14739_vm3, %v14664_v48  ;;  %v14268_v50 = vmax.f32 %v12274_v28, %v13857_v47  ;;  %v12275_v37 = vmax.f32 %v23147_v42, %v11866_v30  ;;  %v23161_v28 = vld [vmem:[#allocation223_spill] sm:$0xff]  ;;  %v23166_v42 = vld [vmem:[#allocation226_spill] sm:$0xff] }
 0x44f   : > { %v14473_v62 = vadd.f32 %v21679_v61, %v14270_v12  ;;  %v14271_v51 = vmax.f32 %v12277_v14, %v17561_v11  ;;  %v23162_v45 = vmax.f32 %v23160_v27, %v23161_v28  ;;  %v23164_v14 = vld [vmem:[#allocation225_spill] sm:$0xff] }
 0x450   : > { %v14471_v52 = vadd.f32 %v21679_v61, %v14268_v50  ;;  %v14269_v24 = vmax.f32 %v12275_v37, %v13860_v49  ;;  %v23165_v30 = vmax.f32 %v23163_v57, %v23164_v14  ;;  %v23167_v37 = vld [vmem:[#allocation227_spill] sm:$0xff] }
 0x451   : > { %v14669_v5 = vmax.f32 %v14473_v62, 0.0  ;;  %v14474_v54 = vadd.f32 %v21679_v61, %v14271_v51  ;;  %v23168_v62 = vmax.f32 %v23166_v42, %v23167_v37 }
 0x452   : > { %v14667_v55 = vmax.f32 %v14471_v52, 0.0  ;;  %v14472_v59 = vadd.f32 %v21679_v61, %v14269_v24  ;;  %v17358_v58 = vpop.f32.mrb[68].mxu0  ;;  %v17564_v56 = vpop.f32.mrb[68].mxu1 }
 0x453   : > { %14866 = vst.msk [vmem:[%s20760_s22 + $0x3f0] sm:$0xff] %vm14739_vm3, %v14669_v5  ;;  %v14670_v60 = vmax.f32 %v14474_v54, 0.0  ;;  %v12280_v21 = vmax.f32 %v23150_v10, %v17358_v58  ;;  %v11879_v13 = vpop.f32.mrb[69].mxu0  ;;  %v13873_v33 = vpop.f32.mrb[69].mxu1  ;;  %v23169_v54 = vld [vmem:[#allocation228_spill] sm:$0xff] }
 0x454   : > { %14864 = vst.msk [vmem:[%s20760_s22 + $0x3e0] sm:$0xff] %vm14739_vm3, %v14667_v55  ;;  %v14668_v34 = vmax.f32 %v14472_v59, 0.0  ;;  %v12278_v18 = vmax.f32 %v23153_v17, %v11879_v13  ;;  %v17359_v35 = vpop.f32.mrb[70].mxu0  ;;  %v17565_v36 = vpop.f32.mrb[70].mxu1  ;;  %v23170_v55 = vld [vmem:[#allocation229_spill] sm:$0xff]  ;;  %v23172_v17 = vld [vmem:[#allocation230_spill] sm:$0xff] }
 0x455   : > { %14867 = vst.msk [vmem:[%s20760_s22 + $0x3f8] sm:$0xff] %vm14739_vm3, %v14670_v60  ;;  %v14274_v29 = vmax.f32 %v12280_v21, %v17564_v56  ;;  %v12281_v43 = vmax.f32 %v23156_v39, %v17359_v35  ;;  %v11882_v44 = vpop.f32.mrb[71].mxu0  ;;  %v13876_v8 = vpop.f32.mrb[71].mxu1  ;;  %v23171_v59 = vmax.f32 %v23169_v54, %v23170_v55  ;;  %v23175_v39 = vld [vmem:[#allocation232_spill] sm:$0xff] }
 0x456   : > { %14865 = vst.msk [vmem:[%s20760_s22 + $0x3e8] sm:$0xff] %vm14739_vm3, %v14668_v34  ;;  %v14272_v9 = vmax.f32 %v12278_v18, %v13873_v33  ;;  %v12279_v41 = vmax.f32 %v23159_v19, %v11882_v44  ;;  %v23173_v18 = vld [vmem:[#allocation231_spill] sm:$0xff]  ;;  %v23178_v19 = vld [vmem:[#allocation234_spill] sm:$0xff] }
 0x457   : > { %v14477_v20 = vadd.f32 %v21679_v61, %v14274_v29  ;;  %v14275_v15 = vmax.f32 %v12281_v43, %v17565_v36  ;;  %v23174_v35 = vmax.f32 %v23172_v17, %v23173_v18  ;;  %v23176_v43 = vld [vmem:[#allocation233_spill] sm:$0xff] }
 0x458   : > { %v14475_v16 = vadd.f32 %v21679_v61, %v14272_v9  ;;  %v14273_v6 = vmax.f32 %v12279_v41, %v13876_v8  ;;  %v23177_v44 = vmax.f32 %v23175_v39, %v23176_v43  ;;  %v23179_v41 = vld [vmem:[#allocation235_spill] sm:$0xff] }
 0x459   : > { %v14673_v7 = vmax.f32 %v14477_v20, 0.0  ;;  %v14478_v25 = vadd.f32 %v21679_v61, %v14275_v15  ;;  %v23180_v20 = vmax.f32 %v23178_v19, %v23179_v41 }
 0x45a   : > { %v14671_v31 = vmax.f32 %v14475_v16, 0.0  ;;  %v14476_v47 = vadd.f32 %v21679_v61, %v14273_v6  ;;  %v17362_v48 = vpop.f32.mrb[72].mxu0  ;;  %v17568_v22 = vpop.f32.mrb[72].mxu1 }
 0x45b   : > { %14870 = vst.msk [vmem:[%s20760_s22 + $0x410] sm:$0xff] %vm14739_vm3, %v14673_v7  ;;  %v14674_v23 = vmax.f32 %v14478_v25, 0.0  ;;  %v12284_v11 = vmax.f32 %v23162_v45, %v17362_v48  ;;  %v11895_v12 = vpop.f32.mrb[73].mxu0  ;;  %v13889_v46 = vpop.f32.mrb[73].mxu1  ;;  %v23181_v25 = vld [vmem:[#allocation236_spill] sm:$0xff] }
 0x45c   : > { %14868 = vst.msk [vmem:[%s20760_s22 + $0x400] sm:$0xff] %vm14739_vm3, %v14671_v31  ;;  %v14672_v53 = vmax.f32 %v14476_v47, 0.0  ;;  %v12282_v49 = vmax.f32 %v23165_v30, %v11895_v12  ;;  %v17363_v50 = vpop.f32.mrb[74].mxu0  ;;  %v17569_v26 = vpop.f32.mrb[74].mxu1  ;;  %v23182_v31 = vld [vmem:[#allocation237_spill] sm:$0xff]  ;;  %v23184_v30 = vld [vmem:[#allocation238_spill] sm:$0xff] }
 0x45d   : > { %14871 = vst.msk [vmem:[%s20760_s22 + $0x418] sm:$0xff] %vm14739_vm3, %v14674_v23  ;;  %v14278_v32 = vmax.f32 %v12284_v11, %v17568_v22  ;;  %v12285_v51 = vmax.f32 %v23168_v62, %v17363_v50  ;;  %v11898_v52 = vpop.f32.mrb[75].mxu0  ;;  %v13892_v24 = vpop.f32.mrb[75].mxu1  ;;  %v23183_v47 = vmax.f32 %v23181_v25, %v23182_v31  ;;  %v23187_v62 = vld [vmem:[#allocation240_spill] sm:$0xff] }
 0x45e   : > { %14869 = vst.msk [vmem:[%s20760_s22 + $0x408] sm:$0xff] %vm14739_vm3, %v14672_v53  ;;  %v14276_v5 = vmax.f32 %v12282_v49, %v13889_v46  ;;  %v12283_v58 = vmax.f32 %v23171_v59, %v11898_v52  ;;  %v23185_v49 = vld [vmem:[#allocation239_spill] sm:$0xff]  ;;  %v23190_v59 = vld [vmem:[#allocation242_spill] sm:$0xff] }
 0x45f   : > { %v14481_v56 = vadd.f32 %v21679_v61, %v14278_v32  ;;  %v14279_v60 = vmax.f32 %v12285_v51, %v17569_v26  ;;  %v23186_v50 = vmax.f32 %v23184_v30, %v23185_v49  ;;  %v23188_v51 = vld [vmem:[#allocation241_spill] sm:$0xff] }
 0x460   : > { %v14479_v40 = vadd.f32 %v21679_v61, %v14276_v5  ;;  %v14277_v0 = vmax.f32 %v12283_v58, %v13892_v24  ;;  %v23189_v52 = vmax.f32 %v23187_v62, %v23188_v51  ;;  %v23191_v58 = vld [vmem:[#allocation243_spill] sm:$0xff] }
 0x461   : > { %v14677_v10 = vmax.f32 %v14481_v56, 0.0  ;;  %v14482_v21 = vadd.f32 %v21679_v61, %v14279_v60  ;;  %v23192_v56 = vmax.f32 %v23190_v59, %v23191_v58 }
 0x462   : > { %v14675_v13 = vmax.f32 %v14479_v40, 0.0  ;;  %v14480_v33 = vadd.f32 %v21679_v61, %v14277_v0  ;;  %v17366_v34 = vpop.f32.mrb[76].mxu0  ;;  %v17572_v1 = vpop.f32.mrb[76].mxu1 }
 0x463   : > { %14874 = vst.msk [vmem:[%s20760_s22 + $0x430] sm:$0xff] %vm14739_vm3, %v14677_v10  ;;  %v14678_v2 = vmax.f32 %v14482_v21, 0.0  ;;  %v12288_v36 = vmax.f32 %v23174_v35, %v17366_v34  ;;  %v11911_v29 = vpop.f32.mrb[77].mxu0  ;;  %v13905_v63 = vpop.f32.mrb[77].mxu1  ;;  %v23193_v21 = vld [vmem:[#allocation244_spill] sm:$0xff] }
 0x464   : > { %14872 = vst.msk [vmem:[%s20760_s22 + $0x420] sm:$0xff] %vm14739_vm3, %v14675_v13  ;;  %v14676_v38 = vmax.f32 %v14480_v33, 0.0  ;;  %v12286_v8 = vmax.f32 %v23177_v44, %v11911_v29  ;;  %v17367_v9 = vpop.f32.mrb[78].mxu0  ;;  %v17573_v3 = vpop.f32.mrb[78].mxu1  ;;  %v23194_v13 = vld [vmem:[#allocation245_spill] sm:$0xff]  ;;  %v23196_v44 = vld [vmem:[#allocation246_spill] sm:$0xff] }
 0x465   : > { %14875 = vst.msk [vmem:[%s20760_s22 + $0x438] sm:$0xff] %vm14739_vm3, %v14678_v2  ;;  %v14282_v4 = vmax.f32 %v12288_v36, %v17572_v1  ;;  %v12289_v15 = vmax.f32 %v23180_v20, %v17367_v9  ;;  %v11914_v16 = vpop.f32.mrb[79].mxu0  ;;  %v13908_v6 = vpop.f32.mrb[79].mxu1  ;;  %v23195_v33 = vmax.f32 %v23193_v21, %v23194_v13  ;;  %v23199_v20 = vld [vmem:[#allocation248_spill] sm:$0xff] }
 0x466   : > { %14873 = vst.msk [vmem:[%s20760_s22 + $0x428] sm:$0xff] %vm14739_vm3, %v14676_v38  ;;  %v14280_v7 = vmax.f32 %v12286_v8, %v13905_v63  ;;  %v12287_v48 = vmax.f32 %v23183_v47, %v11914_v16  ;;  %v23197_v8 = vld [vmem:[#allocation247_spill] sm:$0xff]  ;;  %v23202_v47 = vld [vmem:[#allocation250_spill] sm:$0xff] }
 0x467   : > { %v14485_v22 = vadd.f32 %v21679_v61, %v14282_v4  ;;  %v14283_v23 = vmax.f32 %v12289_v15, %v17573_v3  ;;  %v23198_v9 = vmax.f32 %v23196_v44, %v23197_v8  ;;  %v23200_v15 = vld [vmem:[#allocation249_spill] sm:$0xff] }
 0x468   : > { %v14483_v27 = vadd.f32 %v21679_v61, %v14280_v7  ;;  %v14281_v28 = vmax.f32 %v12287_v48, %v13908_v6  ;;  %v23201_v16 = vmax.f32 %v23199_v20, %v23200_v15  ;;  %v23203_v48 = vld [vmem:[#allocation251_spill] sm:$0xff] }
 0x469   : > { %v14681_v45 = vmax.f32 %v14485_v22, 0.0  ;;  %v14486_v11 = vadd.f32 %v21679_v61, %v14283_v23  ;;  %v23204_v22 = vmax.f32 %v23202_v47, %v23203_v48 }
 0x46a   : > { %v14679_v12 = vmax.f32 %v14483_v27, 0.0  ;;  %v14484_v46 = vadd.f32 %v21679_v61, %v14281_v28  ;;  %v17370_v53 = vpop.f32.mrb[80].mxu0  ;;  %v17576_v57 = vpop.f32.mrb[80].mxu1 }
 0x46b   : > { %14878 = vst.msk [vmem:[%s20760_s22 + $0x450] sm:$0xff] %vm14739_vm3, %v14681_v45  ;;  %v14682_v14 = vmax.f32 %v14486_v11, 0.0  ;;  %v12292_v26 = vmax.f32 %v23186_v50, %v17370_v53  ;;  %v11927_v32 = vpop.f32.mrb[81].mxu0  ;;  %v13921_v42 = vpop.f32.mrb[81].mxu1  ;;  %v23205_v11 = vld [vmem:[#allocation252_spill] sm:$0xff] }
 0x46c   : > { %14876 = vst.msk [vmem:[%s20760_s22 + $0x440] sm:$0xff] %vm14739_vm3, %v14679_v12  ;;  %v14680_v37 = vmax.f32 %v14484_v46, 0.0  ;;  %v12290_v24 = vmax.f32 %v23189_v52, %v11927_v32  ;;  %v17371_v5 = vpop.f32.mrb[82].mxu0  ;;  %v17577_v54 = vpop.f32.mrb[82].mxu1  ;;  %v23206_v12 = vld [vmem:[#allocation253_spill] sm:$0xff]  ;;  %v23208_v52 = vld [vmem:[#allocation254_spill] sm:$0xff] }
 0x46d   : > { %14879 = vst.msk [vmem:[%s20760_s22 + $0x458] sm:$0xff] %vm14739_vm3, %v14682_v14  ;;  %v14286_v55 = vmax.f32 %v12292_v26, %v17576_v57  ;;  %v12293_v60 = vmax.f32 %v23192_v56, %v17371_v5  ;;  %v11930_v40 = vpop.f32.mrb[83].mxu0  ;;  %v13924_v0 = vpop.f32.mrb[83].mxu1  ;;  %v23207_v46 = vmax.f32 %v23205_v11, %v23206_v12  ;;  %v23211_v56 = vld [vmem:[#allocation256_spill] sm:$0xff] }
 0x46e   : > { %14877 = vst.msk [vmem:[%s20760_s22 + $0x448] sm:$0xff] %vm14739_vm3, %v14680_v37  ;;  %v14284_v10 = vmax.f32 %v12290_v24, %v13921_v42  ;;  %v12291_v34 = vmax.f32 %v23195_v33, %v11930_v40  ;;  %v23209_v24 = vld [vmem:[#allocation255_spill] sm:$0xff]  ;;  %v23214_v33 = vld [vmem:[#allocation258_spill] sm:$0xff] }
 0x46f   : > { %v14489_v1 = vadd.f32 %v21679_v61, %v14286_v55  ;;  %v14287_v2 = vmax.f32 %v12293_v60, %v17577_v54  ;;  %v23210_v5 = vmax.f32 %v23208_v52, %v23209_v24  ;;  %v23212_v60 = vld [vmem:[#allocation257_spill] sm:$0xff] }
 0x470   : > { %v14487_v17 = vadd.f32 %v21679_v61, %v14284_v10  ;;  %v14285_v18 = vmax.f32 %v12291_v34, %v13924_v0  ;;  %v23213_v40 = vmax.f32 %v23211_v56, %v23212_v60  ;;  %v23215_v34 = vld [vmem:[#allocation259_spill] sm:$0xff] }
 0x471   : > { %v14685_v35 = vmax.f32 %v14489_v1, 0.0  ;;  %v14490_v36 = vadd.f32 %v21679_v61, %v14287_v2  ;;  %v23216_v1 = vmax.f32 %v23214_v33, %v23215_v34 }
 0x472   : > { %v14683_v29 = vmax.f32 %v14487_v17, 0.0  ;;  %v14488_v63 = vadd.f32 %v21679_v61, %v14285_v18  ;;  %v17374_v38 = vpop.f32.mrb[84].mxu0  ;;  %v17580_v39 = vpop.f32.mrb[84].mxu1 }
 0x473   : > { %14882 = vst.msk [vmem:[%s20760_s22 + $0x470] sm:$0xff] %vm14739_vm3, %v14685_v35  ;;  %v14686_v43 = vmax.f32 %v14490_v36, 0.0  ;;  %v12296_v3 = vmax.f32 %v23198_v9, %v17374_v38  ;;  %v11943_v4 = vpop.f32.mrb[85].mxu0  ;;  %v13937_v19 = vpop.f32.mrb[85].mxu1  ;;  %v23217_v36 = vld [vmem:[#allocation260_spill] sm:$0xff] }
 0x474   : > { %14880 = vst.msk [vmem:[%s20760_s22 + $0x460] sm:$0xff] %vm14739_vm3, %v14683_v29  ;;  %v14684_v41 = vmax.f32 %v14488_v63, 0.0  ;;  %v12294_v6 = vmax.f32 %v23201_v16, %v11943_v4  ;;  %v17375_v7 = vpop.f32.mrb[86].mxu0  ;;  %v17581_v25 = vpop.f32.mrb[86].mxu1  ;;  %v23218_v29 = vld [vmem:[#allocation261_spill] sm:$0xff]  ;;  %v23220_v16 = vld [vmem:[#allocation262_spill] sm:$0xff] }
 0x475   : > { %14883 = vst.msk [vmem:[%s20760_s22 + $0x478] sm:$0xff] %vm14739_vm3, %v14686_v43  ;;  %v14290_v31 = vmax.f32 %v12296_v3, %v17580_v39  ;;  %v12297_v23 = vmax.f32 %v23204_v22, %v17375_v7  ;;  %v11946_v27 = vpop.f32.mrb[87].mxu0  ;;  %v13940_v28 = vpop.f32.mrb[87].mxu1  ;;  %v23219_v63 = vmax.f32 %v23217_v36, %v23218_v29  ;;  %v23223_v22 = vld [vmem:[#allocation264_spill] sm:$0xff] }
 0x476   : > { %14881 = vst.msk [vmem:[%s20760_s22 + $0x468] sm:$0xff] %vm14739_vm3, %v14684_v41  ;;  %v14288_v45 = vmax.f32 %v12294_v6, %v13937_v19  ;;  %v12295_v53 = vmax.f32 %v23207_v46, %v11946_v27  ;;  %v23221_v6 = vld [vmem:[#allocation263_spill] sm:$0xff]  ;;  %v23226_v46 = vld [vmem:[#allocation266_spill] sm:$0xff] }
 0x477   : > { %v14493_v57 = vadd.f32 %v21679_v61, %v14290_v31  ;;  %v14291_v14 = vmax.f32 %v12297_v23, %v17581_v25  ;;  %v23222_v7 = vmax.f32 %v23220_v16, %v23221_v6  ;;  %v23224_v23 = vld [vmem:[#allocation265_spill] sm:$0xff] }
 0x478   : > { %v14491_v30 = vadd.f32 %v21679_v61, %v14288_v45  ;;  %v14289_v49 = vmax.f32 %v12295_v53, %v13940_v28  ;;  %v23225_v27 = vmax.f32 %v23223_v22, %v23224_v23  ;;  %v23227_v53 = vld [vmem:[#allocation267_spill] sm:$0xff] }
 0x479   : > { %v14689_v50 = vmax.f32 %v14493_v57, 0.0  ;;  %v14494_v26 = vadd.f32 %v21679_v61, %v14291_v14  ;;  %v23228_v57 = vmax.f32 %v23226_v46, %v23227_v53 }
 0x47a   : > { %v14687_v32 = vmax.f32 %v14491_v30, 0.0  ;;  %v14492_v42 = vadd.f32 %v21679_v61, %v14289_v49  ;;  %v17378_v37 = vpop.f32.mrb[88].mxu0  ;;  %v17584_v62 = vpop.f32.mrb[88].mxu1 }
 0x47b   : > { %14886 = vst.msk [vmem:[%s20760_s22 + $0x490] sm:$0xff] %vm14739_vm3, %v14689_v50  ;;  %v14690_v51 = vmax.f32 %v14494_v26, 0.0  ;;  %v12300_v54 = vmax.f32 %v23210_v5, %v17378_v37  ;;  %v11959_v55 = vpop.f32.mrb[89].mxu0  ;;  %v13953_v59 = vpop.f32.mrb[89].mxu1  ;;  %v23229_v26 = vld [vmem:[#allocation268_spill] sm:$0xff] }
 0x47c   : > { %14884 = vst.msk [vmem:[%s20760_s22 + $0x480] sm:$0xff] %vm14739_vm3, %v14687_v32  ;;  %v14688_v58 = vmax.f32 %v14492_v42, 0.0  ;;  %v12298_v0 = vmax.f32 %v23213_v40, %v11959_v55  ;;  %v17379_v10 = vpop.f32.mrb[90].mxu0  ;;  %v17585_v21 = vpop.f32.mrb[90].mxu1  ;;  %v23230_v32 = vld [vmem:[#allocation269_spill] sm:$0xff]  ;;  %v23232_v40 = vld [vmem:[#allocation270_spill] sm:$0xff] }
 0x47d   : > { %14887 = vst.msk [vmem:[%s20760_s22 + $0x498] sm:$0xff] %vm14739_vm3, %v14690_v51  ;;  %v14294_v13 = vmax.f32 %v12300_v54, %v17584_v62  ;;  %v12301_v2 = vmax.f32 %v23216_v1, %v17379_v10  ;;  %v11962_v17 = vpop.f32.mrb[91].mxu0  ;;  %v13956_v18 = vpop.f32.mrb[91].mxu1  ;;  %v23231_v42 = vmax.f32 %v23229_v26, %v23230_v32  ;;  %v23235_v1 = vld [vmem:[#allocation272_spill] sm:$0xff] }
 0x47e   : > { %14885 = vst.msk [vmem:[%s20760_s22 + $0x488] sm:$0xff] %vm14739_vm3, %v14688_v58  ;;  %v14292_v35 = vmax.f32 %v12298_v0, %v13953_v59  ;;  %v12299_v38 = vmax.f32 %v23219_v63, %v11962_v17  ;;  %v23233_v0 = vld [vmem:[#allocation271_spill] sm:$0xff]  ;;  %v23238_v63 = vld [vmem:[#allocation274_spill] sm:$0xff] }
 0x47f   : > { %v14497_v39 = vadd.f32 %v21679_v61, %v14294_v13  ;;  %v14295_v43 = vmax.f32 %v12301_v2, %v17585_v21  ;;  %v23234_v10 = vmax.f32 %v23232_v40, %v23233_v0  ;;  %v23236_v2 = vld [vmem:[#allocation273_spill] sm:$0xff] }
 0x480   : > { %v14495_v44 = vadd.f32 %v21679_v61, %v14292_v35  ;;  %v14293_v8 = vmax.f32 %v12299_v38, %v13956_v18  ;;  %v23237_v17 = vmax.f32 %v23235_v1, %v23236_v2  ;;  %v23239_v38 = vld [vmem:[#allocation275_spill] sm:$0xff] }
 0x481   : > { %v14693_v9 = vmax.f32 %v14497_v39, 0.0  ;;  %v14498_v3 = vadd.f32 %v21679_v61, %v14295_v43  ;;  %v23240_v39 = vmax.f32 %v23238_v63, %v23239_v38 }
 0x482   : > { %v14691_v4 = vmax.f32 %v14495_v44, 0.0  ;;  %v14496_v19 = vadd.f32 %v21679_v61, %v14293_v8  ;;  %v17382_v41 = vpop.f32.mrb[92].mxu0  ;;  %v17588_v20 = vpop.f32.mrb[92].mxu1 }
 0x483   : > { %14890 = vst.msk [vmem:[%s20760_s22 + $0x4b0] sm:$0xff] %vm14739_vm3, %v14693_v9  ;;  %v14694_v15 = vmax.f32 %v14498_v3, 0.0  ;;  %v12304_v25 = vmax.f32 %v23222_v7, %v17382_v41  ;;  %v11975_v31 = vpop.f32.mrb[93].mxu0  ;;  %v13969_v47 = vpop.f32.mrb[93].mxu1  ;;  %v23241_v3 = vld [vmem:[#allocation276_spill] sm:$0xff] }
 0x484   : > { %14888 = vst.msk [vmem:[%s20760_s22 + $0x4a0] sm:$0xff] %vm14739_vm3, %v14691_v4  ;;  %v14692_v48 = vmax.f32 %v14496_v19, 0.0  ;;  %v12302_v28 = vmax.f32 %v23225_v27, %v11975_v31  ;;  %v17383_v45 = vpop.f32.mrb[94].mxu0  ;;  %v17589_v11 = vpop.f32.mrb[94].mxu1  ;;  %v23242_v4 = vld [vmem:[#allocation277_spill] sm:$0xff]  ;;  %v23244_v27 = vld [vmem:[#allocation278_spill] sm:$0xff] }
 0x485   : > { %14891 = vst.msk [vmem:[%s20760_s22 + $0x4b8] sm:$0xff] %vm14739_vm3, %v14694_v15  ;;  %v14298_v12 = vmax.f32 %v12304_v25, %v17588_v20  ;;  %v12305_v14 = vmax.f32 %v23228_v57, %v17383_v45  ;;  %v11978_v30 = vpop.f32.mrb[95].mxu0  ;;  %v13972_v49 = vpop.f32.mrb[95].mxu1  ;;  %v23243_v19 = vmax.f32 %v23241_v3, %v23242_v4  ;;  %v23247_v57 = vld [vmem:[#allocation280_spill] sm:$0xff] }
 0x486   : > { %14889 = vst.msk [vmem:[%s20760_s22 + $0x4a8] sm:$0xff] %vm14739_vm3, %v14692_v48  ;;  %v14296_v50 = vmax.f32 %v12302_v28, %v13969_v47  ;;  %v12303_v37 = vmax.f32 %v23231_v42, %v11978_v30  ;;  %v23245_v28 = vld [vmem:[#allocation279_spill] sm:$0xff]  ;;  %v23250_v42 = vld [vmem:[#allocation282_spill] sm:$0xff] }
 0x487   : > { %v14501_v62 = vadd.f32 %v21679_v61, %v14298_v12  ;;  %v14299_v51 = vmax.f32 %v12305_v14, %v17589_v11  ;;  %v23246_v45 = vmax.f32 %v23244_v27, %v23245_v28  ;;  %v23248_v14 = vld [vmem:[#allocation281_spill] sm:$0xff] }
 0x488   : > { %v14499_v52 = vadd.f32 %v21679_v61, %v14296_v50  ;;  %v14297_v24 = vmax.f32 %v12303_v37, %v13972_v49  ;;  %v23249_v30 = vmax.f32 %v23247_v57, %v23248_v14  ;;  %v23251_v37 = vld [vmem:[#allocation283_spill] sm:$0xff] }
 0x489   : > { %v14697_v5 = vmax.f32 %v14501_v62, 0.0  ;;  %v14502_v54 = vadd.f32 %v21679_v61, %v14299_v51  ;;  %v23252_v62 = vmax.f32 %v23250_v42, %v23251_v37 }
 0x48a   : > { %v14695_v55 = vmax.f32 %v14499_v52, 0.0  ;;  %v14500_v59 = vadd.f32 %v21679_v61, %v14297_v24  ;;  %v17386_v58 = vpop.f32.mrb[96].mxu0  ;;  %v17592_v56 = vpop.f32.mrb[96].mxu1 }
 0x48b   : > { %14894 = vst.msk [vmem:[%s20760_s22 + $0x4d0] sm:$0xff] %vm14739_vm3, %v14697_v5  ;;  %v14698_v60 = vmax.f32 %v14502_v54, 0.0  ;;  %v12308_v21 = vmax.f32 %v23234_v10, %v17386_v58  ;;  %v11991_v13 = vpop.f32.mrb[97].mxu0  ;;  %v13985_v33 = vpop.f32.mrb[97].mxu1  ;;  %v23253_v54 = vld [vmem:[#allocation284_spill] sm:$0xff] }
 0x48c   : > { %14892 = vst.msk [vmem:[%s20760_s22 + $0x4c0] sm:$0xff] %vm14739_vm3, %v14695_v55  ;;  %v14696_v34 = vmax.f32 %v14500_v59, 0.0  ;;  %v12306_v18 = vmax.f32 %v23237_v17, %v11991_v13  ;;  %v17387_v35 = vpop.f32.mrb[98].mxu0  ;;  %v17593_v36 = vpop.f32.mrb[98].mxu1  ;;  %v23254_v55 = vld [vmem:[#allocation285_spill] sm:$0xff]  ;;  %v23256_v17 = vld [vmem:[#allocation286_spill] sm:$0xff] }
 0x48d   : > { %14895 = vst.msk [vmem:[%s20760_s22 + $0x4d8] sm:$0xff] %vm14739_vm3, %v14698_v60  ;;  %v14302_v29 = vmax.f32 %v12308_v21, %v17592_v56  ;;  %v12309_v43 = vmax.f32 %v23240_v39, %v17387_v35  ;;  %v11994_v44 = vpop.f32.mrb[99].mxu0  ;;  %v13988_v8 = vpop.f32.mrb[99].mxu1  ;;  %v23255_v59 = vmax.f32 %v23253_v54, %v23254_v55  ;;  %v23259_v39 = vld [vmem:[#allocation288_spill] sm:$0xff] }
 0x48e   : > { %14893 = vst.msk [vmem:[%s20760_s22 + $0x4c8] sm:$0xff] %vm14739_vm3, %v14696_v34  ;;  %v14300_v9 = vmax.f32 %v12306_v18, %v13985_v33  ;;  %v12307_v41 = vmax.f32 %v23243_v19, %v11994_v44  ;;  %v23257_v18 = vld [vmem:[#allocation287_spill] sm:$0xff]  ;;  %v23262_v19 = vld [vmem:[#allocation290_spill] sm:$0xff] }
 0x48f   : > { %v14505_v20 = vadd.f32 %v21679_v61, %v14302_v29  ;;  %v14303_v15 = vmax.f32 %v12309_v43, %v17593_v36  ;;  %v23258_v35 = vmax.f32 %v23256_v17, %v23257_v18  ;;  %v23260_v43 = vld [vmem:[#allocation289_spill] sm:$0xff] }
 0x490   : > { %v14503_v16 = vadd.f32 %v21679_v61, %v14300_v9  ;;  %v14301_v6 = vmax.f32 %v12307_v41, %v13988_v8  ;;  %v23261_v44 = vmax.f32 %v23259_v39, %v23260_v43  ;;  %v23263_v41 = vld [vmem:[#allocation291_spill] sm:$0xff] }
 0x491   : > { %v14701_v7 = vmax.f32 %v14505_v20, 0.0  ;;  %v14506_v25 = vadd.f32 %v21679_v61, %v14303_v15  ;;  %v23264_v20 = vmax.f32 %v23262_v19, %v23263_v41 }
 0x492   : > { %v14699_v31 = vmax.f32 %v14503_v16, 0.0  ;;  %v14504_v47 = vadd.f32 %v21679_v61, %v14301_v6  ;;  %v17390_v48 = vpop.f32.mrb[100].mxu0  ;;  %v17596_v22 = vpop.f32.mrb[100].mxu1 }
 0x493   : > { %14898 = vst.msk [vmem:[%s20760_s22 + $0x4f0] sm:$0xff] %vm14739_vm3, %v14701_v7  ;;  %v14702_v23 = vmax.f32 %v14506_v25, 0.0  ;;  %v12312_v11 = vmax.f32 %v23246_v45, %v17390_v48  ;;  %v12007_v12 = vpop.f32.mrb[101].mxu0  ;;  %v14001_v46 = vpop.f32.mrb[101].mxu1  ;;  %v23265_v25 = vld [vmem:[#allocation292_spill] sm:$0xff] }
 0x494   : > { %14896 = vst.msk [vmem:[%s20760_s22 + $0x4e0] sm:$0xff] %vm14739_vm3, %v14699_v31  ;;  %v14700_v53 = vmax.f32 %v14504_v47, 0.0  ;;  %v12310_v49 = vmax.f32 %v23249_v30, %v12007_v12  ;;  %v17391_v50 = vpop.f32.mrb[102].mxu0  ;;  %v17597_v26 = vpop.f32.mrb[102].mxu1  ;;  %v23266_v31 = vld [vmem:[#allocation293_spill] sm:$0xff]  ;;  %v23268_v30 = vld [vmem:[#allocation294_spill] sm:$0xff] }
 0x495   : > { %14899 = vst.msk [vmem:[%s20760_s22 + $0x4f8] sm:$0xff] %vm14739_vm3, %v14702_v23  ;;  %v14306_v32 = vmax.f32 %v12312_v11, %v17596_v22  ;;  %v12313_v51 = vmax.f32 %v23252_v62, %v17391_v50  ;;  %v12010_v52 = vpop.f32.mrb[103].mxu0  ;;  %v14004_v24 = vpop.f32.mrb[103].mxu1  ;;  %v23267_v47 = vmax.f32 %v23265_v25, %v23266_v31  ;;  %v23271_v62 = vld [vmem:[#allocation296_spill] sm:$0xff] }
 0x496   : > { %14897 = vst.msk [vmem:[%s20760_s22 + $0x4e8] sm:$0xff] %vm14739_vm3, %v14700_v53  ;;  %v14304_v5 = vmax.f32 %v12310_v49, %v14001_v46  ;;  %v12311_v58 = vmax.f32 %v23255_v59, %v12010_v52  ;;  %v23269_v49 = vld [vmem:[#allocation295_spill] sm:$0xff]  ;;  %v23274_v59 = vld [vmem:[#allocation298_spill] sm:$0xff] }
 0x497   : > { %v14509_v56 = vadd.f32 %v21679_v61, %v14306_v32  ;;  %v14307_v60 = vmax.f32 %v12313_v51, %v17597_v26  ;;  %v23270_v50 = vmax.f32 %v23268_v30, %v23269_v49  ;;  %v23272_v51 = vld [vmem:[#allocation297_spill] sm:$0xff] }
 0x498   : > { %v14507_v40 = vadd.f32 %v21679_v61, %v14304_v5  ;;  %v14305_v0 = vmax.f32 %v12311_v58, %v14004_v24  ;;  %v23273_v52 = vmax.f32 %v23271_v62, %v23272_v51  ;;  %v23275_v58 = vld [vmem:[#allocation299_spill] sm:$0xff] }
 0x499   : > { %v14705_v10 = vmax.f32 %v14509_v56, 0.0  ;;  %v14510_v21 = vadd.f32 %v21679_v61, %v14307_v60  ;;  %v23276_v56 = vmax.f32 %v23274_v59, %v23275_v58 }
 0x49a   : > { %v14703_v13 = vmax.f32 %v14507_v40, 0.0  ;;  %v14508_v33 = vadd.f32 %v21679_v61, %v14305_v0  ;;  %v17394_v34 = vpop.f32.mrb[104].mxu0  ;;  %v17600_v1 = vpop.f32.mrb[104].mxu1 }
 0x49b   : > { %14902 = vst.msk [vmem:[%s20760_s22 + $0x510] sm:$0xff] %vm14739_vm3, %v14705_v10  ;;  %v14706_v2 = vmax.f32 %v14510_v21, 0.0  ;;  %v12316_v36 = vmax.f32 %v23258_v35, %v17394_v34  ;;  %v12023_v29 = vpop.f32.mrb[105].mxu0  ;;  %v14017_v63 = vpop.f32.mrb[105].mxu1  ;;  %v23277_v21 = vld [vmem:[#allocation300_spill] sm:$0xff] }
 0x49c   : > { %14900 = vst.msk [vmem:[%s20760_s22 + $0x500] sm:$0xff] %vm14739_vm3, %v14703_v13  ;;  %v14704_v38 = vmax.f32 %v14508_v33, 0.0  ;;  %v12314_v8 = vmax.f32 %v23261_v44, %v12023_v29  ;;  %v17395_v9 = vpop.f32.mrb[106].mxu0  ;;  %v17601_v3 = vpop.f32.mrb[106].mxu1  ;;  %v23278_v13 = vld [vmem:[#allocation301_spill] sm:$0xff]  ;;  %v23280_v44 = vld [vmem:[#allocation302_spill] sm:$0xff] }
 0x49d   : > { %14903 = vst.msk [vmem:[%s20760_s22 + $0x518] sm:$0xff] %vm14739_vm3, %v14706_v2  ;;  %v14310_v4 = vmax.f32 %v12316_v36, %v17600_v1  ;;  %v12317_v15 = vmax.f32 %v23264_v20, %v17395_v9  ;;  %v12026_v16 = vpop.f32.mrb[107].mxu0  ;;  %v14020_v6 = vpop.f32.mrb[107].mxu1  ;;  %v23279_v33 = vmax.f32 %v23277_v21, %v23278_v13  ;;  %v23283_v20 = vld [vmem:[#allocation304_spill] sm:$0xff] }
 0x49e   : > { %14901 = vst.msk [vmem:[%s20760_s22 + $0x508] sm:$0xff] %vm14739_vm3, %v14704_v38  ;;  %v14308_v7 = vmax.f32 %v12314_v8, %v14017_v63  ;;  %v12315_v48 = vmax.f32 %v23267_v47, %v12026_v16  ;;  %v23281_v8 = vld [vmem:[#allocation303_spill] sm:$0xff]  ;;  %v23286_v47 = vld [vmem:[#allocation306_spill] sm:$0xff] }
 0x49f   : > { %v14513_v22 = vadd.f32 %v21679_v61, %v14310_v4  ;;  %v14311_v23 = vmax.f32 %v12317_v15, %v17601_v3  ;;  %v23282_v9 = vmax.f32 %v23280_v44, %v23281_v8  ;;  %v23284_v15 = vld [vmem:[#allocation305_spill] sm:$0xff] }
 0x4a0   : > { %v14511_v27 = vadd.f32 %v21679_v61, %v14308_v7  ;;  %v14309_v28 = vmax.f32 %v12315_v48, %v14020_v6  ;;  %v23285_v16 = vmax.f32 %v23283_v20, %v23284_v15  ;;  %v23287_v48 = vld [vmem:[#allocation307_spill] sm:$0xff] }
 0x4a1   : > { %v14709_v45 = vmax.f32 %v14513_v22, 0.0  ;;  %v14514_v11 = vadd.f32 %v21679_v61, %v14311_v23  ;;  %v23288_v22 = vmax.f32 %v23286_v47, %v23287_v48 }
 0x4a2   : > { %v14707_v12 = vmax.f32 %v14511_v27, 0.0  ;;  %v14512_v46 = vadd.f32 %v21679_v61, %v14309_v28  ;;  %v17398_v53 = vpop.f32.mrb[108].mxu0  ;;  %v17604_v57 = vpop.f32.mrb[108].mxu1 }
 0x4a3   : > { %14906 = vst.msk [vmem:[%s20760_s22 + $0x530] sm:$0xff] %vm14739_vm3, %v14709_v45  ;;  %v14710_v14 = vmax.f32 %v14514_v11, 0.0  ;;  %v12320_v26 = vmax.f32 %v23270_v50, %v17398_v53  ;;  %v12039_v32 = vpop.f32.mrb[109].mxu0  ;;  %v14033_v42 = vpop.f32.mrb[109].mxu1  ;;  %v23289_v11 = vld [vmem:[#allocation308_spill] sm:$0xff] }
 0x4a4   : > { %14904 = vst.msk [vmem:[%s20760_s22 + $0x520] sm:$0xff] %vm14739_vm3, %v14707_v12  ;;  %v14708_v37 = vmax.f32 %v14512_v46, 0.0  ;;  %v12318_v24 = vmax.f32 %v23273_v52, %v12039_v32  ;;  %v17399_v5 = vpop.f32.mrb[110].mxu0  ;;  %v17605_v54 = vpop.f32.mrb[110].mxu1  ;;  %v23290_v12 = vld [vmem:[#allocation309_spill] sm:$0xff]  ;;  %v23292_v52 = vld [vmem:[#allocation310_spill] sm:$0xff] }
 0x4a5   : > { %14907 = vst.msk [vmem:[%s20760_s22 + $0x538] sm:$0xff] %vm14739_vm3, %v14710_v14  ;;  %v14314_v55 = vmax.f32 %v12320_v26, %v17604_v57  ;;  %v12321_v60 = vmax.f32 %v23276_v56, %v17399_v5  ;;  %v12042_v40 = vpop.f32.mrb[111].mxu0  ;;  %v14036_v0 = vpop.f32.mrb[111].mxu1  ;;  %v23291_v46 = vmax.f32 %v23289_v11, %v23290_v12  ;;  %v23295_v56 = vld [vmem:[#allocation312_spill] sm:$0xff] }
 0x4a6   : > { %14905 = vst.msk [vmem:[%s20760_s22 + $0x528] sm:$0xff] %vm14739_vm3, %v14708_v37  ;;  %v14312_v10 = vmax.f32 %v12318_v24, %v14033_v42  ;;  %v12319_v34 = vmax.f32 %v23279_v33, %v12042_v40  ;;  %v23293_v24 = vld [vmem:[#allocation311_spill] sm:$0xff]  ;;  %v23298_v33 = vld [vmem:[#allocation314_spill] sm:$0xff] }
 0x4a7   : > { %v14517_v1 = vadd.f32 %v21679_v61, %v14314_v55  ;;  %v14315_v2 = vmax.f32 %v12321_v60, %v17605_v54  ;;  %v23294_v5 = vmax.f32 %v23292_v52, %v23293_v24  ;;  %v23296_v60 = vld [vmem:[#allocation313_spill] sm:$0xff] }
 0x4a8   : > { %v14515_v17 = vadd.f32 %v21679_v61, %v14312_v10  ;;  %v14313_v18 = vmax.f32 %v12319_v34, %v14036_v0  ;;  %v23297_v40 = vmax.f32 %v23295_v56, %v23296_v60  ;;  %v23299_v34 = vld [vmem:[#allocation315_spill] sm:$0xff] }
 0x4a9   : > { %v14713_v35 = vmax.f32 %v14517_v1, 0.0  ;;  %v14518_v36 = vadd.f32 %v21679_v61, %v14315_v2  ;;  %v23300_v1 = vmax.f32 %v23298_v33, %v23299_v34 }
 0x4aa   : > { %v14711_v29 = vmax.f32 %v14515_v17, 0.0  ;;  %v14516_v63 = vadd.f32 %v21679_v61, %v14313_v18  ;;  %v17402_v38 = vpop.f32.mrb[112].mxu0  ;;  %v17608_v39 = vpop.f32.mrb[112].mxu1 }
 0x4ab   : > { %14910 = vst.msk [vmem:[%s20760_s22 + $0x550] sm:$0xff] %vm14739_vm3, %v14713_v35  ;;  %v14714_v43 = vmax.f32 %v14518_v36, 0.0  ;;  %v12324_v3 = vmax.f32 %v23282_v9, %v17402_v38  ;;  %v12055_v4 = vpop.f32.mrb[113].mxu0  ;;  %v14049_v19 = vpop.f32.mrb[113].mxu1  ;;  %v23301_v36 = vld [vmem:[#allocation316_spill] sm:$0xff] }
 0x4ac   : > { %14908 = vst.msk [vmem:[%s20760_s22 + $0x540] sm:$0xff] %vm14739_vm3, %v14711_v29  ;;  %v14712_v41 = vmax.f32 %v14516_v63, 0.0  ;;  %v12322_v6 = vmax.f32 %v23285_v16, %v12055_v4  ;;  %v17403_v7 = vpop.f32.mrb[114].mxu0  ;;  %v17609_v25 = vpop.f32.mrb[114].mxu1  ;;  %v23302_v29 = vld [vmem:[#allocation317_spill] sm:$0xff]  ;;  %v23304_v16 = vld [vmem:[#allocation318_spill] sm:$0xff] }
 0x4ad   : > { %14911 = vst.msk [vmem:[%s20760_s22 + $0x558] sm:$0xff] %vm14739_vm3, %v14714_v43  ;;  %v14318_v31 = vmax.f32 %v12324_v3, %v17608_v39  ;;  %v12325_v23 = vmax.f32 %v23288_v22, %v17403_v7  ;;  %v12058_v27 = vpop.f32.mrb[115].mxu0  ;;  %v14052_v28 = vpop.f32.mrb[115].mxu1  ;;  %v23303_v63 = vmax.f32 %v23301_v36, %v23302_v29  ;;  %v23307_v22 = vld [vmem:[#allocation320_spill] sm:$0xff] }
 0x4ae   : > { %14909 = vst.msk [vmem:[%s20760_s22 + $0x548] sm:$0xff] %vm14739_vm3, %v14712_v41  ;;  %v14316_v45 = vmax.f32 %v12322_v6, %v14049_v19  ;;  %v12323_v53 = vmax.f32 %v23291_v46, %v12058_v27  ;;  %v23305_v6 = vld [vmem:[#allocation319_spill] sm:$0xff]  ;;  %v23310_v46 = vld [vmem:[#allocation322_spill] sm:$0xff] }
 0x4af   : > { %v14521_v57 = vadd.f32 %v21679_v61, %v14318_v31  ;;  %v14319_v14 = vmax.f32 %v12325_v23, %v17609_v25  ;;  %v23306_v7 = vmax.f32 %v23304_v16, %v23305_v6  ;;  %v23308_v23 = vld [vmem:[#allocation321_spill] sm:$0xff] }
 0x4b0   : > { %v14519_v30 = vadd.f32 %v21679_v61, %v14316_v45  ;;  %v14317_v49 = vmax.f32 %v12323_v53, %v14052_v28  ;;  %v23309_v27 = vmax.f32 %v23307_v22, %v23308_v23  ;;  %v23311_v53 = vld [vmem:[#allocation323_spill] sm:$0xff] }
 0x4b1   : > { %v14717_v50 = vmax.f32 %v14521_v57, 0.0  ;;  %v14522_v26 = vadd.f32 %v21679_v61, %v14319_v14  ;;  %v23312_v57 = vmax.f32 %v23310_v46, %v23311_v53 }
 0x4b2   : > { %v14715_v32 = vmax.f32 %v14519_v30, 0.0  ;;  %v14520_v42 = vadd.f32 %v21679_v61, %v14317_v49  ;;  %v17406_v37 = vpop.f32.mrb[116].mxu0  ;;  %v17612_v62 = vpop.f32.mrb[116].mxu1 }
 0x4b3   : > { %14914 = vst.msk [vmem:[%s20760_s22 + $0x570] sm:$0xff] %vm14739_vm3, %v14717_v50  ;;  %v14718_v51 = vmax.f32 %v14522_v26, 0.0  ;;  %v12328_v54 = vmax.f32 %v23294_v5, %v17406_v37  ;;  %v12071_v55 = vpop.f32.mrb[117].mxu0  ;;  %v14065_v59 = vpop.f32.mrb[117].mxu1  ;;  %v23313_v26 = vld [vmem:[#allocation324_spill] sm:$0xff] }
 0x4b4   : > { %14912 = vst.msk [vmem:[%s20760_s22 + $0x560] sm:$0xff] %vm14739_vm3, %v14715_v32  ;;  %v14716_v58 = vmax.f32 %v14520_v42, 0.0  ;;  %v12326_v0 = vmax.f32 %v23297_v40, %v12071_v55  ;;  %v17407_v10 = vpop.f32.mrb[118].mxu0  ;;  %v17613_v21 = vpop.f32.mrb[118].mxu1  ;;  %v23314_v32 = vld [vmem:[#allocation325_spill] sm:$0xff]  ;;  %v23316_v40 = vld [vmem:[#allocation326_spill] sm:$0xff] }
 0x4b5   : > { %14915 = vst.msk [vmem:[%s20760_s22 + $0x578] sm:$0xff] %vm14739_vm3, %v14718_v51  ;;  %v14322_v13 = vmax.f32 %v12328_v54, %v17612_v62  ;;  %v12329_v2 = vmax.f32 %v23300_v1, %v17407_v10  ;;  %v12074_v17 = vpop.f32.mrb[119].mxu0  ;;  %v14068_v18 = vpop.f32.mrb[119].mxu1  ;;  %v23315_v42 = vmax.f32 %v23313_v26, %v23314_v32  ;;  %v23319_v1 = vld [vmem:[#allocation328_spill] sm:$0xff] }
 0x4b6   : > { %14913 = vst.msk [vmem:[%s20760_s22 + $0x568] sm:$0xff] %vm14739_vm3, %v14716_v58  ;;  %v14320_v35 = vmax.f32 %v12326_v0, %v14065_v59  ;;  %v12327_v38 = vmax.f32 %v23303_v63, %v12074_v17  ;;  %v23317_v0 = vld [vmem:[#allocation327_spill] sm:$0xff]  ;;  %v23322_v63 = vld [vmem:[#allocation330_spill] sm:$0xff] }
 0x4b7   : > { %v14525_v39 = vadd.f32 %v21679_v61, %v14322_v13  ;;  %v14323_v43 = vmax.f32 %v12329_v2, %v17613_v21  ;;  %v23318_v10 = vmax.f32 %v23316_v40, %v23317_v0  ;;  %v23320_v2 = vld [vmem:[#allocation329_spill] sm:$0xff] }
 0x4b8   : > { %v14523_v44 = vadd.f32 %v21679_v61, %v14320_v35  ;;  %v14321_v8 = vmax.f32 %v12327_v38, %v14068_v18  ;;  %v23321_v17 = vmax.f32 %v23319_v1, %v23320_v2  ;;  %v23323_v38 = vld [vmem:[#allocation331_spill] sm:$0xff] }
 0x4b9   : > { %v14721_v9 = vmax.f32 %v14525_v39, 0.0  ;;  %v14526_v3 = vadd.f32 %v21679_v61, %v14323_v43  ;;  %v23324_v39 = vmax.f32 %v23322_v63, %v23323_v38 }
 0x4ba   : > { %v14719_v4 = vmax.f32 %v14523_v44, 0.0  ;;  %v14524_v19 = vadd.f32 %v21679_v61, %v14321_v8  ;;  %v17410_v41 = vpop.f32.mrb[120].mxu0  ;;  %v17616_v20 = vpop.f32.mrb[120].mxu1 }
 0x4bb   : > { %14918 = vst.msk [vmem:[%s20760_s22 + $0x590] sm:$0xff] %vm14739_vm3, %v14721_v9  ;;  %v14722_v15 = vmax.f32 %v14526_v3, 0.0  ;;  %v12332_v25 = vmax.f32 %v23306_v7, %v17410_v41  ;;  %v12087_v31 = vpop.f32.mrb[121].mxu0  ;;  %v14081_v47 = vpop.f32.mrb[121].mxu1  ;;  %v23325_v3 = vld [vmem:[#allocation332_spill] sm:$0xff] }
 0x4bc   : > { %14916 = vst.msk [vmem:[%s20760_s22 + $0x580] sm:$0xff] %vm14739_vm3, %v14719_v4  ;;  %v14720_v48 = vmax.f32 %v14524_v19, 0.0  ;;  %v12330_v28 = vmax.f32 %v23309_v27, %v12087_v31  ;;  %v17411_v45 = vpop.f32.mrb[122].mxu0  ;;  %v17617_v11 = vpop.f32.mrb[122].mxu1  ;;  %v23326_v4 = vld [vmem:[#allocation333_spill] sm:$0xff]  ;;  %v23328_v27 = vld [vmem:[#allocation334_spill] sm:$0xff] }
 0x4bd   : > { %14919 = vst.msk [vmem:[%s20760_s22 + $0x598] sm:$0xff] %vm14739_vm3, %v14722_v15  ;;  %v14326_v12 = vmax.f32 %v12332_v25, %v17616_v20  ;;  %v12333_v14 = vmax.f32 %v23312_v57, %v17411_v45  ;;  %v12090_v30 = vpop.f32.mrb[123].mxu0  ;;  %v14084_v49 = vpop.f32.mrb[123].mxu1  ;;  %v23327_v19 = vmax.f32 %v23325_v3, %v23326_v4  ;;  %v23331_v57 = vld [vmem:[#allocation336_spill] sm:$0xff] }
 0x4be   : > { %14917 = vst.msk [vmem:[%s20760_s22 + $0x588] sm:$0xff] %vm14739_vm3, %v14720_v48  ;;  %v14324_v50 = vmax.f32 %v12330_v28, %v14081_v47  ;;  %v12331_v37 = vmax.f32 %v23315_v42, %v12090_v30  ;;  %v23329_v28 = vld [vmem:[#allocation335_spill] sm:$0xff]  ;;  %v23334_v42 = vld [vmem:[#allocation338_spill] sm:$0xff] }
 0x4bf   : > { %v14529_v62 = vadd.f32 %v21679_v61, %v14326_v12  ;;  %v14327_v51 = vmax.f32 %v12333_v14, %v17617_v11  ;;  %v23330_v45 = vmax.f32 %v23328_v27, %v23329_v28  ;;  %v23332_v14 = vld [vmem:[#allocation337_spill] sm:$0xff] }
 0x4c0   : > { %v14527_v52 = vadd.f32 %v21679_v61, %v14324_v50  ;;  %v14325_v24 = vmax.f32 %v12331_v37, %v14084_v49  ;;  %v23333_v30 = vmax.f32 %v23331_v57, %v23332_v14  ;;  %v23335_v37 = vld [vmem:[#allocation339_spill] sm:$0xff] }
 0x4c1   : > { %v14725_v5 = vmax.f32 %v14529_v62, 0.0  ;;  %v14530_v54 = vadd.f32 %v21679_v61, %v14327_v51  ;;  %v23336_v62 = vmax.f32 %v23334_v42, %v23335_v37 }
 0x4c2   : > { %v14723_v55 = vmax.f32 %v14527_v52, 0.0  ;;  %v14528_v59 = vadd.f32 %v21679_v61, %v14325_v24  ;;  %v17414_v58 = vpop.f32.mrb[124].mxu0  ;;  %v17620_v56 = vpop.f32.mrb[124].mxu1 }
 0x4c3   : > { %14922 = vst.msk [vmem:[%s20760_s22 + $0x5b0] sm:$0xff] %vm14739_vm3, %v14725_v5  ;;  %v14726_v60 = vmax.f32 %v14530_v54, 0.0  ;;  %v12336_v21 = vmax.f32 %v23318_v10, %v17414_v58  ;;  %v12103_v13 = vpop.f32.mrb[125].mxu0  ;;  %v14097_v33 = vpop.f32.mrb[125].mxu1  ;;  %v23337_v54 = vld [vmem:[#allocation340_spill] sm:$0xff] }
 0x4c4   : > { %14920 = vst.msk [vmem:[%s20760_s22 + $0x5a0] sm:$0xff] %vm14739_vm3, %v14723_v55  ;;  %v14724_v34 = vmax.f32 %v14528_v59, 0.0  ;;  %v12334_v18 = vmax.f32 %v23321_v17, %v12103_v13  ;;  %v17415_v35 = vpop.f32.mrb[126].mxu0  ;;  %v17621_v36 = vpop.f32.mrb[126].mxu1  ;;  %v23338_v55 = vld [vmem:[#allocation341_spill] sm:$0xff]  ;;  %v23340_v17 = vld [vmem:[#allocation342_spill] sm:$0xff] }
 0x4c5   : > { %14923 = vst.msk [vmem:[%s20760_s22 + $0x5b8] sm:$0xff] %vm14739_vm3, %v14726_v60  ;;  %v14330_v29 = vmax.f32 %v12336_v21, %v17620_v56  ;;  %v12337_v43 = vmax.f32 %v23324_v39, %v17415_v35  ;;  %v12106_v44 = vpop.f32.mrb[127].mxu0  ;;  %v14100_v8 = vpop.f32.mrb[127].mxu1  ;;  %v23339_v59 = vmax.f32 %v23337_v54, %v23338_v55  ;;  %v23343_v39 = vld [vmem:[#allocation344_spill] sm:$0xff] }
 0x4c6   : > { %14921 = vst.msk [vmem:[%s20760_s22 + $0x5a8] sm:$0xff] %vm14739_vm3, %v14724_v34  ;;  %v14328_v9 = vmax.f32 %v12334_v18, %v14097_v33  ;;  %v12335_v41 = vmax.f32 %v23327_v19, %v12106_v44  ;;  %v23341_v18 = vld [vmem:[#allocation343_spill] sm:$0xff]  ;;  %v23346_v19 = vld [vmem:[#allocation346_spill] sm:$0xff] }
 0x4c7   : > { %v14533_v20 = vadd.f32 %v21679_v61, %v14330_v29  ;;  %v14331_v15 = vmax.f32 %v12337_v43, %v17621_v36  ;;  %v23342_v35 = vmax.f32 %v23340_v17, %v23341_v18  ;;  %v23344_v43 = vld [vmem:[#allocation345_spill] sm:$0xff] }
 0x4c8   : > { %v14531_v16 = vadd.f32 %v21679_v61, %v14328_v9  ;;  %v14329_v6 = vmax.f32 %v12335_v41, %v14100_v8  ;;  %v23345_v44 = vmax.f32 %v23343_v39, %v23344_v43  ;;  %v23347_v41 = vld [vmem:[#allocation347_spill] sm:$0xff] }
 0x4c9   : > { %v14729_v7 = vmax.f32 %v14533_v20, 0.0  ;;  %v14534_v25 = vadd.f32 %v21679_v61, %v14331_v15  ;;  %v23348_v20 = vmax.f32 %v23346_v19, %v23347_v41 }
 0x4ca   : > { %v14727_v31 = vmax.f32 %v14531_v16, 0.0  ;;  %v14532_v47 = vadd.f32 %v21679_v61, %v14329_v6  ;;  %v17418_v48 = vpop.f32.mrb[128].mxu0  ;;  %v17624_v22 = vpop.f32.mrb[128].mxu1 }
 0x4cb   : > { %14926 = vst.msk [vmem:[%s20760_s22 + $0x5d0] sm:$0xff] %vm14739_vm3, %v14729_v7  ;;  %v14730_v23 = vmax.f32 %v14534_v25, 0.0  ;;  %v12340_v11 = vmax.f32 %v23330_v45, %v17418_v48  ;;  %v12119_v12 = vpop.f32.mrb[129].mxu0  ;;  %v14113_v46 = vpop.f32.mrb[129].mxu1  ;;  %v23349_v25 = vld [vmem:[#allocation348_spill] sm:$0xff] }
 0x4cc   : > { %14924 = vst.msk [vmem:[%s20760_s22 + $0x5c0] sm:$0xff] %vm14739_vm3, %v14727_v31  ;;  %v14728_v53 = vmax.f32 %v14532_v47, 0.0  ;;  %v12338_v49 = vmax.f32 %v23333_v30, %v12119_v12  ;;  %v17419_v50 = vpop.f32.mrb[130].mxu0  ;;  %v17625_v26 = vpop.f32.mrb[130].mxu1  ;;  %v23350_v31 = vld [vmem:[#allocation349_spill] sm:$0xff] }
 0x4cd   : > { %14927 = vst.msk [vmem:[%s20760_s22 + $0x5d8] sm:$0xff] %vm14739_vm3, %v14730_v23  ;;  %v14334_v32 = vmax.f32 %v12340_v11, %v17624_v22  ;;  %v12341_v51 = vmax.f32 %v23336_v62, %v17419_v50  ;;  %v12122_v52 = vpop.f32.mrb[131].mxu0  ;;  %v14116_v24 = vpop.f32.mrb[131].mxu1  ;;  %v23351_v47 = vmax.f32 %v23349_v25, %v23350_v31 }
 0x4ce   : > { %14925 = vst.msk [vmem:[%s20760_s22 + $0x5c8] sm:$0xff] %vm14739_vm3, %v14728_v53  ;;  %v14332_v5 = vmax.f32 %v12338_v49, %v14113_v46  ;;  %v12339_v58 = vmax.f32 %v23339_v59, %v12122_v52 }
 0x4cf   : > { %v14537_v56 = vadd.f32 %v21679_v61, %v14334_v32  ;;  %v14335_v60 = vmax.f32 %v12341_v51, %v17625_v26 }
 0x4d0   : > { %v14535_v40 = vadd.f32 %v21679_v61, %v14332_v5  ;;  %v14333_v0 = vmax.f32 %v12339_v58, %v14116_v24 }
 0x4d1   : > { %v14733_v10 = vmax.f32 %v14537_v56, 0.0  ;;  %v14538_v21 = vadd.f32 %v21679_v61, %v14335_v60 }
 0x4d2   : > { %v14731_v13 = vmax.f32 %v14535_v40, 0.0  ;;  %v14536_v33 = vadd.f32 %v21679_v61, %v14333_v0  ;;  %v17422_v34 = vpop.f32.mrb[132].mxu0  ;;  %v17628_v1 = vpop.f32.mrb[132].mxu1 }
 0x4d3   : > { %14930 = vst.msk [vmem:[%s20760_s22 + $0x5f0] sm:$0xff] %vm14739_vm3, %v14733_v10  ;;  %v14734_v2 = vmax.f32 %v14538_v21, 0.0  ;;  %v12344_v36 = vmax.f32 %v23342_v35, %v17422_v34  ;;  %v12135_v29 = vpop.f32.mrb[133].mxu0  ;;  %v14129_v63 = vpop.f32.mrb[133].mxu1 }
 0x4d4   : > { %14928 = vst.msk [vmem:[%s20760_s22 + $0x5e0] sm:$0xff] %vm14739_vm3, %v14731_v13  ;;  %v14732_v38 = vmax.f32 %v14536_v33, 0.0  ;;  %v12342_v8 = vmax.f32 %v23345_v44, %v12135_v29  ;;  %v17423_v9 = vpop.f32.mrb[134].mxu0  ;;  %v17629_v3 = vpop.f32.mrb[134].mxu1 }
 0x4d5   : > { %14931 = vst.msk [vmem:[%s20760_s22 + $0x5f8] sm:$0xff] %vm14739_vm3, %v14734_v2  ;;  %v14338_v4 = vmax.f32 %v12344_v36, %v17628_v1  ;;  %v12345_v15 = vmax.f32 %v23348_v20, %v17423_v9  ;;  %v12138_v16 = vpop.f32.mrb[135].mxu0  ;;  %v14132_v6 = vpop.f32.mrb[135].mxu1 }
 0x4d6   : > { %14929 = vst.msk [vmem:[%s20760_s22 + $0x5e8] sm:$0xff] %vm14739_vm3, %v14732_v38  ;;  %v14336_v7 = vmax.f32 %v12342_v8, %v14129_v63  ;;  %v12343_v48 = vmax.f32 %v23351_v47, %v12138_v16 }
 0x4d7   : > { %v14541_v22 = vadd.f32 %v21679_v61, %v14338_v4  ;;  %v14339_v23 = vmax.f32 %v12345_v15, %v17629_v3 }
 0x4d8   : > { %v14539_v27 = vadd.f32 %v21679_v61, %v14336_v7  ;;  %v14337_v28 = vmax.f32 %v12343_v48, %v14132_v6 }
 0x4d9   : > { %v14737_v45 = vmax.f32 %v14541_v22, 0.0  ;;  %v14542_v11 = vadd.f32 %v21679_v61, %v14339_v23 }
 0x4da   : > { %v14735_v12 = vmax.f32 %v14539_v27, 0.0  ;;  %v14540_v46 = vadd.f32 %v21679_v61, %v14337_v28 }
 0x4db   : > { %14934 = vst.msk [vmem:[%s20760_s22 + $0x610] sm:$0xff] %vm14739_vm3, %v14737_v45  ;;  %v14738_v53 = vmax.f32 %v14542_v11, 0.0 }
 0x4dc   : > { %14932 = vst.msk [vmem:[%s20760_s22 + $0x600] sm:$0xff] %vm14739_vm3, %v14735_v12  ;;  %v14736_v57 = vmax.f32 %v14540_v46, 0.0 }
 0x4dd   : > { %14935 = vst.msk [vmem:[%s20760_s22 + $0x618] sm:$0xff] %vm14739_vm3, %v14738_v53 }
 0x4de   : > { %14933 = vst.msk [vmem:[%s20760_s22 + $0x608] sm:$0xff] %vm14739_vm3, %v14736_v57 }
 0x4df PF: > { %p10_p9 = scmp.ge.s32.totalorder %s18118_s16, 4   ;;  %s23352_s12 = smov %s18074_s13 }
 0x4e0   : > { %s23353_s13 = smov %s18127_s19  ;;  %s23354_s14 = smov %s18118_s16 }
 0x4e1   :  { %12 = sbr.rel (!%p10_p9) target bundleno = 2 (0x2), region = 126 }

// kernel: net_forward.3
= control target key start
LH: loop header
LB: loop body
LE: loop exit
PB: predicated region body
PF: predicated region fallthrough
CT: control target
= control target key end

     0   :  { %v6718_v0 = vmov 0   ;;  %vm384_vm0 = vcmask 179200   ;;  %vm460_vm1 = vcmask 1042432   ;;  %vm6720_vm2 = vmmov 0   ;;  %s8804_s1 = inlined_call_operand.vmem [shape: bf16[150,128], index: 1, kind: input, shape index: {}]   ;;  %s8805_s0 = inlined_call_operand.vmem [shape: bf16[4,400,150], index: 0, kind: input, shape index: {}]   ;;  %s8806_s3 = inlined_call_operand.vmem [shape: bf16[3200,128], index: 3, kind: input, shape index: {}]   ;;  %s8807_s2 = inlined_call_operand.vmem [shape: f32[1,128], index: 2, kind: input, shape index: {}]   ;;  %s8808_s4 = inlined_call_operand.vmem [shape: f32[1,128], index: 4, kind: input, shape index: {}]   ;;  %s8809_s5 = inlined_call_operand.vmem [shape: bf16[128,128], index: 5, kind: input, shape index: {}]   ;;  %s8810_s7 = inlined_call_operand.vmem [shape: bf16[128,128], index: 7, kind: input, shape index: {}]   ;;  %s8811_s6 = inlined_call_operand.vmem [shape: f32[1,128], index: 6, kind: input, shape index: {}]   ;;  %s8812_s8 = inlined_call_operand.vmem [shape: f32[1,128], index: 8, kind: input, shape index: {}]   ;;  %s8813_s9 = inlined_call_operand.vmem [shape: f32[16,128], index: 9, kind: output, shape index: {}]  }
   0x1   :  { %464 = vmatprep.subr.bf16.mxu0 %v6718_v0  ;;  %1048 = vmatprep.subr.bf16.mxu1 %v6718_v0  ;;  %v6776_v1 = vld [vmem:[%s8804_s1] sm:$0xff]   ;;  %v6783_v2 = vld [vmem:[%s8804_s1 + $0x8] sm:$0xff]   ;;  %v6792_v3 = vld [vmem:[%s8804_s1 + $0x10] sm:$0xff]  }
   0x2   :  { %465 = vmatpush1.bf16.msra.mxu0 %v6776_v1  ;;  %1049 = vmatpush1.bf16.msra.mxu1 %v6776_v1  ;;  %v6801_v4 = vld [vmem:[%s8804_s1 + $0x18] sm:$0xff]   ;;  %v6203_v5 = vld [vmem:[%s8805_s0 + $0x4] ss:$8 sps:$4 sm:$0xff]   ;;  %v6836_v9 = vld [vmem:[%s8804_s1 + $0x30] sm:$0xff]  }
   0x3   :  { %466 = vmatprep.subr.bf16.mxu0 %v6718_v0  ;;  %1050 = vmatprep.subr.bf16.mxu1 %v6718_v0  ;;  %v6206_v6 = vld [vmem:[%s8805_s0 + $0x194] ss:$8 sps:$4 sm:$0xff]   ;;  %v6817_v7 = vld [vmem:[%s8804_s1 + $0x20] sm:$0xff]   ;;  %v6827_v8 = vld [vmem:[%s8804_s1 + $0x28] sm:$0xff]  }
   0x4   :  { %5217 = vmatprep.mubr.msk.bf16.mxu0 %vm384_vm0, %v6203_v5  ;;  %5342 = vmatprep.mubr.msk.bf16.mxu1 %vm384_vm0, %v6206_v6  ;;  %v6845_v10 = vld [vmem:[%s8804_s1 + $0x38] sm:$0xff]   ;;  %v6854_v11 = vld [vmem:[%s8804_s1 + $0x40] sm:$0xff]   ;;  %v6200_v12 = vld [vmem:[%s8804_s1 + $0x48] ss:$0 sps:$4 sm:$0x77]  }
   0x5   :  { %v6865_v13 = vsel %vm460_vm1, %v6200_v12, 0  ;;  %v6201_v14 = vld [vmem:[%s8805_s0] ss:$8 sps:$4 sm:$0xff]   ;;  %v6204_v15 = vld [vmem:[%s8805_s0 + $0x190] ss:$8 sps:$4 sm:$0xff]  }
   0x6   :  { %467 = vmatpush1.bf16.msra.mxu0 %v6783_v2  ;;  %1051 = vmatpush1.bf16.msra.mxu1 %v6783_v2  ;;  %v6207_v16 = vld [vmem:[%s8805_s0 + $0x14] ss:$8 sps:$4 sm:$0xff]   ;;  %v6209_v17 = vld [vmem:[%s8805_s0 + $0x1a4] ss:$8 sps:$4 sm:$0xff]   ;;  %v6211_v18 = vld [vmem:[%s8805_s0 + $0x10] ss:$8 sps:$4 sm:$0xff]  }
   0x7   :  { %468 = vmatprep.subr.bf16.mxu0 %v6718_v0  ;;  %1052 = vmatprep.subr.bf16.mxu1 %v6718_v0  ;;  %v6212_v19 = vld [vmem:[%s8805_s0 + $0x1a0] ss:$8 sps:$4 sm:$0xff]   ;;  %v6213_v20 = vld [vmem:[%s8805_s0 + $0x24] ss:$8 sps:$4 sm:$0xff]   ;;  %v6215_v21 = vld [vmem:[%s8805_s0 + $0x1b4] ss:$8 sps:$4 sm:$0xff]  }
   0x8   :  { %v6217_v22 = vld [vmem:[%s8805_s0 + $0x20] ss:$8 sps:$4 sm:$0xff]   ;;  %v6218_v23 = vld [vmem:[%s8805_s0 + $0x1b0] ss:$8 sps:$4 sm:$0xff]   ;;  %v6219_v24 = vld [vmem:[%s8805_s0 + $0x34] ss:$8 sps:$4 sm:$0xff]  }
   0x9   :  { %v6221_v25 = vld [vmem:[%s8805_s0 + $0x1c4] ss:$8 sps:$4 sm:$0xff]   ;;  %v6223_v26 = vld [vmem:[%s8805_s0 + $0x30] ss:$8 sps:$4 sm:$0xff]   ;;  %v6224_v27 = vld [vmem:[%s8805_s0 + $0x1c0] ss:$8 sps:$4 sm:$0xff]  }
   0xa   :  { %469 = vmatpush1.bf16.msra.mxu0 %v6792_v3  ;;  %1053 = vmatpush1.bf16.msra.mxu1 %v6792_v3  ;;  %v6225_v28 = vld [vmem:[%s8805_s0 + $0x44] ss:$8 sps:$4 sm:$0xff]   ;;  %v6227_v29 = vld [vmem:[%s8805_s0 + $0x1d4] ss:$8 sps:$4 sm:$0xff]   ;;  %v6229_v30 = vld [vmem:[%s8805_s0 + $0x40] ss:$8 sps:$4 sm:$0xff]  }
   0xb   :  { %470 = vmatprep.subr.bf16.mxu0 %v6718_v0  ;;  %1054 = vmatprep.subr.bf16.mxu1 %v6718_v0  ;;  %v6230_v31 = vld [vmem:[%s8805_s0 + $0x1d0] ss:$8 sps:$4 sm:$0xff]   ;;  %v6231_v32 = vld [vmem:[%s8805_s0 + $0x54] ss:$8 sps:$4 sm:$0xff]   ;;  %v6233_v33 = vld [vmem:[%s8805_s0 + $0x1e4] ss:$8 sps:$4 sm:$0xff]  }
   0xc   :  { %v6235_v34 = vld [vmem:[%s8805_s0 + $0x50] ss:$8 sps:$4 sm:$0xff]   ;;  %v6236_v35 = vld [vmem:[%s8805_s0 + $0x1e0] ss:$8 sps:$4 sm:$0xff]   ;;  %v6237_v36 = vld [vmem:[%s8805_s0 + $0x64] ss:$8 sps:$4 sm:$0xff]  }
   0xd   :  { %v6239_v37 = vld [vmem:[%s8805_s0 + $0x1f4] ss:$8 sps:$4 sm:$0xff]   ;;  %v6241_v38 = vld [vmem:[%s8805_s0 + $0x60] ss:$8 sps:$4 sm:$0xff]   ;;  %v6242_v39 = vld [vmem:[%s8805_s0 + $0x1f0] ss:$8 sps:$4 sm:$0xff]  }
   0xe   :  { %471 = vmatpush1.bf16.msra.mxu0 %v6801_v4  ;;  %1055 = vmatpush1.bf16.msra.mxu1 %v6801_v4  ;;  %v6243_v40 = vld [vmem:[%s8805_s0 + $0x74] ss:$8 sps:$4 sm:$0xff]   ;;  %v6245_v41 = vld [vmem:[%s8805_s0 + $0x204] ss:$8 sps:$4 sm:$0xff]   ;;  %v6247_v42 = vld [vmem:[%s8805_s0 + $0x70] ss:$8 sps:$4 sm:$0xff]  }
   0xf   :  { %472 = vmatprep.subr.bf16.mxu0 %v6718_v0  ;;  %1056 = vmatprep.subr.bf16.mxu1 %v6718_v0  ;;  %v6248_v43 = vld [vmem:[%s8805_s0 + $0x200] ss:$8 sps:$4 sm:$0xff]   ;;  %v6249_v44 = vld [vmem:[%s8805_s0 + $0x84] ss:$8 sps:$4 sm:$0xff]   ;;  %v6251_v45 = vld [vmem:[%s8805_s0 + $0x214] ss:$8 sps:$4 sm:$0xff]  }
  0x10   :  { %v6253_v46 = vld [vmem:[%s8805_s0 + $0x80] ss:$8 sps:$4 sm:$0xff]   ;;  %v6254_v47 = vld [vmem:[%s8805_s0 + $0x210] ss:$8 sps:$4 sm:$0xff]   ;;  %v6255_v48 = vld [vmem:[%s8805_s0 + $0x94] ss:$8 sps:$4 sm:$0xff]  }
  0x11   :  { %v6257_v49 = vld [vmem:[%s8805_s0 + $0x224] ss:$8 sps:$4 sm:$0xff]   ;;  %v6259_v50 = vld [vmem:[%s8805_s0 + $0x90] ss:$8 sps:$4 sm:$0xff]   ;;  %v6260_v51 = vld [vmem:[%s8805_s0 + $0x220] ss:$8 sps:$4 sm:$0xff]  }
  0x12   :  { %473 = vmatpush1.bf16.msra.mxu0 %v6817_v7  ;;  %1057 = vmatpush1.bf16.msra.mxu1 %v6817_v7  ;;  %v6261_v52 = vld [vmem:[%s8805_s0 + $0xa4] ss:$8 sps:$4 sm:$0xff]   ;;  %v6263_v53 = vld [vmem:[%s8805_s0 + $0x234] ss:$8 sps:$4 sm:$0xff]   ;;  %v6265_v54 = vld [vmem:[%s8805_s0 + $0xa0] ss:$8 sps:$4 sm:$0xff]  }
  0x13   :  { %474 = vmatprep.subr.bf16.mxu0 %v6718_v0  ;;  %1058 = vmatprep.subr.bf16.mxu1 %v6718_v0  ;;  %v6266_v55 = vld [vmem:[%s8805_s0 + $0x230] ss:$8 sps:$4 sm:$0xff]   ;;  %v6267_v56 = vld [vmem:[%s8805_s0 + $0xb4] ss:$8 sps:$4 sm:$0xff]   ;;  %v6269_v57 = vld [vmem:[%s8805_s0 + $0x244] ss:$8 sps:$4 sm:$0xff]  }
  0x14   :  { %v6271_v58 = vld [vmem:[%s8805_s0 + $0xb0] ss:$8 sps:$4 sm:$0xff]   ;;  %v6272_v59 = vld [vmem:[%s8805_s0 + $0x240] ss:$8 sps:$4 sm:$0xff]   ;;  %v6273_v60 = vld [vmem:[%s8805_s0 + $0xc4] ss:$8 sps:$4 sm:$0xff]  }
  0x15   :  { %v6275_v61 = vld [vmem:[%s8805_s0 + $0x254] ss:$8 sps:$4 sm:$0xff]   ;;  %v6277_v62 = vld [vmem:[%s8805_s0 + $0xc0] ss:$8 sps:$4 sm:$0xff]   ;;  %v6278_v63 = vld [vmem:[%s8805_s0 + $0x250] ss:$8 sps:$4 sm:$0xff]  }
  0x16   :  { %475 = vmatpush1.bf16.msra.mxu0 %v6827_v8  ;;  %1059 = vmatpush1.bf16.msra.mxu1 %v6827_v8  ;;  %v6287_v5 = vld [vmem:[%s8805_s0 + $0x274] ss:$8 sps:$4 sm:$0xff]   ;;  %v6381_v6 = vld [vmem:[%s8806_s3 + $0x40] sm:$0xff]  }
  0x17   :  { %476 = vmatprep.subr.bf16.mxu0 %v6718_v0  ;;  %1060 = vmatprep.subr.bf16.mxu1 %v6718_v0  ;;  %v6296_v12 = vld [vmem:[%s8805_s0 + $0x280] ss:$8 sps:$4 sm:$0xff]  }
  0x1a   :  { %477 = vmatpush1.bf16.msra.mxu0 %v6836_v9  ;;  %1061 = vmatpush1.bf16.msra.mxu1 %v6836_v9 }
  0x1b   :  { %478 = vmatprep.subr.bf16.mxu0 %v6718_v0  ;;  %1062 = vmatprep.subr.bf16.mxu1 %v6718_v0 }
  0x1e   :  { %479 = vmatpush1.bf16.msra.mxu0 %v6845_v10  ;;  %1063 = vmatpush1.bf16.msra.mxu1 %v6845_v10 }
  0x1f   :  { %480 = vmatprep.subr.bf16.mxu0 %v6718_v0  ;;  %1064 = vmatprep.subr.bf16.mxu1 %v6718_v0 }
  0x22   :  { %481 = vmatpush1.bf16.msra.mxu0 %v6854_v11  ;;  %1065 = vmatpush1.bf16.msra.mxu1 %v6854_v11 }
  0x23   :  { %482 = vmatprep.subr.bf16.mxu0 %v6718_v0  ;;  %1066 = vmatprep.subr.bf16.mxu1 %v6718_v0 }
  0x26   :  { %483 = vmatpush1.bf16.msra.mxu0 %v6865_v13  ;;  %1067 = vmatpush1.bf16.msra.mxu1 %v6865_v13 }
  0x27   :  { %1682 = vmatprep.subr.bf16.mxu0 %v6718_v0  ;;  %2316 = vmatprep.subr.bf16.mxu1 %v6718_v0 }
  0x29   :  { %497 = vmatmul.mubr.bf16.vlgmr.msra.gmra.mrb[0].mxu0 %v6201_v14  ;;  %1081 = vmatmul.mubr.bf16.vlgmr.msra.gmra.mrb[0].mxu1 %v6204_v15  ;;  %v6299_v14 = vld [vmem:[%s8805_s0 + $0x294] ss:$8 sps:$4 sm:$0xff]   ;;  %v6301_v15 = vld [vmem:[%s8805_s0 + $0x100] ss:$8 sps:$4 sm:$0xff]  }
  0x2a   :  { %1683 = vmatpush1.bf16.msra.mxu0 %v6776_v1  ;;  %2317 = vmatpush1.bf16.msra.mxu1 %v6776_v1  ;;  %v6281_v1 = vld [vmem:[%s8805_s0 + $0x264] ss:$8 sps:$4 sm:$0xff]  }
  0x2b   :  { %5218 = vmatprep.mubr.msk.bf16.mxu0 %vm384_vm0, %v6207_v16  ;;  %5343 = vmatprep.mubr.msk.bf16.mxu1 %vm384_vm0, %v6209_v17  ;;  %v6302_v16 = vld [vmem:[%s8805_s0 + $0x290] ss:$8 sps:$4 sm:$0xff]   ;;  %v6303_v17 = vld [vmem:[%s8805_s0 + $0x114] ss:$8 sps:$4 sm:$0xff]  }
  0x2c   :  { %1684 = vmatprep.subr.bf16.mxu0 %v6718_v0  ;;  %2318 = vmatprep.subr.bf16.mxu1 %v6718_v0 }
  0x2e   :  { %1685 = vmatpush1.bf16.msra.mxu0 %v6783_v2  ;;  %2319 = vmatpush1.bf16.msra.mxu1 %v6783_v2  ;;  %v6283_v2 = vld [vmem:[%s8805_s0 + $0xd0] ss:$8 sps:$4 sm:$0xff]  }
  0x2f   :  { %1686 = vmatprep.subr.bf16.mxu0 %v6718_v0  ;;  %2320 = vmatprep.subr.bf16.mxu1 %v6718_v0 }
  0x31   :  { %505 = vmatmul.mubr.bf16.gmra.mrb[4].mxu0 %v6211_v18  ;;  %1089 = vmatmul.mubr.bf16.gmra.mrb[4].mxu1 %v6212_v19  ;;  %v6305_v18 = vld [vmem:[%s8805_s0 + $0x2a4] ss:$8 sps:$4 sm:$0xff]   ;;  %v6307_v19 = vld [vmem:[%s8805_s0 + $0x110] ss:$8 sps:$4 sm:$0xff]  }
  0x32   :  { %5219 = vmatprep.mubr.msk.bf16.mxu0 %vm384_vm0, %v6213_v20  ;;  %5344 = vmatprep.mubr.msk.bf16.mxu1 %vm384_vm0, %v6215_v21  ;;  %v6308_v20 = vld [vmem:[%s8805_s0 + $0x2a0] ss:$8 sps:$4 sm:$0xff]  }
  0x33   :  { %1687 = vmatpush1.bf16.msra.mxu0 %v6792_v3  ;;  %2321 = vmatpush1.bf16.msra.mxu1 %v6792_v3  ;;  %v6284_v3 = vld [vmem:[%s8805_s0 + $0x260] ss:$8 sps:$4 sm:$0xff]  }
  0x34   :  { %1688 = vmatprep.subr.bf16.mxu0 %v6718_v0  ;;  %2322 = vmatprep.subr.bf16.mxu1 %v6718_v0  ;;  %v6403_v21 = vld [vmem:[%s8806_s3 + $0xc0] sm:$0xff]  }
  0x37   :  { %1689 = vmatpush1.bf16.msra.mxu0 %v6801_v4  ;;  %2323 = vmatpush1.bf16.msra.mxu1 %v6801_v4  ;;  %v6285_v4 = vld [vmem:[%s8805_s0 + $0xe4] ss:$8 sps:$4 sm:$0xff]  }
  0x38   :  { %1690 = vmatprep.subr.bf16.mxu0 %v6718_v0  ;;  %2324 = vmatprep.subr.bf16.mxu1 %v6718_v0 }
  0x39   :  { %513 = vmatmul.mubr.bf16.gmra.mrb[8].mxu0 %v6217_v22  ;;  %1097 = vmatmul.mubr.bf16.gmra.mrb[8].mxu1 %v6218_v23  ;;  %v6309_v22 = vld [vmem:[%s8805_s0 + $0x124] ss:$8 sps:$4 sm:$0xff]   ;;  %v6311_v23 = vld [vmem:[%s8805_s0 + $0x2b4] ss:$8 sps:$4 sm:$0xff]  }
  0x3a   :  { %5220 = vmatprep.mubr.msk.bf16.mxu0 %vm384_vm0, %v6219_v24  ;;  %5345 = vmatprep.mubr.msk.bf16.mxu1 %vm384_vm0, %v6221_v25  ;;  %v6313_v24 = vld [vmem:[%s8805_s0 + $0x120] ss:$8 sps:$4 sm:$0xff]   ;;  %v6314_v25 = vld [vmem:[%s8805_s0 + $0x2b0] ss:$8 sps:$4 sm:$0xff]  }
  0x3b   :  { %1691 = vmatpush1.bf16.msra.mxu0 %v6817_v7  ;;  %2325 = vmatpush1.bf16.msra.mxu1 %v6817_v7  ;;  %v6289_v7 = vld [vmem:[%s8805_s0 + $0xe0] ss:$8 sps:$4 sm:$0xff]  }
  0x3c   :  { %1692 = vmatprep.subr.bf16.mxu0 %v6718_v0  ;;  %2326 = vmatprep.subr.bf16.mxu1 %v6718_v0 }
  0x3f   :  { %1693 = vmatpush1.bf16.msra.mxu0 %v6827_v8  ;;  %2327 = vmatpush1.bf16.msra.mxu1 %v6827_v8  ;;  %v6290_v8 = vld [vmem:[%s8805_s0 + $0x270] ss:$8 sps:$4 sm:$0xff]  }
  0x40   :  { %1694 = vmatprep.subr.bf16.mxu0 %v6718_v0  ;;  %2328 = vmatprep.subr.bf16.mxu1 %v6718_v0 }
  0x41   :  { %521 = vmatmul.mubr.bf16.gmra.mrb[12].mxu0 %v6223_v26  ;;  %1105 = vmatmul.mubr.bf16.gmra.mrb[12].mxu1 %v6224_v27  ;;  %v6315_v26 = vld [vmem:[%s8805_s0 + $0x134] ss:$8 sps:$4 sm:$0xff]   ;;  %v6317_v27 = vld [vmem:[%s8805_s0 + $0x2c4] ss:$8 sps:$4 sm:$0xff]  }
  0x42   :  { %5221 = vmatprep.mubr.msk.bf16.mxu0 %vm384_vm0, %v6225_v28  ;;  %5346 = vmatprep.mubr.msk.bf16.mxu1 %vm384_vm0, %v6227_v29  ;;  %v6319_v28 = vld [vmem:[%s8805_s0 + $0x130] ss:$8 sps:$4 sm:$0xff]   ;;  %v6320_v29 = vld [vmem:[%s8805_s0 + $0x2c0] ss:$8 sps:$4 sm:$0xff]  }
  0x43   :  { %1695 = vmatpush1.bf16.msra.mxu0 %v6836_v9  ;;  %2329 = vmatpush1.bf16.msra.mxu1 %v6836_v9  ;;  %v6291_v9 = vld [vmem:[%s8805_s0 + $0xf4] ss:$8 sps:$4 sm:$0xff]  }
  0x44   :  { %1696 = vmatprep.subr.bf16.mxu0 %v6718_v0  ;;  %2330 = vmatprep.subr.bf16.mxu1 %v6718_v0 }
  0x47   :  { %1697 = vmatpush1.bf16.msra.mxu0 %v6845_v10  ;;  %2331 = vmatpush1.bf16.msra.mxu1 %v6845_v10  ;;  %v6293_v10 = vld [vmem:[%s8805_s0 + $0x284] ss:$8 sps:$4 sm:$0xff]  }
  0x48   :  { %1698 = vmatprep.subr.bf16.mxu0 %v6718_v0  ;;  %2332 = vmatprep.subr.bf16.mxu1 %v6718_v0 }
  0x49   :  { %529 = vmatmul.mubr.bf16.gmra.mrb[16].mxu0 %v6229_v30  ;;  %1113 = vmatmul.mubr.bf16.gmra.mrb[16].mxu1 %v6230_v31  ;;  %v6321_v30 = vld [vmem:[%s8805_s0 + $0x144] ss:$8 sps:$4 sm:$0xff]   ;;  %v6323_v31 = vld [vmem:[%s8805_s0 + $0x2d4] ss:$8 sps:$4 sm:$0xff]  }
  0x4a   :  { %5222 = vmatprep.mubr.msk.bf16.mxu0 %vm384_vm0, %v6231_v32  ;;  %5347 = vmatprep.mubr.msk.bf16.mxu1 %vm384_vm0, %v6233_v33  ;;  %v6325_v32 = vld [vmem:[%s8805_s0 + $0x140] ss:$8 sps:$4 sm:$0xff]   ;;  %v6326_v33 = vld [vmem:[%s8805_s0 + $0x2d0] ss:$8 sps:$4 sm:$0xff]  }
  0x4b   :  { %1699 = vmatpush1.bf16.msra.mxu0 %v6854_v11  ;;  %2333 = vmatpush1.bf16.msra.mxu1 %v6854_v11  ;;  %v6295_v11 = vld [vmem:[%s8805_s0 + $0xf0] ss:$8 sps:$4 sm:$0xff]  }
  0x4c   :  { %1700 = vmatprep.subr.bf16.mxu0 %v6718_v0  ;;  %2334 = vmatprep.subr.bf16.mxu1 %v6718_v0  ;;  %v6279_v0 = vld [vmem:[%s8805_s0 + $0xd4] ss:$8 sps:$4 sm:$0xff]  }
  0x4f   :  { %1701 = vmatpush1.bf16.msra.mxu0 %v6865_v13  ;;  %2335 = vmatpush1.bf16.msra.mxu1 %v6865_v13  ;;  %v6297_v13 = vld [vmem:[%s8805_s0 + $0x104] ss:$8 sps:$4 sm:$0xff]  }
  0x50   :  { %5837 = vmatprep.subr.bf16.mxu0 %v6381_v6  ;;  %5859 = vmatprep.subr.bf16.mxu1 %v6403_v21  ;;  %v6445_v6 = vld [vmem:[%s8806_s3 + $0x58] sm:$0xff]   ;;  %v6371_v21 = vld [vmem:[%s8805_s0 + $0x4e4] ss:$8 sps:$4 sm:$0xff]  }
  0x51   :  { %537 = vmatmul.mubr.bf16.gmra.mrb[20].mxu0 %v6235_v34  ;;  %1121 = vmatmul.mubr.bf16.gmra.mrb[20].mxu1 %v6236_v35  ;;  %v6327_v34 = vld [vmem:[%s8805_s0 + $0x154] ss:$8 sps:$4 sm:$0xff]   ;;  %v6329_v35 = vld [vmem:[%s8805_s0 + $0x2e4] ss:$8 sps:$4 sm:$0xff]  }
  0x52   :  { %5223 = vmatprep.mubr.msk.bf16.mxu0 %vm384_vm0, %v6237_v36  ;;  %5348 = vmatprep.mubr.msk.bf16.mxu1 %vm384_vm0, %v6239_v37  ;;  %v6331_v36 = vld [vmem:[%s8805_s0 + $0x150] ss:$8 sps:$4 sm:$0xff]   ;;  %v6332_v37 = vld [vmem:[%s8805_s0 + $0x2e0] ss:$8 sps:$4 sm:$0xff]  }
  0x59   :  { %545 = vmatmul.mubr.bf16.gmra.mrb[24].mxu0 %v6241_v38  ;;  %1129 = vmatmul.mubr.bf16.gmra.mrb[24].mxu1 %v6242_v39  ;;  %v6333_v38 = vld [vmem:[%s8805_s0 + $0x164] ss:$8 sps:$4 sm:$0xff]   ;;  %v6335_v39 = vld [vmem:[%s8805_s0 + $0x2f4] ss:$8 sps:$4 sm:$0xff]  }
  0x5a   :  { %5224 = vmatprep.mubr.msk.bf16.mxu0 %vm384_vm0, %v6243_v40  ;;  %5349 = vmatprep.mubr.msk.bf16.mxu1 %vm384_vm0, %v6245_v41  ;;  %v6337_v40 = vld [vmem:[%s8805_s0 + $0x160] ss:$8 sps:$4 sm:$0xff]   ;;  %v6338_v41 = vld [vmem:[%s8805_s0 + $0x2f0] ss:$8 sps:$4 sm:$0xff]  }
  0x61   :  { %553 = vmatmul.mubr.bf16.gmra.mrb[28].mxu0 %v6247_v42  ;;  %1137 = vmatmul.mubr.bf16.gmra.mrb[28].mxu1 %v6248_v43  ;;  %v6339_v42 = vld [vmem:[%s8805_s0 + $0x174] ss:$8 sps:$4 sm:$0xff]   ;;  %v6341_v43 = vld [vmem:[%s8805_s0 + $0x304] ss:$8 sps:$4 sm:$0xff]  }
  0x62   :  { %5225 = vmatprep.mubr.msk.bf16.mxu0 %vm384_vm0, %v6249_v44  ;;  %5350 = vmatprep.mubr.msk.bf16.mxu1 %vm384_vm0, %v6251_v45  ;;  %v6343_v44 = vld [vmem:[%s8805_s0 + $0x170] ss:$8 sps:$4 sm:$0xff]   ;;  %v6344_v45 = vld [vmem:[%s8805_s0 + $0x300] ss:$8 sps:$4 sm:$0xff]  }
  0x69   :  { %561 = vmatmul.mubr.bf16.gmra.mrb[32].mxu0 %v6253_v46  ;;  %1145 = vmatmul.mubr.bf16.gmra.mrb[32].mxu1 %v6254_v47  ;;  %v6345_v46 = vld [vmem:[%s8805_s0 + $0x184] ss:$8 sps:$4 sm:$0xff]   ;;  %v6347_v47 = vld [vmem:[%s8805_s0 + $0x314] ss:$8 sps:$4 sm:$0xff]  }
  0x6a   :  { %5226 = vmatprep.mubr.msk.bf16.mxu0 %vm384_vm0, %v6255_v48  ;;  %5351 = vmatprep.mubr.msk.bf16.mxu1 %vm384_vm0, %v6257_v49  ;;  %v6349_v48 = vld [vmem:[%s8805_s0 + $0x180] ss:$8 sps:$4 sm:$0xff]   ;;  %v6350_v49 = vld [vmem:[%s8805_s0 + $0x310] ss:$8 sps:$4 sm:$0xff]  }
  0x71   :  { %569 = vmatmul.mubr.bf16.gmra.mrb[36].mxu0 %v6259_v50  ;;  %1153 = vmatmul.mubr.bf16.gmra.mrb[36].mxu1 %v6260_v51  ;;  %v6353_v50 = vld [vmem:[%s8805_s0 + $0x324] ss:$8 sps:$4 sm:$0xff]   ;;  %v6356_v51 = vld [vmem:[%s8805_s0 + $0x4b4] ss:$8 sps:$4 sm:$0xff]  }
  0x72   :  { %5227 = vmatprep.mubr.msk.bf16.mxu0 %vm384_vm0, %v6261_v52  ;;  %5352 = vmatprep.mubr.msk.bf16.mxu1 %vm384_vm0, %v6263_v53  ;;  %v6351_v52 = vld [vmem:[%s8805_s0 + $0x320] ss:$8 sps:$4 sm:$0xff]   ;;  %v6354_v53 = vld [vmem:[%s8805_s0 + $0x4b0] ss:$8 sps:$4 sm:$0xff]  }
  0x79   :  { %577 = vmatmul.mubr.bf16.gmra.mrb[40].mxu0 %v6265_v54  ;;  %1161 = vmatmul.mubr.bf16.gmra.mrb[40].mxu1 %v6266_v55  ;;  %v6357_v54 = vld [vmem:[%s8805_s0 + $0x334] ss:$8 sps:$4 sm:$0xff]   ;;  %v6359_v55 = vld [vmem:[%s8805_s0 + $0x4c4] ss:$8 sps:$4 sm:$0xff]  }
  0x7a   :  { %5228 = vmatprep.mubr.msk.bf16.mxu0 %vm384_vm0, %v6267_v56  ;;  %5353 = vmatprep.mubr.msk.bf16.mxu1 %vm384_vm0, %v6269_v57  ;;  %v6382_v56 = vld [vmem:[%s8806_s3] sm:$0xff]   ;;  %v6401_v57 = vld [vmem:[%s8806_s3 + $0x48] sm:$0xff]  }
  0x81   :  { %585 = vmatmul.mubr.bf16.gmra.mrb[44].mxu0 %v6271_v58  ;;  %1169 = vmatmul.mubr.bf16.gmra.mrb[44].mxu1 %v6272_v59  ;;  %v6404_v58 = vld [vmem:[%s8806_s3 + $0x80] sm:$0xff]   ;;  %v6425_v59 = vld [vmem:[%s8806_s3 + $0xc8] sm:$0xff]  }
  0x82   :  { %5229 = vmatprep.mubr.msk.bf16.mxu0 %vm384_vm0, %v6273_v60  ;;  %5354 = vmatprep.mubr.msk.bf16.mxu1 %vm384_vm0, %v6275_v61  ;;  %v6402_v60 = vld [vmem:[%s8806_s3 + $0x8] sm:$0xff]  }
  0x83   :  { %v6426_v61 = vld [vmem:[%s8806_s3 + $0x88] sm:$0xff]  }
  0x89   :  { %593 = vmatmul.mubr.bf16.gmra.mrb[48].mxu0 %v6277_v62  ;;  %1177 = vmatmul.mubr.bf16.gmra.mrb[48].mxu1 %v6278_v63  ;;  %v6423_v62 = vld [vmem:[%s8806_s3 + $0x50] sm:$0xff]  }
  0x8a   :  { %5230 = vmatprep.mubr.msk.bf16.mxu0 %vm384_vm0, %v6279_v0  ;;  %5355 = vmatprep.mubr.msk.bf16.mxu1 %vm384_vm0, %v6281_v1  ;;  %v6447_v63 = vld [vmem:[%s8806_s3 + $0xd0] sm:$0xff]   ;;  %v6362_v1 = vld [vmem:[%s8805_s0 + $0x4c0] ss:$8 sps:$4 sm:$0xff]  }
  0x8b   :  { %v6361_v0 = vld [vmem:[%s8805_s0 + $0x330] ss:$8 sps:$4 sm:$0xff]  }
  0x91   :  { %601 = vmatmul.mubr.bf16.gmra.mrb[52].mxu0 %v6283_v2  ;;  %1185 = vmatmul.mubr.bf16.gmra.mrb[52].mxu1 %v6284_v3  ;;  %v6363_v2 = vld [vmem:[%s8805_s0 + $0x344] ss:$8 sps:$4 sm:$0xff]   ;;  %v6365_v3 = vld [vmem:[%s8805_s0 + $0x4d4] ss:$8 sps:$4 sm:$0xff]  }
  0x92   :  { %5231 = vmatprep.mubr.msk.bf16.mxu0 %vm384_vm0, %v6285_v4  ;;  %5356 = vmatprep.mubr.msk.bf16.mxu1 %vm384_vm0, %v6287_v5  ;;  %v6424_v4 = vld [vmem:[%s8806_s3 + $0x10] sm:$0xff]  }
  0x93   :  { %v6452_v5 = vld [vmem:[%s8806_s3 + $0x90] sm:$0xff]  }
  0x99   :  { %609 = vmatmul.mubr.bf16.gmra.mrb[56].mxu0 %v6289_v7  ;;  %1193 = vmatmul.mubr.bf16.gmra.mrb[56].mxu1 %v6290_v8  ;;  %v6473_v7 = vld [vmem:[%s8806_s3 + $0xd8] sm:$0xff]  }
  0x9a   :  { %5232 = vmatprep.mubr.msk.bf16.mxu0 %vm384_vm0, %v6291_v9  ;;  %5357 = vmatprep.mubr.msk.bf16.mxu1 %vm384_vm0, %v6293_v10  ;;  %v6446_v8 = vld [vmem:[%s8806_s3 + $0x18] sm:$0xff]   ;;  %v6467_v10 = vld [vmem:[%s8806_s3 + $0x60] sm:$0xff]  }
  0x9b   :  { %v6476_v9 = vld [vmem:[%s8806_s3 + $0x98] sm:$0xff]  }
  0xa1   :  { %617 = vmatmul.mubr.bf16.gmra.mrb[60].mxu0 %v6295_v11  ;;  %1201 = vmatmul.mubr.bf16.gmra.mrb[60].mxu1 %v6296_v12  ;;  %v6367_v11 = vld [vmem:[%s8805_s0 + $0x340] ss:$8 sps:$4 sm:$0xff]   ;;  %v6368_v12 = vld [vmem:[%s8805_s0 + $0x4d0] ss:$8 sps:$4 sm:$0xff]  }
  0xa2   :  { %5233 = vmatprep.mubr.msk.bf16.mxu0 %vm384_vm0, %v6297_v13  ;;  %5358 = vmatprep.mubr.msk.bf16.mxu1 %vm384_vm0, %v6299_v14 }
  0xa9   :  { %625 = vmatmul.mubr.bf16.gmra.mrb[64].mxu0 %v6301_v15  ;;  %1209 = vmatmul.mubr.bf16.gmra.mrb[64].mxu1 %v6302_v16  ;;  %v6461_v15 = vld [vmem:[%s8805_s0 + $0x424] ss:$8 sps:$4 sm:$0xff]  }
  0xaa   :  { %5234 = vmatprep.mubr.msk.bf16.mxu0 %vm384_vm0, %v6303_v17  ;;  %5359 = vmatprep.mubr.msk.bf16.mxu1 %vm384_vm0, %v6305_v18 }
  0xb1   :  { %633 = vmatmul.mubr.bf16.gmra.mrb[68].mxu0 %v6307_v19  ;;  %1217 = vmatmul.mubr.bf16.gmra.mrb[68].mxu1 %v6308_v20  ;;  %v6369_v20 = vld [vmem:[%s8805_s0 + $0x354] ss:$8 sps:$4 sm:$0xff]  }
  0xb2   :  { %5235 = vmatprep.mubr.msk.bf16.mxu0 %vm384_vm0, %v6309_v22  ;;  %5360 = vmatprep.mubr.msk.bf16.mxu1 %vm384_vm0, %v6311_v23 }
  0xb9   :  { %641 = vmatmul.mubr.bf16.gmra.mrb[72].mxu0 %v6313_v24  ;;  %1225 = vmatmul.mubr.bf16.gmra.mrb[72].mxu1 %v6314_v25  ;;  %v6468_v25 = vld [vmem:[%s8806_s3 + $0x20] sm:$0xff]  }
  0xba   :  { %5236 = vmatprep.mubr.msk.bf16.mxu0 %vm384_vm0, %v6315_v26  ;;  %5361 = vmatprep.mubr.msk.bf16.mxu1 %vm384_vm0, %v6317_v27  ;;  %v6373_v26 = vld [vmem:[%s8805_s0 + $0x350] ss:$8 sps:$4 sm:$0xff]   ;;  %v6374_v27 = vld [vmem:[%s8805_s0 + $0x4e0] ss:$8 sps:$4 sm:$0xff]  }
  0xc1   :  { %649 = vmatmul.mubr.bf16.gmra.mrb[76].mxu0 %v6319_v28  ;;  %1233 = vmatmul.mubr.bf16.gmra.mrb[76].mxu1 %v6320_v29 }
  0xc2   :  { %5237 = vmatprep.mubr.msk.bf16.mxu0 %vm384_vm0, %v6321_v30  ;;  %5362 = vmatprep.mubr.msk.bf16.mxu1 %vm384_vm0, %v6323_v31 }
  0xc9   :  { %657 = vmatmul.mubr.bf16.gmra.mrb[80].mxu0 %v6325_v32  ;;  %1241 = vmatmul.mubr.bf16.gmra.mrb[80].mxu1 %v6326_v33 }
  0xca   :  { %5238 = vmatprep.mubr.msk.bf16.mxu0 %vm384_vm0, %v6327_v34  ;;  %5363 = vmatprep.mubr.msk.bf16.mxu1 %vm384_vm0, %v6329_v35  ;;  %v6375_v35 = vld [vmem:[%s8805_s0 + $0x364] ss:$8 sps:$4 sm:$0xff]  }
  0xd1   :  { %665 = vmatmul.mubr.bf16.gmra.mrb[84].mxu0 %v6331_v36  ;;  %1249 = vmatmul.mubr.bf16.gmra.mrb[84].mxu1 %v6332_v37  ;;  %v6377_v36 = vld [vmem:[%s8805_s0 + $0x4f4] ss:$8 sps:$4 sm:$0xff]  }
  0xd2   :  { %5239 = vmatprep.mubr.msk.bf16.mxu0 %vm384_vm0, %v6333_v38  ;;  %5364 = vmatprep.mubr.msk.bf16.mxu1 %vm384_vm0, %v6335_v39  ;;  %v6534_v37 = vld [vmem:[%s8806_s3 + $0xb8] sm:$0xff]  }
  0xd9   :  { %673 = vmatmul.mubr.bf16.gmra.mrb[88].mxu0 %v6337_v40  ;;  %1257 = vmatmul.mubr.bf16.gmra.mrb[88].mxu1 %v6338_v41  ;;  %v6379_v40 = vld [vmem:[%s8805_s0 + $0x360] ss:$8 sps:$4 sm:$0xff]   ;;  %v6380_v41 = vld [vmem:[%s8805_s0 + $0x4f0] ss:$8 sps:$4 sm:$0xff]  }
  0xda   :  { %5240 = vmatprep.mubr.msk.bf16.mxu0 %vm384_vm0, %v6339_v42  ;;  %5365 = vmatprep.mubr.msk.bf16.mxu1 %vm384_vm0, %v6341_v43 }
  0xe1   :  { %681 = vmatmul.mubr.bf16.gmra.mrb[92].mxu0 %v6343_v44  ;;  %1265 = vmatmul.mubr.bf16.gmra.mrb[92].mxu1 %v6344_v45  ;;  %v6533_v44 = vld [vmem:[%s8806_s3 + $0xf8] sm:$0xff]  }
  0xe2   :  { %5241 = vmatprep.mubr.msk.bf16.mxu0 %vm384_vm0, %v6345_v46  ;;  %5366 = vmatprep.mubr.msk.bf16.mxu1 %vm384_vm0, %v6347_v47 }
  0xe9   :  { %689 = vmatmul.mubr.bf16.gmra.mrb[96].mxu0 %v6349_v48  ;;  %1273 = vmatmul.mubr.bf16.gmra.mrb[96].mxu1 %v6350_v49  ;;  %v6383_v49 = vld [vmem:[%s8805_s0 + $0x374] ss:$8 sps:$4 sm:$0xff]  }
  0xea   :  { %5467 = vmatprep.mubr.msk.bf16.mxu0 %vm384_vm0, %v6353_v50  ;;  %5592 = vmatprep.mubr.msk.bf16.mxu1 %vm384_vm0, %v6356_v51  ;;  %v6385_v50 = vld [vmem:[%s8805_s0 + $0x504] ss:$8 sps:$4 sm:$0xff]   ;;  %v6453_v51 = vld [vmem:[%s8805_s0 + $0x400] ss:$8 sps:$4 sm:$0xff]  }
  0xf1   :  { %1715 = vmatmul.mubr.bf16.vlgmr.msra.gmra.mrb[100].mxu0 %v6351_v52  ;;  %2349 = vmatmul.mubr.bf16.vlgmr.msra.gmra.mrb[100].mxu1 %v6354_v53 }
  0xf2   :  { %5468 = vmatprep.mubr.msk.bf16.mxu0 %vm384_vm0, %v6357_v54  ;;  %5593 = vmatprep.mubr.msk.bf16.mxu1 %vm384_vm0, %v6359_v55  ;;  %v6489_v54 = vld [vmem:[%s8806_s3 + $0x68] sm:$0xff]  }
  0xf3   :  { %5838 = vmatpush3.bf16.msra.mxu0 %v6382_v56  ;;  %5860 = vmatpush3.bf16.msra.mxu1 %v6404_v58  ;;  %v6494_v55 = vld [vmem:[%s8806_s3 + $0x28] sm:$0xff]   ;;  %v6497_v56 = vld [vmem:[%s8806_s3 + $0xe0] sm:$0xff]   ;;  %v6387_v58 = vld [vmem:[%s8805_s0 + $0x370] ss:$8 sps:$4 sm:$0xff]  }
  0xf4   :  { %5839 = vmatprep.subr.bf16.mxu0 %v6401_v57  ;;  %5861 = vmatprep.subr.bf16.mxu1 %v6425_v59  ;;  %v6498_v57 = vld [vmem:[%s8806_s3 + $0xa0] sm:$0xff]  }
  0xf5   :  { %v6388_v59 = vld [vmem:[%s8805_s0 + $0x500] ss:$8 sps:$4 sm:$0xff]  }
  0xf7   :  { %5840 = vmatpush3.bf16.msra.mxu0 %v6402_v60  ;;  %5862 = vmatpush3.bf16.msra.mxu1 %v6426_v61 }
  0xf8   :  { %5841 = vmatprep.subr.bf16.mxu0 %v6423_v62  ;;  %5863 = vmatprep.subr.bf16.mxu1 %v6447_v63 }
  0xf9   :  { %1723 = vmatmul.mubr.bf16.gmra.mrb[104].mxu0 %v6361_v0  ;;  %2357 = vmatmul.mubr.bf16.gmra.mrb[104].mxu1 %v6362_v1 }
  0xfa   :  { %5469 = vmatprep.mubr.msk.bf16.mxu0 %vm384_vm0, %v6363_v2  ;;  %5594 = vmatprep.mubr.msk.bf16.mxu1 %vm384_vm0, %v6365_v3  ;;  %v6389_v3 = vld [vmem:[%s8805_s0 + $0x384] ss:$8 sps:$4 sm:$0xff]  }
  0xfb   :  { %5842 = vmatpush3.bf16.msra.mxu0 %v6424_v4  ;;  %5864 = vmatpush3.bf16.msra.mxu1 %v6452_v5  ;;  %v6391_v4 = vld [vmem:[%s8805_s0 + $0x514] ss:$8 sps:$4 sm:$0xff]  }
  0xfc   :  { %v7344_v13 = vpop.f32.mrb[0].mxu0  ;;  %v7346_v14 = vpop.f32.mrb[0].mxu1  ;;  %5843 = vmatprep.subr.bf16.mxu0 %v6445_v6  ;;  %5865 = vmatprep.subr.bf16.mxu1 %v6473_v7 }
  0xfd   :  { %v500_v16 = vpop.f32.mrb[1].mxu0  ;;  %v1084_v17 = vpop.f32.mrb[1].mxu1 }
  0xfe   :  { %v7350_v18 = vpop.f32.mrb[2].mxu0  ;;  %v7352_v19 = vpop.f32.mrb[2].mxu1 }
  0xff   :  { %v503_v23 = vpop.f32.mrb[3].mxu0  ;;  %v1087_v24 = vpop.f32.mrb[3].mxu1  ;;  %5844 = vmatpush3.bf16.msra.mxu0 %v6446_v8  ;;  %5866 = vmatpush3.bf16.msra.mxu1 %v6476_v9  ;;  %v6393_v8 = vld [vmem:[%s8805_s0 + $0x380] ss:$8 sps:$4 sm:$0xff]   ;;  %v6394_v9 = vld [vmem:[%s8805_s0 + $0x510] ss:$8 sps:$4 sm:$0xff]  }
 0x100   :  { %5845 = vmatprep.subr.bf16.mxu0 %v6467_v10  ;;  %5867 = vmatprep.subr.bf16.mxu1 %v6497_v56  ;;  %v6397_v24 = vld [vmem:[%s8805_s0 + $0x524] ss:$8 sps:$4 sm:$0xff]  }
 0x101   :  { %1731 = vmatmul.mubr.bf16.gmra.mrb[108].mxu0 %v6367_v11  ;;  %2365 = vmatmul.mubr.bf16.gmra.mrb[108].mxu1 %v6368_v12  ;;  %v6395_v12 = vld [vmem:[%s8805_s0 + $0x394] ss:$8 sps:$4 sm:$0xff]   ;;  %v6518_v56 = vld [vmem:[%s8806_s3 + $0xe8] sm:$0xff]  }
 0x102   :  { %5470 = vmatprep.mubr.msk.bf16.mxu0 %vm384_vm0, %v6369_v20  ;;  %5595 = vmatprep.mubr.msk.bf16.mxu1 %vm384_vm0, %v6371_v21 }
 0x103   :  { %5846 = vmatpush3.bf16.msra.mxu0 %v6468_v25  ;;  %5868 = vmatpush3.bf16.msra.mxu1 %v6498_v57  ;;  %v6520_v57 = vld [vmem:[%s8806_s3 + $0xa8] sm:$0xff]  }
 0x104   :  { %v7373_v28 = vpop.f32.mrb[4].mxu0  ;;  %v7375_v29 = vpop.f32.mrb[4].mxu1  ;;  %5847 = vmatprep.subr.bf16.mxu0 %v6489_v54  ;;  %v6513_v54 = vld [vmem:[%s8806_s3 + $0x70] sm:$0xff]   ;;  %5869 = vmatprep.subr.bf16.mxu1 %v6518_v56 }
 0x105   :  { %v508_v31 = vpop.f32.mrb[5].mxu0  ;;  %v1092_v32 = vpop.f32.mrb[5].mxu1 }
 0x106   :  { %v7379_v33 = vpop.f32.mrb[6].mxu0  ;;  %v7381_v34 = vpop.f32.mrb[6].mxu1  ;;  %v6399_v31 = vld [vmem:[%s8805_s0 + $0x390] ss:$8 sps:$4 sm:$0xff]   ;;  %v6400_v32 = vld [vmem:[%s8805_s0 + $0x520] ss:$8 sps:$4 sm:$0xff]  }
 0x107   :  { %v511_v38 = vpop.f32.mrb[7].mxu0  ;;  %v1095_v39 = vpop.f32.mrb[7].mxu1  ;;  %5848 = vmatpush3.bf16.msra.mxu0 %v6494_v55  ;;  %v6515_v55 = vld [vmem:[%s8806_s3 + $0x30] sm:$0xff]   ;;  %5870 = vmatpush3.bf16.msra.mxu1 %v6520_v57 }
 0x108   :  { %v6405_v38 = vld [vmem:[%s8805_s0 + $0x3a4] ss:$8 sps:$4 sm:$0xff]   ;;  %5849 = vmatprep.subr.bf16.mxu0 %v6513_v54 }
 0x109   :  { %1739 = vmatmul.mubr.bf16.gmra.mrb[112].mxu0 %v6373_v26  ;;  %2373 = vmatmul.mubr.bf16.gmra.mrb[112].mxu1 %v6374_v27 }
 0x10a   :  { %5471 = vmatprep.mubr.msk.bf16.mxu0 %vm384_vm0, %v6375_v35  ;;  %5596 = vmatprep.mubr.msk.bf16.mxu1 %vm384_vm0, %v6377_v36 }
 0x10b   :  { %5850 = vmatpush3.bf16.msra.mxu0 %v6515_v55 }
 0x10c   :  { %v7399_v42 = vpop.f32.mrb[8].mxu0  ;;  %v7401_v43 = vpop.f32.mrb[8].mxu1 }
 0x10d   :  { %v516_v45 = vpop.f32.mrb[9].mxu0  ;;  %v1100_v46 = vpop.f32.mrb[9].mxu1 }
 0x10e   :  { %v7405_v47 = vpop.f32.mrb[10].mxu0  ;;  %v7407_v48 = vpop.f32.mrb[10].mxu1 }
 0x10f   :  { %v519_v52 = vpop.f32.mrb[11].mxu0  ;;  %v1103_v53 = vpop.f32.mrb[11].mxu1 }
 0x111   :  { %1747 = vmatmul.mubr.bf16.gmra.mrb[116].mxu0 %v6379_v40  ;;  %2381 = vmatmul.mubr.bf16.gmra.mrb[116].mxu1 %v6380_v41 }
 0x112   :  { %5472 = vmatprep.mubr.msk.bf16.mxu0 %vm384_vm0, %v6383_v49  ;;  %5597 = vmatprep.mubr.msk.bf16.mxu1 %vm384_vm0, %v6385_v50  ;;  %v6407_v49 = vld [vmem:[%s8805_s0 + $0x534] ss:$8 sps:$4 sm:$0xff]  }
 0x114   :  { %v7437_v60 = vpop.f32.mrb[12].mxu0  ;;  %v7439_v61 = vpop.f32.mrb[12].mxu1 }
 0x115   :  { %v524_v63 = vpop.f32.mrb[13].mxu0  ;;  %v1108_v0 = vpop.f32.mrb[13].mxu1 }
 0x116   :  { %v7443_v1 = vpop.f32.mrb[14].mxu0  ;;  %v7445_v2 = vpop.f32.mrb[14].mxu1 }
 0x117   :  { %v527_v6 = vpop.f32.mrb[15].mxu0  ;;  %v1111_v7 = vpop.f32.mrb[15].mxu1 }
 0x119   :  { %1755 = vmatmul.mubr.bf16.gmra.mrb[120].mxu0 %v6387_v58  ;;  %2389 = vmatmul.mubr.bf16.gmra.mrb[120].mxu1 %v6388_v59  ;;  %v6409_v58 = vld [vmem:[%s8805_s0 + $0x3a0] ss:$8 sps:$4 sm:$0xff]   ;;  %v6410_v59 = vld [vmem:[%s8805_s0 + $0x530] ss:$8 sps:$4 sm:$0xff]  }
 0x11a   :  { %5473 = vmatprep.mubr.msk.bf16.mxu0 %vm384_vm0, %v6389_v3  ;;  %5598 = vmatprep.mubr.msk.bf16.mxu1 %vm384_vm0, %v6391_v4  ;;  %v6411_v3 = vld [vmem:[%s8805_s0 + $0x3b4] ss:$8 sps:$4 sm:$0xff]  }
 0x11c   :  { %v7463_v10 = vpop.f32.mrb[16].mxu0  ;;  %v7465_v11 = vpop.f32.mrb[16].mxu1 }
 0x11d   :  { %v532_v17 = vpop.f32.mrb[17].mxu0  ;;  %v1116_v20 = vpop.f32.mrb[17].mxu1 }
 0x11e   :  { %v7472_v21 = vpop.f32.mrb[18].mxu0  ;;  %v7474_v23 = vpop.f32.mrb[18].mxu1 }
 0x11f   :  { %v535_v26 = vpop.f32.mrb[19].mxu0  ;;  %v1119_v27 = vpop.f32.mrb[19].mxu1 }
 0x120   :  { %v6415_v26 = vld [vmem:[%s8805_s0 + $0x3b0] ss:$8 sps:$4 sm:$0xff]   ;;  %v6416_v27 = vld [vmem:[%s8805_s0 + $0x540] ss:$8 sps:$4 sm:$0xff]  }
 0x121   :  { %1763 = vmatmul.mubr.bf16.gmra.mrb[124].mxu0 %v6393_v8  ;;  %2397 = vmatmul.mubr.bf16.gmra.mrb[124].mxu1 %v6394_v9 }
 0x122   :  { %5474 = vmatprep.mubr.msk.bf16.mxu0 %vm384_vm0, %v6395_v12  ;;  %5599 = vmatprep.mubr.msk.bf16.mxu1 %vm384_vm0, %v6397_v24  ;;  %v6413_v12 = vld [vmem:[%s8805_s0 + $0x544] ss:$8 sps:$4 sm:$0xff]  }
 0x124   :  { %v7489_v35 = vpop.f32.mrb[20].mxu0  ;;  %v7491_v36 = vpop.f32.mrb[20].mxu1 }
 0x125   :  { %v540_v40 = vpop.f32.mrb[21].mxu0  ;;  %v1124_v41 = vpop.f32.mrb[21].mxu1 }
 0x126   :  { %v7498_v45 = vpop.f32.mrb[22].mxu0  ;;  %v7500_v46 = vpop.f32.mrb[22].mxu1  ;;  %v6419_v40 = vld [vmem:[%s8805_s0 + $0x554] ss:$8 sps:$4 sm:$0xff]  }
 0x127   :  { %v543_v52 = vpop.f32.mrb[23].mxu0  ;;  %v1127_v53 = vpop.f32.mrb[23].mxu1 }
 0x129   :  { %1771 = vmatmul.mubr.bf16.gmra.mrb[128].mxu0 %v6399_v31  ;;  %2405 = vmatmul.mubr.bf16.gmra.mrb[128].mxu1 %v6400_v32 }
 0x12a   :  { %5475 = vmatprep.mubr.msk.bf16.mxu0 %vm384_vm0, %v6405_v38  ;;  %5600 = vmatprep.mubr.msk.bf16.mxu1 %vm384_vm0, %v6407_v49  ;;  %v6417_v38 = vld [vmem:[%s8805_s0 + $0x3c4] ss:$8 sps:$4 sm:$0xff]  }
 0x12c   :  { %v7527_v63 = vpop.f32.mrb[24].mxu0  ;;  %v7529_v0 = vpop.f32.mrb[24].mxu1 }
 0x12d   :  { %v548_v6 = vpop.f32.mrb[25].mxu0  ;;  %v1132_v7 = vpop.f32.mrb[25].mxu1 }
 0x12e   :  { %v7536_v8 = vpop.f32.mrb[26].mxu0  ;;  %v7538_v9 = vpop.f32.mrb[26].mxu1  ;;  %v6427_v7 = vld [vmem:[%s8805_s0 + $0x3d4] ss:$8 sps:$4 sm:$0xff]  }
 0x12f   :  { %v551_v20 = vpop.f32.mrb[27].mxu0  ;;  %v1135_v24 = vpop.f32.mrb[27].mxu1 }
 0x131   :  { %1779 = vmatmul.mubr.bf16.gmra.mrb[132].mxu0 %v6409_v58  ;;  %2413 = vmatmul.mubr.bf16.gmra.mrb[132].mxu1 %v6410_v59  ;;  %v6421_v58 = vld [vmem:[%s8805_s0 + $0x3c0] ss:$8 sps:$4 sm:$0xff]   ;;  %v6422_v59 = vld [vmem:[%s8805_s0 + $0x550] ss:$8 sps:$4 sm:$0xff]  }
 0x132   :  { %5476 = vmatprep.mubr.msk.bf16.mxu0 %vm384_vm0, %v6411_v3  ;;  %5601 = vmatprep.mubr.msk.bf16.mxu1 %vm384_vm0, %v6413_v12  ;;  %v6429_v12 = vld [vmem:[%s8805_s0 + $0x564] ss:$8 sps:$4 sm:$0xff]  }
 0x134   :  { %v7553_v31 = vpop.f32.mrb[28].mxu0  ;;  %v7555_v32 = vpop.f32.mrb[28].mxu1 }
 0x135   :  { %v556_v49 = vpop.f32.mrb[29].mxu0  ;;  %v1140_v52 = vpop.f32.mrb[29].mxu1 }
 0x136   :  { %v7565_v53 = vpop.f32.mrb[30].mxu0  ;;  %v7567_v54 = vpop.f32.mrb[30].mxu1 }
 0x137   :  { %v559_v56 = vpop.f32.mrb[31].mxu0  ;;  %v1143_v57 = vpop.f32.mrb[31].mxu1 }
 0x138   :  { %v6527_v56 = vld [vmem:[%s8806_s3 + $0x78] sm:$0xff]  }
 0x139   :  { %1787 = vmatmul.mubr.bf16.gmra.mrb[136].mxu0 %v6415_v26  ;;  %2421 = vmatmul.mubr.bf16.gmra.mrb[136].mxu1 %v6416_v27  ;;  %v6528_v57 = vld [vmem:[%s8806_s3 + $0x38] sm:$0xff]  }
 0x13a   :  { %5477 = vmatprep.mubr.msk.bf16.mxu0 %vm384_vm0, %v6417_v38  ;;  %5602 = vmatprep.mubr.msk.bf16.mxu1 %vm384_vm0, %v6419_v40 }
 0x13b   :  { %5851 = vmatprep.subr.bf16.mxu0 %v6527_v56 }
 0x13c   :  { %v7579_v3 = vpop.f32.mrb[32].mxu0  ;;  %v7581_v6 = vpop.f32.mrb[32].mxu1  ;;  %5852 = vmatpush3.bf16.msra.mxu0 %v6528_v57  ;;  %v6530_v57 = vld [vmem:[%s8806_s3 + $0xb0] sm:$0xff]  }
 0x13d   :  { %v564_v24 = vpop.f32.mrb[33].mxu0  ;;  %v1148_v26 = vpop.f32.mrb[33].mxu1 }
 0x13e   :  { %v7591_v27 = vpop.f32.mrb[34].mxu0  ;;  %v7593_v38 = vpop.f32.mrb[34].mxu1  ;;  %v6529_v24 = vld [vmem:[%s8806_s3 + $0xf0] sm:$0xff]  }
 0x13f   :  { %v567_v49 = vpop.f32.mrb[35].mxu0  ;;  %v1151_v52 = vpop.f32.mrb[35].mxu1  ;;  %v6431_v26 = vld [vmem:[%s8805_s0 + $0x3d0] ss:$8 sps:$4 sm:$0xff]   ;;  %5871 = vmatprep.subr.bf16.mxu1 %v6529_v24 }
 0x140   :  { %v6432_v49 = vld [vmem:[%s8805_s0 + $0x560] ss:$8 sps:$4 sm:$0xff]   ;;  %5872 = vmatpush3.bf16.msra.mxu1 %v6530_v57 }
 0x141   :  { %1795 = vmatmul.mubr.bf16.gmra.mrb[140].mxu0 %v6421_v58  ;;  %2429 = vmatmul.mubr.bf16.gmra.mrb[140].mxu1 %v6422_v59  ;;  %v6433_v58 = vld [vmem:[%s8805_s0 + $0x3e4] ss:$8 sps:$4 sm:$0xff]   ;;  %v6435_v59 = vld [vmem:[%s8805_s0 + $0x574] ss:$8 sps:$4 sm:$0xff]  }
 0x142   :  { %5478 = vmatprep.mubr.msk.bf16.mxu0 %vm384_vm0, %v6427_v7  ;;  %5603 = vmatprep.mubr.msk.bf16.mxu1 %vm384_vm0, %v6429_v12 }
 0x143   :  { %5873 = vmatprep.subr.bf16.mxu1 %v6533_v44  ;;  %v6543_v44 = vld [vmem:[%s8806_s3 + $0x1c0] sm:$0xff]  }
 0x144   :  { %v7614_v52 = vpop.f32.mrb[36].mxu0  ;;  %v7616_v40 = vpop.f32.mrb[36].mxu1  ;;  %5874 = vmatpush3.bf16.msra.mxu1 %v6534_v37 }
 0x145   :  { %v572_v12 = vpop.f32.mrb[37].mxu0  ;;  %v1156_v20 = vpop.f32.mrb[37].mxu1  ;;  %5903 = vmatprep.subr.bf16.mxu1 %v6543_v44  ;;  %v6469_v44 = vld [vmem:[%s8805_s0 + $0x434] ss:$8 sps:$4 sm:$0xff]  }
 0x146   :  { %v7626_v56 = vpop.f32.mrb[38].mxu0  ;;  %v7628_v24 = vpop.f32.mrb[38].mxu1 }
 0x147   :  { %v575_v41 = vpop.f32.mrb[39].mxu0  ;;  %v1159_v17 = vpop.f32.mrb[39].mxu1 }
 0x148   :  { %v6437_v17 = vld [vmem:[%s8805_s0 + $0x3e0] ss:$8 sps:$4 sm:$0xff]  }
 0x149   :  { %1803 = vmatmul.mubr.bf16.gmra.mrb[144].mxu0 %v6431_v26  ;;  %2437 = vmatmul.mubr.bf16.gmra.mrb[144].mxu1 %v6432_v49  ;;  %v6438_v26 = vld [vmem:[%s8805_s0 + $0x570] ss:$8 sps:$4 sm:$0xff]  }
 0x14a   :  { %5479 = vmatprep.mubr.msk.bf16.mxu0 %vm384_vm0, %v6433_v58  ;;  %5604 = vmatprep.mubr.msk.bf16.mxu1 %vm384_vm0, %v6435_v59  ;;  %v6439_v59 = vld [vmem:[%s8805_s0 + $0x3f4] ss:$8 sps:$4 sm:$0xff]  }
 0x14c   :  { %v7637_v20 = vpop.f32.mrb[40].mxu0  ;;  %v7639_v12 = vpop.f32.mrb[40].mxu1 }
 0x14d   :  { %v580_v55 = vpop.f32.mrb[41].mxu0  ;;  %v1164_v41 = vpop.f32.mrb[41].mxu1 }
 0x14e   :  { %v7649_v49 = vpop.f32.mrb[42].mxu0  ;;  %v7651_v58 = vpop.f32.mrb[42].mxu1  ;;  %v6441_v55 = vld [vmem:[%s8805_s0 + $0x584] ss:$8 sps:$4 sm:$0xff]  }
 0x14f   :  { %v583_v7 = vpop.f32.mrb[43].mxu0  ;;  %v1167_v4 = vpop.f32.mrb[43].mxu1  ;;  %v6531_v41 = vld [vmem:[%s8806_s3 + $0x140] sm:$0xff]  }
 0x150   :  { %v6443_v7 = vld [vmem:[%s8805_s0 + $0x3f0] ss:$8 sps:$4 sm:$0xff]   ;;  %v6444_v4 = vld [vmem:[%s8805_s0 + $0x580] ss:$8 sps:$4 sm:$0xff]   ;;  %5881 = vmatprep.subr.bf16.mxu0 %v6531_v41 }
 0x151   :  { %1811 = vmatmul.mubr.bf16.gmra.mrb[148].mxu0 %v6437_v17  ;;  %2445 = vmatmul.mubr.bf16.gmra.mrb[148].mxu1 %v6438_v26 }
 0x152   :  { %5480 = vmatprep.mubr.msk.bf16.mxu0 %vm384_vm0, %v6439_v59  ;;  %5605 = vmatprep.mubr.msk.bf16.mxu1 %vm384_vm0, %v6441_v55  ;;  %v6448_v59 = vld [vmem:[%s8805_s0 + $0x404] ss:$8 sps:$4 sm:$0xff]  }
 0x154   :  { %v7663_v57 = vpop.f32.mrb[44].mxu0  ;;  %v7665_v50 = vpop.f32.mrb[44].mxu1 }
 0x155   :  { %v588_v25 = vpop.f32.mrb[45].mxu0  ;;  %v1172_v16 = vpop.f32.mrb[45].mxu1 }
 0x156   :  { %v7675_v17 = vpop.f32.mrb[46].mxu0  ;;  %v7677_v26 = vpop.f32.mrb[46].mxu1  ;;  %v6450_v16 = vld [vmem:[%s8805_s0 + $0x594] ss:$8 sps:$4 sm:$0xff]  }
 0x157   :  { %8868 = vst [vmem:[#allocation3_spill] sm:$0xff] %v7675_v17  ;;  %8869 = vst [vmem:[#allocation4_spill] sm:$0xff] %v7677_v26  ;;  %v591_v55 = vpop.f32.mrb[47].mxu0  ;;  %v1175_v39 = vpop.f32.mrb[47].mxu1 }
 0x159   :  { %1819 = vmatmul.mubr.bf16.gmra.mrb[152].mxu0 %v6443_v7  ;;  %2453 = vmatmul.mubr.bf16.gmra.mrb[152].mxu1 %v6444_v4  ;;  %v6454_v7 = vld [vmem:[%s8805_s0 + $0x590] ss:$8 sps:$4 sm:$0xff]  }
 0x15a   :  { %5481 = vmatprep.mubr.msk.bf16.mxu0 %vm384_vm0, %v6448_v59  ;;  %5606 = vmatprep.mubr.msk.bf16.mxu1 %vm384_vm0, %v6450_v16  ;;  %v6455_v59 = vld [vmem:[%s8805_s0 + $0x414] ss:$8 sps:$4 sm:$0xff]   ;;  %v6457_v16 = vld [vmem:[%s8805_s0 + $0x5a4] ss:$8 sps:$4 sm:$0xff]  }
 0x15c   :  { %v7692_v5 = vpop.f32.mrb[48].mxu0  ;;  %v7694_v62 = vpop.f32.mrb[48].mxu1 }
 0x15d   :  { %8870 = vst [vmem:[#allocation5_spill] sm:$0xff] %v7692_v5  ;;  %8871 = vst [vmem:[#allocation6_spill] sm:$0xff] %v7694_v62  ;;  %v596_v55 = vpop.f32.mrb[49].mxu0  ;;  %v1180_v39 = vpop.f32.mrb[49].mxu1 }
 0x15e   :  { %v7704_v4 = vpop.f32.mrb[50].mxu0  ;;  %v7706_v41 = vpop.f32.mrb[50].mxu1 }
 0x15f   :  { %8872 = vst [vmem:[#allocation7_spill] sm:$0xff] %v7704_v4  ;;  %8873 = vst [vmem:[#allocation8_spill] sm:$0xff] %v7706_v41  ;;  %v599_v39 = vpop.f32.mrb[51].mxu0  ;;  %v1183_v25 = vpop.f32.mrb[51].mxu1 }
 0x161   :  { %1827 = vmatmul.mubr.bf16.gmra.mrb[156].mxu0 %v6453_v51  ;;  %2461 = vmatmul.mubr.bf16.gmra.mrb[156].mxu1 %v6454_v7 }
 0x162   :  { %5482 = vmatprep.mubr.msk.bf16.mxu0 %vm384_vm0, %v6455_v59  ;;  %5607 = vmatprep.mubr.msk.bf16.mxu1 %vm384_vm0, %v6457_v16  ;;  %v6459_v59 = vld [vmem:[%s8805_s0 + $0x410] ss:$8 sps:$4 sm:$0xff]   ;;  %v6460_v16 = vld [vmem:[%s8805_s0 + $0x5a0] ss:$8 sps:$4 sm:$0xff]  }
 0x164   :  { %v7724_v30 = vpop.f32.mrb[52].mxu0  ;;  %v7726_v22 = vpop.f32.mrb[52].mxu1 }
 0x165   :  { %8874 = vst [vmem:[#allocation9_spill] sm:$0xff] %v7724_v30  ;;  %8875 = vst [vmem:[#allocation10_spill] sm:$0xff] %v7726_v22  ;;  %v604_v25 = vpop.f32.mrb[53].mxu0  ;;  %v1188_v7 = vpop.f32.mrb[53].mxu1 }
 0x166   :  { %v7736_v39 = vpop.f32.mrb[54].mxu0  ;;  %v7738_v55 = vpop.f32.mrb[54].mxu1  ;;  %v6463_v25 = vld [vmem:[%s8805_s0 + $0x5b4] ss:$8 sps:$4 sm:$0xff]  }
 0x167   :  { %8876 = vst [vmem:[#allocation11_spill] sm:$0xff] %v7736_v39  ;;  %8877 = vst [vmem:[#allocation12_spill] sm:$0xff] %v7738_v55  ;;  %v607_v51 = vpop.f32.mrb[55].mxu0  ;;  %v1191_v22 = vpop.f32.mrb[55].mxu1 }
 0x169   :  { %1835 = vmatmul.mubr.bf16.gmra.mrb[160].mxu0 %v6459_v59  ;;  %2469 = vmatmul.mubr.bf16.gmra.mrb[160].mxu1 %v6460_v16  ;;  %v6465_v59 = vld [vmem:[%s8805_s0 + $0x420] ss:$8 sps:$4 sm:$0xff]  }
 0x16a   :  { %5483 = vmatprep.mubr.msk.bf16.mxu0 %vm384_vm0, %v6461_v15  ;;  %5608 = vmatprep.mubr.msk.bf16.mxu1 %vm384_vm0, %v6463_v25  ;;  %v6466_v15 = vld [vmem:[%s8805_s0 + $0x5b0] ss:$8 sps:$4 sm:$0xff]  }
 0x16c   :  { %v7753_v30 = vpop.f32.mrb[56].mxu0  ;;  %v7755_v41 = vpop.f32.mrb[56].mxu1 }
 0x16d   :  { %8878 = vst [vmem:[#allocation13_spill] sm:$0xff] %v7753_v30  ;;  %8879 = vst [vmem:[#allocation14_spill] sm:$0xff] %v7755_v41  ;;  %v612_v51 = vpop.f32.mrb[57].mxu0  ;;  %v1196_v22 = vpop.f32.mrb[57].mxu1 }
 0x16e   :  { %v7765_v16 = vpop.f32.mrb[58].mxu0  ;;  %v7767_v25 = vpop.f32.mrb[58].mxu1  ;;  %v6471_v51 = vld [vmem:[%s8805_s0 + $0x5c4] ss:$8 sps:$4 sm:$0xff]  }
 0x16f   :  { %8880 = vst [vmem:[#allocation15_spill] sm:$0xff] %v7765_v16  ;;  %8881 = vst [vmem:[#allocation16_spill] sm:$0xff] %v7767_v25  ;;  %v615_v37 = vpop.f32.mrb[59].mxu0  ;;  %v1199_v7 = vpop.f32.mrb[59].mxu1 }
 0x170   :  { %v6474_v37 = vld [vmem:[%s8805_s0 + $0x430] ss:$8 sps:$4 sm:$0xff]   ;;  %v6475_v7 = vld [vmem:[%s8805_s0 + $0x5c0] ss:$8 sps:$4 sm:$0xff]  }
 0x171   :  { %1843 = vmatmul.mubr.bf16.gmra.mrb[164].mxu0 %v6465_v59  ;;  %2477 = vmatmul.mubr.bf16.gmra.mrb[164].mxu1 %v6466_v15 }
 0x172   :  { %5484 = vmatprep.mubr.msk.bf16.mxu0 %vm384_vm0, %v6469_v44  ;;  %5609 = vmatprep.mubr.msk.bf16.mxu1 %vm384_vm0, %v6471_v51  ;;  %v6477_v44 = vld [vmem:[%s8805_s0 + $0x444] ss:$8 sps:$4 sm:$0xff]  }
 0x174   :  { %v7779_v41 = vpop.f32.mrb[60].mxu0  ;;  %v7781_v30 = vpop.f32.mrb[60].mxu1 }
 0x175   :  { %8882 = vst [vmem:[#allocation17_spill] sm:$0xff] %v7779_v41  ;;  %8883 = vst [vmem:[#allocation18_spill] sm:$0xff] %v7781_v30  ;;  %v620_v39 = vpop.f32.mrb[61].mxu0  ;;  %v1204_v4 = vpop.f32.mrb[61].mxu1 }
 0x176   :  { %v7791_v59 = vpop.f32.mrb[62].mxu0  ;;  %v7793_v15 = vpop.f32.mrb[62].mxu1  ;;  %v6479_v4 = vld [vmem:[%s8805_s0 + $0x5d4] ss:$8 sps:$4 sm:$0xff]  }
 0x177   :  { %8884 = vst [vmem:[#allocation19_spill] sm:$0xff] %v7791_v59  ;;  %8885 = vst [vmem:[#allocation20_spill] sm:$0xff] %v7793_v15  ;;  %v623_v51 = vpop.f32.mrb[63].mxu0  ;;  %v1207_v55 = vpop.f32.mrb[63].mxu1 }
 0x178   :  { %v6481_v51 = vld [vmem:[%s8805_s0 + $0x440] ss:$8 sps:$4 sm:$0xff]   ;;  %v6482_v55 = vld [vmem:[%s8805_s0 + $0x5d0] ss:$8 sps:$4 sm:$0xff]  }
 0x179   :  { %1851 = vmatmul.mubr.bf16.gmra.mrb[168].mxu0 %v6474_v37  ;;  %2485 = vmatmul.mubr.bf16.gmra.mrb[168].mxu1 %v6475_v7 }
 0x17a   :  { %5485 = vmatprep.mubr.msk.bf16.mxu0 %vm384_vm0, %v6477_v44  ;;  %5610 = vmatprep.mubr.msk.bf16.mxu1 %vm384_vm0, %v6479_v4  ;;  %v6483_v44 = vld [vmem:[%s8805_s0 + $0x454] ss:$8 sps:$4 sm:$0xff]  }
 0x17c   :  { %v7805_v22 = vpop.f32.mrb[64].mxu0  ;;  %v7807_v30 = vpop.f32.mrb[64].mxu1 }
 0x17d   :  { %8886 = vst [vmem:[#allocation21_spill] sm:$0xff] %v7805_v22  ;;  %8887 = vst [vmem:[#allocation22_spill] sm:$0xff] %v7807_v30  ;;  %v628_v25 = vpop.f32.mrb[65].mxu0  ;;  %v1212_v16 = vpop.f32.mrb[65].mxu1 }
 0x17e   :  { %v7817_v37 = vpop.f32.mrb[66].mxu0  ;;  %v7819_v7 = vpop.f32.mrb[66].mxu1  ;;  %v6485_v16 = vld [vmem:[%s8805_s0 + $0x5e4] ss:$8 sps:$4 sm:$0xff]  }
 0x17f   :  { %8888 = vst [vmem:[#allocation23_spill] sm:$0xff] %v7817_v37  ;;  %8889 = vst [vmem:[#allocation24_spill] sm:$0xff] %v7819_v7  ;;  %v631_v4 = vpop.f32.mrb[67].mxu0  ;;  %v1215_v41 = vpop.f32.mrb[67].mxu1 }
 0x180   :  { %v6487_v4 = vld [vmem:[%s8805_s0 + $0x450] ss:$8 sps:$4 sm:$0xff]   ;;  %v6488_v41 = vld [vmem:[%s8805_s0 + $0x5e0] ss:$8 sps:$4 sm:$0xff]  }
 0x181   :  { %1859 = vmatmul.mubr.bf16.gmra.mrb[172].mxu0 %v6481_v51  ;;  %2493 = vmatmul.mubr.bf16.gmra.mrb[172].mxu1 %v6482_v55 }
 0x182   :  { %5486 = vmatprep.mubr.msk.bf16.mxu0 %vm384_vm0, %v6483_v44  ;;  %5611 = vmatprep.mubr.msk.bf16.mxu1 %vm384_vm0, %v6485_v16  ;;  %v6490_v44 = vld [vmem:[%s8805_s0 + $0x464] ss:$8 sps:$4 sm:$0xff]  }
 0x184   :  { %v7831_v39 = vpop.f32.mrb[68].mxu0  ;;  %v7833_v30 = vpop.f32.mrb[68].mxu1 }
 0x185   :  { %8890 = vst [vmem:[#allocation25_spill] sm:$0xff] %v7831_v39  ;;  %8891 = vst [vmem:[#allocation26_spill] sm:$0xff] %v7833_v30  ;;  %v636_v15 = vpop.f32.mrb[69].mxu0  ;;  %v1220_v59 = vpop.f32.mrb[69].mxu1 }
 0x186   :  { %v7843_v51 = vpop.f32.mrb[70].mxu0  ;;  %v7845_v55 = vpop.f32.mrb[70].mxu1  ;;  %v6492_v59 = vld [vmem:[%s8805_s0 + $0x5f4] ss:$8 sps:$4 sm:$0xff]  }
 0x187   :  { %8892 = vst [vmem:[#allocation27_spill] sm:$0xff] %v7843_v51  ;;  %8893 = vst [vmem:[#allocation28_spill] sm:$0xff] %v7845_v55  ;;  %v639_v16 = vpop.f32.mrb[71].mxu0  ;;  %v1223_v22 = vpop.f32.mrb[71].mxu1 }
 0x188   :  { %v6495_v16 = vld [vmem:[%s8805_s0 + $0x460] ss:$8 sps:$4 sm:$0xff]   ;;  %v6496_v22 = vld [vmem:[%s8805_s0 + $0x5f0] ss:$8 sps:$4 sm:$0xff]  }
 0x189   :  { %1867 = vmatmul.mubr.bf16.gmra.mrb[176].mxu0 %v6487_v4  ;;  %2501 = vmatmul.mubr.bf16.gmra.mrb[176].mxu1 %v6488_v41 }
 0x18a   :  { %5487 = vmatprep.mubr.msk.bf16.mxu0 %vm384_vm0, %v6490_v44  ;;  %5612 = vmatprep.mubr.msk.bf16.mxu1 %vm384_vm0, %v6492_v59  ;;  %v6499_v44 = vld [vmem:[%s8805_s0 + $0x474] ss:$8 sps:$4 sm:$0xff]  }
 0x18c   :  { %v7857_v25 = vpop.f32.mrb[72].mxu0  ;;  %v7859_v30 = vpop.f32.mrb[72].mxu1 }
 0x18d   :  { %8894 = vst [vmem:[#allocation29_spill] sm:$0xff] %v7857_v25  ;;  %8895 = vst [vmem:[#allocation30_spill] sm:$0xff] %v7859_v30  ;;  %v644_v7 = vpop.f32.mrb[73].mxu0  ;;  %v1228_v37 = vpop.f32.mrb[73].mxu1 }
 0x18e   :  { %v7869_v4 = vpop.f32.mrb[74].mxu0  ;;  %v7871_v41 = vpop.f32.mrb[74].mxu1  ;;  %v6501_v37 = vld [vmem:[%s8805_s0 + $0x604] ss:$8 sps:$4 sm:$0xff]  }
 0x18f   :  { %8896 = vst [vmem:[#allocation31_spill] sm:$0xff] %v7869_v4  ;;  %8897 = vst [vmem:[#allocation32_spill] sm:$0xff] %v7871_v41  ;;  %v647_v59 = vpop.f32.mrb[75].mxu0  ;;  %v1231_v39 = vpop.f32.mrb[75].mxu1 }
 0x190   :  { %v6503_v59 = vld [vmem:[%s8805_s0 + $0x470] ss:$8 sps:$4 sm:$0xff]   ;;  %v6504_v39 = vld [vmem:[%s8805_s0 + $0x600] ss:$8 sps:$4 sm:$0xff]  }
 0x191   :  { %1875 = vmatmul.mubr.bf16.gmra.mrb[180].mxu0 %v6495_v16  ;;  %2509 = vmatmul.mubr.bf16.gmra.mrb[180].mxu1 %v6496_v22 }
 0x192   :  { %5488 = vmatprep.mubr.msk.bf16.mxu0 %vm384_vm0, %v6499_v44  ;;  %5613 = vmatprep.mubr.msk.bf16.mxu1 %vm384_vm0, %v6501_v37  ;;  %v6505_v44 = vld [vmem:[%s8805_s0 + $0x484] ss:$8 sps:$4 sm:$0xff]  }
 0x194   :  { %v7883_v15 = vpop.f32.mrb[76].mxu0  ;;  %v7885_v30 = vpop.f32.mrb[76].mxu1 }
 0x195   :  { %8898 = vst [vmem:[#allocation33_spill] sm:$0xff] %v7883_v15  ;;  %8899 = vst [vmem:[#allocation34_spill] sm:$0xff] %v7885_v30  ;;  %v652_v55 = vpop.f32.mrb[77].mxu0  ;;  %v1236_v51 = vpop.f32.mrb[77].mxu1 }
 0x196   :  { %v7895_v16 = vpop.f32.mrb[78].mxu0  ;;  %v7897_v22 = vpop.f32.mrb[78].mxu1  ;;  %v6508_v51 = vld [vmem:[%s8805_s0 + $0x614] ss:$8 sps:$4 sm:$0xff]  }
 0x197   :  { %8900 = vst [vmem:[#allocation35_spill] sm:$0xff] %v7895_v16  ;;  %8901 = vst [vmem:[#allocation36_spill] sm:$0xff] %v7897_v22  ;;  %v655_v37 = vpop.f32.mrb[79].mxu0  ;;  %v1239_v25 = vpop.f32.mrb[79].mxu1 }
 0x198   :  { %v6507_v37 = vld [vmem:[%s8805_s0 + $0x480] ss:$8 sps:$4 sm:$0xff]   ;;  %v6510_v25 = vld [vmem:[%s8805_s0 + $0x610] ss:$8 sps:$4 sm:$0xff]  }
 0x199   :  { %1883 = vmatmul.mubr.bf16.gmra.mrb[184].mxu0 %v6503_v59  ;;  %2517 = vmatmul.mubr.bf16.gmra.mrb[184].mxu1 %v6504_v39 }
 0x19a   :  { %5489 = vmatprep.mubr.msk.bf16.mxu0 %vm384_vm0, %v6505_v44  ;;  %5614 = vmatprep.mubr.msk.bf16.mxu1 %vm384_vm0, %v6508_v51  ;;  %v6511_v44 = vld [vmem:[%s8805_s0 + $0x494] ss:$8 sps:$4 sm:$0xff]  }
 0x19c   :  { %v7909_v7 = vpop.f32.mrb[80].mxu0  ;;  %v7911_v30 = vpop.f32.mrb[80].mxu1 }
 0x19d   :  { %8902 = vst [vmem:[#allocation37_spill] sm:$0xff] %v7909_v7  ;;  %8903 = vst [vmem:[#allocation38_spill] sm:$0xff] %v7911_v30  ;;  %v660_v41 = vpop.f32.mrb[81].mxu0  ;;  %v1244_v4 = vpop.f32.mrb[81].mxu1 }
 0x19e   :  { %v7921_v59 = vpop.f32.mrb[82].mxu0  ;;  %v7923_v39 = vpop.f32.mrb[82].mxu1  ;;  %v6516_v4 = vld [vmem:[%s8805_s0 + $0x624] ss:$8 sps:$4 sm:$0xff]  }
 0x19f   :  { %8904 = vst [vmem:[#allocation39_spill] sm:$0xff] %v7921_v59  ;;  %8905 = vst [vmem:[#allocation40_spill] sm:$0xff] %v7923_v39  ;;  %v663_v51 = vpop.f32.mrb[83].mxu0  ;;  %v1247_v15 = vpop.f32.mrb[83].mxu1 }
 0x1a0   :  { %v6514_v51 = vld [vmem:[%s8805_s0 + $0x490] ss:$8 sps:$4 sm:$0xff]   ;;  %v6519_v15 = vld [vmem:[%s8805_s0 + $0x620] ss:$8 sps:$4 sm:$0xff]  }
 0x1a1   :  { %1891 = vmatmul.mubr.bf16.gmra.mrb[188].mxu0 %v6507_v37  ;;  %2525 = vmatmul.mubr.bf16.gmra.mrb[188].mxu1 %v6510_v25 }
 0x1a2   :  { %5490 = vmatprep.mubr.msk.bf16.mxu0 %vm384_vm0, %v6511_v44  ;;  %5615 = vmatprep.mubr.msk.bf16.mxu1 %vm384_vm0, %v6516_v4  ;;  %v6521_v44 = vld [vmem:[%s8805_s0 + $0x4a4] ss:$8 sps:$4 sm:$0xff]  }
 0x1a4   :  { %v7935_v55 = vpop.f32.mrb[84].mxu0  ;;  %v7937_v30 = vpop.f32.mrb[84].mxu1 }
 0x1a5   :  { %8906 = vst [vmem:[#allocation41_spill] sm:$0xff] %v7935_v55  ;;  %8907 = vst [vmem:[#allocation42_spill] sm:$0xff] %v7937_v30  ;;  %v668_v22 = vpop.f32.mrb[85].mxu0  ;;  %v1252_v16 = vpop.f32.mrb[85].mxu1 }
 0x1a6   :  { %v7947_v37 = vpop.f32.mrb[86].mxu0  ;;  %v7949_v25 = vpop.f32.mrb[86].mxu1  ;;  %v6524_v16 = vld [vmem:[%s8805_s0 + $0x634] ss:$8 sps:$4 sm:$0xff]  }
 0x1a7   :  { %8908 = vst [vmem:[#allocation43_spill] sm:$0xff] %v7947_v37  ;;  %8909 = vst [vmem:[#allocation44_spill] sm:$0xff] %v7949_v25  ;;  %v671_v4 = vpop.f32.mrb[87].mxu0  ;;  %v1255_v7 = vpop.f32.mrb[87].mxu1 }
 0x1a8   :  { %v6523_v4 = vld [vmem:[%s8805_s0 + $0x4a0] ss:$8 sps:$4 sm:$0xff]   ;;  %v6526_v7 = vld [vmem:[%s8805_s0 + $0x630] ss:$8 sps:$4 sm:$0xff]  }
 0x1a9   :  { %1899 = vmatmul.mubr.bf16.gmra.mrb[192].mxu0 %v6514_v51  ;;  %2533 = vmatmul.mubr.bf16.gmra.mrb[192].mxu1 %v6519_v15 }
 0x1aa   :  { %5491 = vmatprep.mubr.msk.bf16.mxu0 %vm384_vm0, %v6521_v44  ;;  %5616 = vmatprep.mubr.msk.bf16.mxu1 %vm384_vm0, %v6524_v16 }
 0x1ac   :  { %v7961_v41 = vpop.f32.mrb[88].mxu0  ;;  %v7963_v30 = vpop.f32.mrb[88].mxu1 }
 0x1ad   :  { %8910 = vst [vmem:[#allocation45_spill] sm:$0xff] %v7961_v41  ;;  %8911 = vst [vmem:[#allocation46_spill] sm:$0xff] %v7963_v30  ;;  %v676_v39 = vpop.f32.mrb[89].mxu0  ;;  %v1260_v59 = vpop.f32.mrb[89].mxu1 }
 0x1ae   :  { %v7973_v51 = vpop.f32.mrb[90].mxu0  ;;  %v7975_v15 = vpop.f32.mrb[90].mxu1 }
 0x1af   :  { %8912 = vst [vmem:[#allocation47_spill] sm:$0xff] %v7973_v51  ;;  %8913 = vst [vmem:[#allocation48_spill] sm:$0xff] %v7975_v15  ;;  %v679_v16 = vpop.f32.mrb[91].mxu0  ;;  %v1263_v22 = vpop.f32.mrb[91].mxu1 }
 0x1b1   :  { %1907 = vmatmul.mubr.bf16.gmra.mrb[196].mxu0 %v6523_v4  ;;  %2541 = vmatmul.mubr.bf16.gmra.mrb[196].mxu1 %v6526_v7 }
 0x1b4   :  { %v7979_v59 = vpop.f32.mrb[92].mxu0  ;;  %v7981_v39 = vpop.f32.mrb[92].mxu1 }
 0x1b5   :  { %8914 = vst [vmem:[#allocation49_spill] sm:$0xff] %v7979_v59  ;;  %8915 = vst [vmem:[#allocation50_spill] sm:$0xff] %v7981_v39  ;;  %v684_v30 = vpop.f32.mrb[93].mxu0  ;;  %v1268_v41 = vpop.f32.mrb[93].mxu1 }
 0x1b6   :  { %v7985_v25 = vpop.f32.mrb[94].mxu0  ;;  %v7987_v37 = vpop.f32.mrb[94].mxu1 }
 0x1b7   :  { %8916 = vst [vmem:[#allocation51_spill] sm:$0xff] %v7985_v25  ;;  %8917 = vst [vmem:[#allocation52_spill] sm:$0xff] %v7987_v37  ;;  %v687_v16 = vpop.f32.mrb[95].mxu0  ;;  %v1271_v22 = vpop.f32.mrb[95].mxu1  ;;  %v8922_v37 = vmax.f32 %v7344_v13, %v7346_v14 }
 0x1bc   :  { %v7991_v4 = vpop.f32.mrb[96].mxu0  ;;  %v7993_v7 = vpop.f32.mrb[96].mxu1 }
 0x1bd   :  { %8918 = vst [vmem:[#allocation53_spill] sm:$0xff] %v7991_v4  ;;  %8919 = vst [vmem:[#allocation54_spill] sm:$0xff] %v7993_v7  ;;  %v692_v51 = vpop.f32.mrb[97].mxu0  ;;  %v1276_v55 = vpop.f32.mrb[97].mxu1  ;;  %v8924_v4 = vmax.f32 %v7373_v28, %v7375_v29 }
 0x1be   :  { %v7997_v30 = vpop.f32.mrb[98].mxu0  ;;  %v7999_v41 = vpop.f32.mrb[98].mxu1  ;;  %v8009_v55 = vld [vmem:[%s8807_s2] ss:$0 sm:$0xff] }
 0x1bf   :  { %8920 = vst [vmem:[#allocation55_spill] sm:$0xff] %v7997_v30  ;;  %8921 = vst [vmem:[#allocation56_spill] sm:$0xff] %v7999_v41  ;;  %v695_v59 = vpop.f32.mrb[99].mxu0  ;;  %v1279_v44 = vpop.f32.mrb[99].mxu1 }
 0x1c0   :  { %v8923_v59 = vmax.f32 %v7350_v18, %v7352_v19 }
 0x1c4   :  { %v1716_v16 = vpop.f32.mrb[100].mxu0  ;;  %v2350_v22 = vpop.f32.mrb[100].mxu1 }
 0x1c5   :  { %v1915_v25 = vmax.f32 %v8922_v37, %v1716_v16  ;;  %v1718_v62 = vpop.f32.mrb[101].mxu0  ;;  %v2352_v5 = vpop.f32.mrb[101].mxu1 }
 0x1c6   :  { %v1719_v51 = vpop.f32.mrb[102].mxu0  ;;  %v2353_v15 = vpop.f32.mrb[102].mxu1 }
 0x1c7   :  { %v2549_v7 = vmax.f32 %v1915_v25, %v2350_v22  ;;  %v1916_v44 = vmax.f32 %v8923_v59, %v1719_v51  ;;  %v1721_v39 = vpop.f32.mrb[103].mxu0  ;;  %v2355_v41 = vpop.f32.mrb[103].mxu1 }
 0x1c9   :  { %v2606_v30 = vadd.f32 %v8009_v55, %v2549_v7  ;;  %v2550_v13 = vmax.f32 %v1916_v44, %v2353_v15  ;;  %v8925_v7 = vmax.f32 %v7379_v33, %v7381_v34 }
 0x1cb   :  { %v2607_v14 = vadd.f32 %v8009_v55, %v2550_v13  ;;  %v2656_v37 = vmax.f32 %v2606_v30, 0.0 }
 0x1cc   :  { %v1724_v62 = vpop.f32.mrb[104].mxu0  ;;  %v2358_v5 = vpop.f32.mrb[104].mxu1 }
 0x1cd   :  { %v2657_v16 = vmax.f32 %v2607_v14, 0.0  ;;  %v1917_v26 = vmax.f32 %v8924_v4, %v1724_v62  ;;  %v1726_v25 = vpop.f32.mrb[105].mxu0  ;;  %v2360_v22 = vpop.f32.mrb[105].mxu1  ;;  %v8926_v14 = vmax.f32 %v7399_v42, %v7401_v43  ;;  %v6535_v42 = vld [vmem:[%s8806_s3 + $0x148] sm:$0xff]  }
 0x1ce   :  { %v1727_v17 = vpop.f32.mrb[106].mxu0  ;;  %v2361_v18 = vpop.f32.mrb[106].mxu1 }
 0x1cf   :  { %v2706_v19 = vpack.c.bf16 %v2657_v16, %v2656_v37  ;;  %v2551_v39 = vmax.f32 %v1917_v26, %v2358_v5  ;;  %v1918_v15 = vmax.f32 %v8925_v7, %v1727_v17  ;;  %v1729_v41 = vpop.f32.mrb[107].mxu0  ;;  %v2363_v51 = vpop.f32.mrb[107].mxu1  ;;  %v8927_v17 = vmax.f32 %v7405_v47, %v7407_v48  ;;  %v6536_v47 = vld [vmem:[%s8806_s3 + $0x108] sm:$0xff]  }
 0x1d0   :  { %v6537_v51 = vld [vmem:[%s8806_s3 + $0x150] sm:$0xff]  }
 0x1d1   :  { %v2608_v59 = vadd.f32 %v8009_v55, %v2551_v39  ;;  %v2552_v30 = vmax.f32 %v1918_v15, %v2361_v18  ;;  %v6532_v39 = vld [vmem:[%s8806_s3 + $0x100] sm:$0xff]  }
 0x1d3   :  { %v2609_v44 = vadd.f32 %v8009_v55, %v2552_v30  ;;  %v2658_v29 = vmax.f32 %v2608_v59, 0.0 }
 0x1d4   :  { %v1732_v13 = vpop.f32.mrb[108].mxu0  ;;  %v2366_v28 = vpop.f32.mrb[108].mxu1 }
 0x1d5   :  { %v2659_v4 = vmax.f32 %v2609_v44, 0.0  ;;  %v1919_v62 = vmax.f32 %v8926_v14, %v1732_v13  ;;  %v1734_v26 = vpop.f32.mrb[109].mxu0  ;;  %v2368_v5 = vpop.f32.mrb[109].mxu1  ;;  %v8928_v44 = vmax.f32 %v7437_v60, %v7439_v61  ;;  %v6539_v60 = vld [vmem:[%s8806_s3 + $0x158] sm:$0xff]  }
 0x1d6   :  { %v1735_v37 = vpop.f32.mrb[110].mxu0  ;;  %v2369_v33 = vpop.f32.mrb[110].mxu1  ;;  %v8929_v26 = vmax.f32 %v7443_v1, %v7445_v2  ;;  %v6540_v1 = vld [vmem:[%s8806_s3 + $0x118] sm:$0xff]  }
 0x1d7   :  { %v2553_v34 = vmax.f32 %v1919_v62, %v2366_v28  ;;  %v1920_v16 = vmax.f32 %v8927_v17, %v1735_v37  ;;  %v1737_v25 = vpop.f32.mrb[111].mxu0  ;;  %v2371_v22 = vpop.f32.mrb[111].mxu1  ;;  %v2707_v18 = vpack.c.bf16 %v2659_v4, %v2658_v29 }
 0x1d8   :  { %v6541_v22 = vld [vmem:[%s8806_s3 + $0x160] sm:$0xff]  }
 0x1d9   :  { %v2610_v43 = vadd.f32 %v8009_v55, %v2553_v34  ;;  %v2554_v7 = vmax.f32 %v1920_v16, %v2369_v33  ;;  %4420 = vmatprep.mubr.bf16.mxu0 %v2707_v18  ;;  %v6538_v34 = vld [vmem:[%s8806_s3 + $0x110] sm:$0xff]  }
 0x1da   :  { %4421 = vmatmul.mubr.bf16.vlgmr.msra.gmra.mrb[200].mxu0 %v2706_v19 }
 0x1db   :  { %v2611_v15 = vadd.f32 %v8009_v55, %v2554_v7  ;;  %5882 = vmatpush3.bf16.msra.mxu0 %v6532_v39  ;;  %v2660_v59 = vmax.f32 %v2610_v43, 0.0 }
 0x1dc   :  { %v1740_v48 = vpop.f32.mrb[112].mxu0  ;;  %v2374_v41 = vpop.f32.mrb[112].mxu1  ;;  %5883 = vmatprep.subr.bf16.mxu0 %v6535_v42  ;;  %v8930_v42 = vmax.f32 %v7463_v10, %v7465_v11  ;;  %v6544_v10 = vld [vmem:[%s8806_s3 + $0x180] sm:$0xff]   ;;  %v6545_v11 = vld [vmem:[%s8806_s3 + $0x168] sm:$0xff]  }
 0x1dd   :  { %v2661_v30 = vmax.f32 %v2611_v15, 0.0  ;;  %v1921_v19 = vmax.f32 %v8928_v44, %v1740_v48  ;;  %v1742_v13 = vpop.f32.mrb[113].mxu0  ;;  %v2376_v28 = vpop.f32.mrb[113].mxu1 }
 0x1de   :  { %v1743_v29 = vpop.f32.mrb[114].mxu0  ;;  %v2377_v4 = vpop.f32.mrb[114].mxu1  ;;  %v6542_v13 = vld [vmem:[%s8806_s3 + $0x120] sm:$0xff]  }
 0x1df   :  { %v2708_v14 = vpack.c.bf16 %v2661_v30, %v2660_v59  ;;  %v2555_v62 = vmax.f32 %v1921_v19, %v2374_v41  ;;  %v1922_v5 = vmax.f32 %v8929_v26, %v1743_v29  ;;  %5884 = vmatpush3.bf16.msra.mxu0 %v6536_v47  ;;  %v1745_v37 = vpop.f32.mrb[115].mxu0  ;;  %v2379_v33 = vpop.f32.mrb[115].mxu1 }
 0x1e0   :  { %5885 = vmatprep.subr.bf16.mxu0 %v6537_v51  ;;  %v8931_v51 = vmax.f32 %v7472_v21, %v7474_v23  ;;  %v6547_v21 = vld [vmem:[%s8806_s3 + $0x1c8] sm:$0xff]   ;;  %v6551_v37 = vld [vmem:[%s8806_s3 + $0x1d0] sm:$0xff]  }
 0x1e1   :  { %v2612_v61 = vadd.f32 %v8009_v55, %v2555_v62  ;;  %v2556_v17 = vmax.f32 %v1922_v5, %v2377_v4  ;;  %v6546_v4 = vld [vmem:[%s8806_s3 + $0x128] sm:$0xff]  }
 0x1e2   :  { %v6548_v62 = vld [vmem:[%s8806_s3 + $0x188] sm:$0xff]  }
 0x1e3   :  { %v2613_v16 = vadd.f32 %v8009_v55, %v2556_v17  ;;  %5886 = vmatpush3.bf16.msra.mxu0 %v6538_v34  ;;  %v2662_v18 = vmax.f32 %v2612_v61, 0.0 }
 0x1e4   :  { %v1748_v2 = vpop.f32.mrb[116].mxu0  ;;  %v2382_v25 = vpop.f32.mrb[116].mxu1  ;;  %5887 = vmatprep.subr.bf16.mxu0 %v6539_v60  ;;  %v8932_v60 = vmax.f32 %v7489_v35, %v7491_v36  ;;  %v6552_v35 = vld [vmem:[%s8806_s3 + $0x190] sm:$0xff]   ;;  %v6553_v36 = vld [vmem:[%s8806_s3 + $0x178] sm:$0xff]  }
 0x1e5   :  { %v2663_v39 = vmax.f32 %v2613_v16, 0.0  ;;  %v1923_v43 = vmax.f32 %v8930_v42, %v1748_v2  ;;  %v1750_v7 = vpop.f32.mrb[117].mxu0  ;;  %v2384_v15 = vpop.f32.mrb[117].mxu1 }
 0x1e6   :  { %v1751_v47 = vpop.f32.mrb[118].mxu0  ;;  %v2385_v48 = vpop.f32.mrb[118].mxu1  ;;  %v6550_v7 = vld [vmem:[%s8806_s3 + $0x130] sm:$0xff]  }
 0x1e7   :  { %v2557_v41 = vmax.f32 %v1923_v43, %v2382_v25  ;;  %v1924_v59 = vmax.f32 %v8931_v51, %v1751_v47  ;;  %5888 = vmatpush3.bf16.msra.mxu0 %v6540_v1  ;;  %v1753_v30 = vpop.f32.mrb[119].mxu0  ;;  %v2387_v44 = vpop.f32.mrb[119].mxu1  ;;  %v2709_v19 = vpack.c.bf16 %v2663_v39, %v2662_v18  ;;  %v8933_v18 = vmax.f32 %v7498_v45, %v7500_v46  ;;  %v6555_v45 = vld [vmem:[%s8806_s3 + $0x1d8] sm:$0xff]  }
 0x1e8   :  { %5889 = vmatprep.subr.bf16.mxu0 %v6541_v22  ;;  %v6557_v30 = vld [vmem:[%s8806_s3 + $0x240] sm:$0xff]  }
 0x1e9   :  { %v2614_v23 = vadd.f32 %v8009_v55, %v2557_v41  ;;  %v2558_v28 = vmax.f32 %v1924_v59, %v2385_v48  ;;  %4461 = vmatprep.mubr.bf16.mxu1 %v2709_v19  ;;  %v6554_v48 = vld [vmem:[%s8806_s3 + $0x138] sm:$0xff]   ;;  %v6558_v44 = vld [vmem:[%s8806_s3 + $0x1e0] sm:$0xff]  }
 0x1ea   :  { %4462 = vmatmul.mubr.bf16.vlgmr.msra.gmra.mrb[200].mxu1 %v2708_v14  ;;  %v6549_v14 = vld [vmem:[%s8806_s3 + $0x170] sm:$0xff]   ;;  %v6556_v41 = vld [vmem:[%s8806_s3 + $0x198] sm:$0xff]  }
 0x1eb   :  { %v2615_v29 = vadd.f32 %v8009_v55, %v2558_v28  ;;  %5890 = vmatpush3.bf16.msra.mxu0 %v6542_v13  ;;  %5904 = vmatpush3.bf16.msra.mxu1 %v6544_v10  ;;  %v2664_v33 = vmax.f32 %v2614_v23, 0.0  ;;  %v8934_v10 = vmax.f32 %v7527_v63, %v7529_v0  ;;  %v6560_v63 = vld [vmem:[%s8806_s3 + $0x1a0] sm:$0xff]   ;;  %v6561_v0 = vld [vmem:[%s8806_s3 + $0x248] sm:$0xff]  }
 0x1ec   :  { %v1756_v26 = vpop.f32.mrb[120].mxu0  ;;  %v2390_v5 = vpop.f32.mrb[120].mxu1  ;;  %5891 = vmatprep.subr.bf16.mxu0 %v6545_v11  ;;  %5905 = vmatprep.subr.bf16.mxu1 %v6547_v21 }
 0x1ed   :  { %v2665_v34 = vmax.f32 %v2615_v29, 0.0  ;;  %v1925_v61 = vmax.f32 %v8932_v60, %v1756_v26  ;;  %v1758_v17 = vpop.f32.mrb[121].mxu0  ;;  %v2392_v16 = vpop.f32.mrb[121].mxu1 }
 0x1ee   :  { %v1759_v1 = vpop.f32.mrb[122].mxu0  ;;  %v2393_v2 = vpop.f32.mrb[122].mxu1  ;;  %v6564_v17 = vld [vmem:[%s8806_s3 + $0x1a8] sm:$0xff]  }
 0x1ef   :  { %v2710_v25 = vpack.c.bf16 %v2665_v34, %v2664_v33  ;;  %v2559_v22 = vmax.f32 %v1925_v61, %v2390_v5  ;;  %v1926_v39 = vmax.f32 %v8933_v18, %v1759_v1  ;;  %5892 = vmatpush3.bf16.msra.mxu0 %v6546_v4  ;;  %v1761_v42 = vpop.f32.mrb[123].mxu0  ;;  %v2395_v43 = vpop.f32.mrb[123].mxu1  ;;  %5906 = vmatpush3.bf16.msra.mxu1 %v6548_v62  ;;  %v6559_v33 = vld [vmem:[%s8806_s3 + $0x200] sm:$0xff]   ;;  %v6563_v61 = vld [vmem:[%s8806_s3 + $0x208] sm:$0xff]  }
 0x1f0   :  { %5893 = vmatprep.subr.bf16.mxu0 %v6549_v14  ;;  %5907 = vmatprep.subr.bf16.mxu1 %v6551_v37  ;;  %v8935_v62 = vmax.f32 %v7536_v8, %v7538_v9  ;;  %v6562_v8 = vld [vmem:[%s8806_s3 + $0x1e8] sm:$0xff]  }
 0x1f1   :  { %v2616_v46 = vadd.f32 %v8009_v55, %v2559_v22  ;;  %v2560_v15 = vmax.f32 %v1926_v39, %v2393_v2  ;;  %v6565_v2 = vld [vmem:[%s8806_s3 + $0x250] sm:$0xff]   ;;  %v8936_v39 = vmax.f32 %v7553_v31, %v7555_v32  ;;  %v6569_v32 = vld [vmem:[%s8806_s3 + $0x258] sm:$0xff]  }
 0x1f2   :  { %v6568_v31 = vld [vmem:[%s8806_s3 + $0x1b0] sm:$0xff]  }
 0x1f3   :  { %v2617_v47 = vadd.f32 %v8009_v55, %v2560_v15  ;;  %5894 = vmatpush3.bf16.msra.mxu0 %v6550_v7  ;;  %5908 = vmatpush3.bf16.msra.mxu1 %v6552_v35  ;;  %v2666_v19 = vmax.f32 %v2616_v46, 0.0  ;;  %v8937_v15 = vmax.f32 %v7565_v53, %v7567_v54  ;;  %v6570_v53 = vld [vmem:[%s8806_s3 + $0x1f8] sm:$0xff]  }
 0x1f4   :  { %v1764_v51 = vpop.f32.mrb[124].mxu0  ;;  %v2398_v59 = vpop.f32.mrb[124].mxu1  ;;  %5895 = vmatprep.subr.bf16.mxu0 %v6553_v36  ;;  %5909 = vmatprep.subr.bf16.mxu1 %v6555_v45 }
 0x1f5   :  { %v2667_v13 = vmax.f32 %v2617_v47, 0.0  ;;  %v1927_v11 = vmax.f32 %v8934_v10, %v1764_v51  ;;  %v1766_v21 = vpop.f32.mrb[125].mxu0  ;;  %v2400_v23 = vpop.f32.mrb[125].mxu1  ;;  %v6567_v51 = vld [vmem:[%s8806_s3 + $0x210] sm:$0xff]  }
 0x1f6   :  { %v1767_v28 = vpop.f32.mrb[126].mxu0  ;;  %v2401_v29 = vpop.f32.mrb[126].mxu1  ;;  %v6575_v21 = vld [vmem:[%s8806_s3 + $0x2c0] sm:$0xff]  }
 0x1f7   :  { %v2561_v4 = vmax.f32 %v1927_v11, %v2398_v59  ;;  %v1928_v26 = vmax.f32 %v8935_v62, %v1767_v28  ;;  %5896 = vmatpush3.bf16.msra.mxu0 %v6554_v48  ;;  %v1769_v5 = vpop.f32.mrb[127].mxu0  ;;  %v2403_v14 = vpop.f32.mrb[127].mxu1  ;;  %5910 = vmatpush3.bf16.msra.mxu1 %v6556_v41  ;;  %v2711_v37 = vpack.c.bf16 %v2667_v13, %v2666_v19  ;;  %v6572_v19 = vld [vmem:[%s8806_s3 + $0x1b8] sm:$0xff]   ;;  %v6573_v11 = vld [vmem:[%s8806_s3 + $0x260] sm:$0xff]  }
 0x1f8   :  { %5925 = vmatprep.subr.bf16.mxu0 %v6557_v30  ;;  %5911 = vmatprep.subr.bf16.mxu1 %v6558_v44  ;;  %v6571_v44 = vld [vmem:[%s8806_s3 + $0x218] sm:$0xff]  }
 0x1f9   :  { %v2618_v9 = vadd.f32 %v8009_v55, %v2561_v4  ;;  %v2562_v34 = vmax.f32 %v1928_v26, %v2401_v29  ;;  %4502 = vmatprep.mubr.bf16.mxu0 %v2711_v37  ;;  %v8938_v29 = vmax.f32 %v7579_v3, %v7581_v6  ;;  %v6576_v3 = vld [vmem:[%s8806_s3 + $0x280] sm:$0xff]   ;;  %v6577_v6 = vld [vmem:[%s8806_s3 + $0x268] sm:$0xff]  }
 0x1fa   :  { %4503 = vmatmul.mubr.bf16.vlgmr.msra.gmra.mrb[204].mxu0 %v2710_v25  ;;  %v6566_v25 = vld [vmem:[%s8806_s3 + $0x1f0] sm:$0xff]  }
 0x1fb   :  { %v2619_v60 = vadd.f32 %v8009_v55, %v2562_v34  ;;  %5926 = vmatpush3.bf16.msra.mxu0 %v6559_v33  ;;  %5912 = vmatpush3.bf16.msra.mxu1 %v6560_v63  ;;  %v2668_v22 = vmax.f32 %v2618_v9, 0.0  ;;  %v8939_v33 = vmax.f32 %v7591_v27, %v7593_v38  ;;  %v6574_v34 = vld [vmem:[%s8806_s3 + $0x220] sm:$0xff]   ;;  %v6579_v27 = vld [vmem:[%s8806_s3 + $0x2c8] sm:$0xff]  }
 0x1fc   :  { %v1772_v16 = vpop.f32.mrb[128].mxu0  ;;  %v2406_v1 = vpop.f32.mrb[128].mxu1  ;;  %5927 = vmatprep.subr.bf16.mxu0 %v6561_v0  ;;  %5913 = vmatprep.subr.bf16.mxu1 %v6562_v8 }
 0x1fd   :  { %v2669_v18 = vmax.f32 %v2619_v60, 0.0  ;;  %v1929_v42 = vmax.f32 %v8936_v39, %v1772_v16  ;;  %v1774_v43 = vpop.f32.mrb[129].mxu0  ;;  %v2408_v7 = vpop.f32.mrb[129].mxu1  ;;  %v6580_v16 = vld [vmem:[%s8806_s3 + $0x288] sm:$0xff]  }
 0x1fe   :  { %v1775_v35 = vpop.f32.mrb[130].mxu0  ;;  %v2409_v36 = vpop.f32.mrb[130].mxu1 }
 0x1ff   :  { %v2712_v45 = vpack.c.bf16 %v2669_v18, %v2668_v22  ;;  %v2563_v46 = vmax.f32 %v1929_v42, %v2406_v1  ;;  %v1930_v47 = vmax.f32 %v8937_v15, %v1775_v35  ;;  %5928 = vmatpush3.bf16.msra.mxu0 %v6563_v61  ;;  %v1777_v48 = vpop.f32.mrb[131].mxu0  ;;  %v2411_v41 = vpop.f32.mrb[131].mxu1  ;;  %5914 = vmatpush3.bf16.msra.mxu1 %v6564_v17  ;;  %v6578_v17 = vld [vmem:[%s8806_s3 + $0x228] sm:$0xff]   ;;  %v6583_v22 = vld [vmem:[%s8806_s3 + $0x2d0] sm:$0xff]  }
 0x200   :  { %5929 = vmatprep.subr.bf16.mxu0 %v6565_v2  ;;  %5915 = vmatprep.subr.bf16.mxu1 %v6566_v25  ;;  %v6581_v25 = vld [vmem:[%s8806_s3 + $0x270] sm:$0xff]   ;;  %v8940_v42 = vmax.f32 %v7614_v52, %v7616_v40  ;;  %v6585_v52 = vld [vmem:[%s8806_s3 + $0x278] sm:$0xff]  }
 0x201   :  { %v2620_v54 = vadd.f32 %v8009_v55, %v2563_v46  ;;  %v2564_v59 = vmax.f32 %v1930_v47, %v2409_v36  ;;  %v8941_v47 = vmax.f32 %v7626_v56, %v7628_v24  ;;  %v6584_v40 = vld [vmem:[%s8806_s3 + $0x290] sm:$0xff]   ;;  %v6587_v56 = vld [vmem:[%s8806_s3 + $0x2d8] sm:$0xff]  }
 0x203   :  { %v2621_v30 = vadd.f32 %v8009_v55, %v2564_v59  ;;  %5930 = vmatpush3.bf16.msra.mxu0 %v6567_v51  ;;  %5916 = vmatpush3.bf16.msra.mxu1 %v6568_v31  ;;  %v2670_v23 = vmax.f32 %v2620_v54, 0.0  ;;  %v6582_v31 = vld [vmem:[%s8806_s3 + $0x230] sm:$0xff]   ;;  %v6586_v54 = vld [vmem:[%s8806_s3 + $0x238] sm:$0xff]  }
 0x204   :  { %v1780_v13 = vpop.f32.mrb[132].mxu0  ;;  %v2414_v10 = vpop.f32.mrb[132].mxu1  ;;  %5931 = vmatprep.subr.bf16.mxu0 %v6569_v32  ;;  %5917 = vmatprep.subr.bf16.mxu1 %v6570_v53  ;;  %v6588_v59 = vld [vmem:[%s8806_s3 + $0x298] sm:$0xff]  }
 0x205   :  { %v2671_v28 = vmax.f32 %v2621_v30, 0.0  ;;  %v1931_v4 = vmax.f32 %v8938_v29, %v1780_v13  ;;  %v1782_v62 = vpop.f32.mrb[133].mxu0  ;;  %v2416_v26 = vpop.f32.mrb[133].mxu1  ;;  %v6590_v13 = vld [vmem:[%s8806_s3 + $0x2e0] sm:$0xff]  }
 0x206   :  { %v1783_v5 = vpop.f32.mrb[134].mxu0  ;;  %v2417_v14 = vpop.f32.mrb[134].mxu1 }
 0x207   :  { %v2565_v37 = vmax.f32 %v1931_v4, %v2414_v10  ;;  %v1932_v63 = vmax.f32 %v8939_v33, %v1783_v5  ;;  %5932 = vmatpush3.bf16.msra.mxu0 %v6571_v44  ;;  %v1785_v0 = vpop.f32.mrb[135].mxu0  ;;  %v2419_v8 = vpop.f32.mrb[135].mxu1  ;;  %5918 = vmatpush3.bf16.msra.mxu1 %v6572_v19  ;;  %v2713_v9 = vpack.c.bf16 %v2671_v28, %v2670_v23  ;;  %v6589_v19 = vld [vmem:[%s8806_s3 + $0x340] sm:$0xff]  }
 0x208   :  { %5933 = vmatprep.subr.bf16.mxu0 %v6573_v11  ;;  %5947 = vmatprep.subr.bf16.mxu1 %v6575_v21  ;;  %v8942_v21 = vmax.f32 %v7637_v20, %v7639_v12  ;;  %v8943_v5 = vmax.f32 %v7649_v49, %v7651_v58  ;;  %v6591_v0 = vld [vmem:[%s8806_s3 + $0x300] sm:$0xff]   ;;  %v6593_v12 = vld [vmem:[%s8806_s3 + $0x348] sm:$0xff]  }
 0x209   :  { %v2622_v38 = vadd.f32 %v8009_v55, %v2565_v37  ;;  %v2566_v60 = vmax.f32 %v1932_v63, %v2417_v14  ;;  %4543 = vmatprep.mubr.bf16.mxu1 %v2713_v9  ;;  %v6592_v20 = vld [vmem:[%s8806_s3 + $0x2a0] sm:$0xff]   ;;  %v6594_v49 = vld [vmem:[%s8806_s3 + $0x2e8] sm:$0xff]  }
 0x20a   :  { %4544 = vmatmul.mubr.bf16.vlgmr.msra.gmra.mrb[204].mxu1 %v2712_v45 }
 0x20b   :  { %v2623_v61 = vadd.f32 %v8009_v55, %v2566_v60  ;;  %5934 = vmatpush3.bf16.msra.mxu0 %v6574_v34  ;;  %5948 = vmatpush3.bf16.msra.mxu1 %v6576_v3  ;;  %v2672_v18 = vmax.f32 %v2622_v38, 0.0  ;;  %v6595_v34 = vld [vmem:[%s8806_s3 + $0x308] sm:$0xff]   ;;  %v6597_v38 = vld [vmem:[%s8806_s3 + $0x350] sm:$0xff]  }
 0x20c   :  { %v1788_v1 = vpop.f32.mrb[136].mxu0  ;;  %v2422_v2 = vpop.f32.mrb[136].mxu1  ;;  %5935 = vmatprep.subr.bf16.mxu0 %v6577_v6  ;;  %5949 = vmatprep.subr.bf16.mxu1 %v6579_v27  ;;  %v6596_v3 = vld [vmem:[%s8806_s3 + $0x2a8] sm:$0xff]   ;;  %v6598_v60 = vld [vmem:[%s8806_s3 + $0x2f0] sm:$0xff]  }
 0x20d   :  { %v2673_v39 = vmax.f32 %v2623_v61, 0.0  ;;  %v1933_v43 = vmax.f32 %v8940_v42, %v1788_v1  ;;  %v1790_v7 = vpop.f32.mrb[137].mxu0  ;;  %v2424_v35 = vpop.f32.mrb[137].mxu1 }
 0x20e   :  { %v1791_v36 = vpop.f32.mrb[138].mxu0  ;;  %v2425_v45 = vpop.f32.mrb[138].mxu1  ;;  %v8946_v7 = vld [vmem:[#allocation4_spill] sm:$0xff] }
 0x20f   :  { %v2714_v46 = vpack.c.bf16 %v2673_v39, %v2672_v18  ;;  %v2567_v15 = vmax.f32 %v1933_v43, %v2422_v2  ;;  %v1934_v48 = vmax.f32 %v8941_v47, %v1791_v36  ;;  %5936 = vmatpush3.bf16.msra.mxu0 %v6578_v17  ;;  %v1793_v41 = vpop.f32.mrb[139].mxu0  ;;  %v2427_v51 = vpop.f32.mrb[139].mxu1  ;;  %5950 = vmatpush3.bf16.msra.mxu1 %v6580_v16  ;;  %v8945_v43 = vld [vmem:[#allocation3_spill] sm:$0xff]  ;;  %v6602_v47 = vld [vmem:[%s8806_s3 + $0x2f8] sm:$0xff]  }
 0x210   :  { %5937 = vmatprep.subr.bf16.mxu0 %v6581_v25  ;;  %5951 = vmatprep.subr.bf16.mxu1 %v6583_v22  ;;  %v8944_v16 = vmax.f32 %v7663_v57, %v7665_v50  ;;  %v8947_v35 = vmax.f32 %v8945_v43, %v8946_v7  ;;  %v6600_v50 = vld [vmem:[%s8806_s3 + $0x2b0] sm:$0xff]   ;;  %v6601_v57 = vld [vmem:[%s8806_s3 + $0x358] sm:$0xff]   ;;  %v8958_v43 = vld [vmem:[#allocation12_spill] sm:$0xff] }
 0x211   :  { %v2624_v24 = vadd.f32 %v8009_v55, %v2567_v15  ;;  %v2568_v32 = vmax.f32 %v1934_v48, %v2425_v45  ;;  %v6599_v15 = vld [vmem:[%s8806_s3 + $0x310] sm:$0xff]  }
 0x213   :  { %v2625_v53 = vadd.f32 %v8009_v55, %v2568_v32  ;;  %5938 = vmatpush3.bf16.msra.mxu0 %v6582_v31  ;;  %5952 = vmatpush3.bf16.msra.mxu1 %v6584_v40  ;;  %v2674_v10 = vmax.f32 %v2624_v24, 0.0  ;;  %v6603_v31 = vld [vmem:[%s8806_s3 + $0x318] sm:$0xff]   ;;  %v6605_v24 = vld [vmem:[%s8806_s3 + $0x360] sm:$0xff]  }
 0x214   :  { %v1796_v30 = vpop.f32.mrb[140].mxu0  ;;  %v2430_v44 = vpop.f32.mrb[140].mxu1  ;;  %5939 = vmatprep.subr.bf16.mxu0 %v6585_v52  ;;  %5953 = vmatprep.subr.bf16.mxu1 %v6587_v56  ;;  %v6604_v40 = vld [vmem:[%s8806_s3 + $0x2b8] sm:$0xff]   ;;  %v6607_v32 = vld [vmem:[%s8806_s3 + $0x3c0] sm:$0xff]  }
 0x215   :  { %v2675_v11 = vmax.f32 %v2625_v53, 0.0  ;;  %v1935_v23 = vmax.f32 %v8942_v21, %v1796_v30  ;;  %v1798_v28 = vpop.f32.mrb[141].mxu0  ;;  %v2432_v29 = vpop.f32.mrb[141].mxu1  ;;  %v8949_v30 = vld [vmem:[#allocation6_spill] sm:$0xff] }
 0x216   :  { %v1799_v4 = vpop.f32.mrb[142].mxu0  ;;  %v2433_v62 = vpop.f32.mrb[142].mxu1  ;;  %v8951_v28 = vld [vmem:[#allocation7_spill] sm:$0xff]  ;;  %v8952_v29 = vld [vmem:[#allocation8_spill] sm:$0xff] }
 0x217   :  { %v2569_v26 = vmax.f32 %v1935_v23, %v2430_v44  ;;  %v1936_v14 = vmax.f32 %v8943_v5, %v1799_v4  ;;  %5940 = vmatpush3.bf16.msra.mxu0 %v6586_v54  ;;  %v1801_v37 = vpop.f32.mrb[143].mxu0  ;;  %v2435_v33 = vpop.f32.mrb[143].mxu1  ;;  %5954 = vmatpush3.bf16.msra.mxu1 %v6588_v59  ;;  %v2715_v63 = vpack.c.bf16 %v2675_v11, %v2674_v10  ;;  %v8948_v59 = vld [vmem:[#allocation5_spill] sm:$0xff] }
 0x218   :  { %5969 = vmatprep.subr.bf16.mxu0 %v6589_v19  ;;  %5955 = vmatprep.subr.bf16.mxu1 %v6590_v13  ;;  %v8950_v44 = vmax.f32 %v8948_v59, %v8949_v30  ;;  %v8953_v4 = vmax.f32 %v8951_v28, %v8952_v29  ;;  %v6606_v37 = vld [vmem:[%s8806_s3 + $0x320] sm:$0xff]   ;;  %v8961_v59 = vld [vmem:[#allocation14_spill] sm:$0xff]  ;;  %v8964_v28 = vld [vmem:[#allocation16_spill] sm:$0xff] }
 0x219   :  { %v2626_v58 = vadd.f32 %v8009_v55, %v2569_v26  ;;  %v2570_v8 = vmax.f32 %v1936_v14, %v2433_v62  ;;  %4584 = vmatprep.mubr.bf16.mxu0 %v2715_v63  ;;  %v6608_v33 = vld [vmem:[%s8806_s3 + $0x380] sm:$0xff]   ;;  %v6609_v63 = vld [vmem:[%s8806_s3 + $0x368] sm:$0xff]  }
 0x21a   :  { %4585 = vmatmul.mubr.bf16.vlgmr.msra.gmra.mrb[208].mxu0 %v2714_v46 }
 0x21b   :  { %v2627_v9 = vadd.f32 %v8009_v55, %v2570_v8  ;;  %5970 = vmatpush3.bf16.msra.mxu0 %v6591_v0  ;;  %5956 = vmatpush3.bf16.msra.mxu1 %v6592_v20  ;;  %v2676_v61 = vmax.f32 %v2626_v58, 0.0  ;;  %v6611_v0 = vld [vmem:[%s8806_s3 + $0x3c8] sm:$0xff]  }
 0x21c   :  { %v1804_v6 = vpop.f32.mrb[144].mxu0  ;;  %v2438_v27 = vpop.f32.mrb[144].mxu1  ;;  %5971 = vmatprep.subr.bf16.mxu0 %v6593_v12  ;;  %5957 = vmatprep.subr.bf16.mxu1 %v6594_v49  ;;  %v6610_v58 = vld [vmem:[%s8806_s3 + $0x328] sm:$0xff]  }
 0x21d   :  { %v2677_v17 = vmax.f32 %v2627_v9, 0.0  ;;  %v1937_v1 = vmax.f32 %v8944_v16, %v1804_v6  ;;  %v1806_v2 = vpop.f32.mrb[145].mxu0  ;;  %v2440_v25 = vpop.f32.mrb[145].mxu1  ;;  %v6612_v8 = vld [vmem:[%s8806_s3 + $0x388] sm:$0xff]   ;;  %v6615_v6 = vld [vmem:[%s8806_s3 + $0x3d0] sm:$0xff]  }
 0x21e   :  { %v1807_v22 = vpop.f32.mrb[146].mxu0  ;;  %v2441_v18 = vpop.f32.mrb[146].mxu1 }
 0x21f   :  { %v2716_v39 = vpack.c.bf16 %v2677_v17, %v2676_v61  ;;  %v2571_v42 = vmax.f32 %v1937_v1, %v2438_v27  ;;  %v1938_v36 = vmax.f32 %v8947_v35, %v1807_v22  ;;  %5972 = vmatpush3.bf16.msra.mxu0 %v6595_v34  ;;  %v1809_v45 = vpop.f32.mrb[147].mxu0  ;;  %v2443_v46 = vpop.f32.mrb[147].mxu1  ;;  %5958 = vmatpush3.bf16.msra.mxu1 %v6596_v3  ;;  %v6613_v3 = vld [vmem:[%s8806_s3 + $0x370] sm:$0xff]   ;;  %v8955_v61 = vld [vmem:[#allocation10_spill] sm:$0xff] }
 0x220   :  { %5973 = vmatprep.subr.bf16.mxu0 %v6597_v38  ;;  %5959 = vmatprep.subr.bf16.mxu1 %v6598_v60  ;;  %v8954_v60 = vld [vmem:[#allocation9_spill] sm:$0xff] }
 0x221   :  { %v2628_v48 = vadd.f32 %v8009_v55, %v2571_v42  ;;  %v2572_v41 = vmax.f32 %v1938_v36, %v2441_v18  ;;  %v8956_v17 = vmax.f32 %v8954_v60, %v8955_v61  ;;  %v8957_v42 = vld [vmem:[#allocation11_spill] sm:$0xff]  ;;  %v6614_v46 = vld [vmem:[%s8806_s3 + $0x330] sm:$0xff]   ;;  %v8967_v60 = vld [vmem:[#allocation18_spill] sm:$0xff] }
 0x222   :  { %v8959_v7 = vmax.f32 %v8957_v42, %v8958_v43  ;;  %v8970_v42 = vld [vmem:[#allocation20_spill] sm:$0xff] }
 0x223   :  { %v2629_v51 = vadd.f32 %v8009_v55, %v2572_v41  ;;  %5974 = vmatpush3.bf16.msra.mxu0 %v6599_v15  ;;  %5960 = vmatpush3.bf16.msra.mxu1 %v6600_v50  ;;  %v2678_v53 = vmax.f32 %v2628_v48, 0.0  ;;  %v6616_v15 = vld [vmem:[%s8806_s3 + $0x390] sm:$0xff]   ;;  %v6617_v50 = vld [vmem:[%s8806_s3 + $0x378] sm:$0xff]  }
 0x224   :  { %v1812_v52 = vpop.f32.mrb[148].mxu0  ;;  %v2446_v56 = vpop.f32.mrb[148].mxu1  ;;  %5975 = vmatprep.subr.bf16.mxu0 %v6601_v57  ;;  %5961 = vmatprep.subr.bf16.mxu1 %v6602_v47  ;;  %v6619_v57 = vld [vmem:[%s8806_s3 + $0x3d8] sm:$0xff]  }
 0x225   :  { %v2679_v54 = vmax.f32 %v2629_v51, 0.0  ;;  %v1939_v19 = vmax.f32 %v8950_v44, %v1812_v52  ;;  %v1814_v13 = vpop.f32.mrb[149].mxu0  ;;  %v2448_v10 = vpop.f32.mrb[149].mxu1  ;;  %v6618_v51 = vld [vmem:[%s8806_s3 + $0x338] sm:$0xff]  }
 0x226   :  { %v1815_v11 = vpop.f32.mrb[150].mxu0  ;;  %v2449_v21 = vpop.f32.mrb[150].mxu1 }
 0x227   :  { %v2573_v23 = vmax.f32 %v1939_v19, %v2446_v56  ;;  %v1940_v62 = vmax.f32 %v8953_v4, %v1815_v11  ;;  %5976 = vmatpush3.bf16.msra.mxu0 %v6603_v31  ;;  %v1817_v26 = vpop.f32.mrb[151].mxu0  ;;  %v2451_v5 = vpop.f32.mrb[151].mxu1  ;;  %5962 = vmatpush3.bf16.msra.mxu1 %v6604_v40  ;;  %v2717_v14 = vpack.c.bf16 %v2679_v54, %v2678_v53  ;;  %v6620_v31 = vld [vmem:[%s8806_s3 + $0x398] sm:$0xff]   ;;  %v6621_v56 = vld [vmem:[%s8806_s3 + $0x440] sm:$0xff]   ;;  %v8960_v54 = vld [vmem:[#allocation13_spill] sm:$0xff] }
 0x228   :  { %5977 = vmatprep.subr.bf16.mxu0 %v6605_v24  ;;  %5991 = vmatprep.subr.bf16.mxu1 %v6607_v32  ;;  %v6622_v24 = vld [vmem:[%s8806_s3 + $0x3e0] sm:$0xff]   ;;  %v8962_v30 = vmax.f32 %v8960_v54, %v8961_v59  ;;  %v8973_v54 = vld [vmem:[#allocation22_spill] sm:$0xff] }
 0x229   :  { %v2630_v20 = vadd.f32 %v8009_v55, %v2573_v23  ;;  %v2574_v12 = vmax.f32 %v1940_v62, %v2449_v21  ;;  %4625 = vmatprep.mubr.bf16.mxu1 %v2717_v14  ;;  %v8963_v23 = vld [vmem:[#allocation15_spill] sm:$0xff] }
 0x22a   :  { %4626 = vmatmul.mubr.bf16.vlgmr.msra.gmra.mrb[208].mxu1 %v2716_v39  ;;  %v8965_v29 = vmax.f32 %v8963_v23, %v8964_v28  ;;  %v6623_v14 = vld [vmem:[%s8806_s3 + $0x400] sm:$0xff]   ;;  %v8976_v23 = vld [vmem:[#allocation24_spill] sm:$0xff] }
 0x22b   :  { %v2631_v49 = vadd.f32 %v8009_v55, %v2574_v12  ;;  %5978 = vmatpush3.bf16.msra.mxu0 %v6606_v37  ;;  %5992 = vmatpush3.bf16.msra.mxu1 %v6608_v33  ;;  %v2680_v27 = vmax.f32 %v2630_v20, 0.0  ;;  %v6624_v37 = vld [vmem:[%s8806_s3 + $0x3a0] sm:$0xff]   ;;  %v6625_v33 = vld [vmem:[%s8806_s3 + $0x448] sm:$0xff]  }
 0x22c   :  { %v1820_v9 = vpop.f32.mrb[152].mxu0  ;;  %v2454_v34 = vpop.f32.mrb[152].mxu1  ;;  %5979 = vmatprep.subr.bf16.mxu0 %v6609_v63  ;;  %5993 = vmatprep.subr.bf16.mxu1 %v6611_v0  ;;  %v6626_v63 = vld [vmem:[%s8806_s3 + $0x3e8] sm:$0xff]  }
 0x22d   :  { %v2681_v38 = vmax.f32 %v2631_v49, 0.0  ;;  %v1941_v16 = vmax.f32 %v8956_v17, %v1820_v9  ;;  %v1822_v1 = vpop.f32.mrb[153].mxu0  ;;  %v2456_v2 = vpop.f32.mrb[153].mxu1  ;;  %v6627_v49 = vld [vmem:[%s8806_s3 + $0x408] sm:$0xff]  }
 0x22e   :  { %v1823_v25 = vpop.f32.mrb[154].mxu0  ;;  %v2457_v22 = vpop.f32.mrb[154].mxu1 }
 0x22f   :  { %v2718_v18 = vpack.c.bf16 %v2681_v38, %v2680_v27  ;;  %v2575_v39 = vmax.f32 %v1941_v16, %v2454_v34  ;;  %v1942_v35 = vmax.f32 %v8959_v7, %v1823_v25  ;;  %5980 = vmatpush3.bf16.msra.mxu0 %v6610_v58  ;;  %v1825_v36 = vpop.f32.mrb[155].mxu0  ;;  %v2459_v45 = vpop.f32.mrb[155].mxu1  ;;  %5994 = vmatpush3.bf16.msra.mxu1 %v6612_v8  ;;  %v6628_v58 = vld [vmem:[%s8806_s3 + $0x3a8] sm:$0xff]   ;;  %v6629_v34 = vld [vmem:[%s8806_s3 + $0x450] sm:$0xff]  }
 0x230   :  { %5981 = vmatprep.subr.bf16.mxu0 %v6613_v3  ;;  %5995 = vmatprep.subr.bf16.mxu1 %v6615_v6  ;;  %v6630_v3 = vld [vmem:[%s8806_s3 + $0x3f0] sm:$0xff]  }
 0x231   :  { %v2632_v47 = vadd.f32 %v8009_v55, %v2575_v39  ;;  %v2576_v48 = vmax.f32 %v1942_v35, %v2457_v22  ;;  %v8966_v38 = vld [vmem:[#allocation17_spill] sm:$0xff]  ;;  %v8969_v39 = vld [vmem:[#allocation19_spill] sm:$0xff] }
 0x232   :  { %v8968_v61 = vmax.f32 %v8966_v38, %v8967_v60  ;;  %v8971_v43 = vmax.f32 %v8969_v39, %v8970_v42  ;;  %v6631_v45 = vld [vmem:[%s8806_s3 + $0x410] sm:$0xff]  }
 0x233   :  { %v2633_v41 = vadd.f32 %v8009_v55, %v2576_v48  ;;  %5982 = vmatpush3.bf16.msra.mxu0 %v6614_v46  ;;  %5996 = vmatpush3.bf16.msra.mxu1 %v6616_v15  ;;  %v2682_v32 = vmax.f32 %v2632_v47, 0.0  ;;  %v6632_v46 = vld [vmem:[%s8806_s3 + $0x3b0] sm:$0xff]   ;;  %v6633_v15 = vld [vmem:[%s8806_s3 + $0x458] sm:$0xff]  }
 0x234   :  { %v1828_v40 = vpop.f32.mrb[156].mxu0  ;;  %v2462_v52 = vpop.f32.mrb[156].mxu1  ;;  %5983 = vmatprep.subr.bf16.mxu0 %v6617_v50  ;;  %5997 = vmatprep.subr.bf16.mxu1 %v6619_v57  ;;  %v6634_v50 = vld [vmem:[%s8806_s3 + $0x3f8] sm:$0xff]  }
 0x235   :  { %v2683_v53 = vmax.f32 %v2633_v41, 0.0  ;;  %v1943_v44 = vmax.f32 %v8962_v30, %v1828_v40  ;;  %v1830_v19 = vpop.f32.mrb[157].mxu0  ;;  %v2464_v13 = vpop.f32.mrb[157].mxu1  ;;  %v6635_v41 = vld [vmem:[%s8806_s3 + $0x418] sm:$0xff]  }
 0x236   :  { %v1831_v10 = vpop.f32.mrb[158].mxu0  ;;  %v2465_v11 = vpop.f32.mrb[158].mxu1 }
 0x237   :  { %v2577_v21 = vmax.f32 %v1943_v44, %v2462_v52  ;;  %v1944_v4 = vmax.f32 %v8965_v29, %v1831_v10  ;;  %5984 = vmatpush3.bf16.msra.mxu0 %v6618_v51  ;;  %v1833_v62 = vpop.f32.mrb[159].mxu0  ;;  %v2467_v26 = vpop.f32.mrb[159].mxu1  ;;  %5998 = vmatpush3.bf16.msra.mxu1 %v6620_v31  ;;  %v2719_v5 = vpack.c.bf16 %v2683_v53, %v2682_v32  ;;  %v6636_v51 = vld [vmem:[%s8806_s3 + $0x3b8] sm:$0xff]   ;;  %v6637_v52 = vld [vmem:[%s8806_s3 + $0x460] sm:$0xff]   ;;  %v8972_v53 = vld [vmem:[#allocation21_spill] sm:$0xff] }
 0x238   :  { %6013 = vmatprep.subr.bf16.mxu0 %v6621_v56  ;;  %5999 = vmatprep.subr.bf16.mxu1 %v6622_v24  ;;  %v6639_v56 = vld [vmem:[%s8806_s3 + $0x4c0] sm:$0xff]   ;;  %v8974_v59 = vmax.f32 %v8972_v53, %v8973_v54  ;;  %v8985_v53 = vld [vmem:[#allocation30_spill] sm:$0xff] }
 0x239   :  { %v2634_v0 = vadd.f32 %v8009_v55, %v2577_v21  ;;  %v2578_v20 = vmax.f32 %v1944_v4, %v2465_v11  ;;  %4666 = vmatprep.mubr.bf16.mxu0 %v2719_v5  ;;  %v8975_v21 = vld [vmem:[#allocation23_spill] sm:$0xff] }
 0x23a   :  { %4667 = vmatmul.mubr.bf16.vlgmr.msra.gmra.mrb[212].mxu0 %v2718_v18  ;;  %v8977_v28 = vmax.f32 %v8975_v21, %v8976_v23  ;;  %v6638_v5 = vld [vmem:[%s8806_s3 + $0x420] sm:$0xff]   ;;  %v8988_v21 = vld [vmem:[#allocation32_spill] sm:$0xff] }
 0x23b   :  { %v2635_v12 = vadd.f32 %v8009_v55, %v2578_v20  ;;  %6014 = vmatpush3.bf16.msra.mxu0 %v6623_v14  ;;  %6000 = vmatpush3.bf16.msra.mxu1 %v6624_v37  ;;  %v2684_v6 = vmax.f32 %v2634_v0, 0.0  ;;  %v6640_v14 = vld [vmem:[%s8806_s3 + $0x480] sm:$0xff]   ;;  %v6641_v37 = vld [vmem:[%s8806_s3 + $0x468] sm:$0xff]  }
 0x23c   :  { %v1836_v8 = vpop.f32.mrb[160].mxu0  ;;  %v2470_v9 = vpop.f32.mrb[160].mxu1  ;;  %6015 = vmatprep.subr.bf16.mxu0 %v6625_v33  ;;  %6001 = vmatprep.subr.bf16.mxu1 %v6626_v63  ;;  %v6643_v33 = vld [vmem:[%s8806_s3 + $0x4c8] sm:$0xff]  }
 0x23d   :  { %v2685_v27 = vmax.f32 %v2635_v12, 0.0  ;;  %v1945_v17 = vmax.f32 %v8968_v61, %v1836_v8  ;;  %v1838_v16 = vpop.f32.mrb[161].mxu0  ;;  %v2472_v1 = vpop.f32.mrb[161].mxu1  ;;  %v6642_v12 = vld [vmem:[%s8806_s3 + $0x428] sm:$0xff]  }
 0x23e   :  { %v1839_v2 = vpop.f32.mrb[162].mxu0  ;;  %v2473_v25 = vpop.f32.mrb[162].mxu1 }
 0x23f   :  { %v2720_v22 = vpack.c.bf16 %v2685_v27, %v2684_v6  ;;  %v2579_v18 = vmax.f32 %v1945_v17, %v2470_v9  ;;  %v1946_v7 = vmax.f32 %v8971_v43, %v1839_v2  ;;  %6016 = vmatpush3.bf16.msra.mxu0 %v6627_v49  ;;  %v1841_v35 = vpop.f32.mrb[163].mxu0  ;;  %v2475_v36 = vpop.f32.mrb[163].mxu1  ;;  %6002 = vmatpush3.bf16.msra.mxu1 %v6628_v58  ;;  %v6644_v49 = vld [vmem:[%s8806_s3 + $0x488] sm:$0xff]   ;;  %v6645_v9 = vld [vmem:[%s8806_s3 + $0x470] sm:$0xff]   ;;  %v8979_v27 = vld [vmem:[#allocation26_spill] sm:$0xff] }
 0x240   :  { %6017 = vmatprep.subr.bf16.mxu0 %v6629_v34  ;;  %6003 = vmatprep.subr.bf16.mxu1 %v6630_v3  ;;  %v8978_v6 = vld [vmem:[#allocation25_spill] sm:$0xff] }
 0x241   :  { %v2636_v57 = vadd.f32 %v8009_v55, %v2579_v18  ;;  %v2580_v47 = vmax.f32 %v1946_v7, %v2473_v25  ;;  %v8980_v38 = vmax.f32 %v8978_v6, %v8979_v27  ;;  %v8982_v18 = vld [vmem:[#allocation28_spill] sm:$0xff]  ;;  %v6646_v35 = vld [vmem:[%s8806_s3 + $0x430] sm:$0xff]   ;;  %v8991_v6 = vld [vmem:[#allocation34_spill] sm:$0xff] }
 0x242   :  { %v6648_v36 = vld [vmem:[%s8806_s3 + $0x490] sm:$0xff]  }
 0x243   :  { %v2637_v48 = vadd.f32 %v8009_v55, %v2580_v47  ;;  %6018 = vmatpush3.bf16.msra.mxu0 %v6631_v45  ;;  %6004 = vmatpush3.bf16.msra.mxu1 %v6632_v46  ;;  %v2686_v24 = vmax.f32 %v2636_v57, 0.0  ;;  %v6649_v45 = vld [vmem:[%s8806_s3 + $0x478] sm:$0xff]  }
 0x244   :  { %v1844_v31 = vpop.f32.mrb[164].mxu0  ;;  %v2478_v40 = vpop.f32.mrb[164].mxu1  ;;  %6019 = vmatprep.subr.bf16.mxu0 %v6633_v15  ;;  %6005 = vmatprep.subr.bf16.mxu1 %v6634_v50  ;;  %v6651_v46 = vld [vmem:[%s8806_s3 + $0x4d8] sm:$0xff]   ;;  %v8501_v15 = vld [vmem:[%s8807_s2] ss:$0 sm:$0xff] }
 0x245   :  { %v2687_v32 = vmax.f32 %v2637_v48, 0.0  ;;  %v1947_v30 = vmax.f32 %v8974_v59, %v1844_v31  ;;  %v1846_v44 = vpop.f32.mrb[165].mxu0  ;;  %v2480_v19 = vpop.f32.mrb[165].mxu1  ;;  %v6650_v48 = vld [vmem:[%s8806_s3 + $0x438] sm:$0xff]  }
 0x246   :  { %v1847_v13 = vpop.f32.mrb[166].mxu0  ;;  %v2481_v10 = vpop.f32.mrb[166].mxu1 }
 0x247   :  { %v2581_v11 = vmax.f32 %v1947_v30, %v2478_v40  ;;  %v1948_v29 = vmax.f32 %v8977_v28, %v1847_v13  ;;  %6020 = vmatpush3.bf16.msra.mxu0 %v6635_v41  ;;  %v1849_v4 = vpop.f32.mrb[167].mxu0  ;;  %v2483_v62 = vpop.f32.mrb[167].mxu1  ;;  %6006 = vmatpush3.bf16.msra.mxu1 %v6636_v51  ;;  %v2721_v26 = vpack.c.bf16 %v2687_v32, %v2686_v24  ;;  %v6652_v41 = vld [vmem:[%s8806_s3 + $0x498] sm:$0xff]   ;;  %v6653_v40 = vld [vmem:[%s8806_s3 + $0x540] sm:$0xff]   ;;  %v8984_v32 = vld [vmem:[#allocation29_spill] sm:$0xff] }
 0x248   :  { %6021 = vmatprep.subr.bf16.mxu0 %v6637_v52  ;;  %6035 = vmatprep.subr.bf16.mxu1 %v6639_v56  ;;  %v6654_v52 = vld [vmem:[%s8806_s3 + $0x4e0] sm:$0xff]   ;;  %v8986_v54 = vmax.f32 %v8984_v32, %v8985_v53  ;;  %v8997_v32 = vld [vmem:[#allocation38_spill] sm:$0xff] }
 0x249   :  { %v2638_v63 = vadd.f32 %v8009_v55, %v2581_v11  ;;  %v2582_v0 = vmax.f32 %v1948_v29, %v2481_v10  ;;  %4707 = vmatprep.mubr.bf16.mxu1 %v2721_v26  ;;  %v8987_v11 = vld [vmem:[#allocation31_spill] sm:$0xff] }
 0x24a   :  { %4708 = vmatmul.mubr.bf16.vlgmr.msra.gmra.mrb[212].mxu1 %v2720_v22  ;;  %v8981_v22 = vld [vmem:[#allocation27_spill] sm:$0xff]  ;;  %v8989_v23 = vmax.f32 %v8987_v11, %v8988_v21  ;;  %v9000_v11 = vld [vmem:[#allocation40_spill] sm:$0xff] }
 0x24b   :  { %v2639_v20 = vadd.f32 %v8009_v55, %v2582_v0  ;;  %6022 = vmatpush3.bf16.msra.mxu0 %v6638_v5  ;;  %6036 = vmatpush3.bf16.msra.mxu1 %v6640_v14  ;;  %v6647_v55 = vld [vmem:[%s8806_s3 + $0x4d0] sm:$0xff]   ;;  %v2688_v34 = vmax.f32 %v2638_v63, 0.0  ;;  %v8983_v39 = vmax.f32 %v8981_v22, %v8982_v18  ;;  %v6655_v26 = vld [vmem:[%s8806_s3 + $0x500] sm:$0xff]   ;;  %v6657_v14 = vld [vmem:[%s8806_s3 + $0x548] sm:$0xff]  }
 0x24c   :  { %v1852_v58 = vpop.f32.mrb[168].mxu0  ;;  %v2486_v8 = vpop.f32.mrb[168].mxu1  ;;  %6023 = vmatprep.subr.bf16.mxu0 %v6641_v37  ;;  %6037 = vmatprep.subr.bf16.mxu1 %v6643_v33  ;;  %v6656_v5 = vld [vmem:[%s8806_s3 + $0x4a0] sm:$0xff]   ;;  %v6658_v37 = vld [vmem:[%s8806_s3 + $0x4e8] sm:$0xff]  }
 0x24d   :  { %v2689_v3 = vmax.f32 %v2639_v20, 0.0  ;;  %v1949_v60 = vmax.f32 %v8980_v38, %v1852_v58  ;;  %v1854_v61 = vpop.f32.mrb[169].mxu0  ;;  %v2488_v17 = vpop.f32.mrb[169].mxu1  ;;  %v6659_v20 = vld [vmem:[%s8806_s3 + $0x508] sm:$0xff]  }
 0x24e   :  { %v1855_v16 = vpop.f32.mrb[170].mxu0  ;;  %v2489_v1 = vpop.f32.mrb[170].mxu1  ;;  %v8994_v22 = vld [vmem:[#allocation36_spill] sm:$0xff] }
 0x24f   :  { %v2722_v2 = vpack.c.bf16 %v2689_v3, %v2688_v34  ;;  %v2583_v25 = vmax.f32 %v1949_v60, %v2486_v8  ;;  %v1950_v42 = vmax.f32 %v8983_v39, %v1855_v16  ;;  %6024 = vmatpush3.bf16.msra.mxu0 %v6642_v12  ;;  %v1857_v43 = vpop.f32.mrb[171].mxu0  ;;  %v2491_v7 = vpop.f32.mrb[171].mxu1  ;;  %6038 = vmatpush3.bf16.msra.mxu1 %v6644_v49  ;;  %v6660_v12 = vld [vmem:[%s8806_s3 + $0x4a8] sm:$0xff]   ;;  %v6661_v8 = vld [vmem:[%s8806_s3 + $0x550] sm:$0xff]  }
 0x250   :  { %6025 = vmatprep.subr.bf16.mxu0 %v6645_v9  ;;  %6039 = vmatprep.subr.bf16.mxu1 %v6647_v55  ;;  %v6662_v9 = vld [vmem:[%s8806_s3 + $0x4f0] sm:$0xff]  }
 0x251   :  { %v2640_v50 = vadd.f32 %v8501_v15, %v2583_v25  ;;  %v2584_v57 = vmax.f32 %v1950_v42, %v2489_v1  ;;  %v8990_v3 = vld [vmem:[#allocation33_spill] sm:$0xff]  ;;  %v8993_v25 = vld [vmem:[#allocation35_spill] sm:$0xff] }
 0x252   :  { %v8992_v27 = vmax.f32 %v8990_v3, %v8991_v6  ;;  %v8995_v18 = vmax.f32 %v8993_v25, %v8994_v22  ;;  %v6663_v7 = vld [vmem:[%s8806_s3 + $0x510] sm:$0xff]   ;;  %v9003_v3 = vld [vmem:[#allocation42_spill] sm:$0xff]  ;;  %v9006_v25 = vld [vmem:[#allocation44_spill] sm:$0xff] }
 0x253   :  { %v2641_v47 = vadd.f32 %v8501_v15, %v2584_v57  ;;  %6026 = vmatpush3.bf16.msra.mxu0 %v6646_v35  ;;  %6040 = vmatpush3.bf16.msra.mxu1 %v6648_v36  ;;  %v2690_v56 = vmax.f32 %v2640_v50, 0.0  ;;  %v6664_v35 = vld [vmem:[%s8806_s3 + $0x4b0] sm:$0xff]   ;;  %v6665_v36 = vld [vmem:[%s8806_s3 + $0x558] sm:$0xff]  }
 0x254   :  { %v1860_v51 = vpop.f32.mrb[172].mxu0  ;;  %v2494_v31 = vpop.f32.mrb[172].mxu1  ;;  %6027 = vmatprep.subr.bf16.mxu0 %v6649_v45  ;;  %6041 = vmatprep.subr.bf16.mxu1 %v6651_v46  ;;  %v6666_v45 = vld [vmem:[%s8806_s3 + $0x4f8] sm:$0xff]  }
 0x255   :  { %v2691_v24 = vmax.f32 %v2641_v47, 0.0  ;;  %v1951_v59 = vmax.f32 %v8986_v54, %v1860_v51  ;;  %v1862_v30 = vpop.f32.mrb[173].mxu0  ;;  %v2496_v44 = vpop.f32.mrb[173].mxu1  ;;  %v6667_v47 = vld [vmem:[%s8806_s3 + $0x518] sm:$0xff]  }
 0x256   :  { %v1863_v19 = vpop.f32.mrb[174].mxu0  ;;  %v2497_v13 = vpop.f32.mrb[174].mxu1 }
 0x257   :  { %v2585_v10 = vmax.f32 %v1951_v59, %v2494_v31  ;;  %v1952_v28 = vmax.f32 %v8989_v23, %v1863_v19  ;;  %6028 = vmatpush3.bf16.msra.mxu0 %v6650_v48  ;;  %v1865_v29 = vpop.f32.mrb[175].mxu0  ;;  %v2499_v4 = vpop.f32.mrb[175].mxu1  ;;  %6042 = vmatpush3.bf16.msra.mxu1 %v6652_v41  ;;  %v2723_v62 = vpack.c.bf16 %v2691_v24, %v2690_v56  ;;  %v6668_v48 = vld [vmem:[%s8806_s3 + $0x4b8] sm:$0xff]   ;;  %v6669_v31 = vld [vmem:[%s8806_s3 + $0x560] sm:$0xff]   ;;  %v8996_v24 = vld [vmem:[#allocation37_spill] sm:$0xff] }
 0x258   :  { %6057 = vmatprep.subr.bf16.mxu0 %v6653_v40  ;;  %6043 = vmatprep.subr.bf16.mxu1 %v6654_v52  ;;  %v6671_v40 = vld [vmem:[%s8806_s3 + $0x5c0] sm:$0xff]   ;;  %v8998_v53 = vmax.f32 %v8996_v24, %v8997_v32 }
 0x259   :  { %v2642_v33 = vadd.f32 %v8501_v15, %v2585_v10  ;;  %v2586_v63 = vmax.f32 %v1952_v28, %v2497_v13  ;;  %4748 = vmatprep.mubr.bf16.mxu0 %v2723_v62  ;;  %v8999_v10 = vld [vmem:[#allocation39_spill] sm:$0xff] }
 0x25a   :  { %4749 = vmatmul.mubr.bf16.vlgmr.msra.gmra.mrb[216].mxu0 %v2722_v2  ;;  %v9001_v21 = vmax.f32 %v8999_v10, %v9000_v11  ;;  %v6670_v62 = vld [vmem:[%s8806_s3 + $0x520] sm:$0xff]  }
 0x25b   :  { %v2643_v0 = vadd.f32 %v8501_v15, %v2586_v63  ;;  %6058 = vmatpush3.bf16.msra.mxu0 %v6655_v26  ;;  %6044 = vmatpush3.bf16.msra.mxu1 %v6656_v5  ;;  %v2692_v55 = vmax.f32 %v2642_v33, 0.0  ;;  %v6672_v26 = vld [vmem:[%s8806_s3 + $0x580] sm:$0xff]   ;;  %v6673_v5 = vld [vmem:[%s8806_s3 + $0x568] sm:$0xff]  }
 0x25c   :  { %v1868_v49 = vpop.f32.mrb[176].mxu0  ;;  %v2502_v58 = vpop.f32.mrb[176].mxu1  ;;  %6059 = vmatprep.subr.bf16.mxu0 %v6657_v14  ;;  %6045 = vmatprep.subr.bf16.mxu1 %v6658_v37  ;;  %v6675_v14 = vld [vmem:[%s8806_s3 + $0x5c8] sm:$0xff]  }
 0x25d   :  { %v2693_v34 = vmax.f32 %v2643_v0, 0.0  ;;  %v1953_v38 = vmax.f32 %v8992_v27, %v1868_v49  ;;  %v1870_v60 = vpop.f32.mrb[177].mxu0  ;;  %v2504_v61 = vpop.f32.mrb[177].mxu1  ;;  %v6674_v0 = vld [vmem:[%s8806_s3 + $0x528] sm:$0xff]  }
 0x25e   :  { %v1871_v17 = vpop.f32.mrb[178].mxu0  ;;  %v2505_v16 = vpop.f32.mrb[178].mxu1 }
 0x25f   :  { %v2724_v1 = vpack.c.bf16 %v2693_v34, %v2692_v55  ;;  %v2587_v2 = vmax.f32 %v1953_v38, %v2502_v58  ;;  %v1954_v39 = vmax.f32 %v8995_v18, %v1871_v17  ;;  %6060 = vmatpush3.bf16.msra.mxu0 %v6659_v20  ;;  %v1873_v42 = vpop.f32.mrb[179].mxu0  ;;  %v2507_v43 = vpop.f32.mrb[179].mxu1  ;;  %6046 = vmatpush3.bf16.msra.mxu1 %v6660_v12  ;;  %v6676_v20 = vld [vmem:[%s8806_s3 + $0x588] sm:$0xff]   ;;  %v6677_v58 = vld [vmem:[%s8806_s3 + $0x570] sm:$0xff]  }
 0x260   :  { %6061 = vmatprep.subr.bf16.mxu0 %v6661_v8  ;;  %6047 = vmatprep.subr.bf16.mxu1 %v6662_v9  ;;  %v6679_v8 = vld [vmem:[%s8806_s3 + $0x5d0] sm:$0xff]  }
 0x261   :  { %v2644_v46 = vadd.f32 %v8501_v15, %v2587_v2  ;;  %v2588_v50 = vmax.f32 %v1954_v39, %v2505_v16  ;;  %v9002_v34 = vld [vmem:[#allocation41_spill] sm:$0xff]  ;;  %v9005_v2 = vld [vmem:[#allocation43_spill] sm:$0xff] }
 0x262   :  { %v9004_v6 = vmax.f32 %v9002_v34, %v9003_v3  ;;  %v9007_v22 = vmax.f32 %v9005_v2, %v9006_v25  ;;  %v6678_v43 = vld [vmem:[%s8806_s3 + $0x530] sm:$0xff]  }
 0x263   :  { %v2645_v57 = vadd.f32 %v8501_v15, %v2588_v50  ;;  %6062 = vmatpush3.bf16.msra.mxu0 %v6663_v7  ;;  %6048 = vmatpush3.bf16.msra.mxu1 %v6664_v35  ;;  %v2694_v52 = vmax.f32 %v2644_v46, 0.0  ;;  %v6680_v7 = vld [vmem:[%s8806_s3 + $0x590] sm:$0xff]   ;;  %v6681_v35 = vld [vmem:[%s8806_s3 + $0x578] sm:$0xff]  }
 0x264   :  { %v1876_v41 = vpop.f32.mrb[180].mxu0  ;;  %v2510_v51 = vpop.f32.mrb[180].mxu1  ;;  %6063 = vmatprep.subr.bf16.mxu0 %v6665_v36  ;;  %6049 = vmatprep.subr.bf16.mxu1 %v6666_v45  ;;  %v6683_v36 = vld [vmem:[%s8806_s3 + $0x5d8] sm:$0xff]   ;;  %v6692_v25 = vld [vmem:[%s8806_s3 + $0x610] sm:$0xff]  }
 0x265   :  { %v2695_v56 = vmax.f32 %v2645_v57, 0.0  ;;  %v1955_v54 = vmax.f32 %v8998_v53, %v1876_v41  ;;  %v1878_v59 = vpop.f32.mrb[181].mxu0  ;;  %v2512_v30 = vpop.f32.mrb[181].mxu1  ;;  %v6682_v57 = vld [vmem:[%s8806_s3 + $0x538] sm:$0xff]  }
 0x266   :  { %v1879_v44 = vpop.f32.mrb[182].mxu0  ;;  %v2513_v19 = vpop.f32.mrb[182].mxu1 }
 0x267   :  { %v2589_v13 = vmax.f32 %v1955_v54, %v2510_v51  ;;  %v1956_v23 = vmax.f32 %v9001_v21, %v1879_v44  ;;  %6064 = vmatpush3.bf16.msra.mxu0 %v6667_v47  ;;  %v1881_v28 = vpop.f32.mrb[183].mxu0  ;;  %v2515_v29 = vpop.f32.mrb[183].mxu1  ;;  %6050 = vmatpush3.bf16.msra.mxu1 %v6668_v48  ;;  %v2725_v4 = vpack.c.bf16 %v2695_v56, %v2694_v52  ;;  %v6684_v47 = vld [vmem:[%s8806_s3 + $0x598] sm:$0xff]   ;;  %v6685_v51 = vld [vmem:[%s8806_s3 + $0x5e0] sm:$0xff]   ;;  %v9008_v52 = vld [vmem:[#allocation45_spill] sm:$0xff] }
 0x268   :  { %6065 = vmatprep.subr.bf16.mxu0 %v6669_v31  ;;  %6079 = vmatprep.subr.bf16.mxu1 %v6671_v40  ;;  %v9009_v56 = vld [vmem:[#allocation46_spill] sm:$0xff]  ;;  %v9011_v44 = vld [vmem:[#allocation47_spill] sm:$0xff] }
 0x269   :  { %v2646_v37 = vadd.f32 %v8501_v15, %v2589_v13  ;;  %v2590_v33 = vmax.f32 %v1956_v23, %v2513_v19  ;;  %4789 = vmatprep.mubr.bf16.mxu1 %v2725_v4  ;;  %v9010_v24 = vmax.f32 %v9008_v52, %v9009_v56  ;;  %v9012_v19 = vld [vmem:[#allocation48_spill] sm:$0xff]  ;;  %v6686_v23 = vld [vmem:[%s8806_s3 + $0x600] sm:$0xff]  }
 0x26a   :  { %4790 = vmatmul.mubr.bf16.vlgmr.msra.gmra.mrb[216].mxu1 %v2724_v1  ;;  %v9013_v13 = vmax.f32 %v9011_v44, %v9012_v19  ;;  %v6687_v29 = vld [vmem:[%s8806_s3 + $0x5a0] sm:$0xff]  }
 0x26b   :  { %v2647_v63 = vadd.f32 %v8501_v15, %v2590_v33  ;;  %6066 = vmatpush3.bf16.msra.mxu0 %v6670_v62  ;;  %6080 = vmatpush3.bf16.msra.mxu1 %v6672_v26  ;;  %v2696_v9 = vmax.f32 %v2646_v37, 0.0  ;;  %v6719_v62 = vmov 0.0   ;;  %v6688_v26 = vld [vmem:[%s8806_s3 + $0x5e8] sm:$0xff]   ;;  %v6697_v19 = vld [vmem:[%s8806_s3 + $0x620] sm:$0xff]  }
 0x26c   :  { %v1884_v12 = vpop.f32.mrb[184].mxu0  ;;  %v2518_v49 = vpop.f32.mrb[184].mxu1  ;;  %6067 = vmatprep.subr.bf16.mxu0 %v6673_v5  ;;  %6081 = vmatprep.subr.bf16.mxu1 %v6675_v14  ;;  %v6689_v33 = vld [vmem:[%s8806_s3 + $0x608] sm:$0xff]  }
 0x26d   :  { %v2697_v55 = vmax.f32 %v2647_v63, 0.0  ;;  %v1957_v27 = vmax.f32 %v9004_v6, %v1884_v12  ;;  %v1886_v38 = vpop.f32.mrb[185].mxu0  ;;  %v2520_v60 = vpop.f32.mrb[185].mxu1  ;;  %v6690_v63 = vld [vmem:[%s8806_s3 + $0x5a8] sm:$0xff]   ;;  %v6691_v12 = vld [vmem:[%s8806_s3 + $0x5f0] sm:$0xff]  }
 0x26e   :  { %v1887_v61 = vpop.f32.mrb[186].mxu0  ;;  %v2521_v17 = vpop.f32.mrb[186].mxu1 }
 0x26f   :  { %v2726_v16 = vpack.c.bf16 %v2697_v55, %v2696_v9  ;;  %v2591_v1 = vmax.f32 %v1957_v27, %v2518_v49  ;;  %v1958_v18 = vmax.f32 %v9007_v22, %v1887_v61  ;;  %6068 = vmatpush3.bf16.msra.mxu0 %v6674_v0  ;;  %v1889_v39 = vpop.f32.mrb[187].mxu0  ;;  %v2523_v42 = vpop.f32.mrb[187].mxu1  ;;  %6082 = vmatpush3.bf16.msra.mxu1 %v6676_v20  ;;  %v9015_v9 = vld [vmem:[#allocation50_spill] sm:$0xff]  ;;  %v9017_v61 = vld [vmem:[#allocation51_spill] sm:$0xff] }
 0x270   :  { %6069 = vmatprep.subr.bf16.mxu0 %v6677_v58  ;;  %6083 = vmatprep.subr.bf16.mxu1 %v6679_v8  ;;  %v9014_v8 = vld [vmem:[#allocation49_spill] sm:$0xff]  ;;  %v6694_v42 = vld [vmem:[%s8806_s3 + $0x5f8] sm:$0xff]  }
 0x271   :  { %v2648_v45 = vadd.f32 %v8501_v15, %v2591_v1  ;;  %v2592_v46 = vmax.f32 %v1958_v18, %v2521_v17  ;;  %v9016_v55 = vmax.f32 %v9014_v8, %v9015_v9  ;;  %v9018_v17 = vld [vmem:[#allocation52_spill] sm:$0xff]  ;;  %v6693_v18 = vld [vmem:[%s8806_s3 + $0x5b0] sm:$0xff]  }
 0x273   :  { %v2649_v50 = vadd.f32 %v8501_v15, %v2592_v46  ;;  %6070 = vmatpush3.bf16.msra.mxu0 %v6678_v43  ;;  %6084 = vmatpush3.bf16.msra.mxu1 %v6680_v7  ;;  %v2698_v31 = vmax.f32 %v2648_v45, 0.0  ;;  %v6696_v45 = vld [vmem:[%s8806_s3 + $0x5b8] sm:$0xff]  }
 0x274   :  { %v1892_v48 = vpop.f32.mrb[188].mxu0  ;;  %6071 = vmatprep.subr.bf16.mxu0 %v6681_v35  ;;  %v2526_v41 = vpop.f32.mrb[188].mxu1  ;;  %6085 = vmatprep.subr.bf16.mxu1 %v6683_v36  ;;  %v6695_v36 = vld [vmem:[%s8806_s3 + $0x618] sm:$0xff]  }
 0x275   :  { %v2699_v40 = vmax.f32 %v2649_v50, 0.0  ;;  %v1959_v32 = vmax.f32 %v9010_v24, %v1892_v48  ;;  %v1894_v53 = vpop.f32.mrb[189].mxu0  ;;  %v2528_v54 = vpop.f32.mrb[189].mxu1  ;;  %v9020_v48 = vld [vmem:[#allocation53_spill] sm:$0xff] }
 0x276   :  { %v1895_v59 = vpop.f32.mrb[190].mxu0  ;;  %v2529_v30 = vpop.f32.mrb[190].mxu1  ;;  %v9024_v53 = vld [vmem:[#allocation56_spill] sm:$0xff] }
 0x277   :  { %v1960_v10 = vmax.f32 %v9013_v13, %v1895_v59  ;;  %v2593_v11 = vmax.f32 %v1959_v32, %v2526_v41  ;;  %6072 = vmatpush3.bf16.msra.mxu0 %v6682_v57  ;;  %6086 = vmatpush3.bf16.msra.mxu1 %v6684_v47  ;;  %v2727_v21 = vpack.c.bf16 %v2699_v40, %v2698_v31  ;;  %v1897_v28 = vpop.f32.mrb[191].mxu0  ;;  %v2531_v4 = vpop.f32.mrb[191].mxu1  ;;  %v9021_v41 = vld [vmem:[#allocation54_spill] sm:$0xff]  ;;  %v9023_v32 = vld [vmem:[#allocation55_spill] sm:$0xff] }
 0x278   :  { %6128 = vmatprep.subr.bf16.mxu0 %v6719_v62  ;;  %6087 = vmatprep.subr.bf16.mxu1 %v6685_v51  ;;  %v9022_v51 = vmax.f32 %v9020_v48, %v9021_v41  ;;  %v9025_v54 = vmax.f32 %v9023_v32, %v9024_v53  ;;  %v6698_v28 = vld [vmem:[%s8806_s3 + $0x628] sm:$0xff]   ;;  %v6705_v48 = vld [vmem:[%s8809_s5 + $0x20] sm:$0xff]  }
 0x279   :  { %v2650_v5 = vadd.f32 %v8501_v15, %v2593_v11  ;;  %v2594_v14 = vmax.f32 %v1960_v10, %v2529_v30  ;;  %4830 = vmatprep.mubr.bf16.mxu0 %v2727_v21  ;;  %v6706_v41 = vld [vmem:[%s8809_s5 + $0x28] sm:$0xff]  }
 0x27a   :  { %4831 = vmatmul.mubr.bf16.vlgmr.msra.gmra.mrb[220].mxu0 %v2726_v16  ;;  %v9019_v16 = vmax.f32 %v9017_v61, %v9018_v17 }
 0x27b   :  { %v2651_v37 = vadd.f32 %v8501_v15, %v2594_v14  ;;  %6129 = vmatpush3.bf16.msra.mxu0 %v6686_v23  ;;  %6088 = vmatpush3.bf16.msra.mxu1 %v6687_v29  ;;  %v2700_v49 = vmax.f32 %v2650_v5, 0.0  ;;  %v6699_v5 = vld [vmem:[%s8806_s3 + $0x630] sm:$0xff]  }
 0x27c   :  { %v1900_v0 = vpop.f32.mrb[192].mxu0  ;;  %6130 = vmatprep.subr.bf16.mxu0 %v6719_v62  ;;  %v2534_v20 = vpop.f32.mrb[192].mxu1  ;;  %6089 = vmatprep.subr.bf16.mxu1 %v6688_v26 }
 0x27d   :  { %v2701_v58 = vmax.f32 %v2651_v37, 0.0  ;;  %v1961_v34 = vmax.f32 %v9016_v55, %v1900_v0  ;;  %v1902_v3 = vpop.f32.mrb[193].mxu0  ;;  %v2536_v6 = vpop.f32.mrb[193].mxu1  ;;  %6144 = vmatprep.mubr.msk.bf16.mxu0 %vm6720_vm2, %v6719_v62 }
 0x27e   :  { %v1903_v27 = vpop.f32.mrb[194].mxu0  ;;  %v2537_v38 = vpop.f32.mrb[194].mxu1 }
 0x27f   :  { %v2728_v60 = vpack.c.bf16 %v2701_v58, %v2700_v49  ;;  %v1962_v1 = vmax.f32 %v9019_v16, %v1903_v27  ;;  %v2595_v2 = vmax.f32 %v1961_v34, %v2534_v20  ;;  %6131 = vmatpush3.bf16.msra.mxu0 %v6689_v33  ;;  %6090 = vmatpush3.bf16.msra.mxu1 %v6690_v63  ;;  %v1905_v22 = vpop.f32.mrb[195].mxu0  ;;  %v2539_v39 = vpop.f32.mrb[195].mxu1 }
 0x280   :  { %6132 = vmatprep.subr.bf16.mxu0 %v6719_v62  ;;  %6091 = vmatprep.subr.bf16.mxu1 %v6691_v12  ;;  %v5618_v12 = vld [vmem:[%s8808_s4] ss:$0 sm:$0xff]  ;;  %v6702_v39 = vld [vmem:[%s8809_s5 + $0x8] sm:$0xff]  }
 0x281   :  { %v2652_v43 = vadd.f32 %v8501_v15, %v2595_v2  ;;  %v2596_v7 = vmax.f32 %v1962_v1, %v2537_v38 }
 0x283   :  { %v2653_v35 = vadd.f32 %v8501_v15, %v2596_v7  ;;  %6133 = vmatpush3.bf16.msra.mxu0 %v6692_v25  ;;  %6092 = vmatpush3.bf16.msra.mxu1 %v6693_v18  ;;  %v2702_v57 = vmax.f32 %v2652_v43, 0.0  ;;  %v6701_v18 = vld [vmem:[%s8809_s5] sm:$0xff]   ;;  %v6703_v43 = vld [vmem:[%s8809_s5 + $0x10] sm:$0xff]  }
 0x284   :  { %v1908_v46 = vpop.f32.mrb[196].mxu0  ;;  %6134 = vmatprep.subr.bf16.mxu0 %v6719_v62  ;;  %v2542_v50 = vpop.f32.mrb[196].mxu1  ;;  %6093 = vmatprep.subr.bf16.mxu1 %v6694_v42 }
 0x285   :  { %v2703_v47 = vmax.f32 %v2653_v35, 0.0  ;;  %v1963_v31 = vmax.f32 %v9022_v51, %v1908_v46  ;;  %v1910_v40 = vpop.f32.mrb[197].mxu0  ;;  %v2544_v52 = vpop.f32.mrb[197].mxu1 }
 0x286   :  { %v1911_v56 = vpop.f32.mrb[198].mxu0  ;;  %v2545_v24 = vpop.f32.mrb[198].mxu1 }
 0x287   :  { %v1964_v59 = vmax.f32 %v9025_v54, %v1911_v56  ;;  %v2597_v30 = vmax.f32 %v1963_v31, %v2542_v50  ;;  %6135 = vmatpush3.bf16.msra.mxu0 %v6695_v36  ;;  %6094 = vmatpush3.bf16.msra.mxu1 %v6696_v45  ;;  %v2729_v44 = vpack.c.bf16 %v2703_v47, %v2702_v57  ;;  %v1913_v13 = vpop.f32.mrb[199].mxu0  ;;  %v2547_v10 = vpop.f32.mrb[199].mxu1  ;;  %v6704_v57 = vld [vmem:[%s8809_s5 + $0x18] sm:$0xff]   ;;  %v6707_v31 = vld [vmem:[%s8809_s5 + $0x30] sm:$0xff]  }
 0x288   :  { %6136 = vmatprep.subr.bf16.mxu0 %v6719_v62  ;;  %6148 = vmatprep.subr.bf16.mxu1 %v6719_v62  ;;  %v6708_v54 = vld [vmem:[%s8809_s5 + $0x38] sm:$0xff]   ;;  %v6711_v13 = vld [vmem:[%s8810_s7 + $0x10] sm:$0xff]  }
 0x289   :  { %v2654_v11 = vadd.f32 %v8501_v15, %v2597_v30  ;;  %v2598_v21 = vmax.f32 %v1964_v59, %v2545_v24  ;;  %4871 = vmatprep.mubr.bf16.mxu1 %v2729_v44  ;;  %v6709_v30 = vld [vmem:[%s8810_s7] sm:$0xff]   ;;  %v6710_v44 = vld [vmem:[%s8810_s7 + $0x8] sm:$0xff]  }
 0x28a   :  { %4872 = vmatmul.mubr.bf16.vlgmr.msra.gmra.mrb[220].mxu1 %v2728_v60 }
 0x28b   :  { %v2655_v23 = vadd.f32 %v8501_v15, %v2598_v21  ;;  %6137 = vmatpush3.bf16.msra.mxu0 %v6697_v19  ;;  %6164 = vmatprep.mubr.msk.bf16.mxu1 %vm6720_vm2, %v6719_v62  ;;  %v2704_v29 = vmax.f32 %v2654_v11, 0.0  ;;  %v6700_v15 = vld [vmem:[%s8806_s3 + $0x638] sm:$0xff]  }
 0x28c   :  { %6138 = vmatprep.subr.bf16.mxu0 %v6719_v62  ;;  %6149 = vmatpush3.bf16.msra.mxu1 %v6701_v18 }
 0x28d   :  { %v2705_v4 = vmax.f32 %v2655_v23, 0.0  ;;  %6150 = vmatprep.subr.bf16.mxu1 %v6719_v62 }
 0x28f   :  { %v2730_v26 = vpack.c.bf16 %v2705_v4, %v2704_v29  ;;  %6139 = vmatpush3.bf16.msra.mxu0 %v6698_v28  ;;  %v6712_v4 = vld [vmem:[%s8810_s7 + $0x18] sm:$0xff]  }
 0x290   :  { %6140 = vmatprep.subr.bf16.mxu0 %v6719_v62  ;;  %6151 = vmatpush3.bf16.msra.mxu1 %v6702_v39 }
 0x291   :  { %6152 = vmatprep.subr.bf16.mxu1 %v6719_v62 }
 0x293   :  { %6141 = vmatpush3.bf16.msra.mxu0 %v6699_v5  ;;  %v6713_v5 = vld [vmem:[%s8810_s7 + $0x20] sm:$0xff]  }
 0x294   :  { %6142 = vmatprep.subr.bf16.mxu0 %v6719_v62  ;;  %6153 = vmatpush3.bf16.msra.mxu1 %v6703_v43 }
 0x295   :  { %6154 = vmatprep.subr.bf16.mxu1 %v6719_v62 }
 0x297   :  { %6143 = vmatpush3.bf16.msra.mxu0 %v6700_v15  ;;  %v6714_v15 = vld [vmem:[%s8810_s7 + $0x28] sm:$0xff]  }
 0x298   :  { %6168 = vmatprep.subr.bf16.mxu0 %v6719_v62  ;;  %6155 = vmatpush3.bf16.msra.mxu1 %v6704_v57 }
 0x299   :  { %6156 = vmatprep.subr.bf16.mxu1 %v6719_v62 }
 0x29a   :  { %6145 = vmatmul.mubr.bf16.vlgmr.msra.gmra.mrb[224].mxu0 %v2730_v26 }
 0x29b   :  { %6184 = vmatprep.mubr.msk.bf16.mxu0 %vm6720_vm2, %v6719_v62  ;;  %6169 = vmatpush3.bf16.msra.mxu0 %v6709_v30 }
 0x29c   :  { %6157 = vmatpush3.bf16.msra.mxu1 %v6705_v48  ;;  %6170 = vmatprep.subr.bf16.mxu0 %v6719_v62 }
 0x29d   :  { %6158 = vmatprep.subr.bf16.mxu1 %v6719_v62 }
 0x29f   :  { %6171 = vmatpush3.bf16.msra.mxu0 %v6710_v44 }
 0x2a0   :  { %6159 = vmatpush3.bf16.msra.mxu1 %v6706_v41  ;;  %6172 = vmatprep.subr.bf16.mxu0 %v6719_v62 }
 0x2a1   :  { %6160 = vmatprep.subr.bf16.mxu1 %v6719_v62 }
 0x2a3   :  { %6173 = vmatpush3.bf16.msra.mxu0 %v6711_v13 }
 0x2a4   :  { %6161 = vmatpush3.bf16.msra.mxu1 %v6707_v31  ;;  %6174 = vmatprep.subr.bf16.mxu0 %v6719_v62 }
 0x2a5   :  { %6162 = vmatprep.subr.bf16.mxu1 %v6719_v62 }
 0x2a7   :  { %6175 = vmatpush3.bf16.msra.mxu0 %v6712_v4  ;;  %v5819_v4 = vld [vmem:[%s8811_s6] ss:$0 sm:$0xff] }
 0x2a8   :  { %6163 = vmatpush3.bf16.msra.mxu1 %v6708_v54  ;;  %6176 = vmatprep.subr.bf16.mxu0 %v6719_v62 }
 0x2ab   :  { %6177 = vmatpush3.bf16.msra.mxu0 %v6713_v5 }
 0x2ac   :  { %6178 = vmatprep.subr.bf16.mxu0 %v6719_v62 }
 0x2ad   :  { %v5853_v14 = vpop.f32.mrb[200].mxu0 }
 0x2ae   :  { %v5854_v37 = vpop.f32.mrb[201].mxu0 }
 0x2af   :  { %v5855_v33 = vadd.f32 %v5854_v37, %v5853_v14  ;;  %v5856_v63 = vpop.f32.mrb[202].mxu0  ;;  %6179 = vmatpush3.bf16.msra.mxu0 %v6714_v15 }
 0x2b0   :  { %v5857_v0 = vpop.f32.mrb[203].mxu0  ;;  %6180 = vmatprep.subr.bf16.mxu0 %v6719_v62 }
 0x2b1   :  { %v5858_v20 = vadd.f32 %v5857_v0, %v5856_v63  ;;  %v4423_v8 = vadd.f32 %v5855_v33, %v5618_v12 }
 0x2b3   :  { %v4426_v3 = vadd.f32 %v5858_v20, %v5618_v12 }
 0x2bd   :  { %v5875_v49 = vpop.f32.mrb[200].mxu1 }
 0x2be   :  { %v5876_v58 = vpop.f32.mrb[201].mxu1 }
 0x2bf   :  { %v5877_v9 = vadd.f32 %v5876_v58, %v5875_v49  ;;  %v5878_v55 = vpop.f32.mrb[202].mxu1 }
 0x2c0   :  { %v5879_v34 = vpop.f32.mrb[203].mxu1 }
 0x2c1   :  { %v4464_v6 = vadd.f32 %v5877_v9, %v4423_v8  ;;  %v5880_v27 = vadd.f32 %v5879_v34, %v5878_v55 }
 0x2c3   :  { %v4467_v38 = vadd.f32 %v5880_v27, %v4426_v3 }
 0x2cd   :  { %v5897_v60 = vpop.f32.mrb[204].mxu0 }
 0x2ce   :  { %v5898_v61 = vpop.f32.mrb[205].mxu0 }
 0x2cf   :  { %v5899_v17 = vadd.f32 %v5898_v61, %v5897_v60  ;;  %v5900_v16 = vpop.f32.mrb[206].mxu0 }
 0x2d0   :  { %v5901_v1 = vpop.f32.mrb[207].mxu0 }
 0x2d1   :  { %v4505_v2 = vadd.f32 %v5899_v17, %v4464_v6  ;;  %v5902_v25 = vadd.f32 %v5901_v1, %v5900_v16 }
 0x2d3   :  { %v4508_v22 = vadd.f32 %v5902_v25, %v4467_v38 }
 0x2dd   :  { %v5919_v42 = vpop.f32.mrb[204].mxu1 }
 0x2de   :  { %v5920_v7 = vpop.f32.mrb[205].mxu1 }
 0x2df   :  { %v5921_v35 = vadd.f32 %v5920_v7, %v5919_v42  ;;  %v5922_v36 = vpop.f32.mrb[206].mxu1 }
 0x2e0   :  { %v5923_v45 = vpop.f32.mrb[207].mxu1 }
 0x2e1   :  { %v4546_v46 = vadd.f32 %v5921_v35, %v4505_v2  ;;  %v5924_v50 = vadd.f32 %v5923_v45, %v5922_v36 }
 0x2e3   :  { %v4549_v47 = vadd.f32 %v5924_v50, %v4508_v22 }
 0x2ed   :  { %v5941_v51 = vpop.f32.mrb[208].mxu0 }
 0x2ee   :  { %v5942_v40 = vpop.f32.mrb[209].mxu0 }
 0x2ef   :  { %v5943_v52 = vadd.f32 %v5942_v40, %v5941_v51  ;;  %v5944_v56 = vpop.f32.mrb[210].mxu0 }
 0x2f0   :  { %v5945_v24 = vpop.f32.mrb[211].mxu0 }
 0x2f1   :  { %v4587_v32 = vadd.f32 %v5943_v52, %v4546_v46  ;;  %v5946_v53 = vadd.f32 %v5945_v24, %v5944_v56 }
 0x2f3   :  { %v4590_v59 = vadd.f32 %v5946_v53, %v4549_v47 }
 0x2fd   :  { %v5963_v19 = vpop.f32.mrb[208].mxu1 }
 0x2fe   :  { %v5964_v10 = vpop.f32.mrb[209].mxu1 }
 0x2ff   :  { %v5965_v11 = vadd.f32 %v5964_v10, %v5963_v19  ;;  %v5966_v21 = vpop.f32.mrb[210].mxu1 }
 0x300   :  { %v5967_v23 = vpop.f32.mrb[211].mxu1 }
 0x301   :  { %v4628_v28 = vadd.f32 %v5965_v11, %v4587_v32  ;;  %v5968_v29 = vadd.f32 %v5967_v23, %v5966_v21 }
 0x303   :  { %v4631_v26 = vadd.f32 %v5968_v29, %v4590_v59  ;;  %v6716_v29 = vld [vmem:[%s8810_s7 + $0x38] sm:$0xff]  }
 0x30d   :  { %v5985_v14 = vpop.f32.mrb[212].mxu0 }
 0x30e   :  { %v5986_v37 = vpop.f32.mrb[213].mxu0 }
 0x30f   :  { %v5987_v33 = vadd.f32 %v5986_v37, %v5985_v14  ;;  %v5988_v63 = vpop.f32.mrb[214].mxu0 }
 0x310   :  { %v5989_v0 = vpop.f32.mrb[215].mxu0 }
 0x311   :  { %v4669_v20 = vadd.f32 %v5987_v33, %v4628_v28  ;;  %v5990_v12 = vadd.f32 %v5989_v0, %v5988_v63  ;;  %v6715_v28 = vld [vmem:[%s8810_s7 + $0x30] sm:$0xff]  }
 0x312   :  { %6181 = vmatpush3.bf16.msra.mxu0 %v6715_v28 }
 0x313   :  { %v4672_v49 = vadd.f32 %v5990_v12, %v4631_v26  ;;  %6182 = vmatprep.subr.bf16.mxu0 %v6719_v62  ;;  %v5828_v62 = vld [vmem:[%s8812_s8] ss:$0 sm:$0xff] }
 0x316   :  { %6183 = vmatpush3.bf16.msra.mxu0 %v6716_v29 }
 0x31d   :  { %v6007_v58 = vpop.f32.mrb[212].mxu1 }
 0x31e   :  { %v6008_v8 = vpop.f32.mrb[213].mxu1 }
 0x31f   :  { %v6009_v9 = vadd.f32 %v6008_v8, %v6007_v58  ;;  %v6010_v55 = vpop.f32.mrb[214].mxu1 }
 0x320   :  { %v6011_v34 = vpop.f32.mrb[215].mxu1 }
 0x321   :  { %v4710_v3 = vadd.f32 %v6009_v9, %v4669_v20  ;;  %v6012_v6 = vadd.f32 %v6011_v34, %v6010_v55 }
 0x323   :  { %v4713_v27 = vadd.f32 %v6012_v6, %v4672_v49 }
 0x32d   :  { %v6029_v38 = vpop.f32.mrb[216].mxu0 }
 0x32e   :  { %v6030_v60 = vpop.f32.mrb[217].mxu0 }
 0x32f   :  { %v6031_v61 = vadd.f32 %v6030_v60, %v6029_v38  ;;  %v6032_v17 = vpop.f32.mrb[218].mxu0 }
 0x330   :  { %v6033_v16 = vpop.f32.mrb[219].mxu0 }
 0x331   :  { %v4751_v1 = vadd.f32 %v6031_v61, %v4710_v3  ;;  %v6034_v2 = vadd.f32 %v6033_v16, %v6032_v17 }
 0x333   :  { %v4754_v25 = vadd.f32 %v6034_v2, %v4713_v27 }
 0x33d   :  { %v6051_v22 = vpop.f32.mrb[216].mxu1 }
 0x33e   :  { %v6052_v18 = vpop.f32.mrb[217].mxu1 }
 0x33f   :  { %v6053_v39 = vadd.f32 %v6052_v18, %v6051_v22  ;;  %v6054_v42 = vpop.f32.mrb[218].mxu1 }
 0x340   :  { %v6055_v43 = vpop.f32.mrb[219].mxu1 }
 0x341   :  { %v4792_v7 = vadd.f32 %v6053_v39, %v4751_v1  ;;  %v6056_v35 = vadd.f32 %v6055_v43, %v6054_v42 }
 0x343   :  { %v4795_v36 = vadd.f32 %v6056_v35, %v4754_v25 }
 0x34d   :  { %v6073_v45 = vpop.f32.mrb[220].mxu0 }
 0x34e   :  { %v6074_v46 = vpop.f32.mrb[221].mxu0 }
 0x34f   :  { %v6075_v50 = vadd.f32 %v6074_v46, %v6073_v45  ;;  %v6076_v57 = vpop.f32.mrb[222].mxu0 }
 0x350   :  { %v6077_v47 = vpop.f32.mrb[223].mxu0 }
 0x351   :  { %v4833_v48 = vadd.f32 %v6075_v50, %v4792_v7  ;;  %v6078_v41 = vadd.f32 %v6077_v47, %v6076_v57 }
 0x353   :  { %v4836_v51 = vadd.f32 %v6078_v41, %v4795_v36 }
 0x35d   :  { %v6095_v31 = vpop.f32.mrb[220].mxu1 }
 0x35e   :  { %v6096_v40 = vpop.f32.mrb[221].mxu1 }
 0x35f   :  { %v6097_v52 = vadd.f32 %v6096_v40, %v6095_v31  ;;  %v6098_v56 = vpop.f32.mrb[222].mxu1 }
 0x360   :  { %v6099_v24 = vpop.f32.mrb[223].mxu1 }
 0x361   :  { %v6100_v32 = vadd.f32 %v6099_v24, %v6098_v56  ;;  %v4874_v53 = vadd.f32 %v6097_v52, %v4833_v48 }
 0x363   :  { %v4877_v54 = vadd.f32 %v6100_v32, %v4836_v51 }
 0x36d   :  { %v4914_v59 = vpop.f32.mrb[224].mxu0 }
 0x36e   :  { %v4915_v30 = vadd.f32 %v4914_v59, %v4874_v53  ;;  %v6146_v44 = vpop.f32.mrb[225].mxu0 }
 0x36f   :  { %v4917_v19 = vpop.f32.mrb[226].mxu0 }
 0x370   :  { %v4918_v13 = vadd.f32 %v4917_v19, %v4877_v54  ;;  %v6147_v10 = vpop.f32.mrb[227].mxu0  ;;  %v4921_v11 = vmax.f32 %v4915_v30, 0.0 }
 0x372   :  { %v4922_v21 = vmax.f32 %v4918_v13, 0.0 }
 0x374   :  { %v4923_v23 = vpack.c.bf16 %v4922_v21, %v4921_v11 }
 0x376   :  { %6165 = vmatmul.mubr.bf16.vlgmr.msra.gmra.mrb[224].mxu1 %v4923_v23 }
 0x449   :  { %v5029_v26 = vpop.f32.mrb[224].mxu1 }
 0x44a   :  { %v5030_v5 = vadd.f32 %v5819_v4, %v5029_v26  ;;  %v6166_v15 = vpop.f32.mrb[225].mxu1 }
 0x44b   :  { %v5032_v14 = vpop.f32.mrb[226].mxu1 }
 0x44c   :  { %v5033_v37 = vadd.f32 %v5819_v4, %v5032_v14  ;;  %v6167_v33 = vpop.f32.mrb[227].mxu1  ;;  %v5036_v63 = vmax.f32 %v5030_v5, 0.0 }
 0x44e   :  { %v5037_v0 = vmax.f32 %v5033_v37, 0.0 }
 0x450   :  { %v5038_v20 = vpack.c.bf16 %v5037_v0, %v5036_v63 }
 0x452   :  { %6185 = vmatmul.mubr.bf16.vlgmr.msra.gmra.mrb[228].mxu0 %v5038_v20 }
 0x525   :  { %v5144_v12 = vpop.f32.mrb[228].mxu0 }
 0x526   :  { %v5145_v49 = vadd.f32 %v5828_v62, %v5144_v12  ;;  %v6186_v58 = vpop.f32.mrb[229].mxu0 }
 0x527   :  { %v5147_v8 = vpop.f32.mrb[230].mxu0 }
 0x528   :  { %5151 = vst [vmem:[%s8813_s9] sm:$0xff] %v5145_v49  ;;  %v5148_v9 = vadd.f32 %v5828_v62, %v5147_v8  ;;  %v6187_v55 = vpop.f32.mrb[231].mxu0 }
 0x52a   :  { %5152 = vst [vmem:[%s8813_s9 + $0x8] sm:$0xff] %v5148_v9 }

</bundles_post_ra>
